<compile_context>
chip_gen: v7x
topology: tpu7x:2x2x1
jax: 0.10.0
libtpu: 0.0.40
codegen_flags: <defaults>
</compile_context>

<pallas_src>
import functools

import jax
import jax.numpy as jnp
from jax.experimental import pallas as pl
from jax.experimental.pallas import tpu as pltpu

_BN_EPS = 1e-5


def _fold_bn(conv_w, gamma, beta, mean, var, eps=_BN_EPS):
    """Fold inference-mode BatchNorm into the preceding bias-free conv."""
    scale = gamma / jnp.sqrt(var + eps)
    if conv_w.ndim == 2:                          # (O, I)   1x1 conv, reshaped
        w = conv_w * scale[:, None]
    else:                                         # (O, I, kh, kw)
        w = conv_w * scale[:, None, None, None]
    b = beta - mean * scale
    return w.astype(jnp.float32), b.astype(jnp.float32)


# ---------------------------------------------------------------------------
# Fused kernel: 4x(1x1 conv+BN+SiLU) -> 1x1 conv -> softmax -> weighted fusion
#               -> 3x3 conv + BN + SiLU.    One grid step = one batch image.
# ---------------------------------------------------------------------------
def _asff4_kernel(x_ref, wbig_ref, bcat_ref, wlv_ref, blv_ref, w9_ref, b3_ref,
                  o_ref, *, C, Wpad):
    # x_ref:  (1, Np, 4C)  bf16, zero-padded channels-last, 4 levels concat
    # o_ref:  (1, Nout, C) f32,  Nout = H*Wpad, row q = h*Wpad + w
    Np = x_ref.shape[1]
    Nout = o_ref.shape[1]

    x = x_ref[0].astype(jnp.float32)                       # single bf16->f32 upcast

    # ---- four 1x1 conv + BN + SiLU branches as ONE block-diagonal matmul ----
    v = jnp.dot(x, wbig_ref[...], preferred_element_type=jnp.float32) + bcat_ref[...]
    v = v * jax.nn.sigmoid(v)                              # SiLU, (Np, 4*Cc)

    # ---- weight_levels 1x1 conv + softmax over the 4 level scores ----
    s = jnp.dot(v, wlv_ref[...], preferred_element_type=jnp.float32) + blv_ref[...]
    s = s - jnp.max(s, axis=-1, keepdims=True)
    e = jnp.exp(s)
    w = e * pl.reciprocal(jnp.sum(e, axis=-1, keepdims=True), approx=True)  # (Np, 4)

    # ---- per-pixel weighted fusion (stays in VMEM; zero at padded pixels) ----
    fused = (x[:, 0 * C:1 * C] * w[:, 0:1] + x[:, 1 * C:2 * C] * w[:, 1:2]
             + x[:, 2 * C:3 * C] * w[:, 2:3] + x[:, 3 * C:4 * C] * w[:, 3:4])

    # ---- 3x3 conv + BN + SiLU: 9 shifted contiguous-row-slab matmuls ----
    #   out[h*Wpad + w] = sum_{dy,dx} fused[(h+dy)*Wpad + (w+dx)] @ K[dy,dx]
    w9 = w9_ref[...]                                       # (9C, C)
    acc = jnp.zeros((Nout, C), jnp.float32)
    for dy in range(3):
        for dx in range(3):
            off = dy * Wpad + dx                           # static slice offset
            k = (dy * 3 + dx) * C
            acc = acc + jnp.dot(fused[off:off + Nout, :], w9[k:k + C, :],
                                preferred_element_type=jnp.float32)
    acc = acc + b3_ref[...]
    o_ref[0] = (acc * jax.nn.sigmoid(acc)).astype(o_ref.dtype)


# ---------------------------------------------------------------------------
# Wrapper
# ---------------------------------------------------------------------------
def asff4_forward(x0, x1, x2, x3, params):
    """Pallas implementation of ASFF_4.forward (inference-mode BatchNorm).

    Inputs are NCHW (PyTorch layout), each (B, inter_dim, H, W). Returns NCHW.
    """
    B, C, H, W = x0.shape
    Cc = params["wl0_w"].shape[0]                 # compress_c (= 8)
    Hpad = H + 3                                  # 1 top zero row + 2 bottom (slab slack)
    Wpad = W + 2                                  # 1 left + 1 right zero column
    Np = Hpad * Wpad
    Nout = H * Wpad

    # --- stage the 4 NCHW levels once: NHWC, zero-pad, channel concat, bf16 ---
    def nhwc_pad(x):
        x = jnp.transpose(x, (0, 2, 3, 1))                        # (B, H, W, C)
        return jnp.pad(x, ((0, 0), (1, 2), (1, 1), (0, 0)))       # (B, Hpad, Wpad, C)

    xpad = jnp.concatenate([nhwc_pad(x0), nhwc_pad(x1),
                            nhwc_pad(x2), nhwc_pad(x3)], axis=-1)
    xpad = xpad.reshape(B, Np, 4 * C).astype(jnp.bfloat16)        # bf16 HBM storage

    # --- fold BN into the four 1x1 convs; build block-diagonal weight ---
    wbig = jnp.zeros((4 * C, 4 * Cc), jnp.float32)
    bcat = []
    for i in range(4):
        w_f, b_f = _fold_bn(params[f"wl{i}_w"].reshape(Cc, C), *params[f"wl{i}_bn"])
        wbig = wbig.at[i * C:(i + 1) * C, i * Cc:(i + 1) * Cc].set(w_f.T)
        bcat.append(b_f)
    bcat = jnp.concatenate(bcat).reshape(1, 4 * Cc)

    wlv = params["levels_w"].reshape(4, 4 * Cc).T.astype(jnp.float32)   # (4Cc, 4)
    blv = params["levels_b"].reshape(1, 4).astype(jnp.float32)

    # --- fold BN into the 3x3 conv; rows ordered (ky, kx, cin), cols cout ---
    w3f, b3f = _fold_bn(params["conv_w"], *params["conv_bn"])           # (C, C, 3, 3)
    w9 = jnp.transpose(w3f, (2, 3, 1, 0)).reshape(9 * C, C)
    b3 = b3f.reshape(1, C)

    kernel = functools.partial(_asff4_kernel, C=C, Wpad=Wpad)

    cost = pl.CostEstimate(
        flops=int(B * (2 * Np * 4 * C * 4 * Cc + 2 * Np * 4 * Cc * 4
                       + 8 * Np * C + 2 * Nout * 9 * C * C + 4 * Nout * C)),
        transcendentals=int(B * (Np * (4 * Cc + 5) + Nout * C)),
        bytes_accessed=int(B * (2 * Np * 4 * C + 4 * Nout * C)
                           + 4 * (4 * C * 4 * Cc + 9 * C * C + 8 * C + 8)),
    )

    out_raw = pl.pallas_call(
        kernel,
        out_shape=jax.ShapeDtypeStruct((B, Nout, C), jnp.float32),
        grid_spec=pltpu.PrefetchScalarGridSpec(
            num_scalar_prefetch=0,
            grid=(B,),                                   # 2 parallel steps in the demo
            in_specs=[
                pl.BlockSpec((1, Np, 4 * C), lambda b: (b, 0, 0)),   # padded levels
                pl.BlockSpec((4 * C, 4 * Cc), lambda b: (0, 0)),     # block-diag 1x1 W
                pl.BlockSpec((1, 4 * Cc), lambda b: (0, 0)),         # folded 1x1 biases
                pl.BlockSpec((4 * Cc, 4), lambda b: (0, 0)),         # weight_levels W^T
                pl.BlockSpec((1, 4), lambda b: (0, 0)),              # weight_levels b
                pl.BlockSpec((9 * C, C), lambda b: (0, 0)),          # folded 3x3 W
                pl.BlockSpec((1, C), lambda b: (0, 0)),              # folded 3x3 b
            ],
            out_specs=pl.BlockSpec((1, Nout, C), lambda b: (b, 0, 0)),
        ),
        compiler_params=pltpu.CompilerParams(dimension_semantics=("parallel",)),
        cost_estimate=cost,
    )(xpad, wbig, bcat, wlv, blv, w9, b3)

    out = out_raw.reshape(B, H, Wpad, C)[:, :, :W, :]     # drop the Wpad-W slack cols
    return jnp.transpose(out, (0, 3, 1, 2))               # back to NCHW


# ---------------------------------------------------------------------------
# Pure-JAX reference (eval-mode BatchNorm), for correctness checking.
# ---------------------------------------------------------------------------
def _reference(x0, x1, x2, x3, params, eps=_BN_EPS):
    hi = jax.lax.Precision.HIGHEST

    def bn(y, g, b, m, v):
        s = (g / jnp.sqrt(v + eps))[None, :, None, None]
        return (y - m[None, :, None, None]) * s + b[None, :, None, None]

    def silu(y):
        return y * jax.nn.sigmoid(y)

    def conv1x1(x, w):                               # w: (O, I)
        return jnp.einsum("bchw,oc->bohw", x, w, precision=hi)

    vs = []
    for i, x in enumerate((x0, x1, x2, x3)):
        w = params[f"wl{i}_w"].reshape(params[f"wl{i}_w"].shape[0], -1)
        vs.append(silu(bn(conv1x1(x, w), *params[f"wl{i}_bn"])))
    cat = jnp.concatenate(vs, axis=1)

    scores = conv1x1(cat, params["levels_w"].reshape(4, -1))
    scores = scores + params["levels_b"][None, :, None, None]
    wsm = jax.nn.softmax(scores, axis=1)

    fused = (x0 * wsm[:, 0:1] + x1 * wsm[:, 1:2] +
             x2 * wsm[:, 2:3] + x3 * wsm[:, 3:4])

    y = jax.lax.conv_general_dilated(
        fused, params["conv_w"], window_strides=(1, 1), padding="SAME",
        dimension_numbers=("NCHW", "OIHW", "NCHW"), precision=hi)
    return silu(bn(y, *params["conv_bn"]))


if __name__ == "__main__":
    # Shapes consistent with the module: inter_dim=32, compress_c=8.
    B, C, H, W = 2, 32, 16, 16
    Cc = 8

    key = jax.random.PRNGKey(0)
    keys = iter(jax.random.split(key, 40))

    def nrm(shape, scale=1.0):
        return scale * jax.random.normal(next(keys), shape, dtype=jnp.float32)

    def bn_params(c):
        gamma = 0.5 + jax.random.uniform(next(keys), (c,), dtype=jnp.float32)
        beta = nrm((c,), 0.1)
        mean = nrm((c,), 0.1)
        var = 0.5 + jax.random.uniform(next(keys), (c,), dtype=jnp.float32)
        return (gamma, beta, mean, var)

    params = {}
    for i in range(4):
        params[f"wl{i}_w"] = nrm((Cc, C, 1, 1), 0.1)      # Conv2d(32, 8, 1), no bias
        params[f"wl{i}_bn"] = bn_params(Cc)
    params["levels_w"] = nrm((4, 4 * Cc, 1, 1), 0.1)      # Conv2d(32, 4, 1), bias
    params["levels_b"] = nrm((4,), 0.1)
    params["conv_w"] = nrm((C, C, 3, 3), 0.05)            # Conv2d(32, 32, 3), no bias
    params["conv_bn"] = bn_params(C)

    # Inputs pre-rounded to bf16-representable values so the kernel's bf16 HBM
    # staging of the activations is lossless and the check stays tight.
    def act(shape):
        return nrm(shape).astype(jnp.bfloat16).astype(jnp.float32)

    x0 = act((B, C, H, W))
    x1 = act((B, C, H, W))
    x2 = act((B, C, H, W))
    x3 = act((B, C, H, W))

    out = jax.block_until_ready(asff4_forward(x0, x1, x2, x3, params))
    ref = _reference(x0, x1, x2, x3, params)

    assert out.shape == (B, C, H, W)
    assert bool(jnp.all(jnp.isfinite(out)))
    assert jnp.allclose(out, ref, atol=2e-2, rtol=2e-2), \
        f"max abs diff {jnp.max(jnp.abs(out - ref))}"

    print("KERNEL_OK")
</pallas_src>

<mosaic_0001>
module attributes {stable_mosaic.version = 11 : i64} {
  func.func @_asff4_kernel(%arg0: i32, %arg1: memref<1x342x128xbf16, #tpu.memory_space<vmem>>, %arg2: memref<128x32xf32, #tpu.memory_space<vmem>>, %arg3: memref<1x32xf32, #tpu.memory_space<vmem>>, %arg4: memref<32x4xf32, #tpu.memory_space<vmem>>, %arg5: memref<1x4xf32, #tpu.memory_space<vmem>>, %arg6: memref<288x32xf32, #tpu.memory_space<vmem>>, %arg7: memref<1x32xf32, #tpu.memory_space<vmem>>, %arg8: memref<1x288x32xf32, #tpu.memory_space<vmem>>) attributes {dimension_semantics = [#tpu.dimension_semantics<parallel>], iteration_bounds = array<i64: 2>, scalar_prefetch = 0 : i64, scratch_operands = 0 : i64, tpu.core_type = #tpu.core_type<tc>, window_params = [{transform_indices = @transform_0, window_bounds = array<i64: 1, 342, 128>}, {pipeline_mode = #tpu.pipeline_mode<synchronous>, transform_indices = @transform_1, window_bounds = array<i64: 128, 32>}, {pipeline_mode = #tpu.pipeline_mode<synchronous>, transform_indices = @transform_2, window_bounds = array<i64: 1, 32>}, {pipeline_mode = #tpu.pipeline_mode<synchronous>, transform_indices = @transform_3, window_bounds = array<i64: 32, 4>}, {pipeline_mode = #tpu.pipeline_mode<synchronous>, transform_indices = @transform_4, window_bounds = array<i64: 1, 4>}, {pipeline_mode = #tpu.pipeline_mode<synchronous>, transform_indices = @transform_5, window_bounds = array<i64: 288, 32>}, {pipeline_mode = #tpu.pipeline_mode<synchronous>, transform_indices = @transform_6, window_bounds = array<i64: 1, 32>}, {transform_indices = @transform_7, window_bounds = array<i64: 1, 288, 32>}]} {
    %c0 = arith.constant 0 : index
    %c0_0 = arith.constant 0 : index
    %c0_1 = arith.constant 0 : index
    %0 = vector.load %arg1[%c0, %c0_0, %c0_1] : memref<1x342x128xbf16, #tpu.memory_space<vmem>>, vector<1x342x128xbf16>
    %1 = vector.shape_cast %0 : vector<1x342x128xbf16> to vector<342x128xbf16>
    %2 = arith.extf %1 : vector<342x128xbf16> to vector<342x128xf32>
    %c0_2 = arith.constant 0 : index
    %c0_3 = arith.constant 0 : index
    %3 = vector.load %arg2[%c0_2, %c0_3] : memref<128x32xf32, #tpu.memory_space<vmem>>, vector<128x32xf32>
    %cst = arith.constant dense<0.000000e+00> : vector<342x32xf32>
    %4 = tpu.matmul %2, %3, %cst {dimension_numbers = #tpu.dot_dimension_numbers<[1], [0], [0], [1], [0, 0, 1, 1], [], []>} : vector<342x128xf32>, vector<128x32xf32>, vector<342x32xf32> -> vector<342x32xf32>
    %c0_4 = arith.constant 0 : index
    %c0_5 = arith.constant 0 : index
    %5 = vector.load %arg3[%c0_4, %c0_5] : memref<1x32xf32, #tpu.memory_space<vmem>>, vector<1x32xf32>
    %6 = vector.broadcast %5 : vector<1x32xf32> to vector<342x32xf32>
    %7 = arith.addf %4, %6 : vector<342x32xf32>
    %8 = arith.negf %7 : vector<342x32xf32>
    %9 = math.exp %8 : vector<342x32xf32>
    %cst_6 = arith.constant 1.000000e+00 : f32
    %10 = vector.broadcast %cst_6 : f32 to vector<342x32xf32>
    %11 = arith.addf %10, %9 : vector<342x32xf32>
    %12 = arith.divf %10, %11 : vector<342x32xf32>
    %13 = arith.mulf %7, %12 : vector<342x32xf32>
    %c0_7 = arith.constant 0 : index
    %c0_8 = arith.constant 0 : index
    %14 = vector.load %arg4[%c0_7, %c0_8] : memref<32x4xf32, #tpu.memory_space<vmem>>, vector<32x4xf32>
    %cst_9 = arith.constant dense<0.000000e+00> : vector<342x4xf32>
    %15 = tpu.matmul %13, %14, %cst_9 {dimension_numbers = #tpu.dot_dimension_numbers<[1], [0], [0], [1], [0, 0, 1, 1], [], []>} : vector<342x32xf32>, vector<32x4xf32>, vector<342x4xf32> -> vector<342x4xf32>
    %c0_10 = arith.constant 0 : index
    %c0_11 = arith.constant 0 : index
    %16 = vector.load %arg5[%c0_10, %c0_11] : memref<1x4xf32, #tpu.memory_space<vmem>>, vector<1x4xf32>
    %17 = vector.broadcast %16 : vector<1x4xf32> to vector<342x4xf32>
    %18 = arith.addf %15, %17 : vector<342x4xf32>
    %cst_12 = arith.constant dense<0xFF800000> : vector<342xf32>
    %19 = vector.multi_reduction <maximumf>, %18, %cst_12 [1] : vector<342x4xf32> to vector<342xf32>
    %20 = vector.shape_cast %19 : vector<342xf32> to vector<342x1xf32>
    %21 = vector.broadcast %20 : vector<342x1xf32> to vector<342x4xf32>
    %22 = arith.subf %18, %21 : vector<342x4xf32>
    %23 = math.exp %22 : vector<342x4xf32>
    %cst_13 = arith.constant dense<0.000000e+00> : vector<342xf32>
    %24 = vector.multi_reduction <add>, %23, %cst_13 [1] : vector<342x4xf32> to vector<342xf32>
    %25 = vector.shape_cast %24 : vector<342xf32> to vector<342x1xf32>
    %26 = tpu.reciprocal %25 {approx = true} : vector<342x1xf32> -> vector<342x1xf32>
    %27 = vector.broadcast %26 : vector<342x1xf32> to vector<342x4xf32>
    %28 = arith.mulf %23, %27 : vector<342x4xf32>
    %29 = vector.extract_strided_slice %2 {offsets = [0, 0], sizes = [342, 32], strides = [1, 1]} : vector<342x128xf32> to vector<342x32xf32>
    %30 = vector.extract_strided_slice %28 {offsets = [0, 0], sizes = [342, 1], strides = [1, 1]} : vector<342x4xf32> to vector<342x1xf32>
    %31 = vector.broadcast %30 : vector<342x1xf32> to vector<342x32xf32>
    %32 = arith.mulf %29, %31 : vector<342x32xf32>
    %33 = vector.extract_strided_slice %2 {offsets = [0, 32], sizes = [342, 32], strides = [1, 1]} : vector<342x128xf32> to vector<342x32xf32>
    %34 = vector.extract_strided_slice %28 {offsets = [0, 1], sizes = [342, 1], strides = [1, 1]} : vector<342x4xf32> to vector<342x1xf32>
    %35 = vector.broadcast %34 : vector<342x1xf32> to vector<342x32xf32>
    %36 = arith.mulf %33, %35 : vector<342x32xf32>
    %37 = arith.addf %32, %36 : vector<342x32xf32>
    %38 = vector.extract_strided_slice %2 {offsets = [0, 64], sizes = [342, 32], strides = [1, 1]} : vector<342x128xf32> to vector<342x32xf32>
    %39 = vector.extract_strided_slice %28 {offsets = [0, 2], sizes = [342, 1], strides = [1, 1]} : vector<342x4xf32> to vector<342x1xf32>
    %40 = vector.broadcast %39 : vector<342x1xf32> to vector<342x32xf32>
    %41 = arith.mulf %38, %40 : vector<342x32xf32>
    %42 = arith.addf %37, %41 : vector<342x32xf32>
    %43 = vector.extract_strided_slice %2 {offsets = [0, 96], sizes = [342, 32], strides = [1, 1]} : vector<342x128xf32> to vector<342x32xf32>
    %44 = vector.extract_strided_slice %28 {offsets = [0, 3], sizes = [342, 1], strides = [1, 1]} : vector<342x4xf32> to vector<342x1xf32>
    %45 = vector.broadcast %44 : vector<342x1xf32> to vector<342x32xf32>
    %46 = arith.mulf %43, %45 : vector<342x32xf32>
    %47 = arith.addf %42, %46 : vector<342x32xf32>
    %c0_14 = arith.constant 0 : index
    %c0_15 = arith.constant 0 : index
    %48 = vector.load %arg6[%c0_14, %c0_15] : memref<288x32xf32, #tpu.memory_space<vmem>>, vector<288x32xf32>
    %cst_16 = arith.constant 0.000000e+00 : f32
    %49 = vector.broadcast %cst_16 : f32 to vector<288x32xf32>
    %50 = vector.extract_strided_slice %47 {offsets = [0, 0], sizes = [288, 32], strides = [1, 1]} : vector<342x32xf32> to vector<288x32xf32>
    %51 = vector.extract_strided_slice %48 {offsets = [0, 0], sizes = [32, 32], strides = [1, 1]} : vector<288x32xf32> to vector<32x32xf32>
    %cst_17 = arith.constant dense<0.000000e+00> : vector<288x32xf32>
    %52 = tpu.matmul %50, %51, %cst_17 {dimension_numbers = #tpu.dot_dimension_numbers<[1], [0], [0], [1], [0, 0, 1, 1], [], []>} : vector<288x32xf32>, vector<32x32xf32>, vector<288x32xf32> -> vector<288x32xf32>
    %53 = arith.addf %49, %52 : vector<288x32xf32>
    %54 = vector.extract_strided_slice %47 {offsets = [1, 0], sizes = [288, 32], strides = [1, 1]} : vector<342x32xf32> to vector<288x32xf32>
    %55 = vector.extract_strided_slice %48 {offsets = [32, 0], sizes = [32, 32], strides = [1, 1]} : vector<288x32xf32> to vector<32x32xf32>
    %cst_18 = arith.constant dense<0.000000e+00> : vector<288x32xf32>
    %56 = tpu.matmul %54, %55, %cst_18 {dimension_numbers = #tpu.dot_dimension_numbers<[1], [0], [0], [1], [0, 0, 1, 1], [], []>} : vector<288x32xf32>, vector<32x32xf32>, vector<288x32xf32> -> vector<288x32xf32>
    %57 = arith.addf %53, %56 : vector<288x32xf32>
    %58 = vector.extract_strided_slice %47 {offsets = [2, 0], sizes = [288, 32], strides = [1, 1]} : vector<342x32xf32> to vector<288x32xf32>
    %59 = vector.extract_strided_slice %48 {offsets = [64, 0], sizes = [32, 32], strides = [1, 1]} : vector<288x32xf32> to vector<32x32xf32>
    %cst_19 = arith.constant dense<0.000000e+00> : vector<288x32xf32>
    %60 = tpu.matmul %58, %59, %cst_19 {dimension_numbers = #tpu.dot_dimension_numbers<[1], [0], [0], [1], [0, 0, 1, 1], [], []>} : vector<288x32xf32>, vector<32x32xf32>, vector<288x32xf32> -> vector<288x32xf32>
    %61 = arith.addf %57, %60 : vector<288x32xf32>
    %62 = vector.extract_strided_slice %47 {offsets = [18, 0], sizes = [288, 32], strides = [1, 1]} : vector<342x32xf32> to vector<288x32xf32>
    %63 = vector.extract_strided_slice %48 {offsets = [96, 0], sizes = [32, 32], strides = [1, 1]} : vector<288x32xf32> to vector<32x32xf32>
    %cst_20 = arith.constant dense<0.000000e+00> : vector<288x32xf32>
    %64 = tpu.matmul %62, %63, %cst_20 {dimension_numbers = #tpu.dot_dimension_numbers<[1], [0], [0], [1], [0, 0, 1, 1], [], []>} : vector<288x32xf32>, vector<32x32xf32>, vector<288x32xf32> -> vector<288x32xf32>
    %65 = arith.addf %61, %64 : vector<288x32xf32>
    %66 = vector.extract_strided_slice %47 {offsets = [19, 0], sizes = [288, 32], strides = [1, 1]} : vector<342x32xf32> to vector<288x32xf32>
    %67 = vector.extract_strided_slice %48 {offsets = [128, 0], sizes = [32, 32], strides = [1, 1]} : vector<288x32xf32> to vector<32x32xf32>
    %cst_21 = arith.constant dense<0.000000e+00> : vector<288x32xf32>
    %68 = tpu.matmul %66, %67, %cst_21 {dimension_numbers = #tpu.dot_dimension_numbers<[1], [0], [0], [1], [0, 0, 1, 1], [], []>} : vector<288x32xf32>, vector<32x32xf32>, vector<288x32xf32> -> vector<288x32xf32>
    %69 = arith.addf %65, %68 : vector<288x32xf32>
    %70 = vector.extract_strided_slice %47 {offsets = [20, 0], sizes = [288, 32], strides = [1, 1]} : vector<342x32xf32> to vector<288x32xf32>
    %71 = vector.extract_strided_slice %48 {offsets = [160, 0], sizes = [32, 32], strides = [1, 1]} : vector<288x32xf32> to vector<32x32xf32>
    %cst_22 = arith.constant dense<0.000000e+00> : vector<288x32xf32>
    %72 = tpu.matmul %70, %71, %cst_22 {dimension_numbers = #tpu.dot_dimension_numbers<[1], [0], [0], [1], [0, 0, 1, 1], [], []>} : vector<288x32xf32>, vector<32x32xf32>, vector<288x32xf32> -> vector<288x32xf32>
    %73 = arith.addf %69, %72 : vector<288x32xf32>
    %74 = vector.extract_strided_slice %47 {offsets = [36, 0], sizes = [288, 32], strides = [1, 1]} : vector<342x32xf32> to vector<288x32xf32>
    %75 = vector.extract_strided_slice %48 {offsets = [192, 0], sizes = [32, 32], strides = [1, 1]} : vector<288x32xf32> to vector<32x32xf32>
    %cst_23 = arith.constant dense<0.000000e+00> : vector<288x32xf32>
    %76 = tpu.matmul %74, %75, %cst_23 {dimension_numbers = #tpu.dot_dimension_numbers<[1], [0], [0], [1], [0, 0, 1, 1], [], []>} : vector<288x32xf32>, vector<32x32xf32>, vector<288x32xf32> -> vector<288x32xf32>
    %77 = arith.addf %73, %76 : vector<288x32xf32>
    %78 = vector.extract_strided_slice %47 {offsets = [37, 0], sizes = [288, 32], strides = [1, 1]} : vector<342x32xf32> to vector<288x32xf32>
    %79 = vector.extract_strided_slice %48 {offsets = [224, 0], sizes = [32, 32], strides = [1, 1]} : vector<288x32xf32> to vector<32x32xf32>
    %cst_24 = arith.constant dense<0.000000e+00> : vector<288x32xf32>
    %80 = tpu.matmul %78, %79, %cst_24 {dimension_numbers = #tpu.dot_dimension_numbers<[1], [0], [0], [1], [0, 0, 1, 1], [], []>} : vector<288x32xf32>, vector<32x32xf32>, vector<288x32xf32> -> vector<288x32xf32>
    %81 = arith.addf %77, %80 : vector<288x32xf32>
    %82 = vector.extract_strided_slice %47 {offsets = [38, 0], sizes = [288, 32], strides = [1, 1]} : vector<342x32xf32> to vector<288x32xf32>
    %83 = vector.extract_strided_slice %48 {offsets = [256, 0], sizes = [32, 32], strides = [1, 1]} : vector<288x32xf32> to vector<32x32xf32>
    %cst_25 = arith.constant dense<0.000000e+00> : vector<288x32xf32>
    %84 = tpu.matmul %82, %83, %cst_25 {dimension_numbers = #tpu.dot_dimension_numbers<[1], [0], [0], [1], [0, 0, 1, 1], [], []>} : vector<288x32xf32>, vector<32x32xf32>, vector<288x32xf32> -> vector<288x32xf32>
    %85 = arith.addf %81, %84 : vector<288x32xf32>
    %c0_26 = arith.constant 0 : index
    %c0_27 = arith.constant 0 : index
    %86 = vector.load %arg7[%c0_26, %c0_27] : memref<1x32xf32, #tpu.memory_space<vmem>>, vector<1x32xf32>
    %87 = vector.broadcast %86 : vector<1x32xf32> to vector<288x32xf32>
    %88 = arith.addf %85, %87 : vector<288x32xf32>
    %89 = arith.negf %88 : vector<288x32xf32>
    %90 = math.exp %89 : vector<288x32xf32>
    %cst_28 = arith.constant 1.000000e+00 : f32
    %91 = vector.broadcast %cst_28 : f32 to vector<288x32xf32>
    %92 = arith.addf %91, %90 : vector<288x32xf32>
    %93 = arith.divf %91, %92 : vector<288x32xf32>
    %94 = arith.mulf %88, %93 : vector<288x32xf32>
    %c0_29 = arith.constant 0 : index
    %c0_30 = arith.constant 0 : index
    %c0_31 = arith.constant 0 : index
    %95 = vector.load %arg8[%c0_29, %c0_30, %c0_31] : memref<1x288x32xf32, #tpu.memory_space<vmem>>, vector<1x288x32xf32>
    %96 = vector.shape_cast %95 : vector<1x288x32xf32> to vector<288x32xf32>
    %97 = vector.shape_cast %94 : vector<288x32xf32> to vector<1x288x32xf32>
    tpu.vector_store %arg8[%c0_29, %c0_30, %c0_31], %97 {strides = array<i32>} : memref<1x288x32xf32, #tpu.memory_space<vmem>>, vector<1x288x32xf32>,
    return
  }
  func.func @transform_0(%arg0: i32) -> (i32, i32, i32) {
    %c0_i32 = arith.constant 0 : i32
    %c0_i32_0 = arith.constant 0 : i32
    %c0_i32_1 = arith.constant 0 : i32
    return %arg0, %c0_i32, %c0_i32_0 : i32, i32, i32
  }
  func.func @transform_1(%arg0: i32) -> (i32, i32) {
    %c0_i32 = arith.constant 0 : i32
    %c0_i32_0 = arith.constant 0 : i32
    %c0_i32_1 = arith.constant 0 : i32
    return %c0_i32, %c0_i32_0 : i32, i32
  }
  func.func @transform_2(%arg0: i32) -> (i32, i32) {
    %c0_i32 = arith.constant 0 : i32
    %c0_i32_0 = arith.constant 0 : i32
    %c0_i32_1 = arith.constant 0 : i32
    return %c0_i32, %c0_i32_0 : i32, i32
  }
  func.func @transform_3(%arg0: i32) -> (i32, i32) {
    %c0_i32 = arith.constant 0 : i32
    %c0_i32_0 = arith.constant 0 : i32
    %c0_i32_1 = arith.constant 0 : i32
    return %c0_i32, %c0_i32_0 : i32, i32
  }
  func.func @transform_4(%arg0: i32) -> (i32, i32) {
    %c0_i32 = arith.constant 0 : i32
    %c0_i32_0 = arith.constant 0 : i32
    %c0_i32_1 = arith.constant 0 : i32
    return %c0_i32, %c0_i32_0 : i32, i32
  }
  func.func @transform_5(%arg0: i32) -> (i32, i32) {
    %c0_i32 = arith.constant 0 : i32
    %c0_i32_0 = arith.constant 0 : i32
    %c0_i32_1 = arith.constant 0 : i32
    return %c0_i32, %c0_i32_0 : i32, i32
  }
  func.func @transform_6(%arg0: i32) -> (i32, i32) {
    %c0_i32 = arith.constant 0 : i32
    %c0_i32_0 = arith.constant 0 : i32
    %c0_i32_1 = arith.constant 0 : i32
    return %c0_i32, %c0_i32_0 : i32, i32
  }
  func.func @transform_7(%arg0: i32) -> (i32, i32, i32) {
    %c0_i32 = arith.constant 0 : i32
    %c0_i32_0 = arith.constant 0 : i32
    %c0_i32_1 = arith.constant 0 : i32
    return %arg0, %c0_i32, %c0_i32_0 : i32, i32, i32
  }
}

</mosaic_0001>

<bundles_post_ra>
// kernel: tpu_custom_call.1
= control target key start
LH: loop header
LB: loop body
LE: loop exit
PB: predicated region body
PF: predicated region fallthrough
CT: control target
= control target key end

     0   :  { %s10199_s24 = smov 0   ;;  %s14347_s0 = inlined_call_operand.vmem [shape: bf16[2,342,128], index: 0, kind: input, shape index: {}]   ;;  %s14348_s1 = inlined_call_operand.vmem [shape: f32[128,32], index: 1, kind: input, shape index: {}]   ;;  %s14349_s2 = inlined_call_operand.vmem [shape: f32[1,32], index: 2, kind: input, shape index: {}]   ;;  %s14350_s3 = inlined_call_operand.vmem [shape: f32[32,4], index: 3, kind: input, shape index: {}]   ;;  %s14351_s4 = inlined_call_operand.vmem [shape: f32[1,4], index: 4, kind: input, shape index: {}]   ;;  %s14352_s5 = inlined_call_operand.vmem [shape: f32[288,32], index: 5, kind: input, shape index: {}]   ;;  %s14353_s6 = inlined_call_operand.vmem [shape: f32[1,32], index: 6, kind: input, shape index: {}]   ;;  %s14354_s7 = inlined_call_operand.vmem [shape: f32[2,288,32], index: 7, kind: output, shape index: {}]  }
   0x1 LB: > { %s7200_s25 = sadd.s32 4294967295, %s10147_s24   ;;  %p7204_p0 = scmp.ge.s32.totalorder %s10147_s24, 1  ;;  %s10147_s24 = sphi %s10199_s24, %s17_s24  }
   0x2   : > { %p237_p1 = scmp.lt.s32.totalorder %s10147_s24, 3 }
   0x4   : > { %p238_p2 = pnand %p7204_p0, %p237_p1 }
   0x6   : > { %241 = sbr.rel (%p238_p2) target bundleno = 2501 (0x9c5), region = 48 }
   0xd   : > { %v365_v0 = vld [vmem:[%s14348_s1] sm:$0xff]  ;;  %v366_v1 = vld [vmem:[%s14348_s1 + $0x8] sm:$0xff]  ;;  %v367_v2 = vld [vmem:[%s14348_s1 + $0x10] sm:$0xff]  ;;  %v10149_v3 = vmov 0.0|0.0   ;;  %vm10150_vm0 = vmmov 0   ;;  %v10151_v6 = vmov 0.0  }
   0xe   : > { %9084 = vmatprep.subr.bf16.mxu0 %v10149_v3  ;;  %v9085_v4 = vpack.c.bf16 %v366_v1, %v365_v0  ;;  %v368_v5 = vld [vmem:[%s14348_s1 + $0x18] sm:$0xff]  ;;  %8260 = vmatprep.mubr.msk.f32.mxu0 %vm10150_vm0, %v10151_v6  ;;  %v369_v8 = vld [vmem:[%s14348_s1 + $0x20] sm:$0xff]  ;;  %v370_v9 = vld [vmem:[%s14348_s1 + $0x28] sm:$0xff]  ;;  %p269_p3 = scmp.lt.s32.totalorder %s7200_s25, 1  ;;  %vm980_vm1 = vcmask 261120   ;;  %vm1388_vm2 = vcmask 31744  }
   0xf   : > { %v9088_v7 = vpack.c.bf16 %v368_v5, %v367_v2  ;;  %v9091_v10 = vpack.c.bf16 %v370_v9, %v369_v8  ;;  %v371_v11 = vld [vmem:[%s14348_s1 + $0x30] sm:$0xff]  ;;  %v372_v12 = vld [vmem:[%s14348_s1 + $0x38] sm:$0xff]  ;;  %v373_v14 = vld [vmem:[%s14348_s1 + $0x40] sm:$0xff]  ;;  %s10156_s9 = smov 96   ;;  %s10158_s11 = smov 64   ;;  %vm3389_vm3 = vcmask 1046528  }
  0x10   : > { %9086 = vmatpush3.bf16.msra.mxu0 %v9085_v4  ;;  %v9094_v13 = vpack.c.bf16 %v372_v12, %v371_v11  ;;  %v374_v15 = vld [vmem:[%s14348_s1 + $0x48] sm:$0xff]  ;;  %v375_v17 = vld [vmem:[%s14348_s1 + $0x50] sm:$0xff]  ;;  %v376_v18 = vld [vmem:[%s14348_s1 + $0x58] sm:$0xff]  ;;  %s15143_s25 = smov (!%p269_p3, %s7200_s25), 1  ;;  %vm4097_vm4 = vcmask 1045504   ;;  %vm4815_vm5 = vcmask 1044480  }
  0x11   : > { %9087 = vmatprep.subr.bf16.mxu0 %v10149_v3  ;;  %v9097_v16 = vpack.c.bf16 %v374_v15, %v373_v14  ;;  %v9100_v19 = vpack.c.bf16 %v376_v18, %v375_v17  ;;  %v377_v20 = vld [vmem:[%s14348_s1 + $0x60] sm:$0xff]  ;;  %v378_v21 = vld [vmem:[%s14348_s1 + $0x68] sm:$0xff]  ;;  %s9478_s10 = smul.u32 172, %s15143_s25  ;;  %v379_v23 = vld [vmem:[%s14348_s1 + $0x70] sm:$0xff]  ;;  %vm5242_vm6 = vcmask 1043456   ;;  %vm6387_vm7 = vcmask 1041408  }
  0x12   : > { %v9103_v22 = vpack.c.bf16 %v378_v21, %v377_v20  ;;  %v380_v24 = vld [vmem:[%s14348_s1 + $0x78] sm:$0xff]  ;;  %v969_v27 = vld [vmem:[%s14350_s3] sm:$0xff]  ;;  %v970_v28 = vld [vmem:[%s14350_s3 + $0x8] sm:$0xff]  ;;  %vm5960_vm8 = vcmask 1042432   ;;  %s9479_s8 = smul.u32 288, %s15143_s25 }
  0x13   : > { %s10267_s17 = scalar_lea.vmem %s14347_s0, %s9478_s10  ;;  %v9106_v25 = vpack.c.bf16 %v380_v24, %v379_v23  ;;  %v9109_v30 = vpack.c.bf16 %v970_v28, %v969_v27  ;;  %v971_v43 = vld [vmem:[%s14350_s3 + $0x10] sm:$0xff]  ;;  %v972_v44 = vld [vmem:[%s14350_s3 + $0x18] sm:$0xff]  ;;  %s10157_s10 = smov 32  }
  0x14   : > { %9089 = vmatpush3.bf16.msra.mxu0 %v9088_v7  ;;  %v7659_v26 = vld [vmem:[%s10267_s17] sm:$0xff]   ;;  %v7742_v32 = vld [vmem:[%s10267_s17 + $0x8] sm:$0xff]   ;;  %v7743_v35 = vld [vmem:[%s10267_s17 + $0x10] sm:$0xff]   ;;  %v9112_v45 = vpack.c.bf16 %v972_v44, %v971_v43  ;;  %s14114_s13 = scalar_lea.vmem %s14354_s7, %s9479_s8 }
  0x15   : > { %9090 = vmatprep.subr.bf16.mxu0 %v10149_v3  ;;  %v10276_v29 = vunpack.c.l.bf16 %v7659_v26  ;;  %v10279_v31 = vunpack.c.h.bf16 %v7659_v26  ;;  %v10285_v33 = vunpack.c.l.bf16 %v7742_v32  ;;  %v10290_v34 = vunpack.c.h.bf16 %v7742_v32  ;;  %v7744_v38 = vld [vmem:[%s10267_s17 + $0x18] sm:$0xff]   ;;  %v7745_v41 = vld [vmem:[%s10267_s17 + $0x20] sm:$0xff]   ;;  %v7746_v47 = vld [vmem:[%s10267_s17 + $0x28] sm:$0xff]  }
  0x16   : > { %v10296_v36 = vunpack.c.l.bf16 %v7743_v35  ;;  %v10301_v37 = vunpack.c.h.bf16 %v7743_v35  ;;  %v10307_v39 = vunpack.c.l.bf16 %v7744_v38  ;;  %v10312_v40 = vunpack.c.h.bf16 %v7744_v38  ;;  %v7747_v50 = vld [vmem:[%s10267_s17 + $0x30] sm:$0xff]   ;;  %v7748_v53 = vld [vmem:[%s10267_s17 + $0x38] sm:$0xff]   ;;  %v7749_v56 = vld [vmem:[%s10267_s17 + $0x40] sm:$0xff]  }
  0x17   : > { %14489 = vst [vmem:[#allocation2_spill] sm:$0xff] %v10290_v34  ;;  %v10318_v42 = vunpack.c.l.bf16 %v7745_v41  ;;  %v10329_v46 = vunpack.c.h.bf16 %v7745_v41  ;;  %v10335_v48 = vunpack.c.l.bf16 %v7746_v47  ;;  %v10340_v49 = vunpack.c.h.bf16 %v7746_v47  ;;  %v7750_v59 = vld [vmem:[%s10267_s17 + $0x48] sm:$0xff]   ;;  %v7751_v62 = vld [vmem:[%s10267_s17 + $0x50] sm:$0xff]   ;;  %v7752_v1 = vld [vmem:[%s10267_s17 + $0x58] sm:$0xff]  }
  0x18   : > { %9092 = vmatpush3.bf16.msra.mxu0 %v9091_v10  ;;  %v10346_v51 = vunpack.c.l.bf16 %v7747_v50  ;;  %v10351_v52 = vunpack.c.h.bf16 %v7747_v50  ;;  %v10357_v54 = vunpack.c.l.bf16 %v7748_v53  ;;  %v10362_v55 = vunpack.c.h.bf16 %v7748_v53  ;;  %v7753_v4 = vld [vmem:[%s10267_s17 + $0x60] sm:$0xff]   ;;  %v7754_v8 = vld [vmem:[%s10267_s17 + $0x68] sm:$0xff]   ;;  %v7755_v11 = vld [vmem:[%s10267_s17 + $0x70] sm:$0xff]  }
  0x19   : > { %9093 = vmatprep.subr.bf16.mxu0 %v10149_v3  ;;  %v10368_v57 = vunpack.c.l.bf16 %v7749_v56  ;;  %v10373_v58 = vunpack.c.h.bf16 %v7749_v56  ;;  %v10379_v60 = vunpack.c.l.bf16 %v7750_v59  ;;  %v10384_v61 = vunpack.c.h.bf16 %v7750_v59  ;;  %v7756_v14 = vld [vmem:[%s10267_s17 + $0x78] sm:$0xff]   ;;  %v7757_v17 = vld [vmem:[%s10267_s17 + $0x80] sm:$0xff]   ;;  %v7758_v20 = vld [vmem:[%s10267_s17 + $0x88] sm:$0xff]  }
  0x1a   : > { %14490 = vst [vmem:[#allocation3_spill] sm:$0xff] %v10357_v54  ;;  %14491 = vst [vmem:[#allocation4_spill] sm:$0xff] %v10362_v55  ;;  %v10390_v63 = vunpack.c.l.bf16 %v7751_v62  ;;  %v10395_v0 = vunpack.c.h.bf16 %v7751_v62  ;;  %v10401_v2 = vunpack.c.l.bf16 %v7752_v1  ;;  %v10412_v5 = vunpack.c.l.bf16 %v7753_v4  ;;  %v7759_v23 = vld [vmem:[%s10267_s17 + $0x90] sm:$0xff]   ;;  %v7760_v26 = vld [vmem:[%s10267_s17 + $0x98] sm:$0xff]  }
  0x1b   : > { %14492 = vst [vmem:[#allocation5_spill] sm:$0xff] %v10368_v57  ;;  %14493 = vst [vmem:[#allocation6_spill] sm:$0xff] %v10373_v58  ;;  %v10417_v7 = vunpack.c.h.bf16 %v7753_v4  ;;  %v10423_v9 = vunpack.c.l.bf16 %v7754_v8  ;;  %v10428_v10 = vunpack.c.h.bf16 %v7754_v8  ;;  %v10434_v12 = vunpack.c.l.bf16 %v7755_v11  ;;  %v321_v38 = vld [vmem:[%s10267_s17 + $0xa8] sm:$0x7]  ;;  %v10515_v43 = vld [vmem:[%s14349_s2] ss:$0 sm:$0xff] }
  0x1c   : > { %9095 = vmatpush3.bf16.msra.mxu0 %v9094_v13  ;;  %14494 = vst [vmem:[#allocation7_spill] sm:$0xff] %v10379_v60  ;;  %14495 = vst [vmem:[#allocation8_spill] sm:$0xff] %v10384_v61  ;;  %v10439_v13 = vunpack.c.h.bf16 %v7755_v11  ;;  %v10445_v15 = vunpack.c.l.bf16 %v7756_v14  ;;  %v10456_v18 = vunpack.c.l.bf16 %v7757_v17  ;;  %v10467_v21 = vunpack.c.l.bf16 %v7758_v20 }
  0x1d   : > { %9096 = vmatprep.subr.bf16.mxu0 %v10149_v3  ;;  %14496 = vst [vmem:[#allocation9_spill] sm:$0xff] %v10390_v63  ;;  %14497 = vst [vmem:[#allocation10_spill] sm:$0xff] %v10395_v0  ;;  %v10478_v24 = vunpack.c.l.bf16 %v7759_v23  ;;  %v10489_v27 = vunpack.c.l.bf16 %v7760_v26  ;;  %v10494_v28 = vunpack.c.h.bf16 %v7760_v26  ;;  %v364_v41 = vunpack.c.l.bf16 %v321_v38 }
  0x1e   : > { %14498 = vst [vmem:[#allocation11_spill] sm:$0xff] %v10401_v2  ;;  %14500 = vst [vmem:[#allocation13_spill] sm:$0xff] %v10412_v5 }
  0x1f   : > { %14501 = vst [vmem:[#allocation14_spill] sm:$0xff] %v10417_v7  ;;  %14502 = vst [vmem:[#allocation15_spill] sm:$0xff] %v10423_v9 }
  0x20   : > { %9098 = vmatpush3.bf16.msra.mxu0 %v9097_v16  ;;  %14503 = vst [vmem:[#allocation16_spill] sm:$0xff] %v10428_v10  ;;  %14504 = vst [vmem:[#allocation17_spill] sm:$0xff] %v10434_v12  ;;  %v10450_v16 = vunpack.c.h.bf16 %v7756_v14 }
  0x21   : > { %9099 = vmatprep.subr.bf16.mxu0 %v10149_v3  ;;  %14505 = vst [vmem:[#allocation18_spill] sm:$0xff] %v10439_v13  ;;  %14506 = vst [vmem:[#allocation19_spill] sm:$0xff] %v10445_v15 }
  0x22   : > { %14507 = vst [vmem:[#allocation20_spill] sm:$0xff] %v10450_v16  ;;  %14508 = vst [vmem:[#allocation21_spill] sm:$0xff] %v10456_v18 }
  0x23   : > { %14510 = vst [vmem:[#allocation23_spill] sm:$0xff] %v10467_v21  ;;  %14512 = vst [vmem:[#allocation25_spill] sm:$0xff] %v10478_v24 }
  0x24   : > { %9101 = vmatpush3.bf16.msra.mxu0 %v9100_v19  ;;  %v10461_v19 = vunpack.c.h.bf16 %v7757_v17  ;;  %14514 = vst [vmem:[#allocation27_spill] sm:$0xff] %v10489_v27  ;;  %14515 = vst [vmem:[#allocation28_spill] sm:$0xff] %v10494_v28 }
  0x25   : > { %9102 = vmatprep.subr.bf16.mxu0 %v10149_v3 }
  0x26   : > { %14509 = vst [vmem:[#allocation22_spill] sm:$0xff] %v10461_v19 }
  0x28   : > { %9104 = vmatpush3.bf16.msra.mxu0 %v9103_v22  ;;  %v10472_v22 = vunpack.c.h.bf16 %v7758_v20 }
  0x29   : > { %9105 = vmatprep.subr.bf16.mxu0 %v10149_v3 }
  0x2a   : > { %14511 = vst [vmem:[#allocation24_spill] sm:$0xff] %v10472_v22 }
  0x2c   : > { %9107 = vmatpush3.bf16.msra.mxu0 %v9106_v25  ;;  %v10483_v25 = vunpack.c.h.bf16 %v7759_v23 }
  0x2d   : > { %9108 = vmatprep.subr.bf16.mxu0 %v10149_v3 }
  0x2e   : > { %14513 = vst [vmem:[#allocation26_spill] sm:$0xff] %v10483_v25 }
  0x2f   : > { %8261 = vmatmul.mubr.f32.vlgmr.msra.gmra.mrb[0].mxu0 %v10276_v29 }
  0x30   : > { %8263 = vmatprep.mubr.msk.f32.mxu0 %vm10150_vm0, %v10151_v6  ;;  %9110 = vmatpush3.bf16.msra.mxu0 %v9109_v30  ;;  %v7761_v30 = vld [vmem:[%s10267_s17 + $0xa0] sm:$0xff]  }
  0x31   : > { %9111 = vmatprep.subr.bf16.mxu0 %v10149_v3  ;;  %v10406_v3 = vunpack.c.h.bf16 %v7752_v1  ;;  %v10500_v32 = vunpack.c.l.bf16 %v7761_v30  ;;  %v7741_v35 = vunpack.c.h.bf16 %v7761_v30 }
  0x33   : > { %8264 = vmatmul.mubr.f32.gmra.mrb[2].mxu0 %v10279_v31  ;;  %14499 = vst [vmem:[#allocation12_spill] sm:$0xff] %v10406_v3  ;;  %14516 = vst [vmem:[#allocation29_spill] sm:$0xff] %v10500_v32 }
  0x34   : > { %8266 = vmatprep.mubr.msk.f32.mxu0 %vm10150_vm0, %v10151_v6  ;;  %9113 = vmatpush3.bf16.msra.mxu0 %v9112_v45 }
  0x37   : > { %8267 = vmatmul.mubr.f32.gmra.mrb[4].mxu0 %v10285_v33 }
  0x38   : > { %8269 = vmatprep.mubr.msk.f32.mxu0 %vm10150_vm0, %v10151_v6 }
  0x3b   : > { %8270 = vmatmul.mubr.f32.gmra.mrb[6].mxu0 %v10290_v34 }
  0x3c   : > { %8272 = vmatprep.mubr.msk.f32.mxu0 %vm10150_vm0, %v10151_v6 }
  0x3f   : > { %8273 = vmatmul.mubr.f32.gmra.mrb[8].mxu0 %v10296_v36 }
  0x40   : > { %8275 = vmatprep.mubr.msk.f32.mxu0 %vm10150_vm0, %v10151_v6 }
  0x43   : > { %8276 = vmatmul.mubr.f32.gmra.mrb[10].mxu0 %v10301_v37 }
  0x44   : > { %8278 = vmatprep.mubr.msk.f32.mxu0 %vm10150_vm0, %v10151_v6 }
  0x47   : > { %8279 = vmatmul.mubr.f32.gmra.mrb[12].mxu0 %v10307_v39 }
  0x48   : > { %8281 = vmatprep.mubr.msk.f32.mxu0 %vm10150_vm0, %v10151_v6 }
  0x4b   : > { %8282 = vmatmul.mubr.f32.gmra.mrb[14].mxu0 %v10312_v40 }
  0x4c   : > { %8284 = vmatprep.mubr.msk.f32.mxu0 %vm10150_vm0, %v10151_v6 }
  0x4f   : > { %8285 = vmatmul.mubr.f32.gmra.mrb[16].mxu0 %v10318_v42 }
  0x50   : > { %8287 = vmatprep.mubr.msk.f32.mxu0 %vm10150_vm0, %v10151_v6 }
  0x53   : > { %8288 = vmatmul.mubr.f32.gmra.mrb[18].mxu0 %v10329_v46 }
  0x54   : > { %8290 = vmatprep.mubr.msk.f32.mxu0 %vm10150_vm0, %v10151_v6 }
  0x57   : > { %8291 = vmatmul.mubr.f32.gmra.mrb[20].mxu0 %v10335_v48 }
  0x58   : > { %8293 = vmatprep.mubr.msk.f32.mxu0 %vm10150_vm0, %v10151_v6 }
  0x5b   : > { %8294 = vmatmul.mubr.f32.gmra.mrb[22].mxu0 %v10340_v49 }
  0x5c   : > { %8296 = vmatprep.mubr.msk.f32.mxu0 %vm10150_vm0, %v10151_v6 }
  0x5f   : > { %8297 = vmatmul.mubr.f32.gmra.mrb[24].mxu0 %v10346_v51 }
  0x60   : > { %8299 = vmatprep.mubr.msk.f32.mxu0 %vm10150_vm0, %v10151_v6 }
  0x63   : > { %8300 = vmatmul.mubr.f32.gmra.mrb[26].mxu0 %v10351_v52 }
  0x64   : > { %8302 = vmatprep.mubr.msk.f32.mxu0 %vm10150_vm0, %v10151_v6 }
  0x67   : > { %8303 = vmatmul.mubr.f32.gmra.mrb[28].mxu0 %v10357_v54 }
  0x68   : > { %8305 = vmatprep.mubr.msk.f32.mxu0 %vm10150_vm0, %v10151_v6 }
  0x6b   : > { %8306 = vmatmul.mubr.f32.gmra.mrb[30].mxu0 %v10362_v55 }
  0x6c   : > { %8308 = vmatprep.mubr.msk.f32.mxu0 %vm10150_vm0, %v10151_v6 }
  0x6f   : > { %8309 = vmatmul.mubr.f32.gmra.mrb[32].mxu0 %v10368_v57 }
  0x70   : > { %8311 = vmatprep.mubr.msk.f32.mxu0 %vm10150_vm0, %v10151_v6 }
  0x73   : > { %8312 = vmatmul.mubr.f32.gmra.mrb[34].mxu0 %v10373_v58 }
  0x74   : > { %8314 = vmatprep.mubr.msk.f32.mxu0 %vm10150_vm0, %v10151_v6 }
  0x77   : > { %8315 = vmatmul.mubr.f32.gmra.mrb[36].mxu0 %v10379_v60 }
  0x78   : > { %8317 = vmatprep.mubr.msk.f32.mxu0 %vm10150_vm0, %v10151_v6 }
  0x7b   : > { %8318 = vmatmul.mubr.f32.gmra.mrb[38].mxu0 %v10384_v61 }
  0x7c   : > { %8320 = vmatprep.mubr.msk.f32.mxu0 %vm10150_vm0, %v10151_v6 }
  0x7f   : > { %8321 = vmatmul.mubr.f32.gmra.mrb[40].mxu0 %v10390_v63 }
  0x80   : > { %8323 = vmatprep.mubr.msk.f32.mxu0 %vm10150_vm0, %v10151_v6 }
  0x83   : > { %8324 = vmatmul.mubr.f32.gmra.mrb[42].mxu0 %v10395_v0 }
  0x84   : > { %8326 = vmatprep.mubr.msk.f32.mxu0 %vm10150_vm0, %v10151_v6 }
  0x87   : > { %8327 = vmatmul.mubr.f32.gmra.mrb[44].mxu0 %v10401_v2 }
  0x88   : > { %8329 = vmatprep.mubr.msk.f32.mxu0 %vm10150_vm0, %v10151_v6 }
  0x8b   : > { %8330 = vmatmul.mubr.f32.gmra.mrb[46].mxu0 %v10406_v3 }
  0x8c   : > { %8332 = vmatprep.mubr.msk.f32.mxu0 %vm10150_vm0, %v10151_v6 }
  0x8f   : > { %8333 = vmatmul.mubr.f32.gmra.mrb[48].mxu0 %v10412_v5 }
  0x90   : > { %8335 = vmatprep.mubr.msk.f32.mxu0 %vm10150_vm0, %v10151_v6 }
  0x93   : > { %8336 = vmatmul.mubr.f32.gmra.mrb[50].mxu0 %v10417_v7 }
  0x94   : > { %8338 = vmatprep.mubr.msk.f32.mxu0 %vm10150_vm0, %v10151_v6 }
  0x97   : > { %8339 = vmatmul.mubr.f32.gmra.mrb[52].mxu0 %v10423_v9 }
  0x98   : > { %8341 = vmatprep.mubr.msk.f32.mxu0 %vm10150_vm0, %v10151_v6 }
  0x9b   : > { %8342 = vmatmul.mubr.f32.gmra.mrb[54].mxu0 %v10428_v10 }
  0x9c   : > { %8344 = vmatprep.mubr.msk.f32.mxu0 %vm10150_vm0, %v10151_v6 }
  0x9f   : > { %8345 = vmatmul.mubr.f32.gmra.mrb[56].mxu0 %v10434_v12 }
  0xa0   : > { %8347 = vmatprep.mubr.msk.f32.mxu0 %vm10150_vm0, %v10151_v6 }
  0xa3   : > { %8348 = vmatmul.mubr.f32.gmra.mrb[58].mxu0 %v10439_v13 }
  0xa4   : > { %8350 = vmatprep.mubr.msk.f32.mxu0 %vm10150_vm0, %v10151_v6 }
  0xa7   : > { %8351 = vmatmul.mubr.f32.gmra.mrb[60].mxu0 %v10445_v15 }
  0xa8   : > { %8353 = vmatprep.mubr.msk.f32.mxu0 %vm10150_vm0, %v10151_v6 }
  0xab   : > { %8354 = vmatmul.mubr.f32.gmra.mrb[62].mxu0 %v10450_v16 }
  0xac   : > { %8356 = vmatprep.mubr.msk.f32.mxu0 %vm10150_vm0, %v10151_v6 }
  0xaf   : > { %8357 = vmatmul.mubr.f32.gmra.mrb[64].mxu0 %v10456_v18 }
  0xb0   : > { %8359 = vmatprep.mubr.msk.f32.mxu0 %vm10150_vm0, %v10151_v6 }
  0xb3   : > { %8360 = vmatmul.mubr.f32.gmra.mrb[66].mxu0 %v10461_v19 }
  0xb4   : > { %8362 = vmatprep.mubr.msk.f32.mxu0 %vm10150_vm0, %v10151_v6 }
  0xb7   : > { %8363 = vmatmul.mubr.f32.gmra.mrb[68].mxu0 %v10467_v21 }
  0xb8   : > { %8365 = vmatprep.mubr.msk.f32.mxu0 %vm10150_vm0, %v10151_v6 }
  0xbb   : > { %8366 = vmatmul.mubr.f32.gmra.mrb[70].mxu0 %v10472_v22 }
  0xbc   : > { %8368 = vmatprep.mubr.msk.f32.mxu0 %vm10150_vm0, %v10151_v6 }
  0xbf   : > { %8369 = vmatmul.mubr.f32.gmra.mrb[72].mxu0 %v10478_v24 }
  0xc0   : > { %8371 = vmatprep.mubr.msk.f32.mxu0 %vm10150_vm0, %v10151_v6 }
  0xc3   : > { %8372 = vmatmul.mubr.f32.gmra.mrb[74].mxu0 %v10483_v25 }
  0xc4   : > { %8374 = vmatprep.mubr.msk.f32.mxu0 %vm10150_vm0, %v10151_v6 }
  0xc7   : > { %8375 = vmatmul.mubr.f32.gmra.mrb[76].mxu0 %v10489_v27 }
  0xc8   : > { %8377 = vmatprep.mubr.msk.f32.mxu0 %vm10150_vm0, %v10151_v6 }
  0xcb   : > { %8378 = vmatmul.mubr.f32.gmra.mrb[78].mxu0 %v10494_v28 }
  0xcc   : > { %8380 = vmatprep.mubr.msk.f32.mxu0 %vm10150_vm0, %v10151_v6 }
  0xcf   : > { %8381 = vmatmul.mubr.f32.gmra.mrb[80].mxu0 %v10500_v32 }
  0xd0   : > { %8383 = vmatprep.mubr.msk.f32.mxu0 %vm10150_vm0, %v10151_v6 }
  0xd3   : > { %8384 = vmatmul.mubr.f32.gmra.mrb[82].mxu0 %v7741_v35 }
  0xd4   : > { %8386 = vmatprep.mubr.msk.f32.mxu0 %vm10150_vm0, %v10151_v6 }
  0xd7   : > { %8387 = vmatmul.mubr.f32.gmra.mrb[84].mxu0 %v364_v41 }
  0xd8   : > { %8397 = vmatprep.mubr.msk.f32.mxu0 %vm10150_vm0, %v10151_v6 }
 0x102   : > { %v454_v44 = vpop.f32.mrb[0].mxu0 }
 0x103   : > { %v455_v45 = vadd.f32 %v10515_v43, %v454_v44  ;;  %v8262_v47 = vpop.f32.mrb[1].mxu0 }
 0x105   : > { %v7208_v50 = vmul.f32 -1.442695, %v455_v45 }
 0x106   : > { %v459_v53 = vpop.f32.mrb[2].mxu0 }
 0x107   : > { %9661 = vpow2.f32 %v7208_v50  ;;  %v460_v56 = vadd.f32 %v10515_v43, %v459_v53  ;;  %v8265_v59 = vpop.f32.mrb[3].mxu0 }
 0x109   : > { %v7209_v62 = vmul.f32 -1.442695, %v460_v56 }
 0x10a   : > { %v464_v1 = vpop.f32.mrb[4].mxu0 }
 0x10b   : > { %9663 = vpow2.f32 %v7209_v62  ;;  %v465_v4 = vadd.f32 %v10515_v43, %v464_v1  ;;  %v8268_v8 = vpop.f32.mrb[5].mxu0 }
 0x10d   : > { %v7210_v11 = vmul.f32 -1.442695, %v465_v4 }
 0x10e   : > { %v469_v14 = vpop.f32.mrb[6].mxu0 }
 0x10f   : > { %9665 = vpow2.f32 %v7210_v11  ;;  %v10521_v17 = vadd.f32 %v10515_v43, %v469_v14  ;;  %v8271_v20 = vpop.f32.mrb[7].mxu0 }
 0x111   : > { %v9662_v23 = vpop.eup %9661  ;;  %v7211_v26 = vmul.f32 -1.442695, %v10521_v17 }
 0x112   : > { %v797_v30 = vadd.f32 1.0, %v9662_v23  ;;  %v474_v35 = vpop.f32.mrb[8].mxu0 }
 0x113   : > { %9667 = vpow2.f32 %v7211_v26  ;;  %v10525_v38 = vadd.f32 %v10515_v43, %v474_v35  ;;  %v8274_v41 = vpop.f32.mrb[9].mxu0 }
 0x114   : > { %9669 = vrcp.f32 %v797_v30 }
 0x115   : > { %v9664_v44 = vpop.eup %9663  ;;  %v7212_v47 = vmul.f32 -1.442695, %v10525_v38 }
 0x116   : > { %v798_v50 = vadd.f32 1.0, %v9664_v44  ;;  %v479_v53 = vpop.f32.mrb[10].mxu0 }
 0x117   : > { %9671 = vpow2.f32 %v7212_v47  ;;  %v10529_v59 = vadd.f32 %v10515_v43, %v479_v53  ;;  %v8277_v62 = vpop.f32.mrb[11].mxu0 }
 0x118   : > { %9673 = vrcp.f32 %v798_v50 }
 0x119   : > { %v9666_v1 = vpop.eup %9665  ;;  %v7213_v8 = vmul.f32 -1.442695, %v10529_v59 }
 0x11a   : > { %v799_v11 = vadd.f32 1.0, %v9666_v1  ;;  %v484_v14 = vpop.f32.mrb[12].mxu0 }
 0x11b   : > { %9675 = vpow2.f32 %v7213_v8  ;;  %v10533_v20 = vadd.f32 %v10515_v43, %v484_v14  ;;  %v8280_v23 = vpop.f32.mrb[13].mxu0 }
 0x11c   : > { %9677 = vrcp.f32 %v799_v11 }
 0x11d   : > { %v9668_v26 = vpop.eup %9667  ;;  %v7214_v30 = vmul.f32 -1.442695, %v10533_v20 }
 0x11e   : > { %v9670_v35 = vpop.eup %9669  ;;  %v800_v41 = vadd.f32 1.0, %v9668_v26  ;;  %v489_v44 = vpop.f32.mrb[14].mxu0 }
 0x11f   : > { %v926_v47 = vmul.f32 %v9670_v35, %v455_v45  ;;  %9679 = vpow2.f32 %v7214_v30  ;;  %v10537_v50 = vadd.f32 %v10515_v43, %v489_v44  ;;  %v8283_v53 = vpop.f32.mrb[15].mxu0 }
 0x120   : > { %9681 = vrcp.f32 %v800_v41 }
 0x121   : > { %v9672_v62 = vpop.eup %9671  ;;  %v7215_v1 = vmul.f32 -1.442695, %v10537_v50  ;;  %8398 = vmatmul.mubr.msk.f32.vlgmr.msra.gmra.mrb[86].mxu0 %vm980_vm1, %v926_v47 }
 0x122   : > { %v9674_v8 = vpop.eup %9673  ;;  %v801_v11 = vadd.f32 1.0, %v9672_v62  ;;  %v494_v14 = vpop.f32.mrb[16].mxu0  ;;  %8400 = vmatprep.mubr.msk.f32.mxu0 %vm10150_vm0, %v10151_v6 }
 0x123   : > { %v927_v23 = vmul.f32 %v9674_v8, %v460_v56  ;;  %9683 = vpow2.f32 %v7215_v1  ;;  %v10544_v45 = vadd.f32 %v10515_v43, %v494_v14  ;;  %v8286_v26 = vpop.f32.mrb[17].mxu0 }
 0x124   : > { %9685 = vrcp.f32 %v801_v11 }
 0x125   : > { %v9676_v30 = vpop.eup %9675  ;;  %v7216_v35 = vmul.f32 -1.442695, %v10544_v45  ;;  %8401 = vmatmul.mubr.msk.f32.gmra.mrb[88].mxu0 %vm980_vm1, %v927_v23 }
 0x126   : > { %v9678_v41 = vpop.eup %9677  ;;  %v802_v44 = vadd.f32 1.0, %v9676_v30  ;;  %v499_v47 = vpop.f32.mrb[18].mxu0  ;;  %8403 = vmatprep.mubr.msk.f32.mxu0 %vm10150_vm0, %v10151_v6 }
 0x127   : > { %v928_v53 = vmul.f32 %v9678_v41, %v465_v4  ;;  %9687 = vpow2.f32 %v7216_v35  ;;  %v10551_v56 = vadd.f32 %v10515_v43, %v499_v47  ;;  %v8289_v62 = vpop.f32.mrb[19].mxu0 }
 0x128   : > { %9689 = vrcp.f32 %v802_v44 }
 0x129   : > { %v9680_v1 = vpop.eup %9679  ;;  %v7217_v8 = vmul.f32 -1.442695, %v10551_v56  ;;  %8404 = vmatmul.mubr.msk.f32.gmra.mrb[90].mxu0 %vm980_vm1, %v928_v53 }
 0x12a   : > { %v9682_v11 = vpop.eup %9681  ;;  %v803_v14 = vadd.f32 1.0, %v9680_v1  ;;  %v504_v23 = vpop.f32.mrb[20].mxu0  ;;  %8406 = vmatprep.mubr.msk.f32.mxu0 %vm10150_vm0, %v10151_v6 }
 0x12b   : > { %v929_v26 = vmul.f32 %v9682_v11, %v10521_v17  ;;  %9691 = vpow2.f32 %v7217_v8  ;;  %v10559_v4 = vadd.f32 %v10515_v43, %v504_v23  ;;  %v8292_v30 = vpop.f32.mrb[21].mxu0 }
 0x12c   : > { %9693 = vrcp.f32 %v803_v14 }
 0x12d   : > { %v9684_v35 = vpop.eup %9683  ;;  %v7218_v41 = vmul.f32 -1.442695, %v10559_v4  ;;  %8407 = vmatmul.mubr.msk.f32.gmra.mrb[92].mxu0 %vm980_vm1, %v929_v26 }
 0x12e   : > { %v9686_v44 = vpop.eup %9685  ;;  %v804_v47 = vadd.f32 1.0, %v9684_v35  ;;  %v509_v53 = vpop.f32.mrb[22].mxu0  ;;  %8409 = vmatprep.mubr.msk.f32.mxu0 %vm10150_vm0, %v10151_v6 }
 0x12f   : > { %v930_v62 = vmul.f32 %v9686_v44, %v10525_v38  ;;  %9695 = vpow2.f32 %v7218_v41  ;;  %v10567_v17 = vadd.f32 %v10515_v43, %v509_v53  ;;  %v8295_v1 = vpop.f32.mrb[23].mxu0 }
 0x130   : > { %9697 = vrcp.f32 %v804_v47 }
 0x131   : > { %v9688_v8 = vpop.eup %9687  ;;  %v7219_v11 = vmul.f32 -1.442695, %v10567_v17  ;;  %8410 = vmatmul.mubr.msk.f32.gmra.mrb[94].mxu0 %vm980_vm1, %v930_v62 }
 0x132   : > { %v9690_v14 = vpop.eup %9689  ;;  %v805_v23 = vadd.f32 1.0, %v9688_v8  ;;  %v514_v26 = vpop.f32.mrb[24].mxu0  ;;  %8412 = vmatprep.mubr.msk.f32.mxu0 %vm10150_vm0, %v10151_v6 }
 0x133   : > { %v931_v30 = vmul.f32 %v9690_v14, %v10529_v59  ;;  %9699 = vpow2.f32 %v7219_v11  ;;  %v10575_v38 = vadd.f32 %v10515_v43, %v514_v26  ;;  %v8298_v35 = vpop.f32.mrb[25].mxu0 }
 0x134   : > { %9701 = vrcp.f32 %v805_v23 }
 0x135   : > { %v9692_v41 = vpop.eup %9691  ;;  %v7220_v44 = vmul.f32 -1.442695, %v10575_v38  ;;  %8413 = vmatmul.mubr.msk.f32.gmra.mrb[96].mxu0 %vm980_vm1, %v931_v30 }
 0x136   : > { %v9694_v47 = vpop.eup %9693  ;;  %v806_v53 = vadd.f32 1.0, %v9692_v41  ;;  %v519_v62 = vpop.f32.mrb[26].mxu0  ;;  %8415 = vmatprep.mubr.msk.f32.mxu0 %vm10150_vm0, %v10151_v6 }
 0x137   : > { %v932_v1 = vmul.f32 %v9694_v47, %v10533_v20  ;;  %9703 = vpow2.f32 %v7220_v44  ;;  %v10583_v59 = vadd.f32 %v10515_v43, %v519_v62  ;;  %v8301_v8 = vpop.f32.mrb[27].mxu0 }
 0x138   : > { %9705 = vrcp.f32 %v806_v53 }
 0x139   : > { %v9696_v11 = vpop.eup %9695  ;;  %v7221_v14 = vmul.f32 -1.442695, %v10583_v59  ;;  %8416 = vmatmul.mubr.msk.f32.gmra.mrb[98].mxu0 %vm980_vm1, %v932_v1 }
 0x13a   : > { %v9698_v23 = vpop.eup %9697  ;;  %v807_v26 = vadd.f32 1.0, %v9696_v11  ;;  %v524_v30 = vpop.f32.mrb[28].mxu0  ;;  %8418 = vmatprep.mubr.msk.f32.mxu0 %vm10150_vm0, %v10151_v6 }
 0x13b   : > { %v933_v35 = vmul.f32 %v9698_v23, %v10537_v50  ;;  %9707 = vpow2.f32 %v7221_v14  ;;  %v10591_v20 = vadd.f32 %v10515_v43, %v524_v30  ;;  %v8304_v41 = vpop.f32.mrb[29].mxu0 }
 0x13c   : > { %9709 = vrcp.f32 %v807_v26 }
 0x13d   : > { %v9700_v44 = vpop.eup %9699  ;;  %v7222_v47 = vmul.f32 -1.442695, %v10591_v20  ;;  %8419 = vmatmul.mubr.msk.f32.gmra.mrb[100].mxu0 %vm980_vm1, %v933_v35 }
 0x13e   : > { %v9702_v53 = vpop.eup %9701  ;;  %v808_v62 = vadd.f32 1.0, %v9700_v44  ;;  %v529_v1 = vpop.f32.mrb[30].mxu0  ;;  %8421 = vmatprep.mubr.msk.f32.mxu0 %vm10150_vm0, %v10151_v6 }
 0x13f   : > { %v934_v8 = vmul.f32 %v9702_v53, %v10544_v45  ;;  %9711 = vpow2.f32 %v7222_v47  ;;  %v10599_v50 = vadd.f32 %v10515_v43, %v529_v1  ;;  %v8307_v11 = vpop.f32.mrb[31].mxu0 }
 0x140   : > { %9713 = vrcp.f32 %v808_v62 }
 0x141   : > { %v9704_v14 = vpop.eup %9703  ;;  %v7223_v23 = vmul.f32 -1.442695, %v10599_v50  ;;  %8422 = vmatmul.mubr.msk.f32.gmra.mrb[102].mxu0 %vm980_vm1, %v934_v8 }
 0x142   : > { %v9706_v26 = vpop.eup %9705  ;;  %v809_v30 = vadd.f32 1.0, %v9704_v14  ;;  %v534_v35 = vpop.f32.mrb[32].mxu0  ;;  %8424 = vmatprep.mubr.msk.f32.mxu0 %vm10150_vm0, %v10151_v6 }
 0x143   : > { %v935_v41 = vmul.f32 %v9706_v26, %v10551_v56  ;;  %9715 = vpow2.f32 %v7223_v23  ;;  %v10607_v45 = vadd.f32 %v10515_v43, %v534_v35  ;;  %v8310_v44 = vpop.f32.mrb[33].mxu0 }
 0x144   : > { %9717 = vrcp.f32 %v809_v30 }
 0x145   : > { %v9708_v47 = vpop.eup %9707  ;;  %v7224_v53 = vmul.f32 -1.442695, %v10607_v45  ;;  %8425 = vmatmul.mubr.msk.f32.gmra.mrb[104].mxu0 %vm980_vm1, %v935_v41 }
 0x146   : > { %v9710_v62 = vpop.eup %9709  ;;  %v810_v1 = vadd.f32 1.0, %v9708_v47  ;;  %v539_v8 = vpop.f32.mrb[34].mxu0  ;;  %8427 = vmatprep.mubr.msk.f32.mxu0 %vm10150_vm0, %v10151_v6 }
 0x147   : > { %v936_v11 = vmul.f32 %v9710_v62, %v10559_v4  ;;  %9719 = vpow2.f32 %v7224_v53  ;;  %v10615_v56 = vadd.f32 %v10515_v43, %v539_v8  ;;  %v8313_v14 = vpop.f32.mrb[35].mxu0 }
 0x148   : > { %9721 = vrcp.f32 %v810_v1 }
 0x149   : > { %v9712_v23 = vpop.eup %9711  ;;  %v7225_v26 = vmul.f32 -1.442695, %v10615_v56  ;;  %8428 = vmatmul.mubr.msk.f32.gmra.mrb[106].mxu0 %vm980_vm1, %v936_v11 }
 0x14a   : > { %v9714_v30 = vpop.eup %9713  ;;  %v811_v35 = vadd.f32 1.0, %v9712_v23  ;;  %v544_v41 = vpop.f32.mrb[36].mxu0  ;;  %8430 = vmatprep.mubr.msk.f32.mxu0 %vm10150_vm0, %v10151_v6 }
 0x14b   : > { %v937_v44 = vmul.f32 %v9714_v30, %v10567_v17  ;;  %9723 = vpow2.f32 %v7225_v26  ;;  %v10623_v4 = vadd.f32 %v10515_v43, %v544_v41  ;;  %v8316_v47 = vpop.f32.mrb[37].mxu0 }
 0x14c   : > { %9725 = vrcp.f32 %v811_v35 }
 0x14d   : > { %v9716_v53 = vpop.eup %9715  ;;  %v7226_v62 = vmul.f32 -1.442695, %v10623_v4  ;;  %8431 = vmatmul.mubr.msk.f32.gmra.mrb[108].mxu0 %vm980_vm1, %v937_v44 }
 0x14e   : > { %v9718_v1 = vpop.eup %9717  ;;  %v812_v8 = vadd.f32 1.0, %v9716_v53  ;;  %v549_v11 = vpop.f32.mrb[38].mxu0  ;;  %8433 = vmatprep.mubr.msk.f32.mxu0 %vm10150_vm0, %v10151_v6 }
 0x14f   : > { %v938_v14 = vmul.f32 %v9718_v1, %v10575_v38  ;;  %9727 = vpow2.f32 %v7226_v62  ;;  %v10631_v17 = vadd.f32 %v10515_v43, %v549_v11  ;;  %v8319_v23 = vpop.f32.mrb[39].mxu0 }
 0x150   : > { %9729 = vrcp.f32 %v812_v8 }
 0x151   : > { %v9720_v26 = vpop.eup %9719  ;;  %v7227_v30 = vmul.f32 -1.442695, %v10631_v17  ;;  %8434 = vmatmul.mubr.msk.f32.gmra.mrb[110].mxu0 %vm980_vm1, %v938_v14 }
 0x152   : > { %v9722_v35 = vpop.eup %9721  ;;  %v813_v41 = vadd.f32 1.0, %v9720_v26  ;;  %v554_v44 = vpop.f32.mrb[40].mxu0  ;;  %8436 = vmatprep.mubr.msk.f32.mxu0 %vm10150_vm0, %v10151_v6 }
 0x153   : > { %v939_v47 = vmul.f32 %v9722_v35, %v10583_v59  ;;  %9731 = vpow2.f32 %v7227_v30  ;;  %v10639_v38 = vadd.f32 %v10515_v43, %v554_v44  ;;  %v8322_v53 = vpop.f32.mrb[41].mxu0 }
 0x154   : > { %9733 = vrcp.f32 %v813_v41 }
 0x155   : > { %v9724_v62 = vpop.eup %9723  ;;  %v7228_v1 = vmul.f32 -1.442695, %v10639_v38  ;;  %8437 = vmatmul.mubr.msk.f32.gmra.mrb[112].mxu0 %vm980_vm1, %v939_v47 }
 0x156   : > { %v9726_v8 = vpop.eup %9725  ;;  %v814_v11 = vadd.f32 1.0, %v9724_v62  ;;  %v559_v14 = vpop.f32.mrb[42].mxu0  ;;  %8439 = vmatprep.mubr.msk.f32.mxu0 %vm10150_vm0, %v10151_v6 }
 0x157   : > { %v940_v23 = vmul.f32 %v9726_v8, %v10591_v20  ;;  %9735 = vpow2.f32 %v7228_v1  ;;  %v10647_v59 = vadd.f32 %v10515_v43, %v559_v14  ;;  %v8325_v26 = vpop.f32.mrb[43].mxu0 }
 0x158   : > { %9737 = vrcp.f32 %v814_v11 }
 0x159   : > { %v9728_v30 = vpop.eup %9727  ;;  %v7229_v35 = vmul.f32 -1.442695, %v10647_v59  ;;  %8440 = vmatmul.mubr.msk.f32.gmra.mrb[114].mxu0 %vm980_vm1, %v940_v23 }
 0x15a   : > { %v9730_v41 = vpop.eup %9729  ;;  %v815_v44 = vadd.f32 1.0, %v9728_v30  ;;  %v564_v47 = vpop.f32.mrb[44].mxu0  ;;  %8442 = vmatprep.mubr.msk.f32.mxu0 %vm10150_vm0, %v10151_v6 }
 0x15b   : > { %v941_v53 = vmul.f32 %v9730_v41, %v10599_v50  ;;  %9739 = vpow2.f32 %v7229_v35  ;;  %v10655_v20 = vadd.f32 %v10515_v43, %v564_v47  ;;  %v8328_v62 = vpop.f32.mrb[45].mxu0 }
 0x15c   : > { %9741 = vrcp.f32 %v815_v44 }
 0x15d   : > { %v9732_v1 = vpop.eup %9731  ;;  %v7230_v8 = vmul.f32 -1.442695, %v10655_v20  ;;  %8443 = vmatmul.mubr.msk.f32.gmra.mrb[116].mxu0 %vm980_vm1, %v941_v53 }
 0x15e   : > { %v9734_v11 = vpop.eup %9733  ;;  %v816_v14 = vadd.f32 1.0, %v9732_v1  ;;  %v569_v23 = vpop.f32.mrb[46].mxu0  ;;  %8445 = vmatprep.mubr.msk.f32.mxu0 %vm10150_vm0, %v10151_v6 }
 0x15f   : > { %v942_v26 = vmul.f32 %v9734_v11, %v10607_v45  ;;  %9743 = vpow2.f32 %v7230_v8  ;;  %v10663_v50 = vadd.f32 %v10515_v43, %v569_v23  ;;  %v8331_v30 = vpop.f32.mrb[47].mxu0 }
 0x160   : > { %9745 = vrcp.f32 %v816_v14 }
 0x161   : > { %v9736_v35 = vpop.eup %9735  ;;  %v7231_v41 = vmul.f32 -1.442695, %v10663_v50  ;;  %8446 = vmatmul.mubr.msk.f32.gmra.mrb[118].mxu0 %vm980_vm1, %v942_v26 }
 0x162   : > { %v9738_v44 = vpop.eup %9737  ;;  %v817_v47 = vadd.f32 1.0, %v9736_v35  ;;  %v574_v53 = vpop.f32.mrb[48].mxu0  ;;  %8448 = vmatprep.mubr.msk.f32.mxu0 %vm10150_vm0, %v10151_v6 }
 0x163   : > { %v943_v62 = vmul.f32 %v9738_v44, %v10615_v56  ;;  %9747 = vpow2.f32 %v7231_v41  ;;  %v10671_v45 = vadd.f32 %v10515_v43, %v574_v53  ;;  %v8334_v1 = vpop.f32.mrb[49].mxu0 }
 0x164   : > { %9749 = vrcp.f32 %v817_v47 }
 0x165   : > { %v9740_v8 = vpop.eup %9739  ;;  %v7232_v11 = vmul.f32 -1.442695, %v10671_v45  ;;  %8449 = vmatmul.mubr.msk.f32.gmra.mrb[120].mxu0 %vm980_vm1, %v943_v62 }
 0x166   : > { %v9742_v14 = vpop.eup %9741  ;;  %v818_v23 = vadd.f32 1.0, %v9740_v8  ;;  %v579_v26 = vpop.f32.mrb[50].mxu0  ;;  %8451 = vmatprep.mubr.msk.f32.mxu0 %vm10150_vm0, %v10151_v6 }
 0x167   : > { %v944_v30 = vmul.f32 %v9742_v14, %v10623_v4  ;;  %9751 = vpow2.f32 %v7232_v11  ;;  %v10679_v56 = vadd.f32 %v10515_v43, %v579_v26  ;;  %v8337_v35 = vpop.f32.mrb[51].mxu0 }
 0x168   : > { %9753 = vrcp.f32 %v818_v23 }
 0x169   : > { %v9744_v41 = vpop.eup %9743  ;;  %v7233_v44 = vmul.f32 -1.442695, %v10679_v56  ;;  %8452 = vmatmul.mubr.msk.f32.gmra.mrb[122].mxu0 %vm980_vm1, %v944_v30 }
 0x16a   : > { %v9746_v47 = vpop.eup %9745  ;;  %v819_v53 = vadd.f32 1.0, %v9744_v41  ;;  %v584_v62 = vpop.f32.mrb[52].mxu0  ;;  %8454 = vmatprep.mubr.msk.f32.mxu0 %vm10150_vm0, %v10151_v6 }
 0x16b   : > { %v945_v1 = vmul.f32 %v9746_v47, %v10631_v17  ;;  %9755 = vpow2.f32 %v7233_v44  ;;  %v10687_v4 = vadd.f32 %v10515_v43, %v584_v62  ;;  %v8340_v8 = vpop.f32.mrb[53].mxu0 }
 0x16c   : > { %9757 = vrcp.f32 %v819_v53 }
 0x16d   : > { %v9748_v11 = vpop.eup %9747  ;;  %v7234_v14 = vmul.f32 -1.442695, %v10687_v4  ;;  %8455 = vmatmul.mubr.msk.f32.gmra.mrb[124].mxu0 %vm980_vm1, %v945_v1 }
 0x16e   : > { %v9750_v23 = vpop.eup %9749  ;;  %v820_v26 = vadd.f32 1.0, %v9748_v11  ;;  %v589_v30 = vpop.f32.mrb[54].mxu0  ;;  %8457 = vmatprep.mubr.msk.f32.mxu0 %vm10150_vm0, %v10151_v6 }
 0x16f   : > { %v946_v35 = vmul.f32 %v9750_v23, %v10639_v38  ;;  %9759 = vpow2.f32 %v7234_v14  ;;  %v10695_v17 = vadd.f32 %v10515_v43, %v589_v30  ;;  %v8343_v41 = vpop.f32.mrb[55].mxu0 }
 0x170   : > { %9761 = vrcp.f32 %v820_v26 }
 0x171   : > { %v9752_v44 = vpop.eup %9751  ;;  %v7235_v47 = vmul.f32 -1.442695, %v10695_v17  ;;  %8458 = vmatmul.mubr.msk.f32.gmra.mrb[126].mxu0 %vm980_vm1, %v946_v35 }
 0x172   : > { %v9754_v53 = vpop.eup %9753  ;;  %v821_v62 = vadd.f32 1.0, %v9752_v44  ;;  %v594_v1 = vpop.f32.mrb[56].mxu0  ;;  %8460 = vmatprep.mubr.msk.f32.mxu0 %vm10150_vm0, %v10151_v6 }
 0x173   : > { %v947_v8 = vmul.f32 %v9754_v53, %v10647_v59  ;;  %9763 = vpow2.f32 %v7235_v47  ;;  %v10703_v38 = vadd.f32 %v10515_v43, %v594_v1  ;;  %v8346_v11 = vpop.f32.mrb[57].mxu0 }
 0x174   : > { %9765 = vrcp.f32 %v821_v62 }
 0x175   : > { %v9756_v14 = vpop.eup %9755  ;;  %v7236_v23 = vmul.f32 -1.442695, %v10703_v38  ;;  %8461 = vmatmul.mubr.msk.f32.gmra.mrb[128].mxu0 %vm980_vm1, %v947_v8 }
 0x176   : > { %v9758_v26 = vpop.eup %9757  ;;  %v822_v30 = vadd.f32 1.0, %v9756_v14  ;;  %v599_v35 = vpop.f32.mrb[58].mxu0  ;;  %8463 = vmatprep.mubr.msk.f32.mxu0 %vm10150_vm0, %v10151_v6 }
 0x177   : > { %v948_v41 = vmul.f32 %v9758_v26, %v10655_v20  ;;  %9767 = vpow2.f32 %v7236_v23  ;;  %v10711_v59 = vadd.f32 %v10515_v43, %v599_v35  ;;  %v8349_v44 = vpop.f32.mrb[59].mxu0 }
 0x178   : > { %9769 = vrcp.f32 %v822_v30 }
 0x179   : > { %v9760_v47 = vpop.eup %9759  ;;  %v7237_v53 = vmul.f32 -1.442695, %v10711_v59  ;;  %8464 = vmatmul.mubr.msk.f32.gmra.mrb[130].mxu0 %vm980_vm1, %v948_v41 }
 0x17a   : > { %v9762_v62 = vpop.eup %9761  ;;  %v823_v1 = vadd.f32 1.0, %v9760_v47  ;;  %v604_v8 = vpop.f32.mrb[60].mxu0  ;;  %8466 = vmatprep.mubr.msk.f32.mxu0 %vm10150_vm0, %v10151_v6 }
 0x17b   : > { %v949_v11 = vmul.f32 %v9762_v62, %v10663_v50  ;;  %9771 = vpow2.f32 %v7237_v53  ;;  %v10719_v20 = vadd.f32 %v10515_v43, %v604_v8  ;;  %v8352_v14 = vpop.f32.mrb[61].mxu0 }
 0x17c   : > { %9773 = vrcp.f32 %v823_v1 }
 0x17d   : > { %v9764_v23 = vpop.eup %9763  ;;  %v7238_v26 = vmul.f32 -1.442695, %v10719_v20  ;;  %8467 = vmatmul.mubr.msk.f32.gmra.mrb[132].mxu0 %vm980_vm1, %v949_v11 }
 0x17e   : > { %v9766_v30 = vpop.eup %9765  ;;  %v824_v35 = vadd.f32 1.0, %v9764_v23  ;;  %v609_v41 = vpop.f32.mrb[62].mxu0  ;;  %8469 = vmatprep.mubr.msk.f32.mxu0 %vm10150_vm0, %v10151_v6 }
 0x17f   : > { %v950_v44 = vmul.f32 %v9766_v30, %v10671_v45  ;;  %9775 = vpow2.f32 %v7238_v26  ;;  %v10727_v50 = vadd.f32 %v10515_v43, %v609_v41  ;;  %v8355_v47 = vpop.f32.mrb[63].mxu0 }
 0x180   : > { %9777 = vrcp.f32 %v824_v35 }
 0x181   : > { %v9768_v53 = vpop.eup %9767  ;;  %v7239_v62 = vmul.f32 -1.442695, %v10727_v50  ;;  %8470 = vmatmul.mubr.msk.f32.gmra.mrb[134].mxu0 %vm980_vm1, %v950_v44 }
 0x182   : > { %v9770_v1 = vpop.eup %9769  ;;  %v825_v8 = vadd.f32 1.0, %v9768_v53  ;;  %v614_v11 = vpop.f32.mrb[64].mxu0  ;;  %8472 = vmatprep.mubr.msk.f32.mxu0 %vm10150_vm0, %v10151_v6 }
 0x183   : > { %v951_v14 = vmul.f32 %v9770_v1, %v10679_v56  ;;  %9779 = vpow2.f32 %v7239_v62  ;;  %v10735_v45 = vadd.f32 %v10515_v43, %v614_v11  ;;  %v8358_v23 = vpop.f32.mrb[65].mxu0 }
 0x184   : > { %9781 = vrcp.f32 %v825_v8 }
 0x185   : > { %v9772_v26 = vpop.eup %9771  ;;  %v7240_v30 = vmul.f32 -1.442695, %v10735_v45  ;;  %8473 = vmatmul.mubr.msk.f32.gmra.mrb[136].mxu0 %vm980_vm1, %v951_v14 }
 0x186   : > { %v9774_v35 = vpop.eup %9773  ;;  %v826_v41 = vadd.f32 1.0, %v9772_v26  ;;  %v619_v44 = vpop.f32.mrb[66].mxu0  ;;  %8475 = vmatprep.mubr.msk.f32.mxu0 %vm10150_vm0, %v10151_v6 }
 0x187   : > { %v952_v47 = vmul.f32 %v9774_v35, %v10687_v4  ;;  %9783 = vpow2.f32 %v7240_v30  ;;  %v10743_v56 = vadd.f32 %v10515_v43, %v619_v44  ;;  %v8361_v53 = vpop.f32.mrb[67].mxu0 }
 0x188   : > { %9785 = vrcp.f32 %v826_v41 }
 0x189   : > { %v9776_v62 = vpop.eup %9775  ;;  %v7241_v1 = vmul.f32 -1.442695, %v10743_v56  ;;  %8476 = vmatmul.mubr.msk.f32.gmra.mrb[138].mxu0 %vm980_vm1, %v952_v47 }
 0x18a   : > { %v9778_v8 = vpop.eup %9777  ;;  %v827_v11 = vadd.f32 1.0, %v9776_v62  ;;  %v624_v14 = vpop.f32.mrb[68].mxu0  ;;  %8478 = vmatprep.mubr.msk.f32.mxu0 %vm10150_vm0, %v10151_v6 }
 0x18b   : > { %v953_v23 = vmul.f32 %v9778_v8, %v10695_v17  ;;  %9787 = vpow2.f32 %v7241_v1  ;;  %v10751_v4 = vadd.f32 %v10515_v43, %v624_v14  ;;  %v8364_v26 = vpop.f32.mrb[69].mxu0 }
 0x18c   : > { %9789 = vrcp.f32 %v827_v11 }
 0x18d   : > { %v9780_v30 = vpop.eup %9779  ;;  %v7242_v35 = vmul.f32 -1.442695, %v10751_v4  ;;  %8479 = vmatmul.mubr.msk.f32.gmra.mrb[140].mxu0 %vm980_vm1, %v953_v23 }
 0x18e   : > { %v9782_v41 = vpop.eup %9781  ;;  %v828_v44 = vadd.f32 1.0, %v9780_v30  ;;  %v629_v47 = vpop.f32.mrb[70].mxu0  ;;  %8481 = vmatprep.mubr.msk.f32.mxu0 %vm10150_vm0, %v10151_v6 }
 0x18f   : > { %v954_v53 = vmul.f32 %v9782_v41, %v10703_v38  ;;  %9791 = vpow2.f32 %v7242_v35  ;;  %v10759_v17 = vadd.f32 %v10515_v43, %v629_v47  ;;  %v8367_v62 = vpop.f32.mrb[71].mxu0 }
 0x190   : > { %9793 = vrcp.f32 %v828_v44 }
 0x191   : > { %v9784_v1 = vpop.eup %9783  ;;  %v7243_v8 = vmul.f32 -1.442695, %v10759_v17  ;;  %8482 = vmatmul.mubr.msk.f32.gmra.mrb[142].mxu0 %vm980_vm1, %v954_v53 }
 0x192   : > { %v9786_v11 = vpop.eup %9785  ;;  %v829_v14 = vadd.f32 1.0, %v9784_v1  ;;  %v634_v23 = vpop.f32.mrb[72].mxu0  ;;  %8484 = vmatprep.mubr.msk.f32.mxu0 %vm10150_vm0, %v10151_v6 }
 0x193   : > { %v955_v26 = vmul.f32 %v9786_v11, %v10711_v59  ;;  %9795 = vpow2.f32 %v7243_v8  ;;  %v10767_v38 = vadd.f32 %v10515_v43, %v634_v23  ;;  %v8370_v30 = vpop.f32.mrb[73].mxu0 }
 0x194   : > { %9797 = vrcp.f32 %v829_v14 }
 0x195   : > { %v9788_v35 = vpop.eup %9787  ;;  %v7244_v41 = vmul.f32 -1.442695, %v10767_v38  ;;  %8485 = vmatmul.mubr.msk.f32.gmra.mrb[144].mxu0 %vm980_vm1, %v955_v26 }
 0x196   : > { %v9790_v44 = vpop.eup %9789  ;;  %v830_v47 = vadd.f32 1.0, %v9788_v35  ;;  %v639_v53 = vpop.f32.mrb[74].mxu0  ;;  %8487 = vmatprep.mubr.msk.f32.mxu0 %vm10150_vm0, %v10151_v6 }
 0x197   : > { %v956_v62 = vmul.f32 %v9790_v44, %v10719_v20  ;;  %9799 = vpow2.f32 %v7244_v41  ;;  %v10775_v59 = vadd.f32 %v10515_v43, %v639_v53  ;;  %v8373_v1 = vpop.f32.mrb[75].mxu0 }
 0x198   : > { %9801 = vrcp.f32 %v830_v47 }
 0x199   : > { %v9792_v8 = vpop.eup %9791  ;;  %v7245_v11 = vmul.f32 -1.442695, %v10775_v59  ;;  %8488 = vmatmul.mubr.msk.f32.gmra.mrb[146].mxu0 %vm980_vm1, %v956_v62 }
 0x19a   : > { %v9794_v14 = vpop.eup %9793  ;;  %v831_v23 = vadd.f32 1.0, %v9792_v8  ;;  %v644_v26 = vpop.f32.mrb[76].mxu0  ;;  %8490 = vmatprep.mubr.msk.f32.mxu0 %vm10150_vm0, %v10151_v6 }
 0x19b   : > { %v957_v30 = vmul.f32 %v9794_v14, %v10727_v50  ;;  %9803 = vpow2.f32 %v7245_v11  ;;  %v10783_v20 = vadd.f32 %v10515_v43, %v644_v26  ;;  %v8376_v35 = vpop.f32.mrb[77].mxu0 }
 0x19c   : > { %9805 = vrcp.f32 %v831_v23 }
 0x19d   : > { %v9796_v41 = vpop.eup %9795  ;;  %v7246_v44 = vmul.f32 -1.442695, %v10783_v20  ;;  %8491 = vmatmul.mubr.msk.f32.gmra.mrb[148].mxu0 %vm980_vm1, %v957_v30 }
 0x19e   : > { %v9798_v47 = vpop.eup %9797  ;;  %v832_v53 = vadd.f32 1.0, %v9796_v41  ;;  %v649_v62 = vpop.f32.mrb[78].mxu0  ;;  %8493 = vmatprep.mubr.msk.f32.mxu0 %vm10150_vm0, %v10151_v6 }
 0x19f   : > { %v958_v1 = vmul.f32 %v9798_v47, %v10735_v45  ;;  %9807 = vpow2.f32 %v7246_v44  ;;  %v10791_v50 = vadd.f32 %v10515_v43, %v649_v62  ;;  %v8379_v8 = vpop.f32.mrb[79].mxu0 }
 0x1a0   : > { %9809 = vrcp.f32 %v832_v53 }
 0x1a1   : > { %v9800_v11 = vpop.eup %9799  ;;  %v7247_v14 = vmul.f32 -1.442695, %v10791_v50  ;;  %8494 = vmatmul.mubr.msk.f32.gmra.mrb[150].mxu0 %vm980_vm1, %v958_v1 }
 0x1a2   : > { %v9802_v23 = vpop.eup %9801  ;;  %v833_v26 = vadd.f32 1.0, %v9800_v11  ;;  %v654_v30 = vpop.f32.mrb[80].mxu0  ;;  %8496 = vmatprep.mubr.msk.f32.mxu0 %vm10150_vm0, %v10151_v6 }
 0x1a3   : > { %v959_v35 = vmul.f32 %v9802_v23, %v10743_v56  ;;  %9811 = vpow2.f32 %v7247_v14  ;;  %v655_v45 = vadd.f32 %v10515_v43, %v654_v30  ;;  %v8382_v41 = vpop.f32.mrb[81].mxu0 }
 0x1a4   : > { %9813 = vrcp.f32 %v833_v26 }
 0x1a5   : > { %v9804_v44 = vpop.eup %9803  ;;  %v7248_v47 = vmul.f32 -1.442695, %v655_v45  ;;  %8497 = vmatmul.mubr.msk.f32.gmra.mrb[152].mxu0 %vm980_vm1, %v959_v35 }
 0x1a6   : > { %v9806_v53 = vpop.eup %9805  ;;  %v834_v62 = vadd.f32 1.0, %v9804_v44  ;;  %8499 = vmatprep.mubr.msk.f32.mxu0 %vm10150_vm0, %v10151_v6  ;;  %v659_v1 = vpop.f32.mrb[82].mxu0 }
 0x1a7   : > { %v960_v8 = vmul.f32 %v9806_v53, %v10751_v4  ;;  %9815 = vpow2.f32 %v7248_v47  ;;  %v660_v56 = vadd.f32 %v10515_v43, %v659_v1  ;;  %v8385_v11 = vpop.f32.mrb[83].mxu0 }
 0x1a8   : > { %9817 = vrcp.f32 %v834_v62 }
 0x1a9   : > { %v9808_v14 = vpop.eup %9807  ;;  %8500 = vmatmul.mubr.msk.f32.gmra.mrb[154].mxu0 %vm980_vm1, %v960_v8  ;;  %v7249_v23 = vmul.f32 -1.442695, %v660_v56 }
 0x1aa   : > { %v9810_v26 = vpop.eup %9809  ;;  %v835_v30 = vadd.f32 1.0, %v9808_v14  ;;  %8502 = vmatprep.mubr.msk.f32.mxu0 %vm10150_vm0, %v10151_v6  ;;  %v664_v35 = vpop.f32.mrb[84].mxu0 }
 0x1ab   : > { %v961_v41 = vmul.f32 %v9810_v26, %v10759_v17  ;;  %9819 = vpow2.f32 %v7249_v23  ;;  %v665_v4 = vadd.f32 %v10515_v43, %v664_v35  ;;  %v8388_v44 = vpop.f32.mrb[85].mxu0 }
 0x1ac   : > { %9821 = vrcp.f32 %v835_v30 }
 0x1ad   : > { %v9812_v47 = vpop.eup %9811  ;;  %8503 = vmatmul.mubr.msk.f32.gmra.mrb[156].mxu0 %vm980_vm1, %v961_v41  ;;  %v7250_v53 = vmul.f32 -1.442695, %v665_v4 }
 0x1ae   : > { %v9814_v62 = vpop.eup %9813  ;;  %v836_v1 = vadd.f32 1.0, %v9812_v47  ;;  %8505 = vmatprep.mubr.msk.f32.mxu0 %vm10150_vm0, %v10151_v6 }
 0x1af   : > { %v962_v8 = vmul.f32 %v9814_v62, %v10767_v38  ;;  %9823 = vpow2.f32 %v7250_v53 }
 0x1b0   : > { %9825 = vrcp.f32 %v836_v1 }
 0x1b1   : > { %v9816_v11 = vpop.eup %9815  ;;  %8506 = vmatmul.mubr.msk.f32.gmra.mrb[158].mxu0 %vm980_vm1, %v962_v8 }
 0x1b2   : > { %v9818_v17 = vpop.eup %9817  ;;  %v837_v43 = vadd.f32 1.0, %v9816_v11  ;;  %8508 = vmatprep.mubr.msk.f32.mxu0 %vm10150_vm0, %v10151_v6 }
 0x1b3   : > { %v963_v14 = vmul.f32 %v9818_v17, %v10775_v59 }
 0x1b4   : > { %9827 = vrcp.f32 %v837_v43 }
 0x1b5   : > { %v9820_v23 = vpop.eup %9819  ;;  %8509 = vmatmul.mubr.msk.f32.gmra.mrb[160].mxu0 %vm980_vm1, %v963_v14 }
 0x1b6   : > { %v9822_v26 = vpop.eup %9821  ;;  %8511 = vmatprep.mubr.msk.f32.mxu0 %vm10150_vm0, %v10151_v6  ;;  %v838_v38 = vadd.f32 1.0, %v9820_v23 }
 0x1b7   : > { %v964_v30 = vmul.f32 %v9822_v26, %v10783_v20 }
 0x1b8   : > { %9829 = vrcp.f32 %v838_v38 }
 0x1b9   : > { %v9824_v35 = vpop.eup %9823  ;;  %8512 = vmatmul.mubr.msk.f32.gmra.mrb[162].mxu0 %vm980_vm1, %v964_v30 }
 0x1ba   : > { %v9826_v41 = vpop.eup %9825  ;;  %8514 = vmatprep.mubr.msk.f32.mxu0 %vm10150_vm0, %v10151_v6  ;;  %v839_v59 = vadd.f32 1.0, %v9824_v35 }
 0x1bb   : > { %v965_v44 = vmul.f32 %v9826_v41, %v10791_v50 }
 0x1bc   : > { %9831 = vrcp.f32 %v839_v59 }
 0x1bd   : > { %8515 = vmatmul.mubr.msk.f32.gmra.mrb[164].mxu0 %vm980_vm1, %v965_v44 }
 0x1be   : > { %v9828_v47 = vpop.eup %9827  ;;  %8517 = vmatprep.mubr.msk.f32.mxu0 %vm10150_vm0, %v10151_v6 }
 0x1bf   : > { %v966_v53 = vmul.f32 %v9828_v47, %v655_v45  ;;  %v10838_v45 = vld [vmem:[%s14351_s4] ss:$0 sm:$0xff] }
 0x1c1   : > { %8518 = vmatmul.mubr.msk.f32.gmra.mrb[166].mxu0 %vm980_vm1, %v966_v53 }
 0x1c2   : > { %v9830_v20 = vpop.eup %9829  ;;  %8520 = vmatprep.mubr.msk.f32.mxu0 %vm10150_vm0, %v10151_v6 }
 0x1c3   : > { %v967_v62 = vmul.f32 %v9830_v20, %v660_v56 }
 0x1c5   : > { %8521 = vmatmul.mubr.msk.f32.gmra.mrb[168].mxu0 %vm980_vm1, %v967_v62 }
 0x1c6   : > { %v9832_v1 = vpop.eup %9831  ;;  %8523 = vmatprep.mubr.msk.f32.mxu0 %vm10150_vm0, %v10151_v6 }
 0x1c7   : > { %v968_v50 = vmul.f32 %v9832_v1, %v665_v4 }
 0x1c9   : > { %8524 = vmatmul.mubr.msk.f32.gmra.mrb[170].mxu0 %vm980_vm1, %v968_v50 }
 0x1f4   : > { %v1176_v8 = vpop.f32.mrb[86].mxu0 }
 0x1f5   : > { %v10841_v11 = vadd.f32 %v10838_v45, %v1176_v8  ;;  %v8399_v56 = vpop.f32.mrb[87].mxu0 }
 0x1f7   : > { %v1389_v17 = vsel %vm1388_vm2, %v10841_v11, -inf }
 0x1f8   : > { %1390 = vmax.xlane.f32.xlu0 %v1389_v17  ;;  %v1181_v43 = vpop.f32.mrb[88].mxu0 }
 0x1f9   : > { %v10846_v6 = vadd.f32 %v10838_v45, %v1181_v43  ;;  %v8402_v4 = vpop.f32.mrb[89].mxu0 }
 0x1fb   : > { %v1392_v14 = vsel %vm1388_vm2, %v10846_v6, -inf }
 0x1fc   : > { %1393 = vmax.xlane.f32.xlu0 %v1392_v14  ;;  %v1186_v23 = vpop.f32.mrb[90].mxu0 }
 0x1fd   : > { %v10851_v26 = vadd.f32 %v10838_v45, %v1186_v23  ;;  %v8405_v38 = vpop.f32.mrb[91].mxu0 }
 0x1ff   : > { %v1395_v30 = vsel %vm1388_vm2, %v10851_v26, -inf }
 0x200   : > { %1396 = vmax.xlane.f32.xlu1 %v1395_v30  ;;  %v1191_v35 = vpop.f32.mrb[92].mxu0 }
 0x201   : > { %v10856_v41 = vadd.f32 %v10838_v45, %v1191_v35  ;;  %v8408_v59 = vpop.f32.mrb[93].mxu0 }
 0x203   : > { %v1398_v44 = vsel %vm1388_vm2, %v10856_v41, -inf }
 0x204   : > { %1399 = vmax.xlane.f32.xlu1 %v1398_v44  ;;  %v1196_v47 = vpop.f32.mrb[94].mxu0 }
 0x205   : > { %v10861_v53 = vadd.f32 %v10838_v45, %v1196_v47  ;;  %v8411_v20 = vpop.f32.mrb[95].mxu0 }
 0x207   : > { %v1401_v62 = vsel %vm1388_vm2, %v10861_v53, -inf }
 0x208   : > { %1402 = vmax.xlane.f32.xlu0 %v1401_v62  ;;  %v1201_v1 = vpop.f32.mrb[96].mxu0 }
 0x209   : > { %v10866_v50 = vadd.f32 %v10838_v45, %v1201_v1  ;;  %v8414_v8 = vpop.f32.mrb[97].mxu0 }
 0x20b   : > { %v1404_v56 = vsel %vm1388_vm2, %v10866_v50, -inf }
 0x20c   : > { %1405 = vmax.xlane.f32.xlu1 %v1404_v56  ;;  %v1206_v17 = vpop.f32.mrb[98].mxu0 }
 0x20d   : > { %v10871_v43 = vadd.f32 %v10838_v45, %v1206_v17  ;;  %v8417_v4 = vpop.f32.mrb[99].mxu0 }
 0x20f   : > { %v1407_v14 = vsel %vm1388_vm2, %v10871_v43, -inf }
 0x210   : > { %1408 = vmax.xlane.f32.xlu0 %v1407_v14  ;;  %v1211_v23 = vpop.f32.mrb[100].mxu0 }
 0x211   : > { %v10876_v38 = vadd.f32 %v10838_v45, %v1211_v23  ;;  %v8420_v30 = vpop.f32.mrb[101].mxu0 }
 0x213   : > { %v1410_v35 = vsel %vm1388_vm2, %v10876_v38, -inf }
 0x214   : > { %1411 = vmax.xlane.f32.xlu1 %v1410_v35  ;;  %v1216_v59 = vpop.f32.mrb[102].mxu0 }
 0x215   : > { %v10881_v44 = vadd.f32 %v10838_v45, %v1216_v59  ;;  %v8423_v47 = vpop.f32.mrb[103].mxu0 }
 0x217   : > { %v1413_v20 = vsel %vm1388_vm2, %v10881_v44, -inf }
 0x218   : > { %1414 = vmax.xlane.f32.xlu0 %v1413_v20  ;;  %v1221_v62 = vpop.f32.mrb[104].mxu0 }
 0x219   : > { %v10886_v1 = vadd.f32 %v10838_v45, %v1221_v62  ;;  %v8426_v8 = vpop.f32.mrb[105].mxu0 }
 0x21b   : > { %v1416_v56 = vsel %vm1388_vm2, %v10886_v1, -inf }
 0x21c   : > { %1417 = vmax.xlane.f32.xlu1 %v1416_v56  ;;  %v1226_v17 = vpop.f32.mrb[106].mxu0 }
 0x21d   : > { %v10891_v4 = vadd.f32 %v10838_v45, %v1226_v17  ;;  %v8429_v14 = vpop.f32.mrb[107].mxu0 }
 0x21f   : > { %v1419_v23 = vsel %vm1388_vm2, %v10891_v4, -inf }
 0x220   : > { %1420 = vmax.xlane.f32.xlu0 %v1419_v23  ;;  %v1231_v30 = vpop.f32.mrb[108].mxu0 }
 0x221   : > { %v10896_v35 = vadd.f32 %v10838_v45, %v1231_v30  ;;  %v8432_v59 = vpop.f32.mrb[109].mxu0 }
 0x223   : > { %v1422_v47 = vsel %vm1388_vm2, %v10896_v35, -inf }
 0x224   : > { %1423 = vmax.xlane.f32.xlu1 %v1422_v47  ;;  %v1236_v20 = vpop.f32.mrb[110].mxu0 }
 0x225   : > { %v10901_v62 = vadd.f32 %v10838_v45, %v1236_v20  ;;  %v8435_v8 = vpop.f32.mrb[111].mxu0 }
 0x227   : > { %v1425_v56 = vsel %vm1388_vm2, %v10901_v62, -inf }
 0x228   : > { %1426 = vmax.xlane.f32.xlu0 %v1425_v56  ;;  %v1241_v17 = vpop.f32.mrb[112].mxu0 }
 0x229   : > { %v10906_v14 = vadd.f32 %v10838_v45, %v1241_v17  ;;  %v8438_v23 = vpop.f32.mrb[113].mxu0 }
 0x22b   : > { %v1428_v30 = vsel %vm1388_vm2, %v10906_v14, -inf }
 0x22c   : > { %1429 = vmax.xlane.f32.xlu1 %v1428_v30  ;;  %v1246_v59 = vpop.f32.mrb[114].mxu0 }
 0x22d   : > { %v10911_v47 = vadd.f32 %v10838_v45, %v1246_v59  ;;  %v8441_v20 = vpop.f32.mrb[115].mxu0 }
 0x22f   : > { %v1431_v8 = vsel %vm1388_vm2, %v10911_v47, -inf }
 0x230   : > { %1432 = vmax.xlane.f32.xlu0 %v1431_v8  ;;  %v1251_v28 = vpop.f32.mrb[116].mxu0 }
 0x231   : > { %v10916_v56 = vadd.f32 %v10838_v45, %v1251_v28  ;;  %v8444_v17 = vpop.f32.mrb[117].mxu0 }
 0x233   : > { %v1434_v23 = vsel %vm1388_vm2, %v10916_v56, -inf }
 0x234   : > { %1435 = vmax.xlane.f32.xlu1 %v1434_v23  ;;  %v1256_v32 = vpop.f32.mrb[118].mxu0 }
 0x235   : > { %v10921_v30 = vadd.f32 %v10838_v45, %v1256_v32  ;;  %v8447_v59 = vpop.f32.mrb[119].mxu0 }
 0x237   : > { %v1437_v20 = vsel %vm1388_vm2, %v10921_v30, -inf }
 0x238   : > { %1438 = vmax.xlane.f32.xlu0 %v1437_v20  ;;  %v1261_v27 = vpop.f32.mrb[120].mxu0 }
 0x239   : > { %v10926_v8 = vadd.f32 %v10838_v45, %v1261_v27  ;;  %v8450_v28 = vpop.f32.mrb[121].mxu0 }
 0x23b   : > { %v1440_v17 = vsel %vm1388_vm2, %v10926_v8, -inf }
 0x23c   : > { %1441 = vmax.xlane.f32.xlu1 %v1440_v17  ;;  %v1266_v25 = vpop.f32.mrb[122].mxu0 }
 0x23d   : > { %v10931_v23 = vadd.f32 %v10838_v45, %v1266_v25  ;;  %v8453_v32 = vpop.f32.mrb[123].mxu0 }
 0x23f   : > { %v1443_v59 = vsel %vm1388_vm2, %v10931_v23, -inf }
 0x240   : > { %1444 = vmax.xlane.f32.xlu0 %v1443_v59  ;;  %v1271_v24 = vpop.f32.mrb[124].mxu0 }
 0x241   : > { %v10936_v20 = vadd.f32 %v10838_v45, %v1271_v24  ;;  %v8456_v27 = vpop.f32.mrb[125].mxu0 }
 0x243   : > { %v1446_v28 = vsel %vm1388_vm2, %v10936_v20, -inf }
 0x244   : > { %1447 = vmax.xlane.f32.xlu1 %v1446_v28  ;;  %v1276_v22 = vpop.f32.mrb[126].mxu0 }
 0x245   : > { %v10941_v17 = vadd.f32 %v10838_v45, %v1276_v22  ;;  %v8459_v25 = vpop.f32.mrb[127].mxu0 }
 0x247   : > { %v1449_v32 = vsel %vm1388_vm2, %v10941_v17, -inf }
 0x248   : > { %1450 = vmax.xlane.f32.xlu0 %v1449_v32  ;;  %v1281_v21 = vpop.f32.mrb[128].mxu0 }
 0x249   : > { %v10946_v59 = vadd.f32 %v10838_v45, %v1281_v21  ;;  %v8462_v24 = vpop.f32.mrb[129].mxu0 }
 0x24b   : > { %v1452_v27 = vsel %vm1388_vm2, %v10946_v59, -inf }
 0x24c   : > { %1453 = vmax.xlane.f32.xlu1 %v1452_v27  ;;  %v1286_v19 = vpop.f32.mrb[130].mxu0 }
 0x24d   : > { %v10951_v28 = vadd.f32 %v10838_v45, %v1286_v19  ;;  %v8465_v22 = vpop.f32.mrb[131].mxu0 }
 0x24f   : > { %v1455_v25 = vsel %vm1388_vm2, %v10951_v28, -inf }
 0x250   : > { %1456 = vmax.xlane.f32.xlu0 %v1455_v25  ;;  %v1291_v18 = vpop.f32.mrb[132].mxu0 }
 0x251   : > { %v10956_v32 = vadd.f32 %v10838_v45, %v1291_v18  ;;  %v8468_v21 = vpop.f32.mrb[133].mxu0 }
 0x253   : > { %v1458_v24 = vsel %vm1388_vm2, %v10956_v32, -inf }
 0x254   : > { %1459 = vmax.xlane.f32.xlu1 %v1458_v24  ;;  %v1296_v16 = vpop.f32.mrb[134].mxu0 }
 0x255   : > { %v10961_v27 = vadd.f32 %v10838_v45, %v1296_v16  ;;  %v8471_v19 = vpop.f32.mrb[135].mxu0 }
 0x257   : > { %v1461_v22 = vsel %vm1388_vm2, %v10961_v27, -inf }
 0x258   : > { %1462 = vmax.xlane.f32.xlu0 %v1461_v22  ;;  %v1301_v15 = vpop.f32.mrb[136].mxu0 }
 0x259   : > { %v10966_v25 = vadd.f32 %v10838_v45, %v1301_v15  ;;  %v8474_v18 = vpop.f32.mrb[137].mxu0 }
 0x25b   : > { %v1464_v21 = vsel %vm1388_vm2, %v10966_v25, -inf }
 0x25c   : > { %1465 = vmax.xlane.f32.xlu1 %v1464_v21  ;;  %v1306_v13 = vpop.f32.mrb[138].mxu0 }
 0x25d   : > { %v10971_v24 = vadd.f32 %v10838_v45, %v1306_v13  ;;  %v8477_v16 = vpop.f32.mrb[139].mxu0 }
 0x25f   : > { %v1467_v19 = vsel %vm1388_vm2, %v10971_v24, -inf }
 0x260   : > { %1468 = vmax.xlane.f32.xlu0 %v1467_v19  ;;  %v1311_v34 = vpop.f32.mrb[140].mxu0 }
 0x261   : > { %v10976_v22 = vadd.f32 %v10838_v45, %v1311_v34  ;;  %v8480_v15 = vpop.f32.mrb[141].mxu0 }
 0x263   : > { %v1470_v18 = vsel %vm1388_vm2, %v10976_v22, -inf }
 0x264   : > { %1471 = vmax.xlane.f32.xlu1 %v1470_v18  ;;  %v1316_v12 = vpop.f32.mrb[142].mxu0 }
 0x265   : > { %v10981_v21 = vadd.f32 %v10838_v45, %v1316_v12  ;;  %v8483_v13 = vpop.f32.mrb[143].mxu0 }
 0x267   : > { %v1473_v16 = vsel %vm1388_vm2, %v10981_v21, -inf }
 0x268   : > { %1474 = vmax.xlane.f32.xlu0 %v1473_v16  ;;  %v1321_v10 = vpop.f32.mrb[144].mxu0 }
 0x269   : > { %v10986_v19 = vadd.f32 %v10838_v45, %v1321_v10  ;;  %v8486_v34 = vpop.f32.mrb[145].mxu0 }
 0x26b   : > { %v1476_v15 = vsel %vm1388_vm2, %v10986_v19, -inf }
 0x26c   : > { %1477 = vmax.xlane.f32.xlu1 %v1476_v15  ;;  %v1326_v9 = vpop.f32.mrb[146].mxu0 }
 0x26d   : > { %v10991_v18 = vadd.f32 %v10838_v45, %v1326_v9  ;;  %v8489_v12 = vpop.f32.mrb[147].mxu0 }
 0x26f   : > { %v1479_v13 = vsel %vm1388_vm2, %v10991_v18, -inf }
 0x270   : > { %1480 = vmax.xlane.f32.xlu0 %v1479_v13  ;;  %v1331_v7 = vpop.f32.mrb[148].mxu0 }
 0x271   : > { %v10996_v16 = vadd.f32 %v10838_v45, %v1331_v7  ;;  %v8492_v10 = vpop.f32.mrb[149].mxu0 }
 0x273   : > { %v1482_v34 = vsel %vm1388_vm2, %v10996_v16, -inf }
 0x274   : > { %1483 = vmax.xlane.f32.xlu1 %v1482_v34  ;;  %v1336_v5 = vpop.f32.mrb[150].mxu0 }
 0x275   : > { %v11001_v15 = vadd.f32 %v10838_v45, %v1336_v5  ;;  %v8495_v9 = vpop.f32.mrb[151].mxu0 }
 0x277   : > { %v1485_v12 = vsel %vm1388_vm2, %v11001_v15, -inf }
 0x278   : > { %1486 = vmax.xlane.f32.xlu0 %v1485_v12  ;;  %v1341_v3 = vpop.f32.mrb[152].mxu0 }
 0x279   : > { %v11006_v13 = vadd.f32 %v10838_v45, %v1341_v3  ;;  %v8498_v7 = vpop.f32.mrb[153].mxu0 }
 0x27b   : > { %v1488_v10 = vsel %vm1388_vm2, %v11006_v13, -inf }
 0x27c   : > { %1489 = vmax.xlane.f32.xlu1 %v1488_v10  ;;  %v1346_v2 = vpop.f32.mrb[154].mxu0 }
 0x27d   : > { %v11011_v34 = vadd.f32 %v10838_v45, %v1346_v2  ;;  %v8501_v5 = vpop.f32.mrb[155].mxu0 }
 0x27f   : > { %v1491_v9 = vsel %vm1388_vm2, %v11011_v34, -inf }
 0x280   : > { %1492 = vmax.xlane.f32.xlu0 %v1491_v9  ;;  %v1351_v0 = vpop.f32.mrb[156].mxu0 }
 0x281   : > { %v11016_v12 = vadd.f32 %v10838_v45, %v1351_v0  ;;  %v8504_v3 = vpop.f32.mrb[157].mxu0 }
 0x283   : > { %v1494_v7 = vsel %vm1388_vm2, %v11016_v12, -inf }
 0x284   : > { %1495 = vmax.xlane.f32.xlu1 %v1494_v7  ;;  %v1356_v63 = vpop.f32.mrb[158].mxu0 }
 0x285   : > { %v11021_v10 = vadd.f32 %v10838_v45, %v1356_v63  ;;  %v1391_v2 = vpop.xlane.xlu0 %1390  ;;  %v8507_v61 = vpop.f32.mrb[159].mxu0 }
 0x286   : > { %v1512_v5 = vsub.f32 %v10841_v11, %v1391_v2 }
 0x287   : > { %v1497_v9 = vsel %vm1388_vm2, %v11021_v10, -inf }
 0x288   : > { %v1553_v60 = vmul.f32 1.442695, %v1512_v5  ;;  %1498 = vmax.xlane.f32.xlu0 %v1497_v9  ;;  %v1361_v0 = vpop.f32.mrb[160].mxu0 }
 0x289   : > { %v11027_v3 = vadd.f32 %v10838_v45, %v1361_v0  ;;  %v1394_v58 = vpop.xlane.xlu0 %1393  ;;  %v8510_v57 = vpop.f32.mrb[161].mxu0 }
 0x28a   : > { %9833 = vpow2.f32 %v1553_v60  ;;  %v1513_v7 = vsub.f32 %v10846_v6, %v1394_v58 }
 0x28b   : > { %v1500_v63 = vsel %vm1388_vm2, %v11027_v3, -inf }
 0x28c   : > { %v1555_v61 = vmul.f32 1.442695, %v1513_v7  ;;  %1501 = vmax.xlane.f32.xlu1 %v1500_v63  ;;  %v1366_v11 = vpop.f32.mrb[162].mxu0 }
 0x28d   : > { %v11033_v2 = vadd.f32 %v10838_v45, %v1366_v11  ;;  %v1397_v5 = vpop.xlane.xlu1 %1396  ;;  %v8513_v9 = vpop.f32.mrb[163].mxu0 }
 0x28e   : > { %9835 = vpow2.f32 %v1555_v61  ;;  %v1514_v0 = vsub.f32 %v10851_v26, %v1397_v5 }
 0x28f   : > { %v1503_v57 = vsel %vm1388_vm2, %v11033_v2, -inf }
 0x290   : > { %v1557_v60 = vmul.f32 1.442695, %v1514_v0  ;;  %1504 = vmax.xlane.f32.xlu0 %v1503_v57  ;;  %v1371_v58 = vpop.f32.mrb[164].mxu0 }
 0x291   : > { %v11039_v6 = vadd.f32 %v10838_v45, %v1371_v58  ;;  %v1400_v7 = vpop.xlane.xlu1 %1399  ;;  %v8516_v63 = vpop.f32.mrb[165].mxu0 }
 0x292   : > { %9837 = vpow2.f32 %v1557_v60  ;;  %v1515_v11 = vsub.f32 %v10856_v41, %v1400_v7 }
 0x293   : > { %v1506_v9 = vsel %vm1388_vm2, %v11039_v6, -inf }
 0x294   : > { %v11044_v61 = vpop.eup %9833  ;;  %v1559_v26 = vmul.f32 1.442695, %v1515_v11  ;;  %1507 = vmax.xlane.f32.xlu1 %v1506_v9  ;;  %v1376_v5 = vpop.f32.mrb[166].mxu0 }
 0x295   : > { %v11047_v0 = vadd.f32 %v10838_v45, %v1376_v5  ;;  %v1403_v57 = vpop.xlane.xlu0 %1402  ;;  %v8519_v55 = vpop.f32.mrb[167].mxu0  ;;  %v1635_v60 = vsel %vm1388_vm2, %v11044_v61, 0.0 }
 0x296   : > { %9839 = vpow2.f32 %v1559_v26  ;;  %v1516_v58 = vsub.f32 %v10861_v53, %v1403_v57 }
 0x297   : > { %v1509_v41 = vsel %vm1388_vm2, %v11047_v0, -inf }
 0x298   : > { %v11054_v7 = vpop.eup %9835  ;;  %v1561_v63 = vmul.f32 1.442695, %v1516_v58  ;;  %1636 = vadd.xlane.f32.xlu1 %v1635_v60  ;;  %1510 = vmax.xlane.f32.xlu0 %v1509_v41  ;;  %v1381_v11 = vpop.f32.mrb[168].mxu0 }
 0x299   : > { %v1406_v9 = vpop.xlane.xlu1 %1405  ;;  %v8522_v45 = vpop.f32.mrb[169].mxu0  ;;  %v1638_v53 = vsel %vm1388_vm2, %v11054_v7, 0.0 }
 0x29a   : > { %9841 = vpow2.f32 %v1561_v63  ;;  %v1517_v55 = vsub.f32 %v10866_v50, %v1406_v9 }
 0x29c   : > { %v11059_v26 = vpop.eup %9837  ;;  %v1563_v5 = vmul.f32 1.442695, %v1517_v55  ;;  %1639 = vadd.xlane.f32.xlu0 %v1638_v53  ;;  %v1385_v57 = vpop.f32.mrb[170].mxu0 }
 0x29d   : > { %v1409_v54 = vpop.xlane.xlu0 %1408  ;;  %v1641_v58 = vsel %vm1388_vm2, %v11059_v26, 0.0  ;;  %v8525_v60 = vpop.f32.mrb[171].mxu0 }
 0x29e   : > { %9843 = vpow2.f32 %v1563_v5  ;;  %v1518_v41 = vsub.f32 %v10871_v43, %v1409_v54  ;;  %1642 = vadd.xlane.f32.xlu1 %v1641_v58 }
 0x2a0   : > { %v11064_v63 = vpop.eup %9839  ;;  %v1565_v50 = vmul.f32 1.442695, %v1518_v41 }
 0x2a1   : > { %v1412_v11 = vpop.xlane.xlu1 %1411  ;;  %v1644_v9 = vsel %vm1388_vm2, %v11064_v63, 0.0 }
 0x2a2   : > { %9845 = vpow2.f32 %v1565_v50  ;;  %v1519_v45 = vsub.f32 %v10876_v38, %v1412_v11  ;;  %1645 = vadd.xlane.f32.xlu0 %v1644_v9 }
 0x2a4   : > { %v11069_v55 = vpop.eup %9841  ;;  %v1567_v53 = vmul.f32 1.442695, %v1519_v45 }
 0x2a5   : > { %v1415_v57 = vpop.xlane.xlu0 %1414  ;;  %v1647_v5 = vsel %vm1388_vm2, %v11069_v55, 0.0 }
 0x2a6   : > { %9847 = vpow2.f32 %v1567_v53  ;;  %v1520_v54 = vsub.f32 %v10881_v44, %v1415_v57  ;;  %1648 = vadd.xlane.f32.xlu1 %v1647_v5 }
 0x2a8   : > { %v11074_v43 = vpop.eup %9843  ;;  %v1569_v58 = vmul.f32 1.442695, %v1520_v54 }
 0x2a9   : > { %v1418_v60 = vpop.xlane.xlu1 %1417  ;;  %v1650_v41 = vsel %vm1388_vm2, %v11074_v43, 0.0 }
 0x2aa   : > { %9849 = vpow2.f32 %v1569_v58  ;;  %v1521_v38 = vsub.f32 %v10886_v1, %v1418_v60  ;;  %1651 = vadd.xlane.f32.xlu0 %v1650_v41 }
 0x2ac   : > { %v11079_v50 = vpop.eup %9845  ;;  %v1571_v11 = vmul.f32 1.442695, %v1521_v38 }
 0x2ad   : > { %v1421_v9 = vpop.xlane.xlu0 %1420  ;;  %v1653_v45 = vsel %vm1388_vm2, %v11079_v50, 0.0 }
 0x2ae   : > { %9851 = vpow2.f32 %v1571_v11  ;;  %v1522_v44 = vsub.f32 %v10891_v4, %v1421_v9  ;;  %1654 = vadd.xlane.f32.xlu1 %v1653_v45 }
 0x2b0   : > { %v11084_v53 = vpop.eup %9847  ;;  %v1573_v57 = vmul.f32 1.442695, %v1522_v44 }
 0x2b1   : > { %v1424_v5 = vpop.xlane.xlu1 %1423  ;;  %v1656_v54 = vsel %vm1388_vm2, %v11084_v53, 0.0 }
 0x2b2   : > { %9853 = vpow2.f32 %v1573_v57  ;;  %v1523_v1 = vsub.f32 %v10896_v35, %v1424_v5  ;;  %1657 = vadd.xlane.f32.xlu0 %v1656_v54 }
 0x2b4   : > { %v11089_v58 = vpop.eup %9849  ;;  %v1575_v60 = vmul.f32 1.442695, %v1523_v1 }
 0x2b5   : > { %v1427_v41 = vpop.xlane.xlu0 %1426  ;;  %v1659_v38 = vsel %vm1388_vm2, %v11089_v58, 0.0 }
 0x2b6   : > { %9855 = vpow2.f32 %v1575_v60  ;;  %v1524_v4 = vsub.f32 %v10901_v62, %v1427_v41  ;;  %1660 = vadd.xlane.f32.xlu1 %v1659_v38  ;;  %v14411_v62 = vmov 1   ;;  %v14413_v60 = vmov 0  }
 0x2b7   : > { %9499 = vset.pattern.permute.xlu1 %v14411_v62  ;;  %9498 = vset.pattern.permute.xlu0 %v14413_v60 }
 0x2b8   : > { %v11094_v11 = vpop.eup %9851  ;;  %v1577_v9 = vmul.f32 1.442695, %v1524_v4 }
 0x2b9   : > { %v1430_v45 = vpop.xlane.xlu1 %1429  ;;  %v1662_v44 = vsel %vm1388_vm2, %v11094_v11, 0.0 }
 0x2ba   : > { %9857 = vpow2.f32 %v1577_v9  ;;  %v1525_v35 = vsub.f32 %v10906_v14, %v1430_v45  ;;  %1663 = vadd.xlane.f32.xlu0 %v1662_v44 }
 0x2bc   : > { %v11099_v57 = vpop.eup %9853  ;;  %v1579_v5 = vmul.f32 1.442695, %v1525_v35 }
 0x2bd   : > { %v1433_v54 = vpop.xlane.xlu0 %1432  ;;  %v1665_v1 = vsel %vm1388_vm2, %v11099_v57, 0.0 }
 0x2be   : > { %9859 = vpow2.f32 %v1579_v5  ;;  %v1526_v41 = vsub.f32 %v10911_v47, %v1433_v54  ;;  %1666 = vadd.xlane.f32.xlu1 %v1665_v1 }
 0x2c0   : > { %v11106_v38 = vpop.eup %9855  ;;  %v1581_v14 = vmul.f32 1.442695, %v1526_v41 }
 0x2c1   : > { %v1436_v4 = vpop.xlane.xlu1 %1435  ;;  %v1668_v9 = vsel %vm1388_vm2, %v11106_v38, 0.0 }
 0x2c2   : > { %9861 = vpow2.f32 %v1581_v14  ;;  %v1527_v45 = vsub.f32 %v10916_v56, %v1436_v4  ;;  %1669 = vadd.xlane.f32.xlu0 %v1668_v9 }
 0x2c4   : > { %v11111_v44 = vpop.eup %9857  ;;  %v1583_v35 = vmul.f32 1.442695, %v1527_v45 }
 0x2c5   : > { %v1439_v62 = vpop.xlane.xlu0 %1438  ;;  %v1671_v5 = vsel %vm1388_vm2, %v11111_v44, 0.0 }
 0x2c6   : > { %9863 = vpow2.f32 %v1583_v35  ;;  %v1528_v47 = vsub.f32 %v10921_v30, %v1439_v62  ;;  %1672 = vadd.xlane.f32.xlu1 %v1671_v5 }
 0x2c8   : > { %v11116_v54 = vpop.eup %9859  ;;  %v1585_v1 = vmul.f32 1.442695, %v1528_v47 }
 0x2c9   : > { %v1442_v41 = vpop.xlane.xlu1 %1441  ;;  %v1674_v14 = vsel %vm1388_vm2, %v11116_v54, 0.0 }
 0x2ca   : > { %9865 = vpow2.f32 %v1585_v1  ;;  %v1529_v56 = vsub.f32 %v10926_v8, %v1442_v41  ;;  %1675 = vadd.xlane.f32.xlu0 %v1674_v14 }
 0x2cc   : > { %v11121_v4 = vpop.eup %9861  ;;  %v1587_v9 = vmul.f32 1.442695, %v1529_v56 }
 0x2cd   : > { %v1445_v45 = vpop.xlane.xlu0 %1444  ;;  %v1677_v35 = vsel %vm1388_vm2, %v11121_v4, 0.0 }
 0x2ce   : > { %9867 = vpow2.f32 %v1587_v9  ;;  %v1530_v30 = vsub.f32 %v10931_v23, %v1445_v45  ;;  %1678 = vadd.xlane.f32.xlu1 %v1677_v35 }
 0x2d0   : > { %v11126_v62 = vpop.eup %9863  ;;  %v1589_v5 = vmul.f32 1.442695, %v1530_v30 }
 0x2d1   : > { %v1448_v47 = vpop.xlane.xlu1 %1447  ;;  %v1680_v1 = vsel %vm1388_vm2, %v11126_v62, 0.0 }
 0x2d2   : > { %9869 = vpow2.f32 %v1589_v5  ;;  %v1531_v8 = vsub.f32 %v10936_v20, %v1448_v47  ;;  %1681 = vadd.xlane.f32.xlu0 %v1680_v1 }
 0x2d4   : > { %v11131_v41 = vpop.eup %9865  ;;  %v1591_v14 = vmul.f32 1.442695, %v1531_v8 }
 0x2d5   : > { %v1451_v56 = vpop.xlane.xlu0 %1450  ;;  %v1683_v9 = vsel %vm1388_vm2, %v11131_v41, 0.0 }
 0x2d6   : > { %9871 = vpow2.f32 %v1591_v14  ;;  %v1532_v23 = vsub.f32 %v10941_v17, %v1451_v56  ;;  %1684 = vadd.xlane.f32.xlu1 %v1683_v9 }
 0x2d8   : > { %v11136_v45 = vpop.eup %9867  ;;  %v1593_v35 = vmul.f32 1.442695, %v1532_v23 }
 0x2d9   : > { %v1454_v30 = vpop.xlane.xlu1 %1453  ;;  %v1686_v5 = vsel %vm1388_vm2, %v11136_v45, 0.0 }
 0x2da   : > { %9873 = vpow2.f32 %v1593_v35  ;;  %v1533_v20 = vsub.f32 %v10946_v59, %v1454_v30  ;;  %1687 = vadd.xlane.f32.xlu0 %v1686_v5 }
 0x2dc   : > { %v11141_v47 = vpop.eup %9869  ;;  %v1595_v1 = vmul.f32 1.442695, %v1533_v20 }
 0x2dd   : > { %v1457_v8 = vpop.xlane.xlu0 %1456  ;;  %v1689_v14 = vsel %vm1388_vm2, %v11141_v47, 0.0 }
 0x2de   : > { %9875 = vpow2.f32 %v1595_v1  ;;  %v1534_v17 = vsub.f32 %v10951_v28, %v1457_v8  ;;  %1690 = vadd.xlane.f32.xlu1 %v1689_v14 }
 0x2e0   : > { %v11146_v56 = vpop.eup %9871  ;;  %v1597_v9 = vmul.f32 1.442695, %v1534_v17 }
 0x2e1   : > { %v1460_v23 = vpop.xlane.xlu1 %1459  ;;  %v1692_v35 = vsel %vm1388_vm2, %v11146_v56, 0.0 }
 0x2e2   : > { %9877 = vpow2.f32 %v1597_v9  ;;  %v1535_v59 = vsub.f32 %v10956_v32, %v1460_v23  ;;  %1693 = vadd.xlane.f32.xlu0 %v1692_v35 }
 0x2e4   : > { %v11151_v30 = vpop.eup %9873  ;;  %v1599_v5 = vmul.f32 1.442695, %v1535_v59 }
 0x2e5   : > { %v1463_v20 = vpop.xlane.xlu0 %1462  ;;  %v1695_v1 = vsel %vm1388_vm2, %v11151_v30, 0.0 }
 0x2e6   : > { %9879 = vpow2.f32 %v1599_v5  ;;  %v1536_v28 = vsub.f32 %v10961_v27, %v1463_v20  ;;  %1696 = vadd.xlane.f32.xlu1 %v1695_v1 }
 0x2e8   : > { %v11156_v8 = vpop.eup %9875  ;;  %v1601_v14 = vmul.f32 1.442695, %v1536_v28 }
 0x2e9   : > { %v1466_v17 = vpop.xlane.xlu1 %1465  ;;  %v1698_v9 = vsel %vm1388_vm2, %v11156_v8, 0.0 }
 0x2ea   : > { %9881 = vpow2.f32 %v1601_v14  ;;  %v1537_v32 = vsub.f32 %v10966_v25, %v1466_v17  ;;  %1699 = vadd.xlane.f32.xlu0 %v1698_v9 }
 0x2ec   : > { %v11161_v23 = vpop.eup %9877  ;;  %v1603_v35 = vmul.f32 1.442695, %v1537_v32 }
 0x2ed   : > { %v1469_v59 = vpop.xlane.xlu0 %1468  ;;  %v1701_v5 = vsel %vm1388_vm2, %v11161_v23, 0.0 }
 0x2ee   : > { %9883 = vpow2.f32 %v1603_v35  ;;  %v1538_v27 = vsub.f32 %v10971_v24, %v1469_v59  ;;  %1702 = vadd.xlane.f32.xlu1 %v1701_v5 }
 0x2f0   : > { %v11166_v20 = vpop.eup %9879  ;;  %v1605_v1 = vmul.f32 1.442695, %v1538_v27 }
 0x2f1   : > { %v1472_v28 = vpop.xlane.xlu1 %1471  ;;  %v1704_v14 = vsel %vm1388_vm2, %v11166_v20, 0.0 }
 0x2f2   : > { %9885 = vpow2.f32 %v1605_v1  ;;  %v1539_v25 = vsub.f32 %v10976_v22, %v1472_v28  ;;  %1705 = vadd.xlane.f32.xlu0 %v1704_v14 }
 0x2f4   : > { %v11171_v17 = vpop.eup %9881  ;;  %v1607_v9 = vmul.f32 1.442695, %v1539_v25 }
 0x2f5   : > { %v1475_v32 = vpop.xlane.xlu0 %1474  ;;  %v1707_v35 = vsel %vm1388_vm2, %v11171_v17, 0.0 }
 0x2f6   : > { %9887 = vpow2.f32 %v1607_v9  ;;  %v1540_v24 = vsub.f32 %v10981_v21, %v1475_v32  ;;  %1708 = vadd.xlane.f32.xlu1 %v1707_v35 }
 0x2f8   : > { %v11176_v59 = vpop.eup %9883  ;;  %v1609_v5 = vmul.f32 1.442695, %v1540_v24 }
 0x2f9   : > { %v1478_v27 = vpop.xlane.xlu1 %1477  ;;  %v1710_v1 = vsel %vm1388_vm2, %v11176_v59, 0.0 }
 0x2fa   : > { %9889 = vpow2.f32 %v1609_v5  ;;  %v1541_v22 = vsub.f32 %v10986_v19, %v1478_v27  ;;  %1711 = vadd.xlane.f32.xlu0 %v1710_v1 }
 0x2fc   : > { %v11181_v28 = vpop.eup %9885  ;;  %v1611_v14 = vmul.f32 1.442695, %v1541_v22 }
 0x2fd   : > { %v1481_v25 = vpop.xlane.xlu0 %1480  ;;  %v1713_v9 = vsel %vm1388_vm2, %v11181_v28, 0.0 }
 0x2fe   : > { %9891 = vpow2.f32 %v1611_v14  ;;  %v1542_v21 = vsub.f32 %v10991_v18, %v1481_v25  ;;  %1714 = vadd.xlane.f32.xlu1 %v1713_v9 }
 0x300   : > { %v11186_v32 = vpop.eup %9887  ;;  %v1613_v35 = vmul.f32 1.442695, %v1542_v21 }
 0x301   : > { %v1484_v24 = vpop.xlane.xlu1 %1483  ;;  %v1716_v5 = vsel %vm1388_vm2, %v11186_v32, 0.0 }
 0x302   : > { %9893 = vpow2.f32 %v1613_v35  ;;  %v1543_v19 = vsub.f32 %v10996_v16, %v1484_v24  ;;  %1717 = vadd.xlane.f32.xlu0 %v1716_v5 }
 0x304   : > { %v11191_v27 = vpop.eup %9889  ;;  %v1615_v1 = vmul.f32 1.442695, %v1543_v19 }
 0x305   : > { %v1487_v22 = vpop.xlane.xlu0 %1486  ;;  %v1719_v14 = vsel %vm1388_vm2, %v11191_v27, 0.0 }
 0x306   : > { %9895 = vpow2.f32 %v1615_v1  ;;  %v1544_v18 = vsub.f32 %v11001_v15, %v1487_v22  ;;  %1720 = vadd.xlane.f32.xlu1 %v1719_v14 }
 0x308   : > { %v11196_v25 = vpop.eup %9891  ;;  %v1617_v9 = vmul.f32 1.442695, %v1544_v18 }
 0x309   : > { %v1490_v21 = vpop.xlane.xlu1 %1489  ;;  %v1722_v35 = vsel %vm1388_vm2, %v11196_v25, 0.0 }
 0x30a   : > { %9897 = vpow2.f32 %v1617_v9  ;;  %v1545_v16 = vsub.f32 %v11006_v13, %v1490_v21  ;;  %1723 = vadd.xlane.f32.xlu0 %v1722_v35 }
 0x30c   : > { %v11201_v24 = vpop.eup %9893  ;;  %v1619_v5 = vmul.f32 1.442695, %v1545_v16 }
 0x30d   : > { %v1493_v19 = vpop.xlane.xlu0 %1492  ;;  %v1725_v1 = vsel %vm1388_vm2, %v11201_v24, 0.0 }
 0x30e   : > { %9899 = vpow2.f32 %v1619_v5  ;;  %v1546_v15 = vsub.f32 %v11011_v34, %v1493_v19  ;;  %1726 = vadd.xlane.f32.xlu1 %v1725_v1 }
 0x310   : > { %v11206_v22 = vpop.eup %9895  ;;  %v1621_v14 = vmul.f32 1.442695, %v1546_v15 }
 0x311   : > { %v1496_v18 = vpop.xlane.xlu1 %1495  ;;  %v1728_v9 = vsel %vm1388_vm2, %v11206_v22, 0.0 }
 0x312   : > { %9901 = vpow2.f32 %v1621_v14  ;;  %v1547_v13 = vsub.f32 %v11016_v12, %v1496_v18  ;;  %1729 = vadd.xlane.f32.xlu0 %v1728_v9 }
 0x314   : > { %v11211_v21 = vpop.eup %9897  ;;  %v1623_v35 = vmul.f32 1.442695, %v1547_v13 }
 0x315   : > { %v1499_v16 = vpop.xlane.xlu0 %1498  ;;  %v1731_v5 = vsel %vm1388_vm2, %v11211_v21, 0.0 }
 0x316   : > { %9903 = vpow2.f32 %v1623_v35  ;;  %v1548_v34 = vsub.f32 %v11021_v10, %v1499_v16  ;;  %1732 = vadd.xlane.f32.xlu1 %v1731_v5 }
 0x318   : > { %v11216_v19 = vpop.eup %9899  ;;  %v1625_v1 = vmul.f32 1.442695, %v1548_v34 }
 0x319   : > { %v1502_v15 = vpop.xlane.xlu1 %1501  ;;  %v1734_v14 = vsel %vm1388_vm2, %v11216_v19, 0.0 }
 0x31a   : > { %9905 = vpow2.f32 %v1625_v1  ;;  %v1549_v12 = vsub.f32 %v11027_v3, %v1502_v15  ;;  %1735 = vadd.xlane.f32.xlu0 %v1734_v14 }
 0x31c   : > { %v11221_v18 = vpop.eup %9901  ;;  %v1627_v9 = vmul.f32 1.442695, %v1549_v12 }
 0x31d   : > { %v1505_v13 = vpop.xlane.xlu0 %1504  ;;  %v1737_v35 = vsel %vm1388_vm2, %v11221_v18, 0.0 }
 0x31e   : > { %9907 = vpow2.f32 %v1627_v9  ;;  %v1550_v10 = vsub.f32 %v11033_v2, %v1505_v13  ;;  %1738 = vadd.xlane.f32.xlu1 %v1737_v35 }
 0x320   : > { %v11226_v16 = vpop.eup %9903  ;;  %v1629_v5 = vmul.f32 1.442695, %v1550_v10 }
 0x321   : > { %v1740_v34 = vsel %vm1388_vm2, %v11226_v16, 0.0  ;;  %v1508_v15 = vpop.xlane.xlu1 %1507 }
 0x322   : > { %9909 = vpow2.f32 %v1629_v5  ;;  %1741 = vadd.xlane.f32.xlu0 %v1740_v34 }
 0x324   : > { %v11230_v3 = vpop.eup %9905 }
 0x325   : > { %v1743_v1 = vsel %vm1388_vm2, %v11230_v3, 0.0  ;;  %v1637_v9 = vpop.xlane.xlu1 %1636  ;;  %v1511_v35 = vpop.xlane.xlu0 %1510 }
 0x326   : > { %1744 = vadd.xlane.f32.xlu1 %v1743_v1  ;;  %9911 = vrcp.f32 %v1637_v9  ;;  %v14416_v1 = vmov 2   ;;  %v1551_v9 = vsub.f32 %v11039_v6, %v1508_v15 }
 0x328   : > { %v11234_v14 = vpop.eup %9907 }
 0x329   : > { %14517 = vst [vmem:[#allocation30_spill] sm:$0xff] %v11234_v14  ;;  %v1746_v2 = vsel %vm1388_vm2, %v11234_v14, 0.0  ;;  %v1640_v5 = vpop.xlane.xlu0 %1639 }
 0x32a   : > { %1747 = vadd.xlane.f32.xlu0 %v1746_v2  ;;  %9913 = vrcp.f32 %v1640_v5  ;;  %v14418_v2 = vmov 3  }
 0x32c   : > { %v11238_v12 = vpop.eup %9909 }
 0x32d   : > { %14518 = vst [vmem:[#allocation31_spill] sm:$0xff] %v11238_v12  ;;  %v1749_v13 = vsel %vm1388_vm2, %v11238_v12, 0.0  ;;  %v1631_v12 = vmul.f32 1.442695, %v1551_v9 }
 0x32e   : > { %1750 = vadd.xlane.f32.xlu1 %v1749_v13 }
 0x32f   : > { %9915 = vpow2.f32 %v1631_v12  ;;  %v1646_v12 = vpop.xlane.xlu0 %1645 }
 0x330   : > { %v9912_v10 = vpop.eup %9911 }
 0x331   : > { %v1799_v34 = vmul.f32 %v9912_v10, %v11044_v61  ;;  %v14519_v61 = vmov 0   ;;  %v14520_v10 = vmov 1  }
 0x334   : > { %v9914_v60 = vpop.eup %9913 }
 0x335   : > { %v1800_v13 = vmul.f32 %v9914_v60, %v11054_v7  ;;  %v1552_v7 = vsub.f32 %v11047_v0, %v1511_v35  ;;  %v1643_v60 = vpop.xlane.xlu1 %1642 }
 0x336   : > { %9917 = vrcp.f32 %v1643_v60  ;;  %v14523_v60 = vmov 3  }
 0x337   : > { %v1633_v15 = vmul.f32 1.442695, %v1552_v7 }
 0x339   : > { %v11251_v5 = vpop.eup %9915  ;;  %9919 = vpow2.f32 %v1633_v15 }
 0x33a   : > { %14521 = vst [vmem:[#allocation32_spill] sm:$0xff] %v11251_v5  ;;  %v1752_v6 = vsel %vm1388_vm2, %v11251_v5, 0.0  ;;  %9921 = vrcp.f32 %v1646_v12 }
 0x33f   : > { %2087 = vperm.xlu1 %9499, %v1799_v34  }
 0x340   : > { %1842 = vperm.xlu0 %9498, %v1799_v34   ;;  %v9918_v9 = vpop.eup %9917 }
 0x341   : > { %v1801_v14 = vmul.f32 %v9918_v9, %v11059_v26 }
 0x343   : > { %9500 = vset.pattern.permute.xlu1 %v14416_v1 }
 0x344   : > { %2497 = vperm.xlu1 %9500, %v1799_v34   ;;  %9505 = vset.pattern.permute.xlu0 %v14418_v2 }
 0x348   : > { %9501 = vset.pattern.permute.xlu1 %v14418_v2  ;;  %v11257_v2 = vpop.eup %9919 }
 0x349   : > { %2907 = vperm.xlu1 %9501, %v1799_v34   ;;  %v1649_v34 = vpop.xlane.xlu1 %1648  ;;  %14522 = vst [vmem:[#allocation33_spill] sm:$0xff] %v11257_v2  ;;  %v1755_v0 = vsel %vm1388_vm2, %v11257_v2, 0.0 }
 0x34a   : > { %9923 = vrcp.f32 %v1649_v34 }
 0x34d   : > { %9502 = vset.pattern.permute.xlu1 %v14519_v61  ;;  %v1655_v35 = vpop.xlane.xlu1 %1654 }
 0x34e   : > { %1847 = vperm.xlu1 %9502, %v1800_v13  }
 0x351   : > { %v1661_v12 = vpop.xlane.xlu1 %1660 }
 0x352   : > { %9503 = vset.pattern.permute.xlu1 %v14520_v10 }
 0x353   : > { %2091 = vperm.xlu1 %9503, %v1800_v13  }
 0x357   : > { %9504 = vset.pattern.permute.xlu1 %v14416_v1  ;;  %v1652_v1 = vpop.xlane.xlu0 %1651 }
 0x358   : > { %2501 = vperm.xlu1 %9504, %v1800_v13   ;;  %9925 = vrcp.f32 %v1652_v1 }
 0x359   : > { %9927 = vrcp.f32 %v1655_v35 }
 0x35b   : > { %v1658_v15 = vpop.xlane.xlu0 %1657 }
 0x35c   : > { %9506 = vset.pattern.permute.xlu1 %v14519_v61  ;;  %9929 = vrcp.f32 %v1658_v15 }
 0x35d   : > { %9931 = vrcp.f32 %v1661_v12 }
 0x35f   : > { %1753 = vadd.xlane.f32.xlu0 %v1752_v6  ;;  %v9922_v6 = vpop.eup %9921 }
 0x360   : > { %v1802_v7 = vmul.f32 %v9922_v6, %v11064_v63  ;;  %v1664_v6 = vpop.xlane.xlu0 %1663 }
 0x361   : > { %9933 = vrcp.f32 %v1664_v6 }
 0x375   : > { %2911 = vperm.xlu0 %9505, %v1800_v13   ;;  %v9924_v13 = vpop.eup %9923 }
 0x376   : > { %v11266_v26 = vmul.f32 %v9924_v13, %v11069_v55  ;;  %v9926_v1 = vpop.eup %9925 }
 0x377   : > { %v11271_v34 = vmul.f32 %v9926_v1, %v11074_v43  ;;  %v9928_v63 = vpop.eup %9927 }
 0x378   : > { %v11276_v9 = vmul.f32 %v9928_v63, %v11079_v50  ;;  %v9930_v55 = vpop.eup %9929  ;;  %v1667_v50 = vpop.xlane.xlu1 %1666 }
 0x379   : > { %9507 = vset.pattern.permute.xlu0 %v14520_v10  ;;  %v11282_v43 = vmul.f32 %v9930_v55, %v11084_v53  ;;  %v9932_v35 = vpop.eup %9931  ;;  %9935 = vrcp.f32 %v1667_v50  ;;  %v1670_v53 = vpop.xlane.xlu0 %1669 }
 0x37a   : > { %2095 = vperm.xlu0 %9507, %v1801_v14   ;;  %v11288_v13 = vmul.f32 %v9932_v35, %v11089_v58  ;;  %v9934_v15 = vpop.eup %9933  ;;  %9937 = vrcp.f32 %v1670_v53 }
 0x37b   : > { %v11297_v58 = vmul.f32 %v9934_v15, %v11094_v11 }
 0x37c   : > { %1756 = vadd.xlane.f32.xlu1 %v1755_v0  ;;  %v14524_v0 = vmov 2   ;;  %v1673_v1 = vpop.xlane.xlu1 %1672 }
 0x37d   : > { %9939 = vrcp.f32 %v1673_v1  ;;  %v1676_v12 = vpop.xlane.xlu0 %1675 }
 0x37e   : > { %9513 = vset.pattern.permute.xlu0 %v14523_v60  ;;  %9941 = vrcp.f32 %v1676_v12 }
 0x37f   : > { %2919 = vperm.xlu0 %9513, %v1802_v7  }
 0x380   : > { %v1679_v11 = vpop.xlane.xlu1 %1678 }
 0x381   : > { %9943 = vrcp.f32 %v1679_v11 }
 0x383   : > { %9515 = vset.pattern.permute.xlu0 %v14520_v10 }
 0x384   : > { %2103 = vperm.xlu0 %9515, %v11266_v26   ;;  %v1685_v50 = vpop.xlane.xlu1 %1684 }
 0x388   : > { %9520 = vset.pattern.permute.xlu0 %v14523_v60  ;;  %v1691_v1 = vpop.xlane.xlu1 %1690 }
 0x389   : > { %2927 = vperm.xlu0 %9520, %v11271_v34  }
 0x38d   : > { %1852 = vperm.xlu1 %9506, %v1801_v14   ;;  %9522 = vset.pattern.permute.xlu0 %v14520_v10 }
 0x38e   : > { %2111 = vperm.xlu0 %9522, %v11276_v9  }
 0x391   : > { %9508 = vset.pattern.permute.xlu1 %v14524_v0 }
 0x392   : > { %2505 = vperm.xlu1 %9508, %v1801_v14   ;;  %9528 = vset.pattern.permute.xlu0 %v14523_v60 }
 0x393   : > { %2935 = vperm.xlu0 %9528, %v11282_v43  }
 0x396   : > { %9509 = vset.pattern.permute.xlu1 %v14523_v60 }
 0x397   : > { %2915 = vperm.xlu1 %9509, %v1801_v14   ;;  %9530 = vset.pattern.permute.xlu0 %v14520_v10  ;;  %v9936_v14 = vpop.eup %9935 }
 0x398   : > { %2119 = vperm.xlu0 %9530, %v11288_v13   ;;  %v11303_v63 = vmul.f32 %v9936_v14, %v11099_v57  ;;  %v9938_v55 = vpop.eup %9937  ;;  %v1682_v57 = vpop.xlane.xlu0 %1681 }
 0x399   : > { %v11309_v6 = vmul.f32 %v9938_v55, %v11106_v38  ;;  %v9940_v35 = vpop.eup %9939  ;;  %9945 = vrcp.f32 %v1682_v57 }
 0x39a   : > { %v9942_v38 = vpop.eup %9941  ;;  %9947 = vrcp.f32 %v1685_v50 }
 0x39b   : > { %9510 = vset.pattern.permute.xlu1 %v14519_v61  ;;  %v11323_v53 = vmul.f32 %v9942_v38, %v11116_v54 }
 0x39c   : > { %1857 = vperm.xlu1 %9510, %v1802_v7   ;;  %9533 = vset.pattern.permute.xlu0 %v14519_v61  ;;  %v1688_v15 = vpop.xlane.xlu0 %1687 }
 0x39d   : > { %1882 = vperm.xlu0 %9533, %v11288_v13   ;;  %9949 = vrcp.f32 %v1688_v15 }
 0x39e   : > { %9951 = vrcp.f32 %v1691_v1 }
 0x3a0   : > { %9511 = vset.pattern.permute.xlu1 %v14520_v10  ;;  %v1694_v11 = vpop.xlane.xlu0 %1693 }
 0x3a1   : > { %2099 = vperm.xlu1 %9511, %v1802_v7   ;;  %9536 = vset.pattern.permute.xlu0 %v14523_v60  ;;  %9953 = vrcp.f32 %v1694_v11 }
 0x3a2   : > { %2943 = vperm.xlu0 %9536, %v11297_v58  }
 0x3a4   : > { %v1700_v38 = vpop.xlane.xlu0 %1699 }
 0x3a5   : > { %9512 = vset.pattern.permute.xlu1 %v14524_v0 }
 0x3a6   : > { %2509 = vperm.xlu1 %9512, %v1802_v7   ;;  %9538 = vset.pattern.permute.xlu0 %v14520_v10  ;;  %v11316_v7 = vmul.f32 %v9940_v35, %v11111_v44  ;;  %v9944_v44 = vpop.eup %9943 }
 0x3a7   : > { %2127 = vperm.xlu0 %9538, %v11303_v63   ;;  %v11330_v14 = vmul.f32 %v9944_v44, %v11121_v4  ;;  %v9946_v54 = vpop.eup %9945 }
 0x3a8   : > { %v11337_v12 = vmul.f32 %v9946_v54, %v11126_v62  ;;  %v9948_v4 = vpop.eup %9947 }
 0x3a9   : > { %v11344_v35 = vmul.f32 %v9948_v4, %v11131_v41  ;;  %v9950_v62 = vpop.eup %9949 }
 0x3aa   : > { %9514 = vset.pattern.permute.xlu1 %v14519_v61  ;;  %v11351_v50 = vmul.f32 %v9950_v62, %v11136_v45  ;;  %v9952_v41 = vpop.eup %9951 }
 0x3ab   : > { %1862 = vperm.xlu1 %9514, %v11266_v26   ;;  %9544 = vset.pattern.permute.xlu0 %v14523_v60  ;;  %v11360_v1 = vmul.f32 %v9952_v41, %v11141_v47  ;;  %v9954_v45 = vpop.eup %9953 }
 0x3ac   : > { %2951 = vperm.xlu0 %9544, %v11309_v6   ;;  %v11369_v4 = vmul.f32 %v9954_v45, %v11146_v56 }
 0x3af   : > { %9516 = vset.pattern.permute.xlu1 %v14524_v0 }
 0x3b0   : > { %2513 = vperm.xlu1 %9516, %v11266_v26   ;;  %9546 = vset.pattern.permute.xlu0 %v14520_v10 }
 0x3b1   : > { %2135 = vperm.xlu0 %9546, %v11316_v7  }
 0x3b4   : > { %9517 = vset.pattern.permute.xlu1 %v14523_v60 }
 0x3b5   : > { %2923 = vperm.xlu1 %9517, %v11266_v26   ;;  %9552 = vset.pattern.permute.xlu0 %v14523_v60  ;;  %v1697_v26 = vpop.xlane.xlu1 %1696 }
 0x3b6   : > { %2959 = vperm.xlu0 %9552, %v11323_v53   ;;  %9955 = vrcp.f32 %v1697_v26 }
 0x3b7   : > { %9957 = vrcp.f32 %v1700_v38 }
 0x3b9   : > { %9518 = vset.pattern.permute.xlu1 %v14520_v10  ;;  %v1703_v55 = vpop.xlane.xlu1 %1702 }
 0x3ba   : > { %2107 = vperm.xlu1 %9518, %v11271_v34   ;;  %9554 = vset.pattern.permute.xlu0 %v14520_v10  ;;  %9959 = vrcp.f32 %v1703_v55 }
 0x3bb   : > { %2143 = vperm.xlu0 %9554, %v11330_v14  }
 0x3bd   : > { %v1709_v57 = vpop.xlane.xlu1 %1708 }
 0x3be   : > { %9519 = vset.pattern.permute.xlu1 %v14524_v0 }
 0x3bf   : > { %2517 = vperm.xlu1 %9519, %v11271_v34   ;;  %9560 = vset.pattern.permute.xlu0 %v14523_v60 }
 0x3c0   : > { %2967 = vperm.xlu0 %9560, %v11337_v12   ;;  %v9956_v47 = vpop.eup %9955 }
 0x3c1   : > { %v1715_v44 = vpop.xlane.xlu1 %1714  ;;  %v11378_v38 = vmul.f32 %v9956_v47, %v11151_v30  ;;  %v9958_v56 = vpop.eup %9957 }
 0x3c2   : > { %v11389_v45 = vmul.f32 %v9958_v56, %v11156_v8 }
 0x3c3   : > { %9521 = vset.pattern.permute.xlu1 %v14519_v61 }
 0x3c4   : > { %1867 = vperm.xlu1 %9521, %v11271_v34   ;;  %9562 = vset.pattern.permute.xlu0 %v14520_v10  ;;  %v1706_v34 = vpop.xlane.xlu0 %1705  ;;  %v9960_v47 = vpop.eup %9959 }
 0x3c5   : > { %2151 = vperm.xlu0 %9562, %v11344_v35   ;;  %v11356_v15 = vpop.xlane.xlu1 %1720  ;;  %9961 = vrcp.f32 %v1706_v34  ;;  %v11402_v2 = vmul.f32 %v9960_v47, %v11161_v23 }
 0x3c6   : > { %9963 = vrcp.f32 %v1709_v57 }
 0x3c8   : > { %9523 = vset.pattern.permute.xlu1 %v14524_v0  ;;  %v1712_v54 = vpop.xlane.xlu0 %1711 }
 0x3c9   : > { %2521 = vperm.xlu1 %9523, %v11276_v9   ;;  %9568 = vset.pattern.permute.xlu0 %v14523_v60  ;;  %v11365_v26 = vpop.xlane.xlu1 %1726  ;;  %9965 = vrcp.f32 %v1712_v54 }
 0x3ca   : > { %2975 = vperm.xlu0 %9568, %v11351_v50   ;;  %9967 = vrcp.f32 %v1715_v44 }
 0x3cc   : > { %v1718_v11 = vpop.xlane.xlu0 %1717 }
 0x3cd   : > { %9524 = vset.pattern.permute.xlu1 %v14523_v60  ;;  %v11374_v62 = vpop.xlane.xlu1 %1732  ;;  %9969 = vrcp.f32 %v1718_v11 }
 0x3ce   : > { %2931 = vperm.xlu1 %9524, %v11276_v9   ;;  %9570 = vset.pattern.permute.xlu0 %v14520_v10  ;;  %9971 = vrcp.f32 %v11356_v15 }
 0x3cf   : > { %2159 = vperm.xlu0 %9570, %v11360_v1   ;;  %v9962_v8 = vpop.eup %9961 }
 0x3d0   : > { %v1724_v41 = vpop.xlane.xlu0 %1723  ;;  %v11411_v56 = vmul.f32 %v9962_v8, %v11166_v20  ;;  %v9964_v23 = vpop.eup %9963 }
 0x3d1   : > { %v11422_v54 = vmul.f32 %v9964_v23, %v11171_v17  ;;  %9973 = vrcp.f32 %v1724_v41 }
 0x3d2   : > { %9525 = vset.pattern.permute.xlu1 %v14519_v61  ;;  %9975 = vrcp.f32 %v11365_v26 }
 0x3d3   : > { %1872 = vperm.xlu1 %9525, %v11276_v9   ;;  %9576 = vset.pattern.permute.xlu0 %v14523_v60  ;;  %v11382_v9 = vpop.xlane.xlu1 %1738  ;;  %v9966_v20 = vpop.eup %9965 }
 0x3d4   : > { %2983 = vperm.xlu0 %9576, %v11369_v4   ;;  %v11385_v55 = vpop.xlane.xlu0 %1729  ;;  %v9968_v17 = vpop.eup %9967 }
 0x3d5   : > { %v11447_v23 = vmul.f32 %v9968_v17, %v11181_v28  ;;  %9977 = vrcp.f32 %v11385_v55 }
 0x3d6   : > { %9979 = vrcp.f32 %v11374_v62 }
 0x3d7   : > { %9526 = vset.pattern.permute.xlu1 %v14520_v10  ;;  %v11391_v30 = vpop.xlane.xlu1 %1744 }
 0x3d8   : > { %2115 = vperm.xlu1 %9526, %v11282_v43   ;;  %9578 = vset.pattern.permute.xlu0 %v14520_v10  ;;  %v11396_v34 = vpop.xlane.xlu0 %1735 }
 0x3d9   : > { %2167 = vperm.xlu0 %9578, %v11378_v38   ;;  %9981 = vrcp.f32 %v11396_v34 }
 0x3da   : > { %9983 = vrcp.f32 %v11382_v9 }
 0x3db   : > { %v11398_v5 = vpop.xlane.xlu1 %1750 }
 0x3dc   : > { %9527 = vset.pattern.permute.xlu1 %v14524_v0  ;;  %14525 = vst [vmem:[#allocation34_spill] sm:$0xff] %v11398_v5  ;;  %v11407_v57 = vpop.xlane.xlu0 %1741 }
 0x3dd   : > { %2525 = vperm.xlu1 %9527, %v11282_v43   ;;  %9584 = vset.pattern.permute.xlu0 %v14523_v60  ;;  %9985 = vrcp.f32 %v11407_v57 }
 0x3de   : > { %2991 = vperm.xlu0 %9584, %v11389_v45   ;;  %9987 = vrcp.f32 %v11391_v30 }
 0x3df   : > { %v11413_v5 = vpop.permute.xlu1 %2087 }
 0x3e1   : > { %9529 = vset.pattern.permute.xlu1 %v14519_v61 }
 0x3e2   : > { %1877 = vperm.xlu1 %9529, %v11282_v43   ;;  %9586 = vset.pattern.permute.xlu0 %v14520_v10  ;;  %v11417_v43 = vpop.xlane.xlu0 %1747 }
 0x3e3   : > { %2175 = vperm.xlu0 %9586, %v11402_v2   ;;  %14526 = vst [vmem:[#allocation35_spill] sm:$0xff] %v11417_v43  ;;  %v11428_v8 = vpop.permute.xlu1 %2497  ;;  %v11435_v43 = vmul.f32 %v9966_v20, %v11176_v59  ;;  %v9970_v59 = vpop.eup %9969 }
 0x3e4   : > { %v9972_v28 = vpop.eup %9971 }
 0x3e6   : > { %9531 = vset.pattern.permute.xlu1 %v14524_v0  ;;  %v11424_v47 = vpop.permute.xlu0 %1842 }
 0x3e7   : > { %2529 = vperm.xlu1 %9531, %v11288_v13   ;;  %9592 = vset.pattern.permute.xlu0 %v14523_v60  ;;  %14527 = vst [vmem:[#allocation36_spill] sm:$0xff] %v11424_v47 }
 0x3e8   : > { %2999 = vperm.xlu0 %9592, %v11411_v56  }
 0x3eb   : > { %9532 = vset.pattern.permute.xlu1 %v14523_v60 }
 0x3ec   : > { %2939 = vperm.xlu1 %9532, %v11288_v13   ;;  %9594 = vset.pattern.permute.xlu0 %v14520_v10  ;;  %v11431_v44 = vpop.xlane.xlu0 %1753  ;;  %v11441_v13 = vpop.permute.xlu1 %2907 }
 0x3ed   : > { %2183 = vperm.xlu0 %9594, %v11422_v54   ;;  %14528 = vst [vmem:[#allocation37_spill] sm:$0xff] %v11431_v44  ;;  %v11458_v44 = vmul.f32 %v9970_v59, %v11186_v32  ;;  %v9974_v32 = vpop.eup %9973 }
 0x3ee   : > { %v11480_v26 = vmul.f32 %v9974_v32, %v11196_v25 }
 0x3f0   : > { %9534 = vset.pattern.permute.xlu1 %v14520_v10  ;;  %v11452_v15 = vpop.permute.xlu1 %1847 }
 0x3f1   : > { %2123 = vperm.xlu1 %9534, %v11297_v58   ;;  %9600 = vset.pattern.permute.xlu0 %v14523_v60  ;;  %14529 = vst [vmem:[#allocation38_spill] sm:$0xff] %v11452_v15  ;;  %v11470_v15 = vmul.f32 %v9972_v28, %v11191_v27  ;;  %v9976_v27 = vpop.eup %9975 }
 0x3f2   : > { %3007 = vperm.xlu0 %9600, %v11435_v43   ;;  %v11492_v47 = vmul.f32 %v9976_v27, %v11201_v24  ;;  %v9978_v25 = vpop.eup %9977 }
 0x3f3   : > { %v9980_v24 = vpop.eup %9979 }
 0x3f4   : > { %v11443_v11 = vpop.permute.xlu0 %2911  ;;  %v11466_v17 = vpop.permute.xlu1 %2091 }
 0x3f5   : > { %9535 = vset.pattern.permute.xlu1 %v14524_v0 }
 0x3f6   : > { %2533 = vperm.xlu1 %9535, %v11297_v58   ;;  %9602 = vset.pattern.permute.xlu0 %v14520_v10 }
 0x3f7   : > { %2191 = vperm.xlu0 %9602, %v11447_v23  }
 0x3f8   : > { %v2502_v59 = vpop.permute.xlu1 %2501 }
 0x3f9   : > { %v11454_v20 = vpop.permute.xlu0 %2095 }
 0x3fa   : > { %9537 = vset.pattern.permute.xlu1 %v14519_v61 }
 0x3fb   : > { %1887 = vperm.xlu1 %9537, %v11297_v58   ;;  %9608 = vset.pattern.permute.xlu0 %v14523_v60 }
 0x3fc   : > { %3015 = vperm.xlu0 %9608, %v11458_v44  }
 0x3fe   : > { %v11464_v41 = vpop.permute.xlu0 %2919 }
 0x3ff   : > { %9539 = vset.pattern.permute.xlu1 %v14524_v0 }
 0x400   : > { %2537 = vperm.xlu1 %9539, %v11303_v63   ;;  %9610 = vset.pattern.permute.xlu0 %v14520_v10 }
 0x401   : > { %2199 = vperm.xlu0 %9610, %v11470_v15  }
 0x403   : > { %v11476_v58 = vpop.permute.xlu0 %2103 }
 0x404   : > { %9540 = vset.pattern.permute.xlu1 %v14523_v60 }
 0x405   : > { %2947 = vperm.xlu1 %9540, %v11303_v63   ;;  %9616 = vset.pattern.permute.xlu0 %v14523_v60 }
 0x406   : > { %3023 = vperm.xlu0 %9616, %v11480_v26  }
 0x408   : > { %v11486_v55 = vpop.permute.xlu0 %2927 }
 0x409   : > { %14530 = vst [vmem:[#allocation39_spill] sm:$0xff] %v11486_v55  ;;  %v11488_v28 = vpop.xlane.xlu1 %1756  ;;  %9541 = vset.pattern.permute.xlu1 %v14519_v61 }
 0x40a   : > { %14531 = vst [vmem:[#allocation40_spill] sm:$0xff] %v11488_v28  ;;  %1892 = vperm.xlu1 %9541, %v11303_v63   ;;  %9618 = vset.pattern.permute.xlu0 %v14520_v10  ;;  %v11503_v28 = vmul.f32 %v9978_v25, %v11206_v22  ;;  %v2250_v25 = vmul.f32 %v10276_v29, %v11413_v5 }
 0x40b   : > { %2207 = vperm.xlu0 %9618, %v11492_v47  }
 0x40d   : > { %v11497_v32 = vpop.permute.xlu1 %1852  ;;  %v11499_v62 = vpop.permute.xlu0 %2111 }
 0x40e   : > { %14532 = vst [vmem:[#allocation41_spill] sm:$0xff] %v11497_v32  ;;  %9542 = vset.pattern.permute.xlu1 %v14520_v10  ;;  %v11513_v32 = vmul.f32 %v9980_v24, %v11211_v21  ;;  %v3070_v21 = vmul.f32 %v10276_v29, %v11441_v13  ;;  %v9982_v24 = vpop.eup %9981 }
 0x40f   : > { %2131 = vperm.xlu1 %9542, %v11309_v6   ;;  %9624 = vset.pattern.permute.xlu0 %v14523_v60 }
 0x410   : > { %3031 = vperm.xlu0 %9624, %v11503_v28  }
 0x411   : > { %v2506_v63 = vpop.permute.xlu1 %2505 }
 0x412   : > { %v11509_v27 = vpop.permute.xlu0 %2935  ;;  %v2662_v57 = vmul.f32 %v10285_v33, %v2506_v63  ;;  %v2254_v63 = vmul.f32 %v10296_v36, %v11476_v58 }
 0x413   : > { %9543 = vset.pattern.permute.xlu1 %v14524_v0 }
 0x414   : > { %2541 = vperm.xlu1 %9543, %v11309_v6   ;;  %9626 = vset.pattern.permute.xlu0 %v14520_v10 }
 0x415   : > { %2215 = vperm.xlu0 %9626, %v11513_v32  }
 0x416   : > { %v11518_v22 = vpop.permute.xlu1 %2915 }
 0x417   : > { %v11522_v55 = vpop.permute.xlu0 %2119 }
 0x418   : > { %9545 = vset.pattern.permute.xlu1 %v14519_v61 }
 0x419   : > { %1897 = vperm.xlu1 %9545, %v11309_v6   ;;  %2332 = vrot.lane.b32.xlu0 %v2250_v25, %s10156_s9  ;;  %v11539_v6 = vmul.f32 %v9982_v24, %v11216_v19  ;;  %v2661_v25 = vmul.f32 %v10279_v31, %v2502_v59 }
 0x41a   : > { %9632 = vset.pattern.permute.xlu0 %v14523_v60 }
 0x41b   : > { %v11531_v34 = vpop.permute.xlu1 %1857 }
 0x41c   : > { %14533 = vst [vmem:[#allocation42_spill] sm:$0xff] %v11531_v34  ;;  %v11533_v5 = vpop.permute.xlu0 %1882 }
 0x41d   : > { %14534 = vst [vmem:[#allocation43_spill] sm:$0xff] %v11533_v5  ;;  %9547 = vset.pattern.permute.xlu1 %v14524_v0  ;;  %3152 = vrot.lane.b32.xlu0 %v3070_v21, %s10157_s10  ;;  %v9984_v5 = vpop.eup %9983 }
 0x41e   : > { %2545 = vperm.xlu1 %9547, %v11316_v7   ;;  %v11557_v21 = vmul.f32 %v9984_v5, %v11221_v18 }
 0x420   : > { %v11541_v9 = vpop.permute.xlu1 %2099 }
 0x421   : > { %3039 = vperm.xlu0 %9632, %v11539_v6   ;;  %v11544_v13 = vpop.permute.xlu0 %2943 }
 0x422   : > { %14535 = vst [vmem:[#allocation44_spill] sm:$0xff] %v11544_v13  ;;  %9548 = vset.pattern.permute.xlu1 %v14523_v60 }
 0x423   : > { %2955 = vperm.xlu1 %9548, %v11316_v7  }
 0x425   : > { %v11549_v34 = vpop.permute.xlu1 %2509  ;;  %2744 = vrot.lane.b32.xlu0 %v2661_v25, %s10158_s11 }
 0x426   : > { %v11552_v19 = vpop.permute.xlu0 %2127  ;;  %9634 = vset.pattern.permute.xlu0 %v14520_v10 }
 0x427   : > { %9549 = vset.pattern.permute.xlu1 %v14519_v61 }
 0x428   : > { %1902 = vperm.xlu1 %9549, %v11316_v7   ;;  %v2252_v7 = vmul.f32 %v10285_v33, %v11454_v20 }
 0x429   : > { %2223 = vperm.xlu0 %9634, %v11557_v21  }
 0x42a   : > { %v11561_v59 = vpop.permute.xlu1 %1862 }
 0x42b   : > { %14536 = vst [vmem:[#allocation45_spill] sm:$0xff] %v11561_v59  ;;  %v11564_v24 = vpop.permute.xlu0 %2951  ;;  %v9986_v59 = vpop.eup %9985 }
 0x42c   : > { %14537 = vst [vmem:[#allocation46_spill] sm:$0xff] %v11564_v24  ;;  %9550 = vset.pattern.permute.xlu1 %v14520_v10  ;;  %v11587_v20 = vmul.f32 %v9986_v59, %v11226_v16 }
 0x42d   : > { %2139 = vperm.xlu1 %9550, %v11323_v53   ;;  %9636 = vset.pattern.permute.xlu0 %v14523_v60 }
 0x42e   : > { %3043 = vperm.xlu0 %9636, %v11557_v21  }
 0x42f   : > { %v2514_v18 = vpop.permute.xlu1 %2513 }
 0x430   : > { %v11572_v5 = vpop.permute.xlu0 %2135  ;;  %v2664_v16 = vmul.f32 %v10296_v36, %v2514_v18 }
 0x431   : > { %9551 = vset.pattern.permute.xlu1 %v14524_v0 }
 0x432   : > { %2549 = vperm.xlu1 %9551, %v11323_v53   ;;  %2336 = vrot.lane.b32.xlu0 %v2252_v7, %s10156_s9 }
 0x433   : > { %9638 = vset.pattern.permute.xlu0 %v14520_v10 }
 0x434   : > { %v11579_v25 = vpop.permute.xlu1 %2923 }
 0x435   : > { %v11581_v24 = vpop.permute.xlu0 %2959 }
 0x436   : > { %14538 = vst [vmem:[#allocation47_spill] sm:$0xff] %v11581_v24  ;;  %9553 = vset.pattern.permute.xlu1 %v14519_v61  ;;  %2746 = vrot.lane.b32.xlu0 %v2662_v57, %s10158_s11 }
 0x437   : > { %1907 = vperm.xlu1 %9553, %v11323_v53  }
 0x439   : > { %v2108_v13 = vpop.permute.xlu1 %2107 }
 0x43a   : > { %2227 = vperm.xlu0 %9638, %v11587_v20   ;;  %v11590_v7 = vpop.permute.xlu0 %2143  ;;  %v2255_v58 = vmul.f32 %v10301_v37, %v2108_v13  ;;  %v2256_v13 = vmul.f32 %v10307_v39, %v11499_v62 }
 0x43b   : > { %9555 = vset.pattern.permute.xlu1 %v14524_v0 }
 0x43c   : > { %2553 = vperm.xlu1 %9555, %v11330_v14  }
 0x43e   : > { %v2518_v24 = vpop.permute.xlu1 %2517  ;;  %2340 = vrot.lane.b32.xlu0 %v2254_v63, %s10156_s9 }
 0x43f   : > { %v11597_v57 = vpop.permute.xlu0 %2967  ;;  %9643 = vset.pattern.permute.xlu0 %v14524_v0  ;;  %v2665_v18 = vmul.f32 %v10301_v37, %v2518_v24 }
 0x440   : > { %14539 = vst [vmem:[#allocation48_spill] sm:$0xff] %v11597_v57  ;;  %9556 = vset.pattern.permute.xlu1 %v14523_v60 }
 0x441   : > { %2963 = vperm.xlu1 %9556, %v11330_v14  }
 0x442   : > { %2750 = vrot.lane.b32.xlu0 %v2664_v16, %s10158_s11 }
 0x443   : > { %v11604_v53 = vpop.permute.xlu1 %1867 }
 0x444   : > { %14540 = vst [vmem:[#allocation49_spill] sm:$0xff] %v11604_v53  ;;  %v11607_v59 = vpop.permute.xlu0 %2151 }
 0x445   : > { %9557 = vset.pattern.permute.xlu1 %v14519_v61 }
 0x446   : > { %1912 = vperm.xlu1 %9557, %v11330_v14   ;;  %2342 = vrot.lane.b32.xlu0 %v2255_v58, %s10156_s9 }
 0x448   : > { %v2522_v63 = vpop.permute.xlu1 %2521 }
 0x449   : > { %v11613_v57 = vpop.permute.xlu0 %2975  ;;  %v2666_v24 = vmul.f32 %v10307_v39, %v2522_v63 }
 0x44a   : > { %14541 = vst [vmem:[#allocation50_spill] sm:$0xff] %v11613_v57  ;;  %9558 = vset.pattern.permute.xlu1 %v14520_v10  ;;  %2752 = vrot.lane.b32.xlu0 %v2665_v18, %s10158_s11 }
 0x44b   : > { %2147 = vperm.xlu1 %9558, %v11337_v12  }
 0x44d   : > { %v11620_v16 = vpop.permute.xlu1 %2931 }
 0x44e   : > { %2344 = vrot.lane.b32.xlu0 %v2256_v13, %s10156_s9  ;;  %v11623_v14 = vpop.permute.xlu0 %2159 }
 0x44f   : > { %9559 = vset.pattern.permute.xlu1 %v14524_v0 }
 0x450   : > { %2557 = vperm.xlu1 %9559, %v11337_v12  }
 0x452   : > { %v11628_v58 = vpop.permute.xlu1 %1872  ;;  %2754 = vrot.lane.b32.xlu0 %v2666_v24, %s10158_s11 }
 0x453   : > { %14542 = vst [vmem:[#allocation51_spill] sm:$0xff] %v11628_v58  ;;  %v11631_v18 = vpop.permute.xlu0 %2983 }
 0x454   : > { %14543 = vst [vmem:[#allocation52_spill] sm:$0xff] %v11631_v18  ;;  %9561 = vset.pattern.permute.xlu1 %v14519_v61 }
 0x455   : > { %1917 = vperm.xlu1 %9561, %v11337_v12   ;;  %v2258_v12 = vmul.f32 %v10318_v42, %v11522_v55 }
 0x457   : > { %v2116_v62 = vpop.permute.xlu1 %2115 }
 0x458   : > { %v2257_v13 = vmul.f32 %v10312_v40, %v2116_v62  ;;  %v11636_v53 = vpop.permute.xlu0 %2167 }
 0x459   : > { %9563 = vset.pattern.permute.xlu1 %v14524_v0 }
 0x45a   : > { %2561 = vperm.xlu1 %9563, %v11344_v35   ;;  %2346 = vrot.lane.b32.xlu0 %v2257_v13, %s10156_s9 }
 0x45c   : > { %v2526_v63 = vpop.permute.xlu1 %2525 }
 0x45d   : > { %v2667_v24 = vmul.f32 %v10312_v40, %v2526_v63  ;;  %v11642_v58 = vpop.permute.xlu0 %2991 }
 0x45e   : > { %14544 = vst [vmem:[#allocation53_spill] sm:$0xff] %v11642_v58  ;;  %9564 = vset.pattern.permute.xlu1 %v14523_v60 }
 0x45f   : > { %2971 = vperm.xlu1 %9564, %v11344_v35   ;;  %2756 = vrot.lane.b32.xlu0 %v2667_v24, %s10158_s11 }
 0x461   : > { %v11649_v62 = vpop.permute.xlu1 %1877 }
 0x462   : > { %14545 = vst [vmem:[#allocation54_spill] sm:$0xff] %v11649_v62  ;;  %v11651_v18 = vpop.permute.xlu0 %2175 }
 0x463   : > { %9565 = vset.pattern.permute.xlu1 %v14519_v61  ;;  %2348 = vrot.lane.b32.xlu0 %v2258_v12, %s10156_s9 }
 0x464   : > { %1922 = vperm.xlu1 %9565, %v11344_v35  }
 0x466   : > { %v2530_v13 = vpop.permute.xlu1 %2529 }
 0x467   : > { %v2668_v63 = vmul.f32 %v10318_v42, %v2530_v13  ;;  %v11657_v58 = vpop.permute.xlu0 %2999 }
 0x468   : > { %14546 = vst [vmem:[#allocation55_spill] sm:$0xff] %v11657_v58  ;;  %9566 = vset.pattern.permute.xlu1 %v14520_v10 }
 0x469   : > { %2155 = vperm.xlu1 %9566, %v11351_v50   ;;  %2758 = vrot.lane.b32.xlu0 %v2668_v63, %s10158_s11 }
 0x46b   : > { %v11662_v55 = vpop.permute.xlu1 %2939 }
 0x46c   : > { %v11664_v24 = vpop.permute.xlu0 %2183 }
 0x46d   : > { %9567 = vset.pattern.permute.xlu1 %v14524_v0 }
 0x46e   : > { %2565 = vperm.xlu1 %9567, %v11351_v50  }
 0x470   : > { %v2124_v35 = vpop.permute.xlu1 %2123 }
 0x471   : > { %v2259_v12 = vmul.f32 %v10329_v46, %v2124_v35  ;;  %v11669_v13 = vpop.permute.xlu0 %3007  ;;  %v2260_v35 = vmul.f32 %v10335_v48, %v11552_v19 }
 0x472   : > { %14547 = vst [vmem:[#allocation56_spill] sm:$0xff] %v11669_v13  ;;  %9569 = vset.pattern.permute.xlu1 %v14519_v61 }
 0x473   : > { %1927 = vperm.xlu1 %9569, %v11351_v50   ;;  %2350 = vrot.lane.b32.xlu0 %v2259_v12, %s10156_s9 }
 0x475   : > { %v2534_v63 = vpop.permute.xlu1 %2533 }
 0x476   : > { %v2669_v62 = vmul.f32 %v10329_v46, %v2534_v63  ;;  %v11675_v58 = vpop.permute.xlu0 %2191 }
 0x477   : > { %9571 = vset.pattern.permute.xlu1 %v14524_v0 }
 0x478   : > { %2569 = vperm.xlu1 %9571, %v11360_v1   ;;  %2760 = vrot.lane.b32.xlu0 %v2669_v62, %s10158_s11 }
 0x47a   : > { %v11682_v13 = vpop.permute.xlu1 %1887 }
 0x47b   : > { %14548 = vst [vmem:[#allocation57_spill] sm:$0xff] %v11682_v13  ;;  %v11684_v57 = vpop.permute.xlu0 %3015 }
 0x47c   : > { %14549 = vst [vmem:[#allocation58_spill] sm:$0xff] %v11684_v57  ;;  %9572 = vset.pattern.permute.xlu1 %v14523_v60  ;;  %2352 = vrot.lane.b32.xlu0 %v2260_v35, %s10156_s9 }
 0x47d   : > { %2979 = vperm.xlu1 %9572, %v11360_v1  }
 0x47f   : > { %v2538_v50 = vpop.permute.xlu1 %2537 }
 0x480   : > { %v2670_v12 = vmul.f32 %v10335_v48, %v2538_v50  ;;  %v11690_v63 = vpop.permute.xlu0 %2199 }
 0x481   : > { %9573 = vset.pattern.permute.xlu1 %v14519_v61 }
 0x482   : > { %1932 = vperm.xlu1 %9573, %v11360_v1   ;;  %2762 = vrot.lane.b32.xlu0 %v2670_v12, %s10158_s11 }
 0x484   : > { %v11695_v19 = vpop.permute.xlu1 %2947 }
 0x485   : > { %v11697_v62 = vpop.permute.xlu0 %3023 }
 0x486   : > { %14550 = vst [vmem:[#allocation59_spill] sm:$0xff] %v11697_v62  ;;  %9574 = vset.pattern.permute.xlu1 %v14520_v10 }
 0x487   : > { %2163 = vperm.xlu1 %9574, %v11369_v4  }
 0x489   : > { %v11701_v35 = vpop.permute.xlu1 %1892 }
 0x48a   : > { %14551 = vst [vmem:[#allocation60_spill] sm:$0xff] %v11701_v35  ;;  %v11703_v13 = vpop.permute.xlu0 %2207 }
 0x48b   : > { %9575 = vset.pattern.permute.xlu1 %v14524_v0 }
 0x48c   : > { %2573 = vperm.xlu1 %9575, %v11369_v4  }
 0x48e   : > { %v2132_v50 = vpop.permute.xlu1 %2131 }
 0x48f   : > { %v2261_v1 = vmul.f32 %v10340_v49, %v2132_v50  ;;  %v11708_v12 = vpop.permute.xlu0 %3031  ;;  %v2262_v50 = vmul.f32 %v10346_v51, %v11572_v5 }
 0x490   : > { %14552 = vst [vmem:[#allocation61_spill] sm:$0xff] %v11708_v12  ;;  %9577 = vset.pattern.permute.xlu1 %v14519_v61 }
 0x491   : > { %1937 = vperm.xlu1 %9577, %v11369_v4   ;;  %2354 = vrot.lane.b32.xlu0 %v2261_v1, %s10156_s9 }
 0x493   : > { %v2542_v62 = vpop.permute.xlu1 %2541 }
 0x494   : > { %v2671_v35 = vmul.f32 %v10340_v49, %v2542_v62  ;;  %v11714_v57 = vpop.permute.xlu0 %2215 }
 0x495   : > { %9579 = vset.pattern.permute.xlu1 %v14524_v0 }
 0x496   : > { %2577 = vperm.xlu1 %9579, %v11378_v38   ;;  %2764 = vrot.lane.b32.xlu0 %v2671_v35, %s10158_s11 }
 0x498   : > { %v11721_v12 = vpop.permute.xlu1 %1897  ;;  %v11725_v4 = vpop.permute.xlu0 %2332 }
 0x499   : > { %14553 = vst [vmem:[#allocation62_spill] sm:$0xff] %v11721_v12  ;;  %14554 = vst [vmem:[#allocation63_spill] sm:$0xff] %v11725_v4 }
 0x49a   : > { %9580 = vset.pattern.permute.xlu1 %v14523_v60  ;;  %2356 = vrot.lane.b32.xlu0 %v2262_v50, %s10156_s9 }
 0x49b   : > { %2987 = vperm.xlu1 %9580, %v11378_v38  }
 0x49c   : > { %v11732_v5 = vpop.permute.xlu0 %3152 }
 0x49d   : > { %v2546_v62 = vpop.permute.xlu1 %2545  ;;  %14555 = vst [vmem:[#allocation64_spill] sm:$0xff] %v11732_v5 }
 0x49e   : > { %v2672_v1 = vmul.f32 %v10346_v51, %v2546_v62 }
 0x49f   : > { %9581 = vset.pattern.permute.xlu1 %v14519_v61 }
 0x4a0   : > { %1942 = vperm.xlu1 %9581, %v11378_v38   ;;  %2766 = vrot.lane.b32.xlu0 %v2672_v1, %s10158_s11  ;;  %v11738_v50 = vpop.permute.xlu0 %3039 }
 0x4a1   : > { %14556 = vst [vmem:[#allocation65_spill] sm:$0xff] %v11738_v50 }
 0x4a2   : > { %v11734_v35 = vpop.permute.xlu1 %2955 }
 0x4a4   : > { %9582 = vset.pattern.permute.xlu1 %v14520_v10  ;;  %v11744_v38 = vpop.permute.xlu0 %2744 }
 0x4a5   : > { %2171 = vperm.xlu1 %9582, %v11389_v45   ;;  %14558 = vst [vmem:[#allocation67_spill] sm:$0xff] %v11744_v38 }
 0x4a7   : > { %v11740_v12 = vpop.permute.xlu1 %1902 }
 0x4a8   : > { %14557 = vst [vmem:[#allocation66_spill] sm:$0xff] %v11740_v12  ;;  %v11751_v4 = vpop.permute.xlu0 %2223  ;;  %v14560_v12 = vld [vmem:[#allocation3_spill] sm:$0xff] }
 0x4a9   : > { %9583 = vset.pattern.permute.xlu1 %v14524_v0  ;;  %14559 = vst [vmem:[#allocation68_spill] sm:$0xff] %v11751_v4 }
 0x4aa   : > { %2581 = vperm.xlu1 %9583, %v11389_v45  }
 0x4ac   : > { %v2140_v62 = vpop.permute.xlu1 %2139 }
 0x4ad   : > { %v2263_v1 = vmul.f32 %v10351_v52, %v2140_v62  ;;  %v2264_v62 = vmul.f32 %v14560_v12, %v11590_v7 }
 0x4ae   : > { %9585 = vset.pattern.permute.xlu1 %v14519_v61 }
 0x4af   : > { %1947 = vperm.xlu1 %9585, %v11389_v45   ;;  %2358 = vrot.lane.b32.xlu0 %v2263_v1, %s10156_s9  ;;  %v11762_v45 = vpop.permute.xlu0 %3043 }
 0x4b0   : > { %14562 = vst [vmem:[#allocation69_spill] sm:$0xff] %v11762_v45 }
 0x4b1   : > { %v2550_v5 = vpop.permute.xlu1 %2549 }
 0x4b2   : > { %v2673_v50 = vmul.f32 %v10351_v52, %v2550_v5 }
 0x4b3   : > { %9587 = vset.pattern.permute.xlu1 %v14524_v0  ;;  %v11769_v7 = vpop.permute.xlu0 %2336 }
 0x4b4   : > { %2585 = vperm.xlu1 %9587, %v11402_v2   ;;  %2768 = vrot.lane.b32.xlu0 %v2673_v50, %s10158_s11  ;;  %14563 = vst [vmem:[#allocation70_spill] sm:$0xff] %v11769_v7 }
 0x4b6   : > { %v11758_v38 = vpop.permute.xlu1 %1907 }
 0x4b7   : > { %14561 = vst [vmem:[#allocation3_spill] sm:$0xff] %v11758_v38 }
 0x4b8   : > { %9588 = vset.pattern.permute.xlu1 %v14523_v60  ;;  %2360 = vrot.lane.b32.xlu0 %v2264_v62, %s10156_s9  ;;  %v11775_v62 = vpop.permute.xlu0 %2746 }
 0x4b9   : > { %2995 = vperm.xlu1 %9588, %v11402_v2   ;;  %14564 = vst [vmem:[#allocation71_spill] sm:$0xff] %v11775_v62 }
 0x4bb   : > { %v2554_v5 = vpop.permute.xlu1 %2553 }
 0x4bc   : > { %v2674_v1 = vmul.f32 %v14560_v12, %v2554_v5 }
 0x4bd   : > { %9589 = vset.pattern.permute.xlu1 %v14519_v61 }
 0x4be   : > { %1952 = vperm.xlu1 %9589, %v11402_v2   ;;  %2770 = vrot.lane.b32.xlu0 %v2674_v1, %s10158_s11  ;;  %v11781_v2 = vpop.permute.xlu0 %2227  ;;  %v14567_v1 = vld [vmem:[#allocation4_spill] sm:$0xff] }
 0x4bf   : > { %14566 = vst [vmem:[#allocation73_spill] sm:$0xff] %v11781_v2 }
 0x4c0   : > { %v11771_v50 = vpop.permute.xlu1 %2963 }
 0x4c2   : > { %9590 = vset.pattern.permute.xlu1 %v14520_v10  ;;  %v11788_v4 = vpop.permute.xlu0 %2340 }
 0x4c3   : > { %2179 = vperm.xlu1 %9590, %v11411_v56   ;;  %14568 = vst [vmem:[#allocation4_spill] sm:$0xff] %v11788_v4 }
 0x4c5   : > { %v11777_v38 = vpop.permute.xlu1 %1912 }
 0x4c6   : > { %14565 = vst [vmem:[#allocation72_spill] sm:$0xff] %v11777_v38  ;;  %v14569_v38 = vld [vmem:[#allocation5_spill] sm:$0xff] }
 0x4c7   : > { %9591 = vset.pattern.permute.xlu1 %v14524_v0 }
 0x4c8   : > { %2589 = vperm.xlu1 %9591, %v11411_v56  }
 0x4ca   : > { %v2148_v5 = vpop.permute.xlu1 %2147 }
 0x4cb   : > { %v2265_v45 = vmul.f32 %v14567_v1, %v2148_v5  ;;  %v2266_v5 = vmul.f32 %v14569_v38, %v11607_v59 }
 0x4cc   : > { %9593 = vset.pattern.permute.xlu1 %v14519_v61 }
 0x4cd   : > { %1957 = vperm.xlu1 %9593, %v11411_v56   ;;  %2362 = vrot.lane.b32.xlu0 %v2265_v45, %s10156_s9  ;;  %v11799_v56 = vpop.permute.xlu0 %2750 }
 0x4ce   : > { %14571 = vst [vmem:[#allocation75_spill] sm:$0xff] %v11799_v56 }
 0x4cf   : > { %v2558_v7 = vpop.permute.xlu1 %2557 }
 0x4d0   : > { %v2675_v62 = vmul.f32 %v14567_v1, %v2558_v7 }
 0x4d1   : > { %9595 = vset.pattern.permute.xlu1 %v14524_v0  ;;  %v11806_v59 = vpop.permute.xlu0 %2342 }
 0x4d2   : > { %2593 = vperm.xlu1 %9595, %v11422_v54   ;;  %2772 = vrot.lane.b32.xlu0 %v2675_v62, %s10158_s11  ;;  %14572 = vst [vmem:[#allocation76_spill] sm:$0xff] %v11806_v59 }
 0x4d4   : > { %v11795_v2 = vpop.permute.xlu1 %1917 }
 0x4d5   : > { %14570 = vst [vmem:[#allocation74_spill] sm:$0xff] %v11795_v2 }
 0x4d6   : > { %9596 = vset.pattern.permute.xlu1 %v14523_v60  ;;  %2364 = vrot.lane.b32.xlu0 %v2266_v5, %s10156_s9  ;;  %v11812_v5 = vpop.permute.xlu0 %2752 }
 0x4d7   : > { %3003 = vperm.xlu1 %9596, %v11422_v54   ;;  %14574 = vst [vmem:[#allocation78_spill] sm:$0xff] %v11812_v5 }
 0x4d9   : > { %v2562_v45 = vpop.permute.xlu1 %2561 }
 0x4da   : > { %v2676_v7 = vmul.f32 %v14569_v38, %v2562_v45 }
 0x4db   : > { %9597 = vset.pattern.permute.xlu1 %v14519_v61 }
 0x4dc   : > { %1962 = vperm.xlu1 %9597, %v11422_v54   ;;  %2774 = vrot.lane.b32.xlu0 %v2676_v7, %s10158_s11  ;;  %v11818_v54 = vpop.permute.xlu0 %2344  ;;  %v14577_v7 = vld [vmem:[#allocation6_spill] sm:$0xff] }
 0x4dd   : > { %14576 = vst [vmem:[#allocation80_spill] sm:$0xff] %v11818_v54 }
 0x4de   : > { %v11808_v62 = vpop.permute.xlu1 %2971 }
 0x4df   : > { %14573 = vst [vmem:[#allocation77_spill] sm:$0xff] %v11808_v62 }
 0x4e0   : > { %9598 = vset.pattern.permute.xlu1 %v14520_v10  ;;  %v11825_v4 = vpop.permute.xlu0 %2754 }
 0x4e1   : > { %2187 = vperm.xlu1 %9598, %v11435_v43   ;;  %14578 = vst [vmem:[#allocation81_spill] sm:$0xff] %v11825_v4 }
 0x4e3   : > { %v11814_v2 = vpop.permute.xlu1 %1922 }
 0x4e4   : > { %14575 = vst [vmem:[#allocation79_spill] sm:$0xff] %v11814_v2  ;;  %v14579_v2 = vld [vmem:[#allocation7_spill] sm:$0xff] }
 0x4e5   : > { %9599 = vset.pattern.permute.xlu1 %v14524_v0 }
 0x4e6   : > { %2597 = vperm.xlu1 %9599, %v11435_v43  }
 0x4e8   : > { %v2156_v45 = vpop.permute.xlu1 %2155 }
 0x4e9   : > { %v2267_v56 = vmul.f32 %v14577_v7, %v2156_v45  ;;  %v2268_v45 = vmul.f32 %v14579_v2, %v11623_v14 }
 0x4ea   : > { %9601 = vset.pattern.permute.xlu1 %v14519_v61 }
 0x4eb   : > { %1967 = vperm.xlu1 %9601, %v11435_v43   ;;  %2366 = vrot.lane.b32.xlu0 %v2267_v56, %s10156_s9  ;;  %v11836_v43 = vpop.permute.xlu0 %2346 }
 0x4ec   : > { %14581 = vst [vmem:[#allocation82_spill] sm:$0xff] %v11836_v43 }
 0x4ed   : > { %v2566_v59 = vpop.permute.xlu1 %2565 }
 0x4ee   : > { %v2677_v5 = vmul.f32 %v14577_v7, %v2566_v59 }
 0x4ef   : > { %9603 = vset.pattern.permute.xlu1 %v14524_v0  ;;  %v11843_v14 = vpop.permute.xlu0 %2756 }
 0x4f0   : > { %2601 = vperm.xlu1 %9603, %v11447_v23   ;;  %2776 = vrot.lane.b32.xlu0 %v2677_v5, %s10158_s11  ;;  %14582 = vst [vmem:[#allocation83_spill] sm:$0xff] %v11843_v14 }
 0x4f2   : > { %v11832_v54 = vpop.permute.xlu1 %1927 }
 0x4f3   : > { %14580 = vst [vmem:[#allocation7_spill] sm:$0xff] %v11832_v54 }
 0x4f4   : > { %9604 = vset.pattern.permute.xlu1 %v14523_v60  ;;  %2368 = vrot.lane.b32.xlu0 %v2268_v45, %s10156_s9  ;;  %v11849_v45 = vpop.permute.xlu0 %2348 }
 0x4f5   : > { %3011 = vperm.xlu1 %9604, %v11447_v23   ;;  %14584 = vst [vmem:[#allocation85_spill] sm:$0xff] %v11849_v45 }
 0x4f7   : > { %v2570_v56 = vpop.permute.xlu1 %2569 }
 0x4f8   : > { %v2678_v59 = vmul.f32 %v14579_v2, %v2570_v56 }
 0x4f9   : > { %9605 = vset.pattern.permute.xlu1 %v14519_v61 }
 0x4fa   : > { %1972 = vperm.xlu1 %9605, %v11447_v23   ;;  %2778 = vrot.lane.b32.xlu0 %v2678_v59, %s10158_s11  ;;  %v11855_v23 = vpop.permute.xlu0 %2758  ;;  %v14586_v59 = vld [vmem:[#allocation8_spill] sm:$0xff] }
 0x4fb   : > { %14585 = vst [vmem:[#allocation86_spill] sm:$0xff] %v11855_v23  ;;  %v14588_v23 = vld [vmem:[#allocation9_spill] sm:$0xff] }
 0x4fc   : > { %v11845_v5 = vpop.permute.xlu1 %2979 }
 0x4fd   : > { %14583 = vst [vmem:[#allocation84_spill] sm:$0xff] %v11845_v5 }
 0x4fe   : > { %9606 = vset.pattern.permute.xlu1 %v14520_v10  ;;  %v11862_v43 = vpop.permute.xlu0 %2350 }
 0x4ff   : > { %2195 = vperm.xlu1 %9606, %v11458_v44   ;;  %14587 = vst [vmem:[#allocation8_spill] sm:$0xff] %v11862_v43 }
 0x501   : > { %v11851_v54 = vpop.permute.xlu1 %1932 }
 0x503   : > { %9607 = vset.pattern.permute.xlu1 %v14524_v0 }
 0x504   : > { %2605 = vperm.xlu1 %9607, %v11458_v44  }
 0x506   : > { %v2164_v56 = vpop.permute.xlu1 %2163 }
 0x507   : > { %v2269_v4 = vmul.f32 %v14586_v59, %v2164_v56  ;;  %v2270_v56 = vmul.f32 %v14588_v23, %v11636_v53 }
 0x508   : > { %9609 = vset.pattern.permute.xlu1 %v14519_v61 }
 0x509   : > { %1977 = vperm.xlu1 %9609, %v11458_v44   ;;  %2370 = vrot.lane.b32.xlu0 %v2269_v4, %s10156_s9  ;;  %v11873_v44 = vpop.permute.xlu0 %2760 }
 0x50a   : > { %14589 = vst [vmem:[#allocation9_spill] sm:$0xff] %v11873_v44 }
 0x50b   : > { %v2574_v14 = vpop.permute.xlu1 %2573 }
 0x50c   : > { %v2679_v45 = vmul.f32 %v14586_v59, %v2574_v14 }
 0x50d   : > { %9611 = vset.pattern.permute.xlu1 %v14524_v0  ;;  %v11880_v53 = vpop.permute.xlu0 %2352 }
 0x50e   : > { %2609 = vperm.xlu1 %9611, %v11470_v15   ;;  %2780 = vrot.lane.b32.xlu0 %v2679_v45, %s10158_s11  ;;  %14590 = vst [vmem:[#allocation87_spill] sm:$0xff] %v11880_v53 }
 0x510   : > { %v11869_v5 = vpop.permute.xlu1 %1937 }
 0x512   : > { %9612 = vset.pattern.permute.xlu1 %v14523_v60  ;;  %2372 = vrot.lane.b32.xlu0 %v2270_v56, %s10156_s9  ;;  %v11885_v56 = vpop.permute.xlu0 %2762 }
 0x513   : > { %3019 = vperm.xlu1 %9612, %v11470_v15   ;;  %14592 = vst [vmem:[#allocation89_spill] sm:$0xff] %v11885_v56 }
 0x515   : > { %v2578_v4 = vpop.permute.xlu1 %2577 }
 0x516   : > { %v2680_v14 = vmul.f32 %v14588_v23, %v2578_v4  ;;  %v11890_v43 = vpop.permute.xlu0 %2354  ;;  %v14594_v4 = vld [vmem:[#allocation10_spill] sm:$0xff] }
 0x517   : > { %9613 = vset.pattern.permute.xlu1 %v14519_v61  ;;  %14593 = vst [vmem:[#allocation90_spill] sm:$0xff] %v11890_v43 }
 0x518   : > { %1982 = vperm.xlu1 %9613, %v11470_v15   ;;  %2782 = vrot.lane.b32.xlu0 %v2680_v14, %s10158_s11 }
 0x51a   : > { %v11882_v45 = vpop.permute.xlu1 %2987  ;;  %v11896_v53 = vpop.permute.xlu0 %2764 }
 0x51b   : > { %14591 = vst [vmem:[#allocation88_spill] sm:$0xff] %v11882_v45  ;;  %14595 = vst [vmem:[#allocation10_spill] sm:$0xff] %v11896_v53 }
 0x51c   : > { %9614 = vset.pattern.permute.xlu1 %v14520_v10 }
 0x51d   : > { %2203 = vperm.xlu1 %9614, %v11480_v26  }
 0x51e   : > { %v11904_v43 = vpop.permute.xlu0 %2356 }
 0x51f   : > { %v11888_v44 = vpop.permute.xlu1 %1942  ;;  %14596 = vst [vmem:[#allocation91_spill] sm:$0xff] %v11904_v43 }
 0x521   : > { %9615 = vset.pattern.permute.xlu1 %v14524_v0 }
 0x522   : > { %2613 = vperm.xlu1 %9615, %v11480_v26  }
 0x524   : > { %v2172_v15 = vpop.permute.xlu1 %2171 }
 0x525   : > { %v2271_v14 = vmul.f32 %v14594_v4, %v2172_v15  ;;  %v14597_v15 = vld [vmem:[#allocation11_spill] sm:$0xff] }
 0x526   : > { %9617 = vset.pattern.permute.xlu1 %v14519_v61  ;;  %v2272_v7 = vmul.f32 %v14597_v15, %v11651_v18 }
 0x527   : > { %1987 = vperm.xlu1 %9617, %v11480_v26   ;;  %2374 = vrot.lane.b32.xlu0 %v2271_v14, %s10156_s9  ;;  %v11912_v26 = vpop.permute.xlu0 %2766 }
 0x528   : > { %14598 = vst [vmem:[#allocation11_spill] sm:$0xff] %v11912_v26 }
 0x529   : > { %v2582_v56 = vpop.permute.xlu1 %2581 }
 0x52a   : > { %v2681_v45 = vmul.f32 %v14594_v4, %v2582_v56 }
 0x52b   : > { %9619 = vset.pattern.permute.xlu1 %v14524_v0  ;;  %v11916_v53 = vpop.permute.xlu0 %2358 }
 0x52c   : > { %2617 = vperm.xlu1 %9619, %v11492_v47   ;;  %2784 = vrot.lane.b32.xlu0 %v2681_v45, %s10158_s11  ;;  %14599 = vst [vmem:[#allocation92_spill] sm:$0xff] %v11916_v53 }
 0x52e   : > { %v11908_v38 = vpop.permute.xlu1 %1947 }
 0x530   : > { %9620 = vset.pattern.permute.xlu1 %v14523_v60  ;;  %2376 = vrot.lane.b32.xlu0 %v2272_v7, %s10156_s9  ;;  %v11924_v7 = vpop.permute.xlu0 %2768 }
 0x531   : > { %3027 = vperm.xlu1 %9620, %v11492_v47   ;;  %14601 = vst [vmem:[#allocation94_spill] sm:$0xff] %v11924_v7 }
 0x533   : > { %v2586_v56 = vpop.permute.xlu1 %2585 }
 0x534   : > { %v2682_v14 = vmul.f32 %v14597_v15, %v2586_v56  ;;  %v11931_v56 = vpop.permute.xlu0 %2360 }
 0x535   : > { %9621 = vset.pattern.permute.xlu1 %v14519_v61  ;;  %14602 = vst [vmem:[#allocation95_spill] sm:$0xff] %v11931_v56 }
 0x536   : > { %1992 = vperm.xlu1 %9621, %v11492_v47   ;;  %2786 = vrot.lane.b32.xlu0 %v2682_v14, %s10158_s11  ;;  %v14603_v47 = vld [vmem:[#allocation12_spill] sm:$0xff] }
 0x538   : > { %v11921_v18 = vpop.permute.xlu1 %2995  ;;  %v11935_v14 = vpop.permute.xlu0 %2770 }
 0x539   : > { %14600 = vst [vmem:[#allocation93_spill] sm:$0xff] %v11921_v18  ;;  %14604 = vst [vmem:[#allocation12_spill] sm:$0xff] %v11935_v14 }
 0x53a   : > { %9622 = vset.pattern.permute.xlu1 %v14520_v10 }
 0x53b   : > { %2211 = vperm.xlu1 %9622, %v11503_v28  }
 0x53d   : > { %v11927_v45 = vpop.permute.xlu1 %1952 }
 0x53f   : > { %9623 = vset.pattern.permute.xlu1 %v14524_v0  ;;  %v11940_v18 = vpop.permute.xlu0 %2362 }
 0x540   : > { %2621 = vperm.xlu1 %9623, %v11503_v28   ;;  %14605 = vst [vmem:[#allocation96_spill] sm:$0xff] %v11940_v18 }
 0x542   : > { %v2180_v53 = vpop.permute.xlu1 %2179 }
 0x543   : > { %v2273_v26 = vmul.f32 %v14603_v47, %v2180_v53  ;;  %v14606_v53 = vld [vmem:[#allocation13_spill] sm:$0xff] }
 0x544   : > { %9625 = vset.pattern.permute.xlu1 %v14519_v61  ;;  %v2274_v56 = vmul.f32 %v14606_v53, %v11664_v24 }
 0x545   : > { %1997 = vperm.xlu1 %9625, %v11503_v28   ;;  %2378 = vrot.lane.b32.xlu0 %v2273_v26, %s10156_s9  ;;  %v11951_v28 = vpop.permute.xlu0 %2772 }
 0x546   : > { %14608 = vst [vmem:[#allocation97_spill] sm:$0xff] %v11951_v28 }
 0x547   : > { %v2590_v7 = vpop.permute.xlu1 %2589 }
 0x548   : > { %v2683_v43 = vmul.f32 %v14603_v47, %v2590_v7 }
 0x549   : > { %9627 = vset.pattern.permute.xlu1 %v14524_v0  ;;  %v11958_v24 = vpop.permute.xlu0 %2364 }
 0x54a   : > { %2625 = vperm.xlu1 %9627, %v11513_v32   ;;  %2788 = vrot.lane.b32.xlu0 %v2683_v43, %s10158_s11  ;;  %14609 = vst [vmem:[#allocation98_spill] sm:$0xff] %v11958_v24  ;;  %v2660_v43 = vmul.f32 %v10276_v29, %v11428_v8  ;;  %v14613_v24 = vld [vmem:[#allocation14_spill] sm:$0xff] }
 0x54c   : > { %v11947_v62 = vpop.permute.xlu1 %1957 }
 0x54d   : > { %14607 = vst [vmem:[#allocation13_spill] sm:$0xff] %v11947_v62 }
 0x54e   : > { %9628 = vset.pattern.permute.xlu1 %v14523_v60  ;;  %2380 = vrot.lane.b32.xlu0 %v2274_v56, %s10156_s9  ;;  %v11965_v56 = vpop.permute.xlu0 %2774 }
 0x54f   : > { %3035 = vperm.xlu1 %9628, %v11513_v32   ;;  %14610 = vst [vmem:[#allocation99_spill] sm:$0xff] %v11965_v56 }
 0x551   : > { %v2594_v26 = vpop.permute.xlu1 %2593 }
 0x552   : > { %v2684_v7 = vmul.f32 %v14606_v53, %v2594_v26 }
 0x553   : > { %9629 = vset.pattern.permute.xlu1 %v14519_v61 }
 0x554   : > { %2002 = vperm.xlu1 %9629, %v11513_v32   ;;  %2790 = vrot.lane.b32.xlu0 %v2684_v7, %s10158_s11 }
 0x556   : > { %v11962_v62 = vpop.permute.xlu1 %3003 }
 0x558   : > { %2742 = vrot.lane.b32.xlu1 %v2660_v43, %s10158_s11 }
 0x559   : > { %9630 = vset.pattern.permute.xlu1 %v14520_v10 }
 0x55b   : > { %v11968_v26 = vpop.permute.xlu1 %1962 }
 0x55c   : > { %14611 = vst [vmem:[#allocation100_spill] sm:$0xff] %v11968_v26  ;;  %2219 = vperm.xlu1 %9630, %v11539_v6  }
 0x55d   : > { %v11971_v32 = vpop.permute.xlu0 %2366 }
 0x55e   : > { %14612 = vst [vmem:[#allocation101_spill] sm:$0xff] %v11971_v32  ;;  %v3316_v32 = vld [vmem:[%s14352_s5] sm:$0xff] }
 0x560   : > { %v2188_v7 = vpop.permute.xlu1 %2187  ;;  %9631 = vset.pattern.permute.xlu1 %v14524_v0 }
 0x561   : > { %v2275_v28 = vmul.f32 %v14613_v24, %v2188_v7  ;;  %2629 = vperm.xlu1 %9631, %v11539_v6   ;;  %v3317_v7 = vld [vmem:[%s14352_s5 + $0x8] sm:$0xff] }
 0x562   : > { %v11976_v8 = vpop.permute.xlu0 %2776  ;;  %v9122_v56 = vpack.c.bf16 %v3317_v7, %v3316_v32  ;;  %v3318_v32 = vld [vmem:[%s14352_s5 + $0x10] sm:$0xff] }
 0x563   : > { %14614 = vst [vmem:[#allocation14_spill] sm:$0xff] %v11976_v8  ;;  %2382 = vrot.lane.b32.xlu0 %v2275_v28, %s10156_s9  ;;  %v2251_v8 = vmul.f32 %v10279_v31, %v11466_v17  ;;  %v3319_v17 = vld [vmem:[%s14352_s5 + $0x18] sm:$0xff] }
 0x564   : > { %9123 = vmatprep.subr.bf16.mxu1 %v9122_v56 }
 0x565   : > { %v2598_v43 = vpop.permute.xlu1 %2597  ;;  %9633 = vset.pattern.permute.xlu1 %v14519_v61  ;;  %9125 = vmatpush3.bf16.msra.mxu1 %v9122_v56 }
 0x566   : > { %v2685_v26 = vmul.f32 %v14613_v24, %v2598_v43  ;;  %2007 = vperm.xlu1 %9633, %v11539_v6   ;;  %v2369_v28 = vpop.permute.xlu0 %2368  ;;  %v2063_v43 = vmul.f32 %v14579_v2, %v11851_v54  ;;  %v14615_v6 = vld [vmem:[#allocation15_spill] sm:$0xff]  ;;  %v9126_v54 = vpack.c.bf16 %v3319_v17, %v3318_v32  ;;  %v3072_v32 = vmul.f32 %v10285_v33, %v11518_v22 }
 0x567   : > { %v2276_v18 = vmul.f32 %v14615_v6, %v11675_v58  ;;  %v3071_v58 = vmul.f32 %v10279_v31, %v11443_v11  ;;  %v3320_v11 = vld [vmem:[%s14352_s5 + $0x20] sm:$0xff]  ;;  %v2064_v22 = vmul.f32 %v14586_v59, %v11869_v5 }
 0x568   : > { %2792 = vrot.lane.b32.xlu0 %v2685_v26, %s10158_s11  ;;  %v2473_v26 = vadd.f32 %v2369_v28, %v2063_v43  ;;  %9127 = vmatprep.subr.bf16.mxu1 %v9126_v54 }
 0x569   : > { %9129 = vmatpush3.bf16.msra.mxu1 %v9126_v54 }
 0x56a   : > { %v11995_v14 = vpop.permute.xlu1 %1967  ;;  %2334 = vrot.lane.b32.xlu1 %v2251_v8, %s10156_s9 }
 0x56b   : > { %14616 = vst [vmem:[#allocation15_spill] sm:$0xff] %v11995_v14  ;;  %9635 = vset.pattern.permute.xlu1 %v14524_v0 }
 0x56c   : > { %2384 = vrot.lane.b32.xlu0 %v2276_v18, %s10156_s9  ;;  %v2779_v7 = vpop.permute.xlu0 %2778  ;;  %v3321_v18 = vld [vmem:[%s14352_s5 + $0x28] sm:$0xff] }
 0x56d   : > { %v12008_v8 = vadd.f32 %v2779_v7, %v2473_v26  ;;  %v9114_v43 = vpack.c.bf16 %v3321_v18, %v3320_v11  ;;  %v3323_v26 = vld [vmem:[%s14352_s5 + $0x38] sm:$0xff] }
 0x56e   : > { %3154 = vrot.lane.b32.xlu1 %v3071_v58, %s10157_s10 }
 0x56f   : > { %v2602_v56 = vpop.permute.xlu1 %2601  ;;  %9115 = vmatprep.subr.bf16.mxu0 %v9114_v43 }
 0x570   : > { %v2686_v14 = vmul.f32 %v14615_v6, %v2602_v56  ;;  %9117 = vmatpush3.bf16.msra.mxu0 %v9114_v43  ;;  %v14618_v56 = vld [vmem:[#allocation16_spill] sm:$0xff] }
 0x572   : > { %2633 = vperm.xlu1 %9635, %v11557_v21   ;;  %2794 = vrot.lane.b32.xlu0 %v2686_v14, %s10158_s11  ;;  %v3322_v14 = vld [vmem:[%s14352_s5 + $0x30] sm:$0xff] }
 0x574   : > { %v12014_v28 = vpop.permute.xlu1 %3011 }
 0x576   : > { %9637 = vset.pattern.permute.xlu1 %v14519_v61 }
 0x577   : > { %2012 = vperm.xlu1 %9637, %v11557_v21   ;;  %v9118_v21 = vpack.c.bf16 %v3323_v26, %v3322_v14  ;;  %v2065_v26 = vmul.f32 %v14588_v23, %v11888_v44 }
 0x579   : > { %v12026_v17 = vpop.permute.xlu1 %1972  ;;  %9119 = vmatprep.subr.bf16.mxu0 %v9118_v21 }
 0x57a   : > { %14617 = vst [vmem:[#allocation102_spill] sm:$0xff] %v12026_v17  ;;  %9121 = vmatpush3.bf16.msra.mxu0 %v9118_v21 }
 0x57b   : > { %3156 = vrot.lane.b32.xlu1 %v3072_v32, %s10157_s10  ;;  %v2371_v54 = vpop.permute.xlu0 %2370 }
 0x57c   : > { %9639 = vset.pattern.permute.xlu1 %v14524_v0  ;;  %v2474_v7 = vadd.f32 %v2371_v54, %v2064_v22  ;;  %v14619_v54 = vld [vmem:[#allocation17_spill] sm:$0xff] }
 0x57d   : > { %v2278_v21 = vmul.f32 %v14619_v54, %v11690_v63 }
 0x57e   : > { %v2196_v58 = vpop.permute.xlu1 %2195 }
 0x57f   : > { %v2277_v11 = vmul.f32 %v14618_v56, %v2196_v58  ;;  %2637 = vperm.xlu1 %9639, %v11587_v20  }
 0x580   : > { %v2781_v18 = vpop.permute.xlu0 %2780 }
 0x581   : > { %v12040_v43 = vadd.f32 %v2781_v18, %v2474_v7  ;;  %2386 = vrot.lane.b32.xlu0 %v2277_v11, %s10156_s9  ;;  %v14621_v11 = vld [vmem:[#allocation2_spill] sm:$0xff] }
 0x582   : > { %v2253_v18 = vmul.f32 %v14621_v11, %v11541_v9  ;;  %v3073_v9 = vmul.f32 %v14621_v11, %v11464_v41  ;;  %v14623_v41 = vld [vmem:[#allocation18_spill] sm:$0xff] }
 0x583   : > { %v2606_v32 = vpop.permute.xlu1 %2605  ;;  %9640 = vset.pattern.permute.xlu1 %v14523_v60 }
 0x584   : > { %v2687_v14 = vmul.f32 %v14618_v56, %v2606_v32  ;;  %3047 = vperm.xlu1 %9640, %v11587_v20   ;;  %v2373_v5 = vpop.permute.xlu0 %2372 }
 0x585   : > { %v2475_v58 = vadd.f32 %v2373_v5, %v2065_v26 }
 0x586   : > { %2796 = vrot.lane.b32.xlu0 %v2687_v14, %s10158_s11  ;;  %v9988_v14 = vpop.eup %9987 }
 0x587   : > { %v12076_v26 = vmul.f32 %v9988_v14, %v11230_v3  ;;  %v14624_v3 = vld [vmem:[#allocation39_spill] sm:$0xff]  ;;  %v3076_v14 = vmul.f32 %v10307_v39, %v11620_v16 }
 0x588   : > { %v12051_v22 = vpop.permute.xlu1 %1977  ;;  %9641 = vset.pattern.permute.xlu1 %v14519_v61 }
 0x589   : > { %14620 = vst [vmem:[#allocation16_spill] sm:$0xff] %v12051_v22  ;;  %2017 = vperm.xlu1 %9641, %v11587_v20   ;;  %v2663_v20 = vmul.f32 %v14621_v11, %v11549_v34  ;;  %v14645_v22 = vld [vmem:[#allocation88_spill] sm:$0xff] }
 0x58a   : > { %2388 = vrot.lane.b32.xlu0 %v2278_v21, %s10156_s9  ;;  %v2783_v7 = vpop.permute.xlu0 %2782  ;;  %v3074_v21 = vmul.f32 %v10296_v36, %v11579_v25 }
 0x58b   : > { %v12059_v32 = vadd.f32 %v2783_v7, %v2475_v58  ;;  %v2066_v58 = vmul.f32 %v14594_v4, %v11908_v38 }
 0x58d   : > { %v2610_v44 = vpop.permute.xlu1 %2609  ;;  %2338 = vrot.lane.b32.xlu1 %v2253_v18, %s10156_s9 }
 0x58e   : > { %v2688_v63 = vmul.f32 %v14619_v54, %v2610_v44  ;;  %9642 = vset.pattern.permute.xlu1 %v14520_v10 }
 0x590   : > { %2798 = vrot.lane.b32.xlu0 %v2688_v63, %s10158_s11 }
 0x591   : > { %2748 = vrot.lane.b32.xlu1 %v2663_v20, %s10158_s11  ;;  %v3075_v20 = vmul.f32 %v10301_v37, %v14624_v3 }
 0x592   : > { %v12068_v30 = vpop.permute.xlu1 %3019 }
 0x595   : > { %3158 = vrot.lane.b32.xlu1 %v3073_v9, %s10157_s10 }
 0x597   : > { %v12073_v5 = vpop.permute.xlu1 %1982 }
 0x598   : > { %14622 = vst [vmem:[#allocation17_spill] sm:$0xff] %v12073_v5 }
 0x599   : > { %2231 = vperm.xlu1 %9642, %v12076_v26   ;;  %v2375_v34 = vpop.permute.xlu0 %2374 }
 0x59a   : > { %v2476_v18 = vadd.f32 %v2375_v34, %v2066_v58  ;;  %v14625_v58 = vld [vmem:[#allocation19_spill] sm:$0xff] }
 0x59c   : > { %v2204_v7 = vpop.permute.xlu1 %2203 }
 0x59d   : > { %v2279_v44 = vmul.f32 %v14623_v41, %v2204_v7  ;;  %3160 = vrot.lane.b32.xlu1 %v3074_v21, %s10157_s10  ;;  %v2067_v21 = vmul.f32 %v14597_v15, %v11927_v45  ;;  %v2280_v7 = vmul.f32 %v14625_v58, %v11703_v13  ;;  %v3078_v45 = vmul.f32 %v10318_v42, %v11662_v55  ;;  %v14627_v13 = vld [vmem:[#allocation44_spill] sm:$0xff]  ;;  %v14629_v55 = vld [vmem:[#allocation46_spill] sm:$0xff] }
 0x59e   : > { %v2785_v63 = vpop.permute.xlu0 %2784  ;;  %9644 = vset.pattern.permute.xlu1 %v14523_v60 }
 0x59f   : > { %v12088_v9 = vadd.f32 %v2785_v63, %v2476_v18  ;;  %2390 = vrot.lane.b32.xlu0 %v2279_v44, %s10156_s9  ;;  %v3077_v44 = vmul.f32 %v10312_v40, %v11509_v27  ;;  %v3079_v27 = vmul.f32 %v10329_v46, %v14627_v13 }
 0x5a1   : > { %v2614_v25 = vpop.permute.xlu1 %2613  ;;  %3162 = vrot.lane.b32.xlu1 %v3075_v20, %s10157_s10 }
 0x5a2   : > { %v2689_v38 = vmul.f32 %v14623_v41, %v2614_v25  ;;  %v2377_v34 = vpop.permute.xlu0 %2376 }
 0x5a3   : > { %v2477_v63 = vadd.f32 %v2377_v34, %v2067_v21  ;;  %v3081_v21 = vmul.f32 %v10340_v49, %v14629_v55 }
 0x5a4   : > { %2800 = vrot.lane.b32.xlu0 %v2689_v38, %s10158_s11 }
 0x5a5   : > { %3164 = vrot.lane.b32.xlu1 %v3076_v14, %s10157_s10  ;;  %v3080_v14 = vmul.f32 %v10335_v48, %v11695_v19  ;;  %v14631_v19 = vld [vmem:[#allocation47_spill] sm:$0xff] }
 0x5a6   : > { %v12101_v18 = vpop.permute.xlu1 %1987 }
 0x5a7   : > { %14626 = vst [vmem:[#allocation2_spill] sm:$0xff] %v12101_v18 }
 0x5a8   : > { %2392 = vrot.lane.b32.xlu0 %v2280_v7, %s10156_s9  ;;  %v2787_v16 = vpop.permute.xlu0 %2786 }
 0x5a9   : > { %v12106_v3 = vadd.f32 %v2787_v16, %v2477_v63  ;;  %3166 = vrot.lane.b32.xlu1 %v3077_v44, %s10157_s10  ;;  %v3082_v44 = vmul.f32 %v10346_v51, %v11734_v35  ;;  %v14630_v63 = vld [vmem:[#allocation20_spill] sm:$0xff]  ;;  %v3084_v35 = vmul.f32 %v14560_v12, %v11771_v50 }
 0x5ab   : > { %v2618_v20 = vpop.permute.xlu1 %2617 }
 0x5ac   : > { %v2690_v25 = vmul.f32 %v14625_v58, %v2618_v20  ;;  %v14632_v20 = vld [vmem:[#allocation21_spill] sm:$0xff] }
 0x5ad   : > { %3168 = vrot.lane.b32.xlu1 %v3078_v45, %s10157_s10  ;;  %v3083_v45 = vmul.f32 %v10351_v52, %v14631_v19  ;;  %v14637_v19 = vld [vmem:[#allocation50_spill] sm:$0xff] }
 0x5ae   : > { %2802 = vrot.lane.b32.xlu0 %v2690_v25, %s10158_s11  ;;  %v2282_v25 = vmul.f32 %v14632_v20, %v11714_v57 }
 0x5b0   : > { %v12116_v38 = vpop.permute.xlu1 %3027 }
 0x5b1   : > { %3170 = vrot.lane.b32.xlu1 %v3079_v27, %s10157_s10 }
 0x5b5   : > { %v12121_v34 = vpop.permute.xlu1 %1992  ;;  %3172 = vrot.lane.b32.xlu1 %v3080_v14, %s10157_s10  ;;  %v14634_v14 = vld [vmem:[#allocation48_spill] sm:$0xff] }
 0x5b6   : > { %14628 = vst [vmem:[#allocation18_spill] sm:$0xff] %v12121_v34  ;;  %v3085_v55 = vmul.f32 %v14567_v1, %v14634_v14 }
 0x5b9   : > { %3174 = vrot.lane.b32.xlu1 %v3081_v21, %s10157_s10 }
 0x5ba   : > { %v2212_v7 = vpop.permute.xlu1 %2211 }
 0x5bb   : > { %v2281_v16 = vmul.f32 %v14630_v63, %v2212_v7  ;;  %v14635_v7 = vld [vmem:[#allocation77_spill] sm:$0xff] }
 0x5bd   : > { %3176 = vrot.lane.b32.xlu1 %v3082_v44, %s10157_s10  ;;  %2394 = vrot.lane.b32.xlu0 %v2281_v16, %s10156_s9  ;;  %v14636_v44 = vld [vmem:[#allocation5_spill] sm:$0xff] }
 0x5be   : > { %v3086_v16 = vmul.f32 %v14636_v44, %v14635_v7 }
 0x5bf   : > { %v12136_v13 = vpop.permute.xlu1 %2621 }
 0x5c1   : > { %3178 = vrot.lane.b32.xlu1 %v3083_v45, %s10157_s10  ;;  %2396 = vrot.lane.b32.xlu0 %v2282_v25, %s10156_s9  ;;  %v14638_v45 = vld [vmem:[#allocation6_spill] sm:$0xff] }
 0x5c2   : > { %v3087_v25 = vmul.f32 %v14638_v45, %v14637_v19  ;;  %v14644_v19 = vld [vmem:[#allocation64_spill] sm:$0xff] }
 0x5c4   : > { %v12142_v27 = vpop.permute.xlu1 %1997 }
 0x5c5   : > { %14633 = vst [vmem:[#allocation39_spill] sm:$0xff] %v12142_v27  ;;  %3180 = vrot.lane.b32.xlu1 %v3084_v35, %s10157_s10  ;;  %v14639_v35 = vld [vmem:[#allocation84_spill] sm:$0xff] }
 0x5c6   : > { %v3088_v14 = vmul.f32 %v14579_v2, %v14639_v35  ;;  %v3090_v2 = vmul.f32 %v14588_v23, %v14645_v22  ;;  %v14650_v23 = vld [vmem:[#allocation93_spill] sm:$0xff] }
 0x5c7   : > { %v3092_v22 = vmul.f32 %v14597_v15, %v14650_v23 }
 0x5c9   : > { %v2626_v21 = vpop.permute.xlu1 %2625  ;;  %3182 = vrot.lane.b32.xlu1 %v3085_v55, %s10157_s10 }
 0x5ca   : > { %v2692_v57 = vmul.f32 %v14632_v20, %v2626_v21  ;;  %v14641_v21 = vld [vmem:[#allocation36_spill] sm:$0xff] }
 0x5cb   : > { %v2045_v27 = vmul.f32 %v10276_v29, %v14641_v21  ;;  %v14647_v29 = vld [vmem:[#allocation53_spill] sm:$0xff] }
 0x5cc   : > { %2806 = vrot.lane.b32.xlu0 %v2692_v57, %s10158_s11  ;;  %v14642_v57 = vld [vmem:[#allocation63_spill] sm:$0xff] }
 0x5cd   : > { %3184 = vrot.lane.b32.xlu1 %v3086_v16, %s10157_s10  ;;  %v2455_v7 = vadd.f32 %v14642_v57, %v2045_v27  ;;  %v14643_v16 = vld [vmem:[#allocation52_spill] sm:$0xff]  ;;  %v14649_v27 = vld [vmem:[#allocation23_spill] sm:$0xff] }
 0x5ce   : > { %v12153_v50 = vpop.permute.xlu1 %3035  ;;  %v3089_v34 = vmul.f32 %v14586_v59, %v14643_v16  ;;  %v3091_v59 = vmul.f32 %v14594_v4, %v14647_v29  ;;  %v14652_v4 = vld [vmem:[#allocation38_spill] sm:$0xff] }
 0x5cf   : > { %v2046_v57 = vmul.f32 %v10279_v31, %v14652_v4 }
 0x5d1   : > { %3186 = vrot.lane.b32.xlu1 %v3087_v25, %s10157_s10 }
 0x5d3   : > { %v12160_v55 = vpop.permute.xlu1 %2002 }
 0x5d4   : > { %14640 = vst [vmem:[#allocation19_spill] sm:$0xff] %v12160_v55  ;;  %v14646_v55 = vld [vmem:[#allocation22_spill] sm:$0xff] }
 0x5d5   : > { %3188 = vrot.lane.b32.xlu1 %v3088_v14, %s10157_s10 }
 0x5d7   : > { %v2743_v18 = vpop.permute.xlu1 %2742 }
 0x5d8   : > { %v2865_v5 = vadd.f32 %v2743_v18, %v2455_v7  ;;  %v14648_v18 = vld [vmem:[#allocation68_spill] sm:$0xff] }
 0x5d9   : > { %3190 = vrot.lane.b32.xlu1 %v3089_v34, %s10157_s10  ;;  %v2284_v34 = vmul.f32 %v14649_v27, %v14648_v18 }
 0x5da   : > { %v3275_v25 = vadd.f32 %v14644_v19, %v2865_v5  ;;  %v3094_v19 = vmul.f32 %v14606_v53, %v11962_v62 }
 0x5db   : > { %v2220_v35 = vpop.permute.xlu1 %2219 }
 0x5dc   : > { %v2283_v17 = vmul.f32 %v14646_v55, %v2220_v35  ;;  %8596 = vmatprep.mubr.msk.f32.mxu1 %vm980_vm1, %v3275_v25  ;;  %v3390_v23 = vrot.slane %v3275_v25, 1 }
 0x5dd   : > { %3192 = vrot.lane.b32.xlu1 %v3090_v2, %s10157_s10  ;;  %v14653_v2 = vld [vmem:[#allocation67_spill] sm:$0xff] }
 0x5de   : > { %2398 = vrot.lane.b32.xlu0 %v2283_v17, %s10156_s9  ;;  %v14651_v17 = vld [vmem:[#allocation55_spill] sm:$0xff] }
 0x5df   : > { %v3093_v21 = vmul.f32 %v14603_v47, %v14651_v17 }
 0x5e0   : > { %v12180_v14 = vpop.permute.xlu1 %2629 }
 0x5e1   : > { %3194 = vrot.lane.b32.xlu1 %v3091_v59, %s10157_s10  ;;  %v14654_v59 = vld [vmem:[#allocation56_spill] sm:$0xff] }
 0x5e2   : > { %2400 = vrot.lane.b32.xlu0 %v2284_v34, %s10156_s9  ;;  %v3095_v18 = vmul.f32 %v14613_v24, %v14654_v59  ;;  %v14661_v59 = vld [vmem:[#allocation70_spill] sm:$0xff] }
 0x5e5   : > { %v12186_v5 = vpop.permute.xlu1 %2007  ;;  %3196 = vrot.lane.b32.xlu1 %v3092_v22, %s10157_s10  ;;  %v4098_v22 = vrot.slane %v3275_v25, 2 }
 0x5e9   : > { %v2335_v7 = vpop.permute.xlu1 %2334  ;;  %3198 = vrot.lane.b32.xlu1 %v3093_v21, %s10157_s10 }
 0x5ea   : > { %v2456_v16 = vadd.f32 %v2335_v7, %v2046_v57  ;;  %v3096_v57 = vmul.f32 %v14615_v6, %v12014_v28  ;;  %v14656_v7 = vld [vmem:[#allocation41_spill] sm:$0xff]  ;;  %v14662_v28 = vld [vmem:[#allocation71_spill] sm:$0xff] }
 0x5eb   : > { %v2047_v25 = vmul.f32 %v10285_v33, %v14656_v7  ;;  %v3098_v33 = vmul.f32 %v14619_v54, %v12068_v30  ;;  %v14663_v7 = vld [vmem:[#allocation59_spill] sm:$0xff] }
 0x5ec   : > { %v2866_v35 = vadd.f32 %v14653_v2, %v2456_v16  ;;  %v14657_v16 = vld [vmem:[#allocation73_spill] sm:$0xff] }
 0x5ed   : > { %v3155_v15 = vpop.permute.xlu1 %3154  ;;  %3200 = vrot.lane.b32.xlu1 %v3094_v19, %s10157_s10  ;;  %v14658_v19 = vld [vmem:[#allocation24_spill] sm:$0xff] }
 0x5ee   : > { %v3276_v29 = vadd.f32 %v3155_v15, %v2866_v35  ;;  %v2285_v2 = vmul.f32 %v14658_v19, %v14657_v16  ;;  %v14660_v15 = vld [vmem:[#allocation58_spill] sm:$0xff] }
 0x5f0   : > { %v3391_v34 = vrot.slane %v3276_v29, 1  ;;  %v4099_v31 = vrot.slane %v3276_v29, 2  ;;  %8597 = vmatmul.mubr.msk.f32.vlgmr.msra.gmra.mrb[0].mxu1 %vm980_vm1, %v3276_v29  ;;  %v3097_v29 = vmul.f32 %v14618_v56, %v14660_v15  ;;  %v14665_v15 = vld [vmem:[#allocation35_spill] sm:$0xff] }
 0x5f1   : > { %v2634_v17 = vpop.permute.xlu1 %2633  ;;  %3202 = vrot.lane.b32.xlu1 %v3095_v18, %s10157_s10  ;;  %v2457_v18 = vadd.f32 %v14661_v59, %v2047_v25  ;;  %v3099_v25 = vmul.f32 %v14623_v41, %v14663_v7  ;;  %9989 = vrcp.f32 %v14665_v15  ;;  %v14671_v7 = vld [vmem:[#allocation42_spill] sm:$0xff] }
 0x5f2   : > { %v2694_v62 = vmul.f32 %v14649_v27, %v2634_v17  ;;  %v3392_v21 = vsel %vm3389_vm3, %v3390_v23, %v3391_v34  ;;  %v12205_v4 = vsel %vm4097_vm4, %v4098_v22, %v4099_v31 }
 0x5f3   : > { %14655 = vst [vmem:[#allocation44_spill] sm:$0xff] %v12205_v4  ;;  %8534 = vmatprep.mubr.msk.f32.mxu0 %vm980_vm1, %v3392_v21  ;;  %v2867_v23 = vadd.f32 %v14662_v28, %v2457_v18  ;;  %v14667_v18 = vld [vmem:[#allocation34_spill] sm:$0xff]  ;;  %v14686_v4 = vld [vmem:[#allocation76_spill] sm:$0xff] }
 0x5f4   : > { %2810 = vrot.lane.b32.xlu0 %v2694_v62, %s10158_s11  ;;  %9991 = vrcp.f32 %v14667_v18 }
 0x5f5   : > { %3204 = vrot.lane.b32.xlu1 %v3096_v57, %s10157_s10 }
 0x5f6   : > { %v12216_v35 = vpop.permute.xlu1 %2012 }
 0x5f7   : > { %14659 = vst [vmem:[#allocation46_spill] sm:$0xff] %v12216_v35 }
 0x5f8   : > { %2402 = vrot.lane.b32.xlu0 %v2285_v2, %s10156_s9 }
 0x5f9   : > { %3206 = vrot.lane.b32.xlu1 %v3097_v29, %s10157_s10  ;;  %v3100_v29 = vmul.f32 %v14625_v58, %v12116_v38  ;;  %v14668_v38 = vld [vmem:[#allocation61_spill] sm:$0xff] }
 0x5fa   : > { %v3157_v22 = vpop.permute.xlu1 %3156 }
 0x5fb   : > { %v12226_v17 = vadd.f32 %v3157_v22, %v2867_v23  ;;  %v9990_v28 = vpop.eup %9989  ;;  %v3101_v23 = vmul.f32 %v14630_v63, %v14668_v38 }
 0x5fd   : > { %3208 = vrot.lane.b32.xlu1 %v3098_v33, %s10157_s10  ;;  %8599 = vmatprep.mubr.msk.f32.mxu1 %vm980_vm1, %v12226_v17  ;;  %v3393_v62 = vrot.slane %v12226_v17, 1  ;;  %v4101_v21 = vrot.slane %v12226_v17, 2  ;;  %v14669_v33 = vld [vmem:[#allocation30_spill] sm:$0xff] }
 0x5fe   : > { %v2638_v57 = vpop.permute.xlu1 %2637 }
 0x5ff   : > { %v2695_v16 = vmul.f32 %v14658_v19, %v2638_v57  ;;  %v3394_v2 = vsel %vm3389_vm3, %v3391_v34, %v3393_v62  ;;  %v12238_v30 = vsel %vm4097_vm4, %v4099_v31, %v4101_v21  ;;  %v2691_v34 = vmul.f32 %v14630_v63, %v12136_v13  ;;  %v12264_v13 = vpop.permute.xlu0 %2378 }
 0x600   : > { %14664 = vst [vmem:[#allocation20_spill] sm:$0xff] %v12238_v30  ;;  %8535 = vmatmul.mubr.msk.f32.vlgmr.msra.gmra.mrb[172].mxu0 %vm980_vm1, %v3394_v2  ;;  %v12262_v57 = vmul.f32 %v9990_v28, %v14669_v33  ;;  %v14684_v30 = vld [vmem:[#allocation51_spill] sm:$0xff] }
 0x601   : > { %3210 = vrot.lane.b32.xlu1 %v3099_v25, %s10157_s10  ;;  %2812 = vrot.lane.b32.xlu0 %v2695_v16, %s10158_s11  ;;  %v2048_v25 = vmul.f32 %v14621_v11, %v14671_v7  ;;  %v3102_v16 = vmul.f32 %v14632_v20, %v12153_v50  ;;  %v14672_v50 = vld [vmem:[#allocation45_spill] sm:$0xff]  ;;  %v14674_v7 = vld [vmem:[#allocation31_spill] sm:$0xff] }
 0x602   : > { %14670 = vst [vmem:[#allocation21_spill] sm:$0xff] %v12262_v57 }
 0x603   : > { %v12246_v59 = vpop.permute.xlu1 %3047  ;;  %v12276_v28 = vpop.permute.xlu0 %2788 }
 0x605   : > { %3212 = vrot.lane.b32.xlu1 %v3100_v29, %s10157_s10  ;;  %2641 = vperm.xlu0 %9643, %v12076_v26   ;;  %v9992_v29 = vpop.eup %9991 }
 0x608   : > { %v12252_v31 = vpop.permute.xlu1 %2017 }
 0x609   : > { %14666 = vst [vmem:[#allocation47_spill] sm:$0xff] %v12252_v31  ;;  %2804 = vrot.lane.b32.xlu1 %v2691_v34, %s10158_s11  ;;  %9645 = vset.pattern.permute.xlu0 %v14519_v61  ;;  %v2693_v34 = vmul.f32 %v14646_v55, %v12180_v14  ;;  %v12287_v14 = vmul.f32 %v9992_v29, %v14674_v7  ;;  %v5243_v29 = vrot.slane %v12226_v17, 4  ;;  %v14678_v7 = vld [vmem:[#allocation49_spill] sm:$0xff] }
 0x60a   : > { %2022 = vperm.xlu0 %9645, %v12076_v26   ;;  %v2050_v61 = vmul.f32 %v10301_v37, %v14678_v7  ;;  %v2051_v37 = vmul.f32 %v10307_v39, %v14684_v30  ;;  %v14685_v7 = vld [vmem:[#allocation54_spill] sm:$0xff]  ;;  %v14687_v31 = vld [vmem:[#allocation57_spill] sm:$0xff] }
 0x60b   : > { %14675 = vst [vmem:[#allocation48_spill] sm:$0xff] %v12287_v14  ;;  %v3324_v39 = vld [vmem:[%s14352_s5 + $0x40] sm:$0xff] }
 0x60c   : > { %v2339_v22 = vpop.permute.xlu1 %2338  ;;  %v14691_v30 = vld [vmem:[#allocation82_spill] sm:$0xff] }
 0x60d   : > { %3214 = vrot.lane.b32.xlu1 %v3101_v23, %s10157_s10  ;;  %v2458_v15 = vadd.f32 %v2339_v22, %v2048_v25  ;;  %v2049_v23 = vmul.f32 %v10296_v36, %v14672_v50  ;;  %v14673_v22 = vld [vmem:[#allocation65_spill] sm:$0xff]  ;;  %v4816_v36 = vrot.slane %v12226_v17, 3 }
 0x60e   : > { %9646 = vset.pattern.permute.xlu0 %v14520_v10  ;;  %v3103_v33 = vmul.f32 %v14646_v55, %v14673_v22 }
 0x60f   : > { %2235 = vperm.xlu0 %9646, %v12262_v57  }
 0x610   : > { %v2749_v2 = vpop.permute.xlu1 %2748 }
 0x611   : > { %3216 = vrot.lane.b32.xlu1 %v3102_v16, %s10157_s10  ;;  %v2868_v18 = vadd.f32 %v2749_v2, %v2458_v15 }
 0x613   : > { %9648 = vset.pattern.permute.xlu0 %v14524_v0 }
 0x614   : > { %v3159_v38 = vpop.permute.xlu1 %3158  ;;  %2645 = vperm.xlu0 %9648, %v12262_v57   ;;  %v12309_v57 = vpop.permute.xlu0 %2380 }
 0x615   : > { %v12279_v11 = vadd.f32 %v3159_v38, %v2868_v18  ;;  %2808 = vrot.lane.b32.xlu1 %v2693_v34, %s10158_s11  ;;  %v14676_v18 = vld [vmem:[#allocation4_spill] sm:$0xff] }
 0x616   : > { %v2459_v38 = vadd.f32 %v14676_v18, %v2049_v23  ;;  %v14681_v23 = vld [vmem:[#allocation69_spill] sm:$0xff] }
 0x617   : > { %8600 = vmatmul.mubr.msk.f32.gmra.mrb[2].mxu1 %vm980_vm1, %v12279_v11  ;;  %v3395_v25 = vrot.slane %v12279_v11, 1  ;;  %v4103_v16 = vrot.slane %v12279_v11, 2  ;;  %v4817_v2 = vrot.slane %v12279_v11, 3  ;;  %v5244_v34 = vrot.slane %v12279_v11, 4 }
 0x618   : > { %v12294_v15 = vpop.permute.xlu1 %2231  ;;  %9651 = vset.pattern.permute.xlu0 %v14523_v60 }
 0x619   : > { %3218 = vrot.lane.b32.xlu1 %v3103_v33, %s10157_s10  ;;  %3059 = vperm.xlu0 %9651, %v12287_v14   ;;  %v3396_v50 = vsel %vm3389_vm3, %v3393_v62, %v3395_v25  ;;  %v12305_v22 = vsel %vm4097_vm4, %v4101_v21, %v4103_v16  ;;  %v12313_v17 = vsel %vm4815_vm5, %v4816_v36, %v4817_v2  ;;  %v14682_v62 = vld [vmem:[#allocation75_spill] sm:$0xff] }
 0x61a   : > { %14677 = vst [vmem:[#allocation77_spill] sm:$0xff] %v12305_v22  ;;  %8537 = vmatprep.mubr.msk.f32.mxu0 %vm980_vm1, %v3396_v50  ;;  %14679 = vst [vmem:[#allocation5_spill] sm:$0xff] %v12313_v17  ;;  %v12316_v11 = vsel %vm5242_vm6, %v5243_v29, %v5244_v34  ;;  %v3104_v33 = vmul.f32 %v14649_v27, %v14681_v23  ;;  %v2869_v18 = vadd.f32 %v14682_v62, %v2459_v38  ;;  %v14683_v21 = vld [vmem:[#allocation43_spill] sm:$0xff] }
 0x61b   : > { %14680 = vst [vmem:[#allocation50_spill] sm:$0xff] %v12316_v11  ;;  %v2053_v22 = vmul.f32 %v10318_v42, %v14683_v21  ;;  %v2052_v50 = vmul.f32 %v10312_v40, %v14685_v7  ;;  %v2460_v36 = vadd.f32 %v14686_v4, %v2050_v61  ;;  %v12330_v29 = vmul.f32 %v10329_v46, %v14687_v31  ;;  %v14688_v11 = vld [vmem:[#allocation60_spill] sm:$0xff]  ;;  %v3325_v40 = vld [vmem:[%s14352_s5 + $0x48] sm:$0xff]  ;;  %v14689_v42 = vld [vmem:[#allocation78_spill] sm:$0xff]  ;;  %v12347_v31 = vpop.permute.xlu0 %2790 }
 0x61c   : > { %v3161_v17 = vpop.permute.xlu1 %3160  ;;  %v12334_v23 = vmul.f32 %v10335_v48, %v14688_v11  ;;  %v14690_v61 = vld [vmem:[#allocation80_spill] sm:$0xff]  ;;  %v3105_v11 = vmul.f32 %v14658_v19, %v12246_v59  ;;  %v14692_v21 = vld [vmem:[#allocation81_spill] sm:$0xff]  ;;  %v14693_v27 = vld [vmem:[#allocation83_spill] sm:$0xff] }
 0x61d   : > { %v3279_v38 = vadd.f32 %v3161_v17, %v2869_v18  ;;  %3220 = vrot.lane.b32.xlu1 %v3104_v33, %s10157_s10  ;;  %9653 = vset.pattern.permute.xlu0 %v14520_v10  ;;  %v2870_v46 = vadd.f32 %v14689_v42, %v2460_v36  ;;  %v2461_v4 = vadd.f32 %v14690_v61, %v2051_v37  ;;  %v14694_v36 = vld [vmem:[#allocation85_spill] sm:$0xff]  ;;  %v3326_v59 = vld [vmem:[%s14352_s5 + $0x50] sm:$0xff] }
 0x61e   : > { %v2462_v48 = vadd.f32 %v14691_v30, %v2052_v50  ;;  %v9130_v17 = vpack.c.bf16 %v3325_v40, %v3324_v39  ;;  %v2463_v42 = vadd.f32 %v14694_v36, %v2053_v22  ;;  %v3327_v40 = vld [vmem:[%s14352_s5 + $0x58] sm:$0xff] }
 0x61f   : > { %8602 = vmatprep.mubr.msk.f32.mxu1 %vm980_vm1, %v3279_v38  ;;  %v3397_v33 = vrot.slane %v3279_v38, 1  ;;  %v4105_v62 = vrot.slane %v3279_v38, 2  ;;  %v4819_v18 = vrot.slane %v3279_v38, 3  ;;  %v2871_v7 = vadd.f32 %v14692_v21, %v2461_v4 }
 0x620   : > { %v2872_v35 = vadd.f32 %v14693_v27, %v2462_v48  ;;  %v3163_v37 = vpop.permute.xlu1 %3162  ;;  %9131 = vmatprep.subr.bf16.mxu1 %v9130_v17  ;;  %v5246_v50 = vrot.slane %v3279_v38, 4  ;;  %v12363_v27 = vpop.permute.xlu0 %2382  ;;  %v9134_v22 = vpack.c.bf16 %v3327_v40, %v3326_v59  ;;  %v6388_v36 = vrot.slane %v3279_v38, 6 }
 0x621   : > { %v3280_v61 = vadd.f32 %v3163_v37, %v2870_v46  ;;  %3222 = vrot.lane.b32.xlu1 %v3105_v11, %s10157_s10  ;;  %v3398_v39 = vsel %vm3389_vm3, %v3395_v25, %v3397_v33  ;;  %9133 = vmatpush3.bf16.msra.mxu1 %v9130_v17  ;;  %v12367_v46 = vsel %vm4097_vm4, %v4103_v16, %v4105_v62 }
 0x622   : > { %8538 = vmatmul.mubr.msk.f32.gmra.mrb[174].mxu0 %vm980_vm1, %v3398_v39  ;;  %v12370_v25 = vsel %vm4815_vm5, %v4817_v2, %v4819_v18  ;;  %v12373_v4 = vsel %vm5242_vm6, %v5244_v34, %v5246_v50  ;;  %9135 = vmatprep.subr.bf16.mxu1 %v9134_v22  ;;  %v5961_v39 = vrot.slane %v3279_v38, 5 }
 0x623   : > { %14695 = vst [vmem:[#allocation6_spill] sm:$0xff] %v12370_v25  ;;  %14696 = vst [vmem:[#allocation84_spill] sm:$0xff] %v12373_v4  ;;  %8603 = vmatmul.mubr.msk.f32.gmra.mrb[4].mxu1 %vm980_vm1, %v3280_v61  ;;  %v3399_v30 = vrot.slane %v3280_v61, 1  ;;  %v4107_v48 = vrot.slane %v3280_v61, 2  ;;  %v6389_v17 = vrot.slane %v3280_v61, 6  ;;  %v4821_v11 = vrot.slane %v3280_v61, 3 }
 0x624   : > { %v3165_v21 = vpop.permute.xlu1 %3164  ;;  %v5248_v37 = vrot.slane %v3280_v61, 4  ;;  %v5962_v59 = vrot.slane %v3280_v61, 5  ;;  %v12398_v25 = vpop.permute.xlu0 %2792 }
 0x625   : > { %v3281_v16 = vadd.f32 %v3165_v21, %v2871_v7  ;;  %3051 = vperm.xlu1 %9644, %v12076_v26   ;;  %v3400_v2 = vsel %vm3389_vm3, %v3397_v33, %v3399_v30  ;;  %9137 = vmatpush3.bf16.msra.mxu1 %v9134_v22  ;;  %v12379_v34 = vsel %vm4097_vm4, %v4105_v62, %v4107_v48  ;;  %v14701_v22 = vld [vmem:[#allocation86_spill] sm:$0xff] }
 0x626   : > { %8540 = vmatprep.mubr.msk.f32.mxu0 %vm980_vm1, %v3400_v2  ;;  %v12383_v40 = vsel %vm6387_vm7, %v6388_v36, %v6389_v17  ;;  %v12386_v4 = vsel %vm4815_vm5, %v4819_v18, %v4821_v11  ;;  %v12389_v38 = vsel %vm5242_vm6, %v5246_v50, %v5248_v37  ;;  %v12392_v7 = vsel %vm5960_vm8, %v5961_v39, %v5962_v59  ;;  %v14702_v36 = vld [vmem:[#allocation8_spill] sm:$0xff] }
 0x627   : > { %14697 = vst [vmem:[#allocation36_spill] sm:$0xff] %v12383_v40  ;;  %14698 = vst [vmem:[#allocation63_spill] sm:$0xff] %v12386_v4  ;;  %8605 = vmatprep.mubr.msk.f32.mxu1 %vm980_vm1, %v3281_v16  ;;  %v3401_v26 = vrot.slane %v3281_v16, 1  ;;  %v4109_v33 = vrot.slane %v3281_v16, 2  ;;  %v6391_v62 = vrot.slane %v3281_v16, 6  ;;  %v4823_v61 = vrot.slane %v3281_v16, 3 }
 0x628   : > { %14699 = vst [vmem:[#allocation52_spill] sm:$0xff] %v12389_v38  ;;  %14700 = vst [vmem:[#allocation64_spill] sm:$0xff] %v12392_v7  ;;  %v2873_v21 = vadd.f32 %v14701_v22, %v2463_v42  ;;  %v2464_v2 = vadd.f32 %v14702_v36, %v12330_v29  ;;  %v3167_v18 = vpop.permute.xlu1 %3166  ;;  %v5250_v4 = vrot.slane %v3281_v16, 4  ;;  %v5964_v50 = vrot.slane %v3281_v16, 5  ;;  %v14707_v22 = vld [vmem:[#allocation62_spill] sm:$0xff] }
 0x629   : > { %v3282_v38 = vadd.f32 %v3167_v18, %v2872_v35  ;;  %9647 = vset.pattern.permute.xlu1 %v14520_v10  ;;  %v3402_v39 = vsel %vm3389_vm3, %v3399_v30, %v3401_v26  ;;  %v12403_v7 = vsel %vm4097_vm4, %v4107_v48, %v4109_v33  ;;  %v12406_v40 = vsel %vm6387_vm7, %v6389_v17, %v6391_v62  ;;  %v14708_v18 = vld [vmem:[#allocation9_spill] sm:$0xff] }
 0x62a   : > { %14703 = vst [vmem:[#allocation88_spill] sm:$0xff] %v12406_v40  ;;  %2239 = vperm.xlu1 %9647, %v12287_v14   ;;  %8541 = vmatmul.mubr.msk.f32.gmra.mrb[176].mxu0 %vm980_vm1, %v3402_v39  ;;  %v12411_v29 = vsel %vm4815_vm5, %v4821_v11, %v4823_v61  ;;  %v12414_v42 = vsel %vm5242_vm6, %v5248_v37, %v5250_v4 }
 0x62b   : > { %14704 = vst [vmem:[#allocation22_spill] sm:$0xff] %v12411_v29  ;;  %14705 = vst [vmem:[#allocation53_spill] sm:$0xff] %v12414_v42  ;;  %v12417_v35 = vsel %vm5960_vm8, %v5962_v59, %v5964_v50  ;;  %8606 = vmatmul.mubr.msk.f32.gmra.mrb[6].mxu1 %vm980_vm1, %v3282_v38  ;;  %v3403_v30 = vrot.slane %v3282_v38, 1  ;;  %v4111_v48 = vrot.slane %v3282_v38, 2  ;;  %v6393_v16 = vrot.slane %v3282_v38, 6  ;;  %v12430_v42 = vpop.permute.xlu0 %2384 }
 0x62c   : > { %14706 = vst [vmem:[#allocation68_spill] sm:$0xff] %v12417_v35  ;;  %v4825_v17 = vrot.slane %v3282_v38, 3  ;;  %v2056_v36 = vmul.f32 %v10340_v49, %v14707_v22  ;;  %v2874_v39 = vadd.f32 %v14708_v18, %v2464_v2  ;;  %v3169_v40 = vpop.permute.xlu1 %3168  ;;  %v5252_v11 = vrot.slane %v3282_v38, 4  ;;  %v14714_v2 = vld [vmem:[#allocation87_spill] sm:$0xff] }
 0x62d   : > { %v5966_v29 = vrot.slane %v3282_v38, 5  ;;  %v3283_v10 = vadd.f32 %v3169_v40, %v2873_v21  ;;  %v3404_v37 = vsel %vm3389_vm3, %v3401_v26, %v3403_v30  ;;  %v12425_v59 = vsel %vm4097_vm4, %v4109_v33, %v4111_v48 }
 0x62e   : > { %14709 = vst [vmem:[#allocation93_spill] sm:$0xff] %v12425_v59  ;;  %v12428_v35 = vsel %vm6387_vm7, %v6391_v62, %v6393_v16  ;;  %9649 = vset.pattern.permute.xlu1 %v14524_v0  ;;  %8543 = vmatprep.mubr.msk.f32.mxu0 %vm980_vm1, %v3404_v37  ;;  %v12435_v49 = vsel %vm4815_vm5, %v4823_v61, %v4825_v17  ;;  %v14715_v61 = vld [vmem:[#allocation25_spill] sm:$0xff] }
 0x62f   : > { %14710 = vst [vmem:[#allocation55_spill] sm:$0xff] %v12428_v35  ;;  %14711 = vst [vmem:[#allocation38_spill] sm:$0xff] %v12435_v49  ;;  %v12438_v38 = vsel %vm5242_vm6, %v5250_v4, %v5252_v11  ;;  %v12441_v40 = vsel %vm5960_vm8, %v5964_v50, %v5966_v29  ;;  %2649 = vperm.xlu1 %9649, %v12287_v14   ;;  %8608 = vmatprep.mubr.msk.f32.mxu1 %vm980_vm1, %v3283_v10  ;;  %v3405_v26 = vrot.slane %v3283_v10, 1  ;;  %v14718_v0 = vld [vmem:[#allocation89_spill] sm:$0xff]  ;;  %v12457_v59 = vpop.permute.xlu0 %2794 }
 0x630   : > { %14712 = vst [vmem:[#allocation67_spill] sm:$0xff] %v12438_v38  ;;  %14713 = vst [vmem:[#allocation56_spill] sm:$0xff] %v12441_v40  ;;  %v4113_v33 = vrot.slane %v3283_v10, 2  ;;  %v6395_v62 = vrot.slane %v3283_v10, 6  ;;  %v4827_v21 = vrot.slane %v3283_v10, 3  ;;  %v2465_v22 = vadd.f32 %v14714_v2, %v12334_v23  ;;  %v3171_v37 = vpop.permute.xlu1 %3170 }
 0x631   : > { %v2286_v18 = vmul.f32 %v14715_v61, %v12294_v15  ;;  %v5254_v4 = vrot.slane %v3283_v10, 4  ;;  %v5968_v38 = vrot.slane %v3283_v10, 5  ;;  %v3284_v49 = vadd.f32 %v3171_v37, %v2874_v39  ;;  %v14722_v39 = vld [vmem:[#allocation66_spill] sm:$0xff] }
 0x632   : > { %v3406_v50 = vsel %vm3389_vm3, %v3403_v30, %v3405_v26  ;;  %v12451_v40 = vsel %vm4097_vm4, %v4111_v48, %v4113_v33  ;;  %v12454_v35 = vsel %vm6387_vm7, %v6393_v16, %v6395_v62  ;;  %v2875_v14 = vadd.f32 %v14718_v0, %v2465_v22  ;;  %v14723_v22 = vld [vmem:[#allocation90_spill] sm:$0xff] }
 0x633   : > { %14716 = vst [vmem:[#allocation41_spill] sm:$0xff] %v12451_v40  ;;  %14717 = vst [vmem:[#allocation73_spill] sm:$0xff] %v12454_v35  ;;  %8544 = vmatmul.mubr.msk.f32.gmra.mrb[178].mxu0 %vm980_vm1, %v3406_v50  ;;  %v12461_v15 = vsel %vm4815_vm5, %v4825_v17, %v4827_v21  ;;  %v12464_v10 = vsel %vm5242_vm6, %v5252_v11, %v5254_v4  ;;  %v12467_v23 = vsel %vm5960_vm8, %v5966_v29, %v5968_v38  ;;  %v12483_v40 = vpop.permute.xlu0 %2386 }
 0x634   : > { %14719 = vst [vmem:[#allocation24_spill] sm:$0xff] %v12461_v15  ;;  %14720 = vst [vmem:[#allocation58_spill] sm:$0xff] %v12464_v10  ;;  %2404 = vrot.lane.b32.xlu1 %v2286_v18, %s10156_s9  ;;  %8609 = vmatmul.mubr.msk.f32.gmra.mrb[8].mxu1 %vm980_vm1, %v3284_v49  ;;  %v3407_v30 = vrot.slane %v3284_v49, 1  ;;  %v4115_v48 = vrot.slane %v3284_v49, 2  ;;  %v6397_v0 = vrot.slane %v3284_v49, 6  ;;  %v4829_v16 = vrot.slane %v3284_v49, 3  ;;  %v3173_v37 = vpop.permute.xlu1 %3172 }
 0x635   : > { %14721 = vst [vmem:[#allocation70_spill] sm:$0xff] %v12467_v23  ;;  %v2057_v2 = vmul.f32 %v10346_v51, %v14722_v39  ;;  %v2466_v17 = vadd.f32 %v14723_v22, %v2056_v36  ;;  %9650 = vset.pattern.permute.xlu1 %v14523_v60  ;;  %v5256_v11 = vrot.slane %v3284_v49, 4  ;;  %v5970_v50 = vrot.slane %v3284_v49, 5  ;;  %v14725_v15 = vld [vmem:[#allocation10_spill] sm:$0xff]  ;;  %v14730_v22 = vld [vmem:[#allocation91_spill] sm:$0xff] }
 0x636   : > { %v3285_v29 = vadd.f32 %v3173_v37, %v2875_v14  ;;  %v3408_v23 = vsel %vm3389_vm3, %v3405_v26, %v3407_v30  ;;  %v12477_v18 = vsel %vm4097_vm4, %v4113_v33, %v4115_v48  ;;  %v12480_v10 = vsel %vm6387_vm7, %v6395_v62, %v6397_v0 }
 0x637   : > { %14724 = vst [vmem:[#allocation71_spill] sm:$0xff] %v12480_v10  ;;  %v2876_v35 = vadd.f32 %v14725_v15, %v2466_v17  ;;  %8546 = vmatprep.mubr.msk.f32.mxu0 %vm980_vm1, %v3408_v23  ;;  %v12487_v51 = vsel %vm4815_vm5, %v4827_v21, %v4829_v16  ;;  %v12490_v36 = vsel %vm5242_vm6, %v5254_v4, %v5256_v11  ;;  %v14729_v15 = vld [vmem:[#allocation3_spill] sm:$0xff] }
 0x638   : > { %14726 = vst [vmem:[#allocation59_spill] sm:$0xff] %v12487_v51  ;;  %14727 = vst [vmem:[#allocation35_spill] sm:$0xff] %v12490_v36  ;;  %v12493_v14 = vsel %vm5960_vm8, %v5968_v38, %v5970_v50  ;;  %8611 = vmatprep.mubr.msk.f32.mxu1 %vm980_vm1, %v3285_v29  ;;  %v3409_v49 = vrot.slane %v3285_v29, 1  ;;  %v4117_v26 = vrot.slane %v3285_v29, 2  ;;  %v6399_v33 = vrot.slane %v3285_v29, 6  ;;  %v3175_v17 = vpop.permute.xlu1 %3174  ;;  %v14732_v36 = vld [vmem:[#allocation11_spill] sm:$0xff] }
 0x639   : > { %14728 = vst [vmem:[#allocation34_spill] sm:$0xff] %v12493_v14  ;;  %v4831_v62 = vrot.slane %v3285_v29, 3  ;;  %v2058_v39 = vmul.f32 %v10351_v52, %v14729_v15  ;;  %v2467_v23 = vadd.f32 %v14730_v22, %v2057_v2  ;;  %v5258_v21 = vrot.slane %v3285_v29, 4  ;;  %v14736_v15 = vld [vmem:[#allocation72_spill] sm:$0xff] }
 0x63a   : > { %v5972_v37 = vrot.slane %v3285_v29, 5  ;;  %v3286_v51 = vadd.f32 %v3175_v17, %v2876_v35  ;;  %v3410_v4 = vsel %vm3389_vm3, %v3407_v30, %v3409_v49  ;;  %v12501_v38 = vsel %vm4097_vm4, %v4115_v48, %v4117_v26  ;;  %v14737_v22 = vld [vmem:[#allocation92_spill] sm:$0xff]  ;;  %v12521_v17 = vpop.permute.xlu0 %2796 }
 0x63b   : > { %v12504_v14 = vsel %vm6387_vm7, %v6397_v0, %v6399_v33  ;;  %v2877_v10 = vadd.f32 %v14732_v36, %v2467_v23  ;;  %8547 = vmatmul.mubr.msk.f32.gmra.mrb[180].mxu0 %vm980_vm1, %v3410_v4  ;;  %v12509_v52 = vsel %vm4815_vm5, %v4829_v16, %v4831_v62  ;;  %v12512_v2 = vsel %vm5242_vm6, %v5256_v11, %v5258_v21 }
 0x63c   : > { %14731 = vst [vmem:[#allocation61_spill] sm:$0xff] %v12504_v14  ;;  %14733 = vst [vmem:[#allocation30_spill] sm:$0xff] %v12509_v52  ;;  %v12515_v35 = vsel %vm5960_vm8, %v5970_v50, %v5972_v37  ;;  %8612 = vmatmul.mubr.msk.f32.gmra.mrb[10].mxu1 %vm980_vm1, %v3286_v51  ;;  %v3411_v30 = vrot.slane %v3286_v51, 1  ;;  %v4119_v48 = vrot.slane %v3286_v51, 2  ;;  %v6401_v29 = vrot.slane %v3286_v51, 6  ;;  %v3177_v16 = vpop.permute.xlu1 %3176  ;;  %v14740_v14 = vld [vmem:[#allocation74_spill] sm:$0xff] }
 0x63d   : > { %14734 = vst [vmem:[#allocation42_spill] sm:$0xff] %v12512_v2  ;;  %14735 = vst [vmem:[#allocation45_spill] sm:$0xff] %v12515_v35  ;;  %v4833_v0 = vrot.slane %v3286_v51, 3  ;;  %v2059_v36 = vmul.f32 %v14560_v12, %v14736_v15  ;;  %v2468_v23 = vadd.f32 %v14737_v22, %v2058_v39  ;;  %v5260_v4 = vrot.slane %v3286_v51, 4  ;;  %v14745_v22 = vld [vmem:[#allocation95_spill] sm:$0xff] }
 0x63e   : > { %v5974_v11 = vrot.slane %v3286_v51, 5  ;;  %v3287_v2 = vadd.f32 %v3177_v16, %v2877_v10  ;;  %v3412_v50 = vsel %vm3389_vm3, %v3409_v49, %v3411_v30  ;;  %v12525_v35 = vsel %vm4097_vm4, %v4117_v26, %v4119_v48  ;;  %v14744_v51 = vld [vmem:[#allocation94_spill] sm:$0xff] }
 0x63f   : > { %14738 = vst [vmem:[#allocation65_spill] sm:$0xff] %v12525_v35  ;;  %v12528_v52 = vsel %vm6387_vm7, %v6399_v33, %v6401_v29  ;;  %v2060_v60 = vmul.f32 %v14567_v1, %v14740_v14  ;;  %8549 = vmatprep.mubr.msk.f32.mxu0 %vm980_vm1, %v3412_v50  ;;  %v12534_v12 = vsel %vm4815_vm5, %v4831_v62, %v4833_v0 }
 0x640   : > { %14739 = vst [vmem:[#allocation31_spill] sm:$0xff] %v12528_v52  ;;  %14741 = vst [vmem:[#allocation4_spill] sm:$0xff] %v12534_v12  ;;  %v12537_v39 = vsel %vm5242_vm6, %v5258_v21, %v5260_v4  ;;  %v12540_v10 = vsel %vm5960_vm8, %v5972_v37, %v5974_v11  ;;  %v2878_v49 = vadd.f32 %v14744_v51, %v2468_v23  ;;  %8614 = vmatprep.mubr.msk.f32.mxu1 %vm980_vm1, %v3287_v2  ;;  %v3179_v14 = vpop.permute.xlu1 %3178  ;;  %v14748_v23 = vld [vmem:[#allocation12_spill] sm:$0xff] }
 0x641   : > { %14742 = vst [vmem:[#allocation49_spill] sm:$0xff] %v12537_v39  ;;  %14743 = vst [vmem:[#allocation69_spill] sm:$0xff] %v12540_v10  ;;  %v3413_v26 = vrot.slane %v3287_v2, 1  ;;  %v4121_v33 = vrot.slane %v3287_v2, 2  ;;  %v6403_v15 = vrot.slane %v3287_v2, 6  ;;  %v2469_v1 = vadd.f32 %v14745_v22, %v2059_v36  ;;  %v12553_v10 = vpop.permute.xlu0 %2388 }
 0x642   : > { %v4835_v16 = vrot.slane %v3287_v2, 3  ;;  %v5262_v50 = vrot.slane %v3287_v2, 4  ;;  %v5976_v62 = vrot.slane %v3287_v2, 5  ;;  %v3288_v12 = vadd.f32 %v3179_v14, %v2878_v49 }
 0x643   : > { %v3414_v21 = vsel %vm3389_vm3, %v3411_v30, %v3413_v26  ;;  %v12547_v39 = vsel %vm4097_vm4, %v4119_v48, %v4121_v33  ;;  %v12550_v37 = vsel %vm6387_vm7, %v6401_v29, %v6403_v15  ;;  %v2879_v51 = vadd.f32 %v14748_v23, %v2469_v1  ;;  %v14752_v1 = vld [vmem:[#allocation79_spill] sm:$0xff]  ;;  %v14753_v23 = vld [vmem:[#allocation96_spill] sm:$0xff] }
 0x644   : > { %14746 = vst [vmem:[#allocation75_spill] sm:$0xff] %v12547_v39  ;;  %14747 = vst [vmem:[#allocation43_spill] sm:$0xff] %v12550_v37  ;;  %8550 = vmatmul.mubr.msk.f32.gmra.mrb[182].mxu0 %vm980_vm1, %v3414_v21  ;;  %v12557_v36 = vsel %vm4815_vm5, %v4833_v0, %v4835_v16  ;;  %v12560_v2 = vsel %vm5242_vm6, %v5260_v4, %v5262_v50  ;;  %v12563_v30 = vsel %vm5960_vm8, %v5974_v11, %v5976_v62  ;;  %v3181_v37 = vpop.permute.xlu1 %3180 }
 0x645   : > { %14749 = vst [vmem:[#allocation51_spill] sm:$0xff] %v12557_v36  ;;  %14750 = vst [vmem:[#allocation54_spill] sm:$0xff] %v12560_v2  ;;  %8615 = vmatmul.mubr.msk.f32.gmra.mrb[12].mxu1 %vm980_vm1, %v3288_v12  ;;  %v3415_v48 = vrot.slane %v3288_v12, 1  ;;  %v4123_v29 = vrot.slane %v3288_v12, 2  ;;  %v6405_v49 = vrot.slane %v3288_v12, 6  ;;  %v4837_v22 = vrot.slane %v3288_v12, 3  ;;  %v12577_v35 = vpop.permute.xlu0 %2798 }
 0x646   : > { %14751 = vst [vmem:[#allocation76_spill] sm:$0xff] %v12563_v30  ;;  %v2061_v14 = vmul.f32 %v14636_v44, %v14752_v1  ;;  %v2470_v21 = vadd.f32 %v14753_v23, %v2060_v60  ;;  %v5264_v0 = vrot.slane %v3288_v12, 4  ;;  %v5978_v36 = vrot.slane %v3288_v12, 5  ;;  %v14756_v2 = vld [vmem:[#allocation97_spill] sm:$0xff]  ;;  %v14761_v1 = vld [vmem:[#allocation98_spill] sm:$0xff] }
 0x647   : > { %v3289_v52 = vadd.f32 %v3181_v37, %v2879_v51  ;;  %v3416_v4 = vsel %vm3389_vm3, %v3413_v26, %v3415_v48  ;;  %v12571_v11 = vsel %vm4097_vm4, %v4121_v33, %v4123_v29  ;;  %v12574_v30 = vsel %vm6387_vm7, %v6403_v15, %v6405_v49  ;;  %v14760_v51 = vld [vmem:[#allocation7_spill] sm:$0xff] }
 0x648   : > { %14754 = vst [vmem:[#allocation57_spill] sm:$0xff] %v12571_v11  ;;  %14755 = vst [vmem:[#allocation60_spill] sm:$0xff] %v12574_v30  ;;  %v2880_v39 = vadd.f32 %v14756_v2, %v2470_v21  ;;  %8552 = vmatprep.mubr.msk.f32.mxu0 %vm980_vm1, %v3416_v4  ;;  %v12581_v60 = vsel %vm4815_vm5, %v4835_v16, %v4837_v22  ;;  %v12584_v44 = vsel %vm5242_vm6, %v5262_v50, %v5264_v0  ;;  %v3183_v21 = vpop.permute.xlu1 %3182 }
 0x649   : > { %14757 = vst [vmem:[#allocation78_spill] sm:$0xff] %v12581_v60  ;;  %14758 = vst [vmem:[#allocation80_spill] sm:$0xff] %v12584_v44  ;;  %v12587_v12 = vsel %vm5960_vm8, %v5976_v62, %v5978_v36  ;;  %8617 = vmatprep.mubr.msk.f32.mxu1 %vm980_vm1, %v3289_v52  ;;  %v3417_v26 = vrot.slane %v3289_v52, 1  ;;  %v4125_v33 = vrot.slane %v3289_v52, 2  ;;  %v6407_v15 = vrot.slane %v3289_v52, 6  ;;  %v14763_v44 = vld [vmem:[#allocation99_spill] sm:$0xff]  ;;  %v12601_v11 = vpop.permute.xlu0 %2390 }
 0x64a   : > { %14759 = vst [vmem:[#allocation82_spill] sm:$0xff] %v12587_v12  ;;  %v4839_v37 = vrot.slane %v3289_v52, 3  ;;  %v2062_v2 = vmul.f32 %v14638_v45, %v14760_v51  ;;  %v2471_v23 = vadd.f32 %v14761_v1, %v2061_v14  ;;  %v5266_v16 = vrot.slane %v3289_v52, 4 }
 0x64b   : > { %v5980_v4 = vrot.slane %v3289_v52, 5  ;;  %v3290_v60 = vadd.f32 %v3183_v21, %v2880_v39  ;;  %v3418_v50 = vsel %vm3389_vm3, %v3415_v48, %v3417_v26  ;;  %v12595_v62 = vsel %vm4097_vm4, %v4123_v29, %v4125_v33 }
 0x64c   : > { %v12598_v12 = vsel %vm6387_vm7, %v6405_v49, %v6407_v15  ;;  %v2881_v30 = vadd.f32 %v14763_v44, %v2471_v23  ;;  %8553 = vmatmul.mubr.msk.f32.gmra.mrb[184].mxu0 %vm980_vm1, %v3418_v50  ;;  %v12605_v45 = vsel %vm4815_vm5, %v4837_v22, %v4839_v37  ;;  %v12608_v52 = vsel %vm5242_vm6, %v5264_v0, %v5266_v16  ;;  %v14767_v44 = vld [vmem:[#allocation101_spill] sm:$0xff]  ;;  %v3185_v1 = vpop.permute.xlu1 %3184 }
 0x64d   : > { %14762 = vst [vmem:[#allocation81_spill] sm:$0xff] %v12598_v12  ;;  %14764 = vst [vmem:[#allocation83_spill] sm:$0xff] %v12605_v45  ;;  %v12611_v39 = vsel %vm5960_vm8, %v5978_v36, %v5980_v4  ;;  %8618 = vmatmul.mubr.msk.f32.gmra.mrb[14].mxu1 %vm980_vm1, %v3290_v60  ;;  %v3419_v48 = vrot.slane %v3290_v60, 1  ;;  %v4127_v29 = vrot.slane %v3290_v60, 2  ;;  %v6409_v49 = vrot.slane %v3290_v60, 6 }
 0x64e   : > { %14765 = vst [vmem:[#allocation85_spill] sm:$0xff] %v12608_v52  ;;  %14766 = vst [vmem:[#allocation86_spill] sm:$0xff] %v12611_v39  ;;  %v4841_v14 = vrot.slane %v3290_v60, 3  ;;  %v2472_v51 = vadd.f32 %v14767_v44, %v2062_v2  ;;  %v5268_v23 = vrot.slane %v3290_v60, 4  ;;  %v5982_v21 = vrot.slane %v3290_v60, 5  ;;  %v14769_v39 = vld [vmem:[#allocation14_spill] sm:$0xff]  ;;  %v12634_v44 = vpop.permute.xlu0 %2800 }
 0x64f   : > { %v3291_v50 = vadd.f32 %v3185_v1, %v2881_v30  ;;  %v3420_v22 = vsel %vm3389_vm3, %v3417_v26, %v3419_v48  ;;  %v12617_v0 = vsel %vm4097_vm4, %v4125_v33, %v4127_v29  ;;  %v12620_v36 = vsel %vm6387_vm7, %v6407_v15, %v6409_v49 }
 0x650   : > { %14768 = vst [vmem:[#allocation8_spill] sm:$0xff] %v12620_v36  ;;  %v2882_v52 = vadd.f32 %v14769_v39, %v2472_v51  ;;  %8555 = vmatprep.mubr.msk.f32.mxu0 %vm980_vm1, %v3420_v22  ;;  %v12625_v45 = vsel %vm4815_vm5, %v4839_v37, %v4841_v14  ;;  %v12628_v2 = vsel %vm5242_vm6, %v5266_v16, %v5268_v23  ;;  %v3187_v39 = vpop.permute.xlu1 %3186 }
 0x651   : > { %14770 = vst [vmem:[#allocation62_spill] sm:$0xff] %v12625_v45  ;;  %14771 = vst [vmem:[#allocation9_spill] sm:$0xff] %v12628_v2  ;;  %v12631_v30 = vsel %vm5960_vm8, %v5980_v4, %v5982_v21  ;;  %8620 = vmatprep.mubr.msk.f32.mxu1 %vm980_vm1, %v3291_v50  ;;  %v3421_v60 = vrot.slane %v3291_v50, 1  ;;  %v4129_v26 = vrot.slane %v3291_v50, 2  ;;  %v6411_v33 = vrot.slane %v3291_v50, 6 }
 0x652   : > { %14772 = vst [vmem:[#allocation87_spill] sm:$0xff] %v12631_v30  ;;  %v4843_v15 = vrot.slane %v3291_v50, 3  ;;  %v5270_v51 = vrot.slane %v3291_v50, 4  ;;  %v5984_v1 = vrot.slane %v3291_v50, 5  ;;  %v3292_v22 = vadd.f32 %v3187_v39, %v2882_v52 }
 0x653   : > { %v3422_v37 = vsel %vm3389_vm3, %v3419_v48, %v3421_v60  ;;  %v12638_v16 = vsel %vm4097_vm4, %v4127_v29, %v4129_v26  ;;  %v12642_v4 = vsel %vm6387_vm7, %v6409_v49, %v6411_v33 }
 0x654   : > { %8556 = vmatmul.mubr.msk.f32.gmra.mrb[186].mxu0 %vm980_vm1, %v3422_v37  ;;  %14773 = vst [vmem:[#allocation25_spill] sm:$0xff] %v12642_v4  ;;  %v12645_v30 = vsel %vm4815_vm5, %v4841_v14, %v4843_v15  ;;  %v12648_v2 = vsel %vm5242_vm6, %v5268_v23, %v5270_v51  ;;  %v12651_v45 = vsel %vm5960_vm8, %v5982_v21, %v5984_v1  ;;  %v3423_v52 = vrot.slane %v3292_v22, 1  ;;  %v3189_v39 = vpop.permute.xlu1 %3188  ;;  %v12659_v23 = vpop.permute.xlu0 %2392 }
 0x655   : > { %14774 = vst [vmem:[#allocation89_spill] sm:$0xff] %v12645_v30  ;;  %14775 = vst [vmem:[#allocation66_spill] sm:$0xff] %v12648_v2  ;;  %8621 = vmatmul.mubr.msk.f32.gmra.mrb[16].mxu1 %vm980_vm1, %v3292_v22  ;;  %v4131_v48 = vrot.slane %v3292_v22, 2  ;;  %v6413_v29 = vrot.slane %v3292_v22, 6  ;;  %v4845_v50 = vrot.slane %v3292_v22, 3  ;;  %v5272_v37 = vrot.slane %v3292_v22, 4 }
 0x656   : > { %14776 = vst [vmem:[#allocation90_spill] sm:$0xff] %v12651_v45  ;;  %v5986_v36 = vrot.slane %v3292_v22, 5  ;;  %v3293_v49 = vadd.f32 %v3189_v39, %v12008_v8  ;;  %v3424_v14 = vsel %vm3389_vm3, %v3421_v60, %v3423_v52 }
 0x657   : > { %v12657_v30 = vsel %vm4097_vm4, %v4129_v26, %v4131_v48  ;;  %8558 = vmatprep.mubr.msk.f32.mxu0 %vm980_vm1, %v3424_v14  ;;  %v12663_v21 = vsel %vm6387_vm7, %v6411_v33, %v6413_v29  ;;  %v12666_v45 = vsel %vm4815_vm5, %v4843_v15, %v4845_v50  ;;  %v12669_v2 = vsel %vm5242_vm6, %v5270_v51, %v5272_v37 }
 0x658   : > { %14777 = vst [vmem:[#allocation10_spill] sm:$0xff] %v12663_v21  ;;  %14778 = vst [vmem:[#allocation3_spill] sm:$0xff] %v12666_v45  ;;  %v12672_v8 = vsel %vm5960_vm8, %v5984_v1, %v5986_v36  ;;  %8623 = vmatprep.mubr.msk.f32.mxu1 %vm980_vm1, %v3293_v49  ;;  %v3425_v60 = vrot.slane %v3293_v49, 1  ;;  %v4133_v26 = vrot.slane %v3293_v49, 2  ;;  %v6415_v22 = vrot.slane %v3293_v49, 6  ;;  %v3191_v4 = vpop.permute.xlu1 %3190  ;;  %v12683_v1 = vpop.permute.xlu0 %2802 }
 0x659   : > { %14779 = vst [vmem:[#allocation91_spill] sm:$0xff] %v12669_v2  ;;  %14780 = vst [vmem:[#allocation11_spill] sm:$0xff] %v12672_v8  ;;  %v4847_v39 = vrot.slane %v3293_v49, 3  ;;  %v5274_v14 = vrot.slane %v3293_v49, 4  ;;  %v5988_v12 = vrot.slane %v3293_v49, 5  ;;  %v3294_v33 = vadd.f32 %v3191_v4, %v12040_v43 }
 0x65a   : > { %v3426_v15 = vsel %vm3389_vm3, %v3423_v52, %v3425_v60  ;;  %v12678_v45 = vsel %vm4097_vm4, %v4131_v48, %v4133_v26  ;;  %v12681_v51 = vsel %vm6387_vm7, %v6413_v29, %v6415_v22 }
 0x65b   : > { %14781 = vst [vmem:[#allocation72_spill] sm:$0xff] %v12678_v45  ;;  %14782 = vst [vmem:[#allocation92_spill] sm:$0xff] %v12681_v51  ;;  %8559 = vmatmul.mubr.msk.f32.gmra.mrb[188].mxu0 %vm980_vm1, %v3426_v15  ;;  %v12687_v8 = vsel %vm4815_vm5, %v4845_v50, %v4847_v39  ;;  %v12690_v2 = vsel %vm5242_vm6, %v5272_v37, %v5274_v14  ;;  %v12693_v43 = vsel %vm5960_vm8, %v5986_v36, %v5988_v12  ;;  %v14798_v45 = vld [vmem:[#allocation15_spill] sm:$0xff] }
 0x65c   : > { %14783 = vst [vmem:[#allocation74_spill] sm:$0xff] %v12687_v8  ;;  %14784 = vst [vmem:[#allocation94_spill] sm:$0xff] %v12690_v2  ;;  %8624 = vmatmul.mubr.msk.f32.gmra.mrb[18].mxu1 %vm980_vm1, %v3294_v33  ;;  %v3427_v4 = vrot.slane %v3294_v33, 1  ;;  %v4135_v52 = vrot.slane %v3294_v33, 2  ;;  %v6417_v48 = vrot.slane %v3294_v33, 6  ;;  %v4849_v29 = vrot.slane %v3294_v33, 3  ;;  %v3193_v49 = vpop.permute.xlu1 %3192  ;;  %v12704_v36 = vpop.permute.xlu0 %2394 }
 0x65d   : > { %14785 = vst [vmem:[#allocation95_spill] sm:$0xff] %v12693_v43  ;;  %v5276_v51 = vrot.slane %v3294_v33, 4  ;;  %v5990_v21 = vrot.slane %v3294_v33, 5  ;;  %v3295_v15 = vadd.f32 %v3193_v49, %v12059_v32 }
 0x65e   : > { %v3428_v50 = vsel %vm3389_vm3, %v3425_v60, %v3427_v4  ;;  %v12699_v8 = vsel %vm4097_vm4, %v4133_v26, %v4135_v52  ;;  %v12702_v37 = vsel %vm6387_vm7, %v6415_v22, %v6417_v48  ;;  %v12708_v43 = vsel %vm4815_vm5, %v4847_v39, %v4849_v29 }
 0x65f   : > { %14786 = vst [vmem:[#allocation12_spill] sm:$0xff] %v12699_v8  ;;  %14787 = vst [vmem:[#allocation79_spill] sm:$0xff] %v12702_v37  ;;  %8561 = vmatprep.mubr.msk.f32.mxu0 %vm980_vm1, %v3428_v50  ;;  %v12711_v2 = vsel %vm5242_vm6, %v5274_v14, %v5276_v51  ;;  %v12714_v32 = vsel %vm5960_vm8, %v5988_v12, %v5990_v21  ;;  %8626 = vmatprep.mubr.msk.f32.mxu1 %vm980_vm1, %v3295_v15  ;;  %v3429_v60 = vrot.slane %v3295_v15, 1  ;;  %v14793_v12 = vld [vmem:[#allocation13_spill] sm:$0xff] }
 0x660   : > { %14788 = vst [vmem:[#allocation96_spill] sm:$0xff] %v12708_v43  ;;  %14789 = vst [vmem:[#allocation97_spill] sm:$0xff] %v12711_v2  ;;  %v4137_v26 = vrot.slane %v3295_v15, 2  ;;  %v6419_v33 = vrot.slane %v3295_v15, 6  ;;  %v4851_v22 = vrot.slane %v3295_v15, 3  ;;  %v3195_v49 = vpop.permute.xlu1 %3194  ;;  %v5278_v37 = vrot.slane %v3295_v15, 4 }
 0x661   : > { %14790 = vst [vmem:[#allocation7_spill] sm:$0xff] %v12714_v32  ;;  %v5992_v8 = vrot.slane %v3295_v15, 5  ;;  %v3296_v50 = vadd.f32 %v3195_v49, %v12088_v9  ;;  %v3430_v39 = vsel %vm3389_vm3, %v3427_v4, %v3429_v60  ;;  %v2068_v32 = vmul.f32 %v14603_v47, %v14793_v12  ;;  %v12741_v12 = vpop.permute.xlu0 %2396 }
 0x662   : > { %v12720_v43 = vsel %vm4097_vm4, %v4135_v52, %v4137_v26  ;;  %v12723_v14 = vsel %vm6387_vm7, %v6417_v48, %v6419_v33  ;;  %8562 = vmatmul.mubr.msk.f32.gmra.mrb[190].mxu0 %vm980_vm1, %v3430_v39  ;;  %v12729_v2 = vsel %vm4815_vm5, %v4849_v29, %v4851_v22  ;;  %v12732_v15 = vsel %vm5242_vm6, %v5276_v51, %v5278_v37 }
 0x663   : > { %14791 = vst [vmem:[#allocation98_spill] sm:$0xff] %v12720_v43  ;;  %14792 = vst [vmem:[#allocation99_spill] sm:$0xff] %v12723_v14  ;;  %v12735_v9 = vsel %vm5960_vm8, %v5990_v21, %v5992_v8  ;;  %8627 = vmatmul.mubr.msk.f32.gmra.mrb[20].mxu1 %vm980_vm1, %v3296_v50  ;;  %v3431_v4 = vrot.slane %v3296_v50, 1  ;;  %v4139_v52 = vrot.slane %v3296_v50, 2  ;;  %v6421_v48 = vrot.slane %v3296_v50, 6  ;;  %v14797_v14 = vld [vmem:[#allocation100_spill] sm:$0xff] }
 0x664   : > { %14794 = vst [vmem:[#allocation101_spill] sm:$0xff] %v12729_v2  ;;  %14795 = vst [vmem:[#allocation14_spill] sm:$0xff] %v12732_v15  ;;  %v4853_v49 = vrot.slane %v3296_v50, 3  ;;  %v2069_v47 = vmul.f32 %v14606_v53, %v14797_v14  ;;  %v2478_v39 = vadd.f32 %v12264_v13, %v2068_v32  ;;  %v3197_v29 = vpop.permute.xlu1 %3196  ;;  %v5280_v2 = vrot.slane %v3296_v50, 4 }
 0x665   : > { %14796 = vst [vmem:[#allocation13_spill] sm:$0xff] %v12735_v9  ;;  %v5994_v51 = vrot.slane %v3296_v50, 5  ;;  %v3297_v15 = vadd.f32 %v3197_v29, %v12106_v3  ;;  %v3432_v21 = vsel %vm3389_vm3, %v3429_v60, %v3431_v4  ;;  %v12746_v9 = vsel %vm4097_vm4, %v4137_v26, %v4139_v52 }
 0x666   : > { %v12749_v43 = vsel %vm6387_vm7, %v6419_v33, %v6421_v48  ;;  %v2070_v53 = vmul.f32 %v14613_v24, %v14798_v45  ;;  %8564 = vmatprep.mubr.msk.f32.mxu0 %vm980_vm1, %v3432_v21  ;;  %v12755_v13 = vsel %vm4815_vm5, %v4851_v22, %v4853_v49  ;;  %v12758_v32 = vsel %vm5242_vm6, %v5278_v37, %v5280_v2  ;;  %v12766_v45 = vpop.permute.xlu0 %2806 }
 0x667   : > { %14799 = vst [vmem:[#allocation100_spill] sm:$0xff] %v12755_v13  ;;  %14800 = vst [vmem:[#allocation15_spill] sm:$0xff] %v12758_v32  ;;  %v12761_v3 = vsel %vm5960_vm8, %v5992_v8, %v5994_v51  ;;  %v2888_v60 = vadd.f32 %v12276_v28, %v2478_v39  ;;  %8629 = vmatprep.mubr.msk.f32.mxu1 %vm980_vm1, %v3297_v15  ;;  %v3433_v26 = vrot.slane %v3297_v15, 1  ;;  %v4141_v33 = vrot.slane %v3297_v15, 2  ;;  %v14802_v39 = vld [vmem:[#allocation102_spill] sm:$0xff] }
 0x668   : > { %14801 = vst [vmem:[#allocation103_spill] sm:$0xff] %v12761_v3  ;;  %v6423_v50 = vrot.slane %v3297_v15, 6  ;;  %v2479_v24 = vadd.f32 %v12309_v57, %v2069_v47  ;;  %v3199_v14 = vpop.permute.xlu1 %3198  ;;  %v4855_v22 = vrot.slane %v3297_v15, 3  ;;  %v5282_v29 = vrot.slane %v3297_v15, 4 }
 0x669   : > { %v5996_v21 = vrot.slane %v3297_v15, 5  ;;  %v3298_v37 = vadd.f32 %v3199_v14, %v2888_v60  ;;  %v3434_v32 = vsel %vm3389_vm3, %v3431_v4, %v3433_v26  ;;  %v12770_v8 = vsel %vm4097_vm4, %v4139_v52, %v4141_v33 }
 0x66a   : > { %v12773_v28 = vsel %vm6387_vm7, %v6421_v48, %v6423_v50  ;;  %v2071_v3 = vmul.f32 %v14615_v6, %v14802_v39  ;;  %8565 = vmatmul.mubr.msk.f32.gmra.mrb[192].mxu0 %vm980_vm1, %v3434_v32  ;;  %v12779_v57 = vsel %vm4815_vm5, %v4853_v49, %v4855_v22  ;;  %v12782_v47 = vsel %vm5242_vm6, %v5280_v2, %v5282_v29  ;;  %v12790_v14 = vpop.permute.xlu0 %2398 }
 0x66b   : > { %14803 = vst [vmem:[#allocation102_spill] sm:$0xff] %v12779_v57  ;;  %14804 = vst [vmem:[#allocation104_spill] sm:$0xff] %v12782_v47  ;;  %v12785_v15 = vsel %vm5960_vm8, %v5994_v51, %v5996_v21  ;;  %v2889_v4 = vadd.f32 %v12347_v31, %v2479_v24  ;;  %8630 = vmatmul.mubr.msk.f32.gmra.mrb[22].mxu1 %vm980_vm1, %v3298_v37  ;;  %v3435_v52 = vrot.slane %v3298_v37, 1  ;;  %v4143_v48 = vrot.slane %v3298_v37, 2 }
 0x66c   : > { %14805 = vst [vmem:[#allocation105_spill] sm:$0xff] %v12785_v15  ;;  %v6425_v60 = vrot.slane %v3298_v37, 6  ;;  %v2480_v6 = vadd.f32 %v12363_v27, %v2070_v53  ;;  %v3201_v32 = vpop.permute.xlu1 %3200  ;;  %v4857_v49 = vrot.slane %v3298_v37, 3  ;;  %v5284_v39 = vrot.slane %v3298_v37, 4 }
 0x66d   : > { %v5998_v57 = vrot.slane %v3298_v37, 5  ;;  %v3299_v2 = vadd.f32 %v3201_v32, %v2889_v4  ;;  %v3436_v47 = vsel %vm3389_vm3, %v3433_v26, %v3435_v52  ;;  %v12794_v51 = vsel %vm4097_vm4, %v4141_v33, %v4143_v48  ;;  %v14809_v32 = vld [vmem:[#allocation16_spill] sm:$0xff] }
 0x66e   : > { %v12797_v31 = vsel %vm6387_vm7, %v6423_v50, %v6425_v60  ;;  %v2890_v24 = vadd.f32 %v12398_v25, %v2480_v6  ;;  %8567 = vmatprep.mubr.msk.f32.mxu0 %vm980_vm1, %v3436_v47  ;;  %v12802_v27 = vsel %vm4815_vm5, %v4855_v22, %v4857_v49  ;;  %v12805_v53 = vsel %vm5242_vm6, %v5282_v29, %v5284_v39  ;;  %v12822_v13 = vpop.permute.xlu0 %2400 }
 0x66f   : > { %14806 = vst [vmem:[#allocation106_spill] sm:$0xff] %v12802_v27  ;;  %14807 = vst [vmem:[#allocation107_spill] sm:$0xff] %v12805_v53  ;;  %v12808_v37 = vsel %vm5960_vm8, %v5996_v21, %v5998_v57  ;;  %8632 = vmatprep.mubr.msk.f32.mxu1 %vm980_vm1, %v3299_v2  ;;  %v3437_v26 = vrot.slane %v3299_v2, 1  ;;  %v4145_v33 = vrot.slane %v3299_v2, 2  ;;  %v6427_v4 = vrot.slane %v3299_v2, 6 }
 0x670   : > { %14808 = vst [vmem:[#allocation108_spill] sm:$0xff] %v12808_v37  ;;  %v4859_v50 = vrot.slane %v3299_v2, 3  ;;  %v2072_v25 = vmul.f32 %v14618_v56, %v14809_v32  ;;  %v2481_v47 = vadd.f32 %v12430_v42, %v2071_v3  ;;  %v3203_v6 = vpop.permute.xlu1 %3202  ;;  %v5286_v22 = vrot.slane %v3299_v2, 4 }
 0x671   : > { %v6000_v15 = vrot.slane %v3299_v2, 5  ;;  %v3300_v27 = vadd.f32 %v3203_v6, %v2890_v24  ;;  %v3438_v29 = vsel %vm3389_vm3, %v3435_v52, %v3437_v26  ;;  %v12816_v21 = vsel %vm4097_vm4, %v4143_v48, %v4145_v33 }
 0x672   : > { %v12819_v37 = vsel %vm6387_vm7, %v6425_v60, %v6427_v4  ;;  %v2891_v53 = vadd.f32 %v12457_v59, %v2481_v47  ;;  %8568 = vmatmul.mubr.msk.f32.gmra.mrb[194].mxu0 %vm980_vm1, %v3438_v29  ;;  %v12826_v56 = vsel %vm4815_vm5, %v4857_v49, %v4859_v50  ;;  %v12829_v42 = vsel %vm5242_vm6, %v5284_v39, %v5286_v22  ;;  %v14813_v59 = vld [vmem:[#allocation17_spill] sm:$0xff] }
 0x673   : > { %14810 = vst [vmem:[#allocation16_spill] sm:$0xff] %v12826_v56  ;;  %14811 = vst [vmem:[#allocation109_spill] sm:$0xff] %v12829_v42  ;;  %v12832_v3 = vsel %vm5960_vm8, %v5998_v57, %v6000_v15  ;;  %8633 = vmatmul.mubr.msk.f32.gmra.mrb[24].mxu1 %vm980_vm1, %v3300_v27  ;;  %v3439_v52 = vrot.slane %v3300_v27, 1  ;;  %v4147_v48 = vrot.slane %v3300_v27, 2  ;;  %v6429_v60 = vrot.slane %v3300_v27, 6  ;;  %v12846_v56 = vpop.permute.xlu0 %2810 }
 0x674   : > { %14812 = vst [vmem:[#allocation110_spill] sm:$0xff] %v12832_v3  ;;  %v4861_v2 = vrot.slane %v3300_v27, 3  ;;  %v2073_v24 = vmul.f32 %v14619_v54, %v14813_v59  ;;  %v2482_v32 = vadd.f32 %v12483_v40, %v2072_v25  ;;  %v3205_v47 = vpop.permute.xlu1 %3204  ;;  %v5288_v49 = vrot.slane %v3300_v27, 4 }
 0x675   : > { %v6002_v6 = vrot.slane %v3300_v27, 5  ;;  %v3301_v29 = vadd.f32 %v3205_v47, %v2891_v53  ;;  %v3440_v39 = vsel %vm3389_vm3, %v3437_v26, %v3439_v52  ;;  %v12840_v57 = vsel %vm4097_vm4, %v4145_v33, %v4147_v48 }
 0x676   : > { %v12843_v3 = vsel %vm6387_vm7, %v6427_v4, %v6429_v60  ;;  %v2892_v42 = vadd.f32 %v12521_v17, %v2482_v32  ;;  %8570 = vmatprep.mubr.msk.f32.mxu0 %vm980_vm1, %v3440_v39  ;;  %v12850_v54 = vsel %vm4815_vm5, %v4859_v50, %v4861_v2  ;;  %v12853_v40 = vsel %vm5242_vm6, %v5286_v22, %v5288_v49  ;;  %v14817_v17 = vld [vmem:[#allocation2_spill] sm:$0xff] }
 0x677   : > { %14814 = vst [vmem:[#allocation17_spill] sm:$0xff] %v12850_v54  ;;  %14815 = vst [vmem:[#allocation111_spill] sm:$0xff] %v12853_v40  ;;  %v12856_v27 = vsel %vm5960_vm8, %v6000_v15, %v6002_v6  ;;  %8635 = vmatprep.mubr.msk.f32.mxu1 %vm980_vm1, %v3301_v29  ;;  %v3441_v53 = vrot.slane %v3301_v29, 1  ;;  %v4149_v26 = vrot.slane %v3301_v29, 2  ;;  %v6431_v33 = vrot.slane %v3301_v29, 6 }
 0x678   : > { %14816 = vst [vmem:[#allocation112_spill] sm:$0xff] %v12856_v27  ;;  %v4863_v4 = vrot.slane %v3301_v29, 3  ;;  %v2074_v25 = vmul.f32 %v14623_v41, %v14817_v17  ;;  %v2483_v59 = vadd.f32 %v12553_v10, %v2073_v24  ;;  %v3207_v32 = vpop.permute.xlu1 %3206  ;;  %v5290_v50 = vrot.slane %v3301_v29, 4 }
 0x679   : > { %v6004_v47 = vrot.slane %v3301_v29, 5  ;;  %v3302_v39 = vadd.f32 %v3207_v32, %v2892_v42  ;;  %v3442_v22 = vsel %vm3389_vm3, %v3439_v52, %v3441_v53  ;;  %v12864_v15 = vsel %vm4097_vm4, %v4147_v48, %v4149_v26  ;;  %v14821_v29 = vld [vmem:[#allocation18_spill] sm:$0xff] }
 0x67a   : > { %v12867_v27 = vsel %vm6387_vm7, %v6429_v60, %v6431_v33  ;;  %v2893_v40 = vadd.f32 %v12577_v35, %v2483_v59  ;;  %8571 = vmatmul.mubr.msk.f32.gmra.mrb[196].mxu0 %vm980_vm1, %v3442_v22  ;;  %v12872_v41 = vsel %vm4815_vm5, %v4861_v2, %v4863_v4  ;;  %v12875_v10 = vsel %vm5242_vm6, %v5288_v49, %v5290_v50  ;;  %v12884_v59 = vpop.permute.xlu0 %2402 }
 0x67b   : > { %14818 = vst [vmem:[#allocation2_spill] sm:$0xff] %v12872_v41  ;;  %14819 = vst [vmem:[#allocation113_spill] sm:$0xff] %v12875_v10  ;;  %v12878_v42 = vsel %vm5960_vm8, %v6002_v6, %v6004_v47  ;;  %8636 = vmatmul.mubr.msk.f32.gmra.mrb[26].mxu1 %vm980_vm1, %v3302_v39  ;;  %v3443_v52 = vrot.slane %v3302_v39, 1  ;;  %v4151_v48 = vrot.slane %v3302_v39, 2  ;;  %v6433_v24 = vrot.slane %v3302_v39, 6 }
 0x67c   : > { %14820 = vst [vmem:[#allocation114_spill] sm:$0xff] %v12878_v42  ;;  %v4865_v60 = vrot.slane %v3302_v39, 3  ;;  %v2075_v35 = vmul.f32 %v14625_v58, %v14821_v29  ;;  %v2484_v17 = vadd.f32 %v12601_v11, %v2074_v25  ;;  %v3209_v2 = vpop.permute.xlu1 %3208  ;;  %v5292_v32 = vrot.slane %v3302_v39, 4 }
 0x67d   : > { %v6006_v49 = vrot.slane %v3302_v39, 5  ;;  %v3303_v22 = vadd.f32 %v3209_v2, %v2893_v40  ;;  %v3444_v6 = vsel %vm3389_vm3, %v3441_v53, %v3443_v52  ;;  %v12888_v42 = vsel %vm4097_vm4, %v4149_v26, %v4151_v48 }
 0x67e   : > { %v12891_v10 = vsel %vm6387_vm7, %v6431_v33, %v6433_v24  ;;  %v2894_v41 = vadd.f32 %v12634_v44, %v2484_v17  ;;  %8573 = vmatprep.mubr.msk.f32.mxu0 %vm980_vm1, %v3444_v6  ;;  %v12896_v58 = vsel %vm4815_vm5, %v4863_v4, %v4865_v60  ;;  %v12899_v11 = vsel %vm5242_vm6, %v5290_v50, %v5292_v32  ;;  %v12906_v44 = vpop.permute.xlu0 %2812 }
 0x67f   : > { %14822 = vst [vmem:[#allocation18_spill] sm:$0xff] %v12896_v58  ;;  %14823 = vst [vmem:[#allocation115_spill] sm:$0xff] %v12899_v11  ;;  %v12902_v40 = vsel %vm5960_vm8, %v6004_v47, %v6006_v49  ;;  %8638 = vmatprep.mubr.msk.f32.mxu1 %vm980_vm1, %v3303_v22  ;;  %v3445_v53 = vrot.slane %v3303_v22, 1  ;;  %v4153_v26 = vrot.slane %v3303_v22, 2  ;;  %v6435_v25 = vrot.slane %v3303_v22, 6 }
 0x680   : > { %14824 = vst [vmem:[#allocation116_spill] sm:$0xff] %v12902_v40  ;;  %v4867_v33 = vrot.slane %v3303_v22, 3  ;;  %v2485_v39 = vadd.f32 %v12659_v23, %v2075_v35  ;;  %v3211_v29 = vpop.permute.xlu1 %3210  ;;  %v5294_v17 = vrot.slane %v3303_v22, 4  ;;  %v6008_v4 = vrot.slane %v3303_v22, 5 }
 0x681   : > { %v3304_v2 = vadd.f32 %v3211_v29, %v2894_v41  ;;  %v3446_v50 = vsel %vm3389_vm3, %v3443_v52, %v3445_v53  ;;  %v12910_v6 = vsel %vm4097_vm4, %v4151_v48, %v4153_v26  ;;  %v12913_v47 = vsel %vm6387_vm7, %v6433_v24, %v6435_v25  ;;  %v14828_v29 = vld [vmem:[#allocation39_spill] sm:$0xff] }
 0x682   : > { %v2895_v40 = vadd.f32 %v12683_v1, %v2485_v39  ;;  %8574 = vmatmul.mubr.msk.f32.gmra.mrb[198].mxu0 %vm980_vm1, %v3446_v50  ;;  %v12918_v23 = vsel %vm4815_vm5, %v4865_v60, %v4867_v33  ;;  %v12921_v35 = vsel %vm5242_vm6, %v5292_v32, %v5294_v17  ;;  %v12924_v41 = vsel %vm5960_vm8, %v6006_v49, %v6008_v4 }
 0x683   : > { %14825 = vst [vmem:[#allocation117_spill] sm:$0xff] %v12918_v23  ;;  %14826 = vst [vmem:[#allocation118_spill] sm:$0xff] %v12921_v35  ;;  %8639 = vmatmul.mubr.msk.f32.gmra.mrb[28].mxu1 %vm980_vm1, %v3304_v2  ;;  %v3447_v52 = vrot.slane %v3304_v2, 1  ;;  %v4155_v48 = vrot.slane %v3304_v2, 2  ;;  %v6437_v22 = vrot.slane %v3304_v2, 6  ;;  %v4869_v24 = vrot.slane %v3304_v2, 3 }
 0x684   : > { %14827 = vst [vmem:[#allocation119_spill] sm:$0xff] %v12924_v41  ;;  %v2076_v1 = vmul.f32 %v14630_v63, %v14828_v29  ;;  %v3213_v39 = vpop.permute.xlu1 %3212  ;;  %v2642_v50 = vpop.permute.xlu0 %2641  ;;  %v5296_v11 = vrot.slane %v3304_v2, 4  ;;  %v6010_v60 = vrot.slane %v3304_v2, 5 }
 0x685   : > { %v3305_v23 = vadd.f32 %v3213_v39, %v2895_v40  ;;  %v2696_v32 = vmul.f32 %v14715_v61, %v2642_v50  ;;  %v3448_v35 = vsel %vm3389_vm3, %v3445_v53, %v3447_v52  ;;  %v12932_v49 = vsel %vm4097_vm4, %v4153_v26, %v4155_v48 }
 0x686   : > { %8576 = vmatprep.mubr.msk.f32.mxu0 %vm980_vm1, %v3448_v35  ;;  %v12936_v41 = vsel %vm6387_vm7, %v6435_v25, %v6437_v22  ;;  %v12939_v58 = vsel %vm4815_vm5, %v4867_v33, %v4869_v24  ;;  %v12942_v63 = vsel %vm5242_vm6, %v5294_v17, %v5296_v11  ;;  %v12945_v40 = vsel %vm5960_vm8, %v6008_v4, %v6010_v60 }
 0x687   : > { %14829 = vst [vmem:[#allocation39_spill] sm:$0xff] %v12936_v41  ;;  %14830 = vst [vmem:[#allocation120_spill] sm:$0xff] %v12939_v58  ;;  %8641 = vmatprep.mubr.msk.f32.mxu1 %vm980_vm1, %v3305_v23  ;;  %2814 = vrot.lane.b32.xlu1 %v2696_v32, %s10158_s11  ;;  %v3449_v53 = vrot.slane %v3305_v23, 1  ;;  %v4157_v26 = vrot.slane %v3305_v23, 2  ;;  %v6439_v2 = vrot.slane %v3305_v23, 6  ;;  %v4871_v35 = vrot.slane %v3305_v23, 3 }
 0x688   : > { %14831 = vst [vmem:[#allocation121_spill] sm:$0xff] %v12942_v63  ;;  %14832 = vst [vmem:[#allocation122_spill] sm:$0xff] %v12945_v40  ;;  %v2805_v29 = vpop.permute.xlu1 %2804  ;;  %v5298_v25 = vrot.slane %v3305_v23, 4  ;;  %v6012_v39 = vrot.slane %v3305_v23, 5  ;;  %v2486_v33 = vadd.f32 %v12704_v36, %v2076_v1  ;;  %v14834_v32 = vld [vmem:[#allocation19_spill] sm:$0xff] }
 0x689   : > { %v12950_v50 = vpop.permute.xlu0 %2022  ;;  %v3450_v17 = vsel %vm3389_vm3, %v3447_v52, %v3449_v53  ;;  %v12954_v4 = vsel %vm4097_vm4, %v4155_v48, %v4157_v26  ;;  %v12957_v40 = vsel %vm6387_vm7, %v6437_v22, %v6439_v2  ;;  %v2077_v63 = vmul.f32 %v14632_v20, %v14834_v32  ;;  %v14838_v20 = vld [vmem:[#allocation26_spill] sm:$0xff] }
 0x68a   : > { %14833 = vst [vmem:[#allocation123_spill] sm:$0xff] %v12957_v40  ;;  %8577 = vmatmul.mubr.msk.f32.gmra.mrb[200].mxu0 %vm980_vm1, %v3450_v17  ;;  %v12963_v58 = vsel %vm4815_vm5, %v4869_v24, %v4871_v35  ;;  %v12966_v36 = vsel %vm5242_vm6, %v5296_v11, %v5298_v25  ;;  %v12969_v23 = vsel %vm5960_vm8, %v6010_v60, %v6012_v39 }
 0x68b   : > { %14835 = vst [vmem:[#allocation19_spill] sm:$0xff] %v12963_v58  ;;  %14836 = vst [vmem:[#allocation124_spill] sm:$0xff] %v12966_v36  ;;  %v2896_v52 = vadd.f32 %v2805_v29, %v2486_v33  ;;  %v2487_v48 = vadd.f32 %v12741_v12, %v2077_v63 }
 0x68c   : > { %14837 = vst [vmem:[#allocation125_spill] sm:$0xff] %v12969_v23  ;;  %v3215_v1 = vpop.permute.xlu1 %3214 }
 0x68d   : > { %v3306_v22 = vadd.f32 %v3215_v1, %v2896_v52  ;;  %v2897_v54 = vadd.f32 %v12766_v45, %v2487_v48  ;;  %v14843_v52 = vld [vmem:[#allocation23_spill] sm:$0xff] }
 0x68e   : > { %v2236_v40 = vpop.permute.xlu0 %2235 }
 0x68f   : > { %v2287_v32 = vmul.f32 %v14838_v20, %v2236_v40  ;;  %8642 = vmatmul.mubr.msk.f32.gmra.mrb[30].mxu1 %vm980_vm1, %v3306_v22  ;;  %v3451_v24 = vrot.slane %v3306_v22, 1  ;;  %v4159_v17 = vrot.slane %v3306_v22, 2  ;;  %v6441_v58 = vrot.slane %v3306_v22, 6 }
 0x690   : > { %v3217_v11 = vpop.permute.xlu1 %3216  ;;  %v4873_v36 = vrot.slane %v3306_v22, 3  ;;  %v5300_v41 = vrot.slane %v3306_v22, 4  ;;  %v6014_v60 = vrot.slane %v3306_v22, 5  ;;  %v2078_v40 = vmul.f32 %v14646_v55, %v12186_v5 }
 0x691   : > { %v12975_v23 = vadd.f32 %v3217_v11, %v2897_v54  ;;  %2406 = vrot.lane.b32.xlu0 %v2287_v32, %s10156_s9  ;;  %v3452_v12 = vsel %vm3389_vm3, %v3449_v53, %v3451_v24  ;;  %v12980_v45 = vsel %vm4097_vm4, %v4157_v26, %v4159_v17  ;;  %v12983_v63 = vsel %vm6387_vm7, %v6439_v2, %v6441_v58 }
 0x692   : > { %8579 = vmatprep.mubr.msk.f32.mxu0 %vm980_vm1, %v3452_v12  ;;  %v12989_v29 = vsel %vm4815_vm5, %v4871_v35, %v4873_v36  ;;  %v12992_v54 = vsel %vm5242_vm6, %v5298_v25, %v5300_v41  ;;  %v12995_v33 = vsel %vm5960_vm8, %v6012_v39, %v6014_v60  ;;  %v14842_v35 = vld [vmem:[#allocation46_spill] sm:$0xff]  ;;  %v2488_v32 = vadd.f32 %v12790_v14, %v2078_v40  ;;  %v3329_v14 = vld [vmem:[%s14352_s5 + $0x68] sm:$0xff] }
 0x693   : > { %14839 = vst [vmem:[#allocation26_spill] sm:$0xff] %v12989_v29  ;;  %14840 = vst [vmem:[#allocation126_spill] sm:$0xff] %v12992_v54  ;;  %8644 = vmatprep.mubr.msk.f32.mxu1 %vm980_vm1, %v12975_v23  ;;  %v2646_v53 = vpop.permute.xlu0 %2645  ;;  %v3453_v26 = vrot.slane %v12975_v23, 1  ;;  %v4161_v2 = vrot.slane %v12975_v23, 2  ;;  %v6443_v55 = vrot.slane %v12975_v23, 6  ;;  %v4875_v5 = vrot.slane %v12975_v23, 3 }
 0x694   : > { %14841 = vst [vmem:[#allocation127_spill] sm:$0xff] %v12995_v33  ;;  %v2079_v48 = vmul.f32 %v14843_v52, %v14842_v35  ;;  %v2697_v25 = vmul.f32 %v14838_v20, %v2646_v53  ;;  %v2809_v1 = vpop.permute.xlu1 %2808  ;;  %v5302_v39 = vrot.slane %v12975_v23, 4  ;;  %v6016_v22 = vrot.slane %v12975_v23, 5  ;;  %v3328_v53 = vld [vmem:[%s14352_s5 + $0x60] sm:$0xff] }
 0x695   : > { %v3454_v11 = vsel %vm3389_vm3, %v3451_v24, %v3453_v26  ;;  %v13011_v12 = vsel %vm4097_vm4, %v4159_v17, %v4161_v2  ;;  %v13014_v33 = vsel %vm6387_vm7, %v6441_v58, %v6443_v55  ;;  %v13025_v23 = vsel %vm4815_vm5, %v4873_v36, %v4875_v5  ;;  %v3348_v36 = vld [vmem:[%s14352_s5 + $0x100] sm:$0xff] }
 0x696   : > { %14844 = vst [vmem:[#allocation46_spill] sm:$0xff] %v13011_v12  ;;  %8580 = vmatmul.mubr.msk.f32.gmra.mrb[202].mxu0 %vm980_vm1, %v3454_v11  ;;  %2816 = vrot.lane.b32.xlu0 %v2697_v25, %s10158_s11  ;;  %14845 = vst [vmem:[#allocation23_spill] sm:$0xff] %v13025_v23  ;;  %v13028_v24 = vsel %vm5242_vm6, %v5300_v41, %v5302_v39  ;;  %v13031_v58 = vsel %vm5960_vm8, %v6014_v60, %v6016_v22  ;;  %v3349_v41 = vld [vmem:[%s14352_s5 + $0x108] sm:$0xff] }
 0x697   : > { %14846 = vst [vmem:[#allocation128_spill] sm:$0xff] %v13028_v24  ;;  %14847 = vst [vmem:[#allocation129_spill] sm:$0xff] %v13031_v58  ;;  %v2898_v17 = vadd.f32 %v2809_v1, %v2488_v32  ;;  %v13033_v40 = vpack.c.bf16 %v3329_v14, %v3328_v53  ;;  %v2489_v35 = vadd.f32 %v12822_v13, %v2079_v48  ;;  %v14848_v11 = vld [vmem:[#allocation47_spill] sm:$0xff] }
 0x698   : > { %v3219_v52 = vpop.permute.xlu1 %3218  ;;  %v2080_v60 = vmul.f32 %v14658_v19, %v14848_v11  ;;  %v13046_v32 = vpack.c.bf16 %v3349_v41, %v3348_v36 }
 0x699   : > { %v3308_v25 = vadd.f32 %v3219_v52, %v2898_v17  ;;  %9139 = vmatprep.subr.bf16.mxu1 %v13033_v40  ;;  %v2899_v1 = vadd.f32 %v12846_v56, %v2489_v35  ;;  %v3350_v35 = vld [vmem:[%s14352_s5 + $0x110] sm:$0xff] }
 0x69a   : > { %14849 = vst [vmem:[#allocation47_spill] sm:$0xff] %v13046_v32  ;;  %v2490_v17 = vadd.f32 %v12884_v59, %v2080_v60  ;;  %9179 = vmatprep.subr.bf16.mxu0 %v13046_v32 }
 0x69b   : > { %8645 = vmatmul.mubr.msk.f32.gmra.mrb[32].mxu1 %vm980_vm1, %v3308_v25  ;;  %v3455_v13 = vrot.slane %v3308_v25, 1  ;;  %v4163_v48 = vrot.slane %v3308_v25, 2  ;;  %v6445_v53 = vrot.slane %v3308_v25, 6  ;;  %v4877_v14 = vrot.slane %v3308_v25, 3  ;;  %9181 = vmatpush3.bf16.msra.mxu0 %v13046_v32 }
 0x69c   : > { %v3221_v52 = vpop.permute.xlu1 %3220  ;;  %v5304_v58 = vrot.slane %v3308_v25, 4  ;;  %v6018_v24 = vrot.slane %v3308_v25, 5  ;;  %v2900_v59 = vadd.f32 %v12906_v44, %v2490_v17 }
 0x69d   : > { %v3309_v54 = vadd.f32 %v3221_v52, %v2899_v1  ;;  %v3456_v19 = vsel %vm3389_vm3, %v3453_v26, %v3455_v13  ;;  %v13053_v56 = vsel %vm4097_vm4, %v4161_v2, %v4163_v48  ;;  %v13060_v36 = vsel %vm6387_vm7, %v6443_v55, %v6445_v53  ;;  %v3351_v26 = vld [vmem:[%s14352_s5 + $0x118] sm:$0xff] }
 0x69e   : > { %14850 = vst [vmem:[#allocation130_spill] sm:$0xff] %v13053_v56  ;;  %8582 = vmatprep.mubr.msk.f32.mxu0 %vm980_vm1, %v3456_v19  ;;  %v13068_v2 = vsel %vm4815_vm5, %v4875_v5, %v4877_v14  ;;  %v13071_v25 = vsel %vm5242_vm6, %v5302_v39, %v5304_v58  ;;  %v13074_v41 = vsel %vm5960_vm8, %v6016_v22, %v6018_v24  ;;  %v3330_v22 = vld [vmem:[%s14352_s5 + $0x70] sm:$0xff] }
 0x69f   : > { %14851 = vst [vmem:[#allocation131_spill] sm:$0xff] %v13068_v2  ;;  %14852 = vst [vmem:[#allocation132_spill] sm:$0xff] %v13071_v25  ;;  %8647 = vmatprep.mubr.msk.f32.mxu1 %vm980_vm1, %v3309_v54  ;;  %v3457_v55 = vrot.slane %v3309_v54, 1  ;;  %v4165_v11 = vrot.slane %v3309_v54, 2  ;;  %v13077_v44 = vpack.c.bf16 %v3351_v26, %v3350_v35  ;;  %v6447_v60 = vrot.slane %v3309_v54, 6  ;;  %v3331_v35 = vld [vmem:[%s14352_s5 + $0x78] sm:$0xff] }
 0x6a0   : > { %14853 = vst [vmem:[#allocation133_spill] sm:$0xff] %v13074_v41  ;;  %v3223_v1 = vpop.permute.xlu1 %3222  ;;  %v4879_v17 = vrot.slane %v3309_v54, 3  ;;  %v5306_v52 = vrot.slane %v3309_v54, 4  ;;  %v6020_v19 = vrot.slane %v3309_v54, 5  ;;  %v14860_v41 = vld [vmem:[#allocation44_spill] sm:$0xff] }
 0x6a1   : > { %14854 = vst [vmem:[#allocation134_spill] sm:$0xff] %v13077_v44  ;;  %v13079_v32 = vadd.f32 %v3223_v1, %v2900_v59  ;;  %v3458_v5 = vsel %vm3389_vm3, %v3455_v13, %v3457_v55  ;;  %v13083_v39 = vsel %vm4097_vm4, %v4163_v48, %v4165_v11  ;;  %9183 = vmatprep.subr.bf16.mxu0 %v13077_v44 }
 0x6a2   : > { %14855 = vst [vmem:[#allocation135_spill] sm:$0xff] %v13083_v39  ;;  %v13093_v26 = vsel %vm6387_vm7, %v6445_v53, %v6447_v60  ;;  %8583 = vmatmul.mubr.msk.f32.gmra.mrb[204].mxu0 %vm980_vm1, %v3458_v5  ;;  %v13097_v54 = vsel %vm4815_vm5, %v4877_v14, %v4879_v17  ;;  %v13100_v13 = vsel %vm5242_vm6, %v5304_v58, %v5306_v52 }
 0x6a3   : > { %14856 = vst [vmem:[#allocation136_spill] sm:$0xff] %v13093_v26  ;;  %14857 = vst [vmem:[#allocation137_spill] sm:$0xff] %v13097_v54  ;;  %v13103_v48 = vsel %vm5960_vm8, %v6018_v24, %v6020_v19  ;;  %8648 = vmatmul.mubr.msk.f32.gmra.mrb[34].mxu1 %vm980_vm1, %v13079_v32  ;;  %v14477_v59 = vrot.slane %v13079_v32, 1  ;;  %9185 = vmatpush3.bf16.msra.mxu0 %v13077_v44  ;;  %v9142_v58 = vpack.c.bf16 %v3331_v35, %v3330_v22 }
 0x6a4   : > { %14858 = vst [vmem:[#allocation138_spill] sm:$0xff] %v13100_v13  ;;  %14859 = vst [vmem:[#allocation139_spill] sm:$0xff] %v13103_v48  ;;  %v3052_v5 = vpop.permute.xlu1 %3051  ;;  %8658 = vmatprep.mubr.msk.f32.mxu1 %vm980_vm1, %v14860_v41  ;;  %v14476_v24 = vrot.slane %v13079_v32, 4  ;;  %v14475_v48 = vrot.slane %v13079_v32, 5  ;;  %v14861_v44 = vrot.slane %v13079_v32, 2  ;;  %v14863_v14 = vrot.slane %v13079_v32, 6 }
 0x6a5   : > { %v3106_v13 = vmul.f32 %v14715_v61, %v3052_v5  ;;  %v3460_v1 = vsel %vm3389_vm3, %v3457_v55, %v14477_v59  ;;  %v14865_v22 = vrot.slane %v13079_v32, 3  ;;  %v14877_v5 = vld [vmem:[#allocation27_spill] sm:$0xff] }
 0x6a6   : > { %v13123_v53 = vsel %vm4097_vm4, %v4165_v11, %v14861_v44  ;;  %v13128_v41 = vsel %vm6387_vm7, %v6447_v60, %v14863_v14  ;;  %8585 = vmatprep.mubr.msk.f32.mxu0 %vm980_vm1, %v3460_v1  ;;  %v13139_v55 = vsel %vm5242_vm6, %v5306_v52, %v14476_v24  ;;  %v13144_v11 = vsel %vm5960_vm8, %v6020_v19, %v14475_v48  ;;  %v14869_v44 = vld [vmem:[#allocation20_spill] sm:$0xff]  ;;  %v14870_v60 = vld [vmem:[#allocation77_spill] sm:$0xff]  ;;  %v14881_v59 = vld [vmem:[#allocation75_spill] sm:$0xff] }
 0x6a7   : > { %14862 = vst [vmem:[#allocation44_spill] sm:$0xff] %v13123_v53  ;;  %14864 = vst [vmem:[#allocation140_spill] sm:$0xff] %v13128_v41  ;;  %v13134_v35 = vsel %vm4815_vm5, %v4879_v17, %v14865_v22  ;;  %8659 = vmatmul.mubr.msk.f32.vlgmr.msra.gmra.mrb[0].mxu1 %vm980_vm1, %v14869_v44  ;;  %3224 = vrot.lane.b32.xlu1 %v3106_v13, %s10157_s10  ;;  %v14871_v17 = vld [vmem:[#allocation21_spill] sm:$0xff]  ;;  %v14872_v52 = vmov 0   ;;  %v14875_v1 = vld [vmem:[#allocation48_spill] sm:$0xff] }
 0x6a8   : > { %14866 = vst [vmem:[#allocation141_spill] sm:$0xff] %v13134_v35  ;;  %14867 = vst [vmem:[#allocation142_spill] sm:$0xff] %v13139_v55  ;;  %8661 = vmatprep.mubr.msk.f32.mxu1 %vm980_vm1, %v14870_v60  ;;  %9141 = vmatpush3.bf16.msra.mxu1 %v13033_v40  ;;  %v14873_v19 = vld [vmem:[#allocation93_spill] sm:$0xff]  ;;  %v14876_v14 = vld [vmem:[#allocation40_spill] sm:$0xff] }
 0x6a9   : > { %14868 = vst [vmem:[#allocation143_spill] sm:$0xff] %v13144_v11  ;;  %9143 = vmatprep.subr.bf16.mxu1 %v9142_v58  ;;  %v2240_v40 = vpop.permute.xlu1 %2239  ;;  %v14874_v13 = vld [vmem:[#allocation41_spill] sm:$0xff]  ;;  %9993 = vrcp.f32 %v14876_v14  ;;  %v14886_v55 = vld [vmem:[#allocation12_spill] sm:$0xff] }
 0x6aa   : > { %v14878_v44 = vld [vmem:[#allocation65_spill] sm:$0xff] }
 0x6ab   : > { %8662 = vmatmul.mubr.msk.f32.gmra.mrb[2].mxu1 %vm980_vm1, %v12367_v46  ;;  %3055 = vperm.xlu1 %9650, %v14871_v17   ;;  %v14880_v48 = vld [vmem:[#allocation37_spill] sm:$0xff] }
 0x6ac   : > { %8664 = vmatprep.mubr.msk.f32.mxu1 %vm980_vm1, %v12379_v34  ;;  %9145 = vmatpush3.bf16.msra.mxu1 %v9142_v58  ;;  %v2288_v58 = vmul.f32 %v14877_v5, %v2240_v40  ;;  %9995 = vrcp.f32 %v14880_v48  ;;  %v14882_v40 = vld [vmem:[#allocation57_spill] sm:$0xff] }
 0x6ad   : > { %v14883_v48 = vld [vmem:[#allocation33_spill] sm:$0xff] }
 0x6ae   : > { %v2650_v22 = vpop.permute.xlu1 %2649 }
 0x6af   : > { %8665 = vmatmul.mubr.msk.f32.gmra.mrb[4].mxu1 %vm980_vm1, %v12403_v7  ;;  %9652 = vset.pattern.permute.xlu1 %v14872_v52  ;;  %v2698_v24 = vmul.f32 %v14877_v5, %v2650_v22 }
 0x6b0   : > { %8667 = vmatprep.mubr.msk.f32.mxu1 %vm980_vm1, %v14873_v19  ;;  %2027 = vperm.xlu1 %9652, %v14871_v17   ;;  %v14879_v17 = vmov 1  }
 0x6b3   : > { %8668 = vmatmul.mubr.msk.f32.gmra.mrb[6].mxu1 %vm980_vm1, %v14874_v13  ;;  %v9994_v11 = vpop.eup %9993 }
 0x6b4   : > { %8670 = vmatprep.mubr.msk.f32.mxu1 %vm980_vm1, %v12477_v18  ;;  %2032 = vperm.xlu1 %9652, %v14875_v1   ;;  %v3060_v1 = vpop.permute.xlu0 %3059 }
 0x6b5   : > { %v3108_v14 = vmul.f32 %v14877_v5, %v3060_v1 }
 0x6b6   : > { %v9996_v22 = vpop.eup %9995 }
 0x6b7   : > { %8671 = vmatmul.mubr.msk.f32.gmra.mrb[8].mxu1 %vm980_vm1, %v12501_v38 }
 0x6b8   : > { %8673 = vmatprep.mubr.msk.f32.mxu1 %vm980_vm1, %v14878_v44  ;;  %2408 = vrot.lane.b32.xlu1 %v2288_v58, %s10156_s9  ;;  %v13190_v58 = vmul.f32 %v9994_v11, %v14883_v48  ;;  %v14887_v11 = vmov 2   ;;  %v14889_v48 = vmov 3  }
 0x6b9   : > { %9654 = vset.pattern.permute.xlu1 %v14879_v17  ;;  %v14885_v17 = vld [vmem:[#allocation32_spill] sm:$0xff] }
 0x6ba   : > { %v13200_v1 = vmul.f32 %v9996_v22, %v14885_v17 }
 0x6bb   : > { %8674 = vmatmul.mubr.msk.f32.gmra.mrb[10].mxu1 %vm980_vm1, %v14881_v59 }
 0x6bc   : > { %8676 = vmatprep.mubr.msk.f32.mxu1 %vm980_vm1, %v14882_v40  ;;  %2818 = vrot.lane.b32.xlu1 %v2698_v24, %s10158_s11  ;;  %v14884_v24 = vld [vmem:[#allocation72_spill] sm:$0xff] }
 0x6bf   : > { %8677 = vmatmul.mubr.msk.f32.gmra.mrb[12].mxu1 %vm980_vm1, %v12595_v62 }
 0x6c0   : > { %8679 = vmatprep.mubr.msk.f32.mxu1 %vm980_vm1, %v12617_v0  ;;  %3228 = vrot.lane.b32.xlu1 %v3108_v14, %s10157_s10  ;;  %v14888_v14 = vld [vmem:[#allocation98_spill] sm:$0xff] }
 0x6c3   : > { %8680 = vmatmul.mubr.msk.f32.gmra.mrb[14].mxu1 %vm980_vm1, %v12638_v16 }
 0x6c4   : > { %8682 = vmatprep.mubr.msk.f32.mxu1 %vm980_vm1, %v12657_v30  ;;  %2247 = vperm.xlu1 %9654, %v13190_v58  }
 0x6c7   : > { %8683 = vmatmul.mubr.msk.f32.gmra.mrb[16].mxu1 %vm980_vm1, %v14884_v24 }
 0x6c8   : > { %8685 = vmatprep.mubr.msk.f32.mxu1 %vm980_vm1, %v14886_v55  ;;  %9655 = vset.pattern.permute.xlu1 %v14887_v11 }
 0x6c9   : > { %2653 = vperm.xlu1 %9655, %v13200_v1  }
 0x6cb   : > { %8686 = vmatmul.mubr.msk.f32.gmra.mrb[18].mxu1 %vm980_vm1, %v14888_v14 }
 0x6cc   : > { %8688 = vmatprep.mubr.msk.f32.mxu1 %vm980_vm1, %v12746_v9 }
 0x6cd   : > { %9657 = vset.pattern.permute.xlu1 %v14889_v48 }
 0x6ce   : > { %3063 = vperm.xlu1 %9657, %v13200_v1  }
 0x6cf   : > { %8689 = vmatmul.mubr.msk.f32.gmra.mrb[20].mxu1 %vm980_vm1, %v12770_v8 }
 0x6d0   : > { %8691 = vmatprep.mubr.msk.f32.mxu1 %vm980_vm1, %v12794_v51 }
 0x6d2   : > { %3067 = vperm.xlu1 %9657, %v13190_v58  }
 0x6d3   : > { %v13217_v22 = vpop.f32.mrb[172].mxu0  ;;  %8692 = vmatmul.mubr.msk.f32.gmra.mrb[22].mxu1 %vm980_vm1, %v12816_v21 }
 0x6d4   : > { %14890 = vst [vmem:[#allocation20_spill] sm:$0xff] %v13217_v22  ;;  %v13221_v17 = vpop.f32.mrb[173].mxu0  ;;  %8694 = vmatprep.mubr.msk.f32.mxu1 %vm980_vm1, %v12840_v57  ;;  %v3333_v22 = vld [vmem:[%s14352_s5 + $0x88] sm:$0xff] }
 0x6d5   : > { %14891 = vst [vmem:[#allocation77_spill] sm:$0xff] %v13221_v17  ;;  %v3332_v17 = vld [vmem:[%s14352_s5 + $0x80] sm:$0xff] }
 0x6d6   : > { %9659 = vset.pattern.permute.xlu1 %v14872_v52  ;;  %v9146_v25 = vpack.c.bf16 %v3333_v22, %v3332_v17 }
 0x6d7   : > { %8695 = vmatmul.mubr.msk.f32.gmra.mrb[24].mxu1 %vm980_vm1, %v12864_v15  ;;  %2042 = vperm.xlu1 %9659, %v13190_v58  }
 0x6d8   : > { %8697 = vmatprep.mubr.msk.f32.mxu1 %vm980_vm1, %v12888_v42  ;;  %9147 = vmatprep.subr.bf16.mxu1 %v9146_v25 }
 0x6db   : > { %8698 = vmatmul.mubr.msk.f32.gmra.mrb[26].mxu1 %vm980_vm1, %v12910_v6 }
 0x6dc   : > { %8700 = vmatprep.mubr.msk.f32.mxu1 %vm980_vm1, %v12932_v49 }
 0x6df   : > { %8701 = vmatmul.mubr.msk.f32.gmra.mrb[28].mxu1 %vm980_vm1, %v12954_v4 }
 0x6e0   : > { %8703 = vmatprep.mubr.msk.f32.mxu1 %vm980_vm1, %v12980_v45 }
 0x6e3   : > { %8704 = vmatmul.mubr.msk.f32.gmra.mrb[30].mxu1 %vm980_vm1, %v13011_v12 }
 0x6e4   : > { %8706 = vmatprep.mubr.msk.f32.mxu1 %vm980_vm1, %v13053_v56 }
 0x6e7   : > { %8707 = vmatmul.mubr.msk.f32.gmra.mrb[32].mxu1 %vm980_vm1, %v13083_v39  ;;  %v2405_v39 = vpop.permute.xlu1 %2404 }
 0x6e8   : > { %8709 = vmatprep.mubr.msk.f32.mxu1 %vm980_vm1, %v13123_v53  ;;  %v2081_v53 = vmul.f32 %v14715_v61, %v12950_v50 }
 0x6f5   : > { %v13253_v35 = vpop.f32.mrb[174].mxu0 }
 0x6f6   : > { %14892 = vst [vmem:[#allocation21_spill] sm:$0xff] %v13253_v35  ;;  %v13255_v54 = vpop.f32.mrb[175].mxu0 }
 0x6f7   : > { %14893 = vst [vmem:[#allocation93_spill] sm:$0xff] %v13255_v54  ;;  %v2491_v54 = vadd.f32 %v2405_v39, %v2081_v53  ;;  %v14904_v39 = vrot.slane %v13079_v32, 1  ;;  %v14906_v53 = vrot.slane %v13079_v32, 3 }
 0x6f9   : > { %v2815_v56 = vpop.permute.xlu1 %2814 }
 0x6fd   : > { %v13257_v2 = vpop.f32.mrb[176].mxu0 }
 0x6fe   : > { %14894 = vst [vmem:[#allocation41_spill] sm:$0xff] %v13257_v2  ;;  %v13259_v22 = vpop.f32.mrb[177].mxu0  ;;  %v2901_v2 = vadd.f32 %v2815_v56, %v2491_v54 }
 0x6ff   : > { %14895 = vst [vmem:[#allocation48_spill] sm:$0xff] %v13259_v22 }
 0x706   : > { %v13261_v17 = vpop.f32.mrb[178].mxu0 }
 0x707   : > { %14896 = vst [vmem:[#allocation40_spill] sm:$0xff] %v13261_v17  ;;  %v13263_v23 = vpop.f32.mrb[179].mxu0 }
 0x708   : > { %14897 = vst [vmem:[#allocation27_spill] sm:$0xff] %v13263_v23 }
 0x70e   : > { %v13265_v29 = vpop.f32.mrb[180].mxu0 }
 0x70f   : > { %14898 = vst [vmem:[#allocation65_spill] sm:$0xff] %v13265_v29  ;;  %v13267_v41 = vpop.f32.mrb[181].mxu0 }
 0x710   : > { %14899 = vst [vmem:[#allocation37_spill] sm:$0xff] %v13267_v41 }
 0x717   : > { %v13271_v35 = vpop.f32.mrb[182].mxu0 }
 0x718   : > { %14900 = vst [vmem:[#allocation75_spill] sm:$0xff] %v13271_v35  ;;  %v13273_v26 = vpop.f32.mrb[183].mxu0 }
 0x719   : > { %14901 = vst [vmem:[#allocation57_spill] sm:$0xff] %v13273_v26  ;;  %v3225_v22 = vpop.permute.xlu1 %3224 }
 0x71a   : > { %v13275_v12 = vadd.f32 %v3225_v22, %v2901_v2  ;;  %v14905_v2 = vrot.slane %v13079_v32, 2 }
 0x71c   : > { %v3461_v23 = vrot.slane %v13275_v12, 1  ;;  %v14485_v29 = vrot.slane %v13275_v12, 2  ;;  %v14484_v41 = vrot.slane %v13275_v12, 3  ;;  %v5310_v61 = vrot.slane %v13275_v12, 4 }
 0x71d   : > { %v6024_v50 = vrot.slane %v13275_v12, 5 }
 0x71e   : > { %v3462_v56 = vsel %vm3389_vm3, %v14904_v39, %v3461_v23  ;;  %v13294_v54 = vsel %vm4097_vm4, %v14905_v2, %v14485_v29  ;;  %v13301_v22 = vsel %vm4815_vm5, %v14906_v53, %v14484_v41  ;;  %v3334_v23 = vld [vmem:[%s14352_s5 + $0x90] sm:$0xff]  ;;  %v3335_v39 = vld [vmem:[%s14352_s5 + $0x98] sm:$0xff]  ;;  %v14907_v2 = vrot.slane %v13079_v32, 4 }
 0x71f   : > { %v13280_v17 = vpop.f32.mrb[184].mxu0  ;;  %8586 = vmatmul.mubr.msk.f32.gmra.mrb[206].mxu0 %vm980_vm1, %v3462_v56  ;;  %8710 = vmatmul.mubr.msk.f32.gmra.mrb[34].mxu1 %vm980_vm1, %v13294_v54  ;;  %v14908_v56 = vrot.slane %v13079_v32, 5  ;;  %v14909_v29 = vld [vmem:[#allocation36_spill] sm:$0xff] }
 0x720   : > { %14902 = vst [vmem:[#allocation33_spill] sm:$0xff] %v13280_v17  ;;  %v13284_v35 = vpop.f32.mrb[185].mxu0  ;;  %v13317_v53 = vsel %vm5242_vm6, %v14907_v2, %v5310_v61  ;;  %8720 = vmatprep.mubr.msk.f32.mxu1 %vm980_vm1, %v14870_v60  ;;  %9030 = vmatprep.mubr.msk.f32.mxu0 %vm980_vm1, %v14909_v29  ;;  %v14910_v17 = vld [vmem:[#allocation88_spill] sm:$0xff]  ;;  %v14911_v2 = vld [vmem:[#allocation55_spill] sm:$0xff]  ;;  %v14914_v29 = vld [vmem:[#allocation73_spill] sm:$0xff] }
 0x721   : > { %14903 = vst [vmem:[#allocation72_spill] sm:$0xff] %v13284_v35  ;;  %v13324_v41 = vsel %vm5960_vm8, %v14908_v56, %v6024_v50  ;;  %v9150_v35 = vpack.c.bf16 %v3335_v39, %v3334_v23  ;;  %v14916_v39 = vld [vmem:[#allocation61_spill] sm:$0xff] }
 0x723   : > { %8721 = vmatmul.mubr.msk.f32.vlgmr.msra.gmra.mrb[0].mxu1 %vm980_vm1, %v12367_v46  ;;  %9031 = vmatmul.mubr.msk.f32.vlgmr.msra.gmra.mrb[208].mxu0 %vm980_vm1, %v14910_v17  ;;  %v3336_v46 = vld [vmem:[%s14352_s5 + $0xa0] sm:$0xff] }
 0x724   : > { %8723 = vmatprep.mubr.msk.f32.mxu1 %vm980_vm1, %v12379_v34  ;;  %9033 = vmatprep.mubr.msk.f32.mxu0 %vm980_vm1, %v14911_v2  ;;  %v3337_v34 = vld [vmem:[%s14352_s5 + $0xa8] sm:$0xff] }
 0x725   : > { %9149 = vmatpush3.bf16.msra.mxu1 %v9146_v25  ;;  %v14915_v25 = vld [vmem:[#allocation71_spill] sm:$0xff]  ;;  %v13356_v17 = vpack.c.bf16 %v3337_v34, %v3336_v46  ;;  %v14922_v34 = vld [vmem:[#allocation81_spill] sm:$0xff] }
 0x726   : > { %9151 = vmatprep.subr.bf16.mxu1 %v9150_v35 }
 0x727   : > { %v13338_v56 = vpop.f32.mrb[186].mxu0  ;;  %8724 = vmatmul.mubr.msk.f32.gmra.mrb[2].mxu1 %vm980_vm1, %v12403_v7  ;;  %9034 = vmatmul.mubr.msk.f32.gmra.mrb[210].mxu0 %vm980_vm1, %v14914_v29 }
 0x728   : > { %14912 = vst [vmem:[#allocation32_spill] sm:$0xff] %v13338_v56  ;;  %v13340_v60 = vpop.f32.mrb[187].mxu0  ;;  %8726 = vmatprep.mubr.msk.f32.mxu1 %vm980_vm1, %v14873_v19  ;;  %9036 = vmatprep.mubr.msk.f32.mxu0 %vm980_vm1, %v14915_v25  ;;  %v14917_v19 = vld [vmem:[#allocation31_spill] sm:$0xff]  ;;  %v15038_v56 = vld [vmem:[#allocation128_spill] sm:$0xff] }
 0x729   : > { %14913 = vst [vmem:[#allocation12_spill] sm:$0xff] %v13340_v60  ;;  %9153 = vmatpush3.bf16.msra.mxu1 %v9150_v35 }
 0x72a   : > { %v3056_v7 = vpop.permute.xlu1 %3055  ;;  %9155 = vmatprep.subr.bf16.mxu1 %v13356_v17 }
 0x72b   : > { %v3107_v23 = vmul.f32 %v14838_v20, %v3056_v7  ;;  %8727 = vmatmul.mubr.msk.f32.gmra.mrb[4].mxu1 %vm980_vm1, %v14874_v13  ;;  %9037 = vmatmul.mubr.msk.f32.gmra.mrb[212].mxu0 %vm980_vm1, %v14916_v39  ;;  %v14920_v13 = vld [vmem:[#allocation43_spill] sm:$0xff] }
 0x72c   : > { %8729 = vmatprep.mubr.msk.f32.mxu1 %vm980_vm1, %v12477_v18  ;;  %9039 = vmatprep.mubr.msk.f32.mxu0 %vm980_vm1, %v14917_v19  ;;  %v14921_v18 = vld [vmem:[#allocation60_spill] sm:$0xff]  ;;  %v14929_v39 = vld [vmem:[#allocation79_spill] sm:$0xff] }
 0x72d   : > { %3226 = vrot.lane.b32.xlu0 %v3107_v23, %s10157_s10  ;;  %v14926_v23 = vld [vmem:[#allocation25_spill] sm:$0xff] }
 0x72e   : > { %v13369_v35 = vpop.f32.mrb[188].mxu0 }
 0x72f   : > { %14918 = vst [vmem:[#allocation98_spill] sm:$0xff] %v13369_v35  ;;  %v13371_v2 = vpop.f32.mrb[189].mxu0  ;;  %v13373_v29 = vpop.permute.xlu1 %2027  ;;  %8730 = vmatmul.mubr.msk.f32.gmra.mrb[6].mxu1 %vm980_vm1, %v12501_v38  ;;  %9040 = vmatmul.mubr.msk.f32.gmra.mrb[214].mxu0 %vm980_vm1, %v14920_v13  ;;  %v14923_v38 = vld [vmem:[#allocation8_spill] sm:$0xff] }
 0x730   : > { %14919 = vst [vmem:[#allocation36_spill] sm:$0xff] %v13371_v2  ;;  %8732 = vmatprep.mubr.msk.f32.mxu1 %vm980_vm1, %v14878_v44  ;;  %9042 = vmatprep.mubr.msk.f32.mxu0 %vm980_vm1, %v14921_v18 }
 0x731   : > { %2243 = vperm.xlu0 %9653, %v13200_v1  }
 0x733   : > { %v2033_v46 = vpop.permute.xlu1 %2032  ;;  %8733 = vmatmul.mubr.msk.f32.gmra.mrb[8].mxu1 %vm980_vm1, %v14881_v59  ;;  %9043 = vmatmul.mubr.msk.f32.gmra.mrb[216].mxu0 %vm980_vm1, %v14922_v34 }
 0x734   : > { %8735 = vmatprep.mubr.msk.f32.mxu1 %vm980_vm1, %v14882_v40  ;;  %9045 = vmatprep.mubr.msk.f32.mxu0 %vm980_vm1, %v14923_v38  ;;  %v2083_v25 = vmul.f32 %v14877_v5, %v2033_v46 }
 0x735   : > { %9656 = vset.pattern.permute.xlu0 %v14887_v11  ;;  %v13393_v44 = vpop.f32.mrb[190].mxu0  ;;  %v14927_v11 = vld [vmem:[#allocation10_spill] sm:$0xff] }
 0x736   : > { %14924 = vst [vmem:[#allocation88_spill] sm:$0xff] %v13393_v44  ;;  %2657 = vperm.xlu0 %9656, %v13190_v58   ;;  %v13397_v7 = vpop.f32.mrb[191].mxu0  ;;  %v14928_v58 = vld [vmem:[#allocation92_spill] sm:$0xff]  ;;  %v15032_v44 = vld [vmem:[#allocation121_spill] sm:$0xff] }
 0x737   : > { %14925 = vst [vmem:[#allocation55_spill] sm:$0xff] %v13397_v7  ;;  %v2409_v59 = vpop.permute.xlu1 %2408  ;;  %8736 = vmatmul.mubr.msk.f32.gmra.mrb[10].mxu1 %vm980_vm1, %v12595_v62  ;;  %9046 = vmatmul.mubr.msk.f32.gmra.mrb[218].mxu0 %vm980_vm1, %v14926_v23  ;;  %v15030_v7 = vld [vmem:[#allocation118_spill] sm:$0xff] }
 0x738   : > { %v2493_v40 = vadd.f32 %v2409_v59, %v2083_v25  ;;  %8738 = vmatprep.mubr.msk.f32.mxu1 %vm980_vm1, %v12617_v0  ;;  %9048 = vmatprep.mubr.msk.f32.mxu0 %vm980_vm1, %v14927_v11 }
 0x73a   : > { %9658 = vset.pattern.permute.xlu0 %v14872_v52 }
 0x73b   : > { %v2819_v5 = vpop.permute.xlu1 %2818  ;;  %8739 = vmatmul.mubr.msk.f32.gmra.mrb[12].mxu1 %vm980_vm1, %v12638_v16  ;;  %9049 = vmatmul.mubr.msk.f32.gmra.mrb[220].mxu0 %vm980_vm1, %v14928_v58  ;;  %v14932_v16 = vld [vmem:[#allocation99_spill] sm:$0xff]  ;;  %v14955_v58 = vrot.slane %v13275_v12, 2 }
 0x73c   : > { %v2903_v62 = vadd.f32 %v2819_v5, %v2493_v40  ;;  %2037 = vperm.xlu0 %9658, %v13200_v1   ;;  %8741 = vmatprep.mubr.msk.f32.mxu1 %vm980_vm1, %v12657_v30 }
 0x73d   : > { %9051 = vmatprep.mubr.msk.f32.mxu0 %vm980_vm1, %v14929_v39  ;;  %v13417_v0 = vpop.f32.mrb[192].mxu0 }
 0x73e   : > { %14930 = vst [vmem:[#allocation73_spill] sm:$0xff] %v13417_v0  ;;  %v13419_v19 = vpop.f32.mrb[193].mxu0 }
 0x73f   : > { %14931 = vst [vmem:[#allocation71_spill] sm:$0xff] %v13419_v19  ;;  %8742 = vmatmul.mubr.msk.f32.gmra.mrb[14].mxu1 %vm980_vm1, %v14884_v24  ;;  %9052 = vmatmul.mubr.msk.f32.gmra.mrb[222].mxu0 %vm980_vm1, %v14932_v16  ;;  %v3229_v52 = vpop.permute.xlu1 %3228  ;;  %v14933_v24 = vld [vmem:[#allocation29_spill] sm:$0xff] }
 0x740   : > { %v13425_v13 = vadd.f32 %v3229_v52, %v2903_v62  ;;  %8744 = vmatprep.mubr.msk.f32.mxu1 %vm980_vm1, %v14886_v55  ;;  %9054 = vmatprep.mubr.msk.f32.mxu0 %vm980_vm1, %v12749_v43 }
 0x741   : > { %9660 = vset.pattern.permute.xlu0 %v14889_v48 }
 0x742   : > { %v14486_v25 = vrot.slane %v13425_v13, 6  ;;  %v14488_v5 = vrot.slane %v13425_v13, 5 }
 0x743   : > { %8745 = vmatmul.mubr.msk.f32.gmra.mrb[16].mxu1 %vm980_vm1, %v14888_v14  ;;  %9055 = vmatmul.mubr.msk.f32.gmra.mrb[224].mxu0 %vm980_vm1, %v12773_v28  ;;  %v2248_v30 = vpop.permute.xlu1 %2247  ;;  %v14938_v28 = vld [vmem:[#allocation39_spill] sm:$0xff]  ;;  %v2082_v14 = vmul.f32 %v14838_v20, %v13373_v29  ;;  %v4887_v20 = vrot.slane %v13425_v13, 3 }
 0x744   : > { %v2290_v1 = vmul.f32 %v14933_v24, %v2248_v30  ;;  %8747 = vmatprep.mubr.msk.f32.mxu1 %vm980_vm1, %v12746_v9  ;;  %9057 = vmatprep.mubr.msk.f32.mxu0 %vm980_vm1, %v12797_v31  ;;  %v3338_v30 = vld [vmem:[%s14352_s5 + $0xb0] sm:$0xff] }
 0x745   : > { %v13441_v55 = vpop.f32.mrb[194].mxu0 }
 0x746   : > { %14934 = vst [vmem:[#allocation61_spill] sm:$0xff] %v13441_v55  ;;  %2412 = vrot.lane.b32.xlu0 %v2290_v1, %s10156_s9  ;;  %v13444_v43 = vpop.f32.mrb[195].mxu0  ;;  %v3339_v1 = vld [vmem:[%s14352_s5 + $0xb8] sm:$0xff] }
 0x747   : > { %14935 = vst [vmem:[#allocation31_spill] sm:$0xff] %v13444_v43  ;;  %8748 = vmatmul.mubr.msk.f32.gmra.mrb[18].mxu1 %vm980_vm1, %v12770_v8  ;;  %9058 = vmatmul.mubr.msk.f32.gmra.mrb[226].mxu0 %vm980_vm1, %v12819_v37  ;;  %v15028_v43 = vld [vmem:[#allocation115_spill] sm:$0xff] }
 0x748   : > { %8750 = vmatprep.mubr.msk.f32.mxu1 %vm980_vm1, %v12794_v51  ;;  %9060 = vmatprep.mubr.msk.f32.mxu0 %vm980_vm1, %v12843_v3  ;;  %v14939_v51 = vld [vmem:[#allocation123_spill] sm:$0xff]  ;;  %v14942_v3 = vld [vmem:[#allocation46_spill] sm:$0xff] }
 0x74b   : > { %8751 = vmatmul.mubr.msk.f32.gmra.mrb[20].mxu1 %vm980_vm1, %v12816_v21  ;;  %9061 = vmatmul.mubr.msk.f32.gmra.mrb[228].mxu0 %vm980_vm1, %v12867_v27  ;;  %v6451_v21 = vrot.slane %v13275_v12, 6  ;;  %v14944_v27 = vld [vmem:[#allocation130_spill] sm:$0xff] }
 0x74c   : > { %8753 = vmatprep.mubr.msk.f32.mxu1 %vm980_vm1, %v12840_v57  ;;  %9063 = vmatprep.mubr.msk.f32.mxu0 %vm980_vm1, %v12891_v10  ;;  %v14943_v57 = vld [vmem:[#allocation136_spill] sm:$0xff] }
 0x74d   : > { %v13462_v9 = vpop.f32.mrb[196].mxu0 }
 0x74e   : > { %14936 = vst [vmem:[#allocation43_spill] sm:$0xff] %v13462_v9  ;;  %v13464_v8 = vpop.f32.mrb[197].mxu0 }
 0x74f   : > { %14937 = vst [vmem:[#allocation60_spill] sm:$0xff] %v13464_v8  ;;  %8754 = vmatmul.mubr.msk.f32.gmra.mrb[22].mxu1 %vm980_vm1, %v12864_v15  ;;  %9064 = vmatmul.mubr.msk.f32.gmra.mrb[230].mxu0 %vm980_vm1, %v12913_v47  ;;  %v14945_v15 = vld [vmem:[#allocation140_spill] sm:$0xff]  ;;  %v15026_v8 = vld [vmem:[#allocation113_spill] sm:$0xff] }
 0x750   : > { %8756 = vmatprep.mubr.msk.f32.mxu1 %vm980_vm1, %v12888_v42  ;;  %9066 = vmatprep.mubr.msk.f32.mxu0 %vm980_vm1, %v14938_v28  ;;  %v14956_v28 = vrot.slane %v13275_v12, 3  ;;  %v3341_v12 = vld [vmem:[%s14352_s5 + $0xc8] sm:$0xff] }
 0x753   : > { %8757 = vmatmul.mubr.msk.f32.gmra.mrb[24].mxu1 %vm980_vm1, %v12910_v6  ;;  %9067 = vmatmul.mubr.msk.f32.gmra.mrb[232].mxu0 %vm980_vm1, %v14939_v51  ;;  %v14948_v6 = vrot.slane %v13079_v32, 6 }
 0x754   : > { %8759 = vmatprep.mubr.msk.f32.mxu1 %vm980_vm1, %v12932_v49  ;;  %9069 = vmatprep.mubr.msk.f32.mxu0 %vm980_vm1, %v12983_v63  ;;  %v14949_v49 = vld [vmem:[#allocation135_spill] sm:$0xff] }
 0x755   : > { %v13482_v31 = vpop.f32.mrb[198].mxu0  ;;  %v6452_v47 = vsel %vm6387_vm7, %v14948_v6, %v6451_v21  ;;  %v9158_v6 = vpack.c.bf16 %v3339_v1, %v3338_v30  ;;  %v14969_v30 = vld [vmem:[#allocation83_spill] sm:$0xff]  ;;  %v14970_v1 = vld [vmem:[#allocation62_spill] sm:$0xff] }
 0x756   : > { %14940 = vst [vmem:[#allocation81_spill] sm:$0xff] %v13482_v31  ;;  %v13484_v37 = vpop.f32.mrb[199].mxu0 }
 0x757   : > { %14941 = vst [vmem:[#allocation8_spill] sm:$0xff] %v13484_v37  ;;  %8760 = vmatmul.mubr.msk.f32.gmra.mrb[26].mxu1 %vm980_vm1, %v12954_v4  ;;  %9070 = vmatmul.mubr.msk.f32.gmra.mrb[234].mxu0 %vm980_vm1, %v13014_v33  ;;  %v14950_v4 = vld [vmem:[#allocation44_spill] sm:$0xff]  ;;  %v15024_v37 = vld [vmem:[#allocation111_spill] sm:$0xff] }
 0x758   : > { %8762 = vmatprep.mubr.msk.f32.mxu1 %vm980_vm1, %v12980_v45  ;;  %9072 = vmatprep.mubr.msk.f32.mxu0 %vm980_vm1, %v13060_v36  ;;  %v2407_v36 = vpop.permute.xlu0 %2406 }
 0x759   : > { %v2492_v48 = vadd.f32 %v2407_v36, %v2082_v14  ;;  %v14960_v36 = vld [vmem:[#allocation22_spill] sm:$0xff] }
 0x75a   : > { %v14961_v14 = vld [vmem:[#allocation38_spill] sm:$0xff] }
 0x75b   : > { %8763 = vmatmul.mubr.msk.f32.gmra.mrb[28].mxu1 %vm980_vm1, %v14942_v3  ;;  %9073 = vmatmul.mubr.msk.f32.gmra.mrb[236].mxu0 %vm980_vm1, %v14943_v57 }
 0x75c   : > { %8765 = vmatprep.mubr.msk.f32.mxu1 %vm980_vm1, %v14944_v27  ;;  %9075 = vmatprep.mubr.msk.f32.mxu0 %vm980_vm1, %v14945_v15  ;;  %v2817_v18 = vpop.permute.xlu0 %2816  ;;  %v14957_v15 = vld [vmem:[#allocation5_spill] sm:$0xff] }
 0x75d   : > { %v13503_v10 = vpop.f32.mrb[200].mxu0  ;;  %v2902_v46 = vadd.f32 %v2817_v18, %v2492_v48 }
 0x75e   : > { %14946 = vst [vmem:[#allocation25_spill] sm:$0xff] %v13503_v10  ;;  %v13505_v42 = vpop.f32.mrb[201].mxu0 }
 0x75f   : > { %14947 = vst [vmem:[#allocation10_spill] sm:$0xff] %v13505_v42  ;;  %8766 = vmatmul.mubr.msk.f32.gmra.mrb[30].mxu1 %vm980_vm1, %v14949_v49  ;;  %9076 = vmatmul.mubr.msk.f32.gmra.mrb[238].mxu0 %vm980_vm1, %v6452_v47  ;;  %v14958_v47 = vld [vmem:[#allocation6_spill] sm:$0xff]  ;;  %v14959_v49 = vld [vmem:[#allocation63_spill] sm:$0xff]  ;;  %v15022_v42 = vld [vmem:[#allocation109_spill] sm:$0xff] }
 0x760   : > { %8768 = vmatprep.mubr.msk.f32.mxu1 %vm980_vm1, %v14950_v4 }
 0x763   : > { %8769 = vmatmul.mubr.msk.f32.gmra.mrb[32].mxu1 %vm980_vm1, %v13294_v54  ;;  %v4528_v54 = vrot.slane %v13425_v13, 2 }
 0x769   : > { %v13517_v45 = vpop.f32.mrb[202].mxu0 }
 0x76a   : > { %14951 = vst [vmem:[#allocation92_spill] sm:$0xff] %v13517_v45  ;;  %v13519_v63 = vpop.f32.mrb[203].mxu0 }
 0x76b   : > { %14952 = vst [vmem:[#allocation79_spill] sm:$0xff] %v13519_v63  ;;  %v15020_v63 = vld [vmem:[#allocation107_spill] sm:$0xff] }
 0x775   : > { %v13521_v33 = vpop.f32.mrb[204].mxu0 }
 0x776   : > { %14953 = vst [vmem:[#allocation99_spill] sm:$0xff] %v13521_v33  ;;  %v13523_v32 = vpop.f32.mrb[205].mxu0 }
 0x777   : > { %14954 = vst [vmem:[#allocation29_spill] sm:$0xff] %v13523_v32  ;;  %v15018_v32 = vld [vmem:[#allocation104_spill] sm:$0xff] }
 0x79f   : > { %v3227_v34 = vpop.permute.xlu0 %3226 }
 0x7a0   : > { %v13527_v38 = vadd.f32 %v3227_v34, %v2902_v46  ;;  %v14962_v46 = vld [vmem:[#allocation28_spill] sm:$0xff] }
 0x7a2   : > { %v4526_v59 = vrot.slane %v13527_v38, 2  ;;  %v6453_v23 = vrot.slane %v13527_v38, 6  ;;  %v4885_v40 = vrot.slane %v13527_v38, 3  ;;  %v14487_v11 = vrot.slane %v13527_v38, 4 }
 0x7a3   : > { %v6026_v29 = vrot.slane %v13527_v38, 5 }
 0x7a4   : > { %v4527_v62 = vsel %vm4097_vm4, %v14955_v58, %v4526_v59  ;;  %v6454_v39 = vsel %vm6387_vm7, %v6451_v21, %v6453_v23  ;;  %v4529_v16 = vsel %vm4097_vm4, %v4526_v59, %v4528_v54  ;;  %v6456_v52 = vsel %vm6387_vm7, %v6453_v23, %v14486_v25  ;;  %v14963_v54 = vld [vmem:[#allocation24_spill] sm:$0xff] }
 0x7a5   : > { %8771 = vmatprep.mubr.msk.f32.mxu1 %vm980_vm1, %v4527_v62  ;;  %9078 = vmatprep.mubr.msk.f32.mxu0 %vm980_vm1, %v6454_v39  ;;  %v13557_v51 = vsel %vm4815_vm5, %v14956_v28, %v4885_v40  ;;  %v13560_v21 = vsel %vm4815_vm5, %v4885_v40, %v4887_v20  ;;  %v13567_v3 = vsel %vm5242_vm6, %v5310_v61, %v14487_v11  ;;  %v3340_v61 = vld [vmem:[%s14352_s5 + $0xc0] sm:$0xff]  ;;  %v14966_v58 = vld [vmem:[#allocation4_spill] sm:$0xff]  ;;  %v14971_v28 = vld [vmem:[#allocation89_spill] sm:$0xff] }
 0x7a6   : > { %8772 = vmatmul.mubr.msk.f32.gmra.mrb[34].mxu1 %vm980_vm1, %v4529_v16  ;;  %9079 = vmatmul.mubr.msk.f32.gmra.mrb[240].mxu0 %vm980_vm1, %v6456_v52  ;;  %v13574_v57 = vsel %vm5960_vm8, %v6024_v50, %v6026_v29  ;;  %v13579_v27 = vsel %vm5960_vm8, %v6026_v29, %v14488_v5  ;;  %v2654_v50 = vpop.permute.xlu1 %2653  ;;  %v9162_v4 = vpack.c.bf16 %v3341_v12, %v3340_v61  ;;  %v14965_v20 = vld [vmem:[#allocation30_spill] sm:$0xff]  ;;  %v14967_v16 = vld [vmem:[#allocation51_spill] sm:$0xff]  ;;  %v14974_v61 = vld [vmem:[#allocation96_spill] sm:$0xff] }
 0x7a7   : > { %8782 = vmatprep.mubr.msk.f32.mxu1 %vm980_vm1, %v14957_v15  ;;  %v2699_v59 = vmul.f32 %v14962_v46, %v2654_v50  ;;  %v14968_v52 = vld [vmem:[#allocation78_spill] sm:$0xff]  ;;  %v14972_v15 = vld [vmem:[#allocation3_spill] sm:$0xff]  ;;  %v14975_v12 = vld [vmem:[#allocation101_spill] sm:$0xff] }
 0x7a8   : > { %v14977_v50 = vld [vmem:[#allocation102_spill] sm:$0xff] }
 0x7a9   : > { %v15014_v11 = vld [vmem:[#allocation14_spill] sm:$0xff] }
 0x7aa   : > { %8783 = vmatmul.mubr.msk.f32.vlgmr.msra.gmra.mrb[0].mxu1 %vm980_vm1, %v14958_v47  ;;  %v3064_v18 = vpop.permute.xlu1 %3063  ;;  %v14976_v47 = vld [vmem:[#allocation100_spill] sm:$0xff] }
 0x7ab   : > { %9157 = vmatpush3.bf16.msra.mxu1 %v13356_v17  ;;  %8785 = vmatprep.mubr.msk.f32.mxu1 %vm980_vm1, %v14959_v49  ;;  %v14964_v17 = vld [vmem:[#allocation59_spill] sm:$0xff]  ;;  %v3109_v62 = vmul.f32 %v14962_v46, %v3064_v18  ;;  %v14978_v49 = vld [vmem:[#allocation106_spill] sm:$0xff] }
 0x7ac   : > { %9159 = vmatprep.subr.bf16.mxu1 %v9158_v6  ;;  %v14982_v18 = vld [vmem:[#allocation18_spill] sm:$0xff] }
 0x7ae   : > { %8786 = vmatmul.mubr.msk.f32.gmra.mrb[2].mxu1 %vm980_vm1, %v14960_v36  ;;  %v3068_v29 = vpop.permute.xlu1 %3067  ;;  %v14979_v36 = vld [vmem:[#allocation16_spill] sm:$0xff] }
 0x7af   : > { %8788 = vmatprep.mubr.msk.f32.mxu1 %vm980_vm1, %v14961_v14  ;;  %9161 = vmatpush3.bf16.msra.mxu1 %v9158_v6  ;;  %v3110_v39 = vmul.f32 %v14933_v24, %v3068_v29  ;;  %v14973_v6 = vld [vmem:[#allocation74_spill] sm:$0xff]  ;;  %v14980_v14 = vld [vmem:[#allocation17_spill] sm:$0xff] }
 0x7b0   : > { %v2244_v48 = vpop.permute.xlu0 %2243  ;;  %9163 = vmatprep.subr.bf16.mxu1 %v9162_v4  ;;  %v14990_v29 = vld [vmem:[#allocation141_spill] sm:$0xff] }
 0x7b1   : > { %v2289_v34 = vmul.f32 %v14962_v46, %v2244_v48  ;;  %v14981_v48 = vld [vmem:[#allocation2_spill] sm:$0xff] }
 0x7b2   : > { %8789 = vmatmul.mubr.msk.f32.gmra.mrb[4].mxu1 %vm980_vm1, %v14963_v54  ;;  %v14984_v54 = vld [vmem:[#allocation120_spill] sm:$0xff]  ;;  %v2043_v0 = vpop.permute.xlu1 %2042 }
 0x7b3   : > { %8791 = vmatprep.mubr.msk.f32.mxu1 %vm980_vm1, %v14964_v17  ;;  %2410 = vrot.lane.b32.xlu1 %v2289_v34, %s10156_s9  ;;  %v14983_v34 = vld [vmem:[#allocation117_spill] sm:$0xff]  ;;  %v14985_v17 = vld [vmem:[#allocation19_spill] sm:$0xff] }
 0x7b5   : > { %v2658_v23 = vpop.permute.xlu0 %2657 }
 0x7b6   : > { %v2700_v40 = vmul.f32 %v14933_v24, %v2658_v23  ;;  %8792 = vmatmul.mubr.msk.f32.gmra.mrb[6].mxu1 %vm980_vm1, %v14965_v20  ;;  %v14987_v23 = vld [vmem:[#allocation23_spill] sm:$0xff]  ;;  %v14989_v20 = vld [vmem:[#allocation137_spill] sm:$0xff] }
 0x7b7   : > { %8794 = vmatprep.mubr.msk.f32.mxu1 %vm980_vm1, %v14966_v58  ;;  %2820 = vrot.lane.b32.xlu1 %v2699_v59, %s10158_s11  ;;  %v14986_v59 = vld [vmem:[#allocation26_spill] sm:$0xff]  ;;  %v3342_v58 = vld [vmem:[%s14352_s5 + $0xd0] sm:$0xff] }
 0x7b8   : > { %2822 = vrot.lane.b32.xlu0 %v2700_v40, %s10158_s11  ;;  %v14988_v40 = vld [vmem:[#allocation131_spill] sm:$0xff] }
 0x7ba   : > { %8795 = vmatmul.mubr.msk.f32.gmra.mrb[8].mxu1 %vm980_vm1, %v14967_v16 }
 0x7bb   : > { %8797 = vmatprep.mubr.msk.f32.mxu1 %vm980_vm1, %v14968_v52  ;;  %3230 = vrot.lane.b32.xlu1 %v3109_v62, %s10157_s10  ;;  %v3343_v62 = vld [vmem:[%s14352_s5 + $0xd8] sm:$0xff]  ;;  %v2038_v19 = vpop.permute.xlu0 %2037 }
 0x7bc   : > { %3232 = vrot.lane.b32.xlu0 %v3110_v39, %s10157_s10  ;;  %v14991_v39 = vld [vmem:[#allocation50_spill] sm:$0xff]  ;;  %v9166_v16 = vpack.c.bf16 %v3343_v62, %v3342_v58 }
 0x7bd   : > { %v15006_v58 = vld [vmem:[#allocation66_spill] sm:$0xff] }
 0x7be   : > { %8798 = vmatmul.mubr.msk.f32.gmra.mrb[10].mxu1 %vm980_vm1, %v14969_v30  ;;  %v14993_v30 = vld [vmem:[#allocation84_spill] sm:$0xff] }
 0x7bf   : > { %8800 = vmatprep.mubr.msk.f32.mxu1 %vm980_vm1, %v14970_v1 }
 0x7c2   : > { %8801 = vmatmul.mubr.msk.f32.gmra.mrb[12].mxu1 %vm980_vm1, %v14971_v28 }
 0x7c3   : > { %8803 = vmatprep.mubr.msk.f32.mxu1 %vm980_vm1, %v14972_v15  ;;  %v14996_v15 = vld [vmem:[#allocation53_spill] sm:$0xff] }
 0x7c6   : > { %8804 = vmatmul.mubr.msk.f32.gmra.mrb[14].mxu1 %vm980_vm1, %v14973_v6 }
 0x7c7   : > { %8806 = vmatprep.mubr.msk.f32.mxu1 %vm980_vm1, %v14974_v61  ;;  %v14997_v61 = vld [vmem:[#allocation67_spill] sm:$0xff] }
 0x7ca   : > { %8807 = vmatmul.mubr.msk.f32.gmra.mrb[16].mxu1 %vm980_vm1, %v14975_v12 }
 0x7cb   : > { %8809 = vmatprep.mubr.msk.f32.mxu1 %vm980_vm1, %v14976_v47 }
 0x7ce   : > { %8810 = vmatmul.mubr.msk.f32.gmra.mrb[18].mxu1 %vm980_vm1, %v14977_v50  ;;  %v14999_v50 = vld [vmem:[#allocation35_spill] sm:$0xff] }
 0x7cf   : > { %8812 = vmatprep.mubr.msk.f32.mxu1 %vm980_vm1, %v14978_v49 }
 0x7d2   : > { %8813 = vmatmul.mubr.msk.f32.gmra.mrb[20].mxu1 %vm980_vm1, %v14979_v36  ;;  %v15000_v36 = vld [vmem:[#allocation42_spill] sm:$0xff] }
 0x7d3   : > { %8815 = vmatprep.mubr.msk.f32.mxu1 %vm980_vm1, %v14980_v14 }
 0x7d6   : > { %8816 = vmatmul.mubr.msk.f32.gmra.mrb[22].mxu1 %vm980_vm1, %v14981_v48  ;;  %v15001_v48 = vld [vmem:[#allocation49_spill] sm:$0xff] }
 0x7d7   : > { %8818 = vmatprep.mubr.msk.f32.mxu1 %vm980_vm1, %v14982_v18 }
 0x7da   : > { %8819 = vmatmul.mubr.msk.f32.gmra.mrb[24].mxu1 %vm980_vm1, %v14983_v34  ;;  %v15002_v34 = vld [vmem:[#allocation54_spill] sm:$0xff] }
 0x7db   : > { %8821 = vmatprep.mubr.msk.f32.mxu1 %vm980_vm1, %v14984_v54 }
 0x7de   : > { %8822 = vmatmul.mubr.msk.f32.gmra.mrb[26].mxu1 %vm980_vm1, %v14985_v17  ;;  %v15003_v17 = vld [vmem:[#allocation80_spill] sm:$0xff] }
 0x7df   : > { %8824 = vmatprep.mubr.msk.f32.mxu1 %vm980_vm1, %v14986_v59 }
 0x7e2   : > { %8825 = vmatmul.mubr.msk.f32.gmra.mrb[28].mxu1 %vm980_vm1, %v14987_v23  ;;  %v15004_v23 = vld [vmem:[#allocation85_spill] sm:$0xff] }
 0x7e3   : > { %8827 = vmatprep.mubr.msk.f32.mxu1 %vm980_vm1, %v14988_v40 }
 0x7e6   : > { %8828 = vmatmul.mubr.msk.f32.gmra.mrb[30].mxu1 %vm980_vm1, %v14989_v20  ;;  %v15005_v20 = vld [vmem:[#allocation9_spill] sm:$0xff] }
 0x7e7   : > { %8830 = vmatprep.mubr.msk.f32.mxu1 %vm980_vm1, %v14990_v29 }
 0x7ea   : > { %8831 = vmatmul.mubr.msk.f32.gmra.mrb[32].mxu1 %vm980_vm1, %v13301_v22  ;;  %v3344_v22 = vld [vmem:[%s14352_s5 + $0xe0] sm:$0xff] }
 0x7eb   : > { %8833 = vmatprep.mubr.msk.f32.mxu1 %vm980_vm1, %v13557_v51  ;;  %v3345_v51 = vld [vmem:[%s14352_s5 + $0xe8] sm:$0xff] }
 0x7ec   : > { %v13692_v28 = vpack.c.bf16 %v3345_v51, %v3344_v22  ;;  %v15010_v22 = vld [vmem:[#allocation94_spill] sm:$0xff] }
 0x7ee   : > { %8834 = vmatmul.mubr.msk.f32.gmra.mrb[34].mxu1 %vm980_vm1, %v13560_v21  ;;  %v14995_v21 = vld [vmem:[#allocation52_spill] sm:$0xff] }
 0x7ef   : > { %8844 = vmatprep.mubr.msk.f32.mxu1 %vm980_vm1, %v14991_v39  ;;  %v15008_v39 = vld [vmem:[#allocation91_spill] sm:$0xff] }
 0x7f2   : > { %v13684_v52 = vpop.f32.mrb[206].mxu0  ;;  %8845 = vmatmul.mubr.msk.f32.vlgmr.msra.gmra.mrb[0].mxu1 %vm980_vm1, %v14993_v30  ;;  %v15012_v30 = vld [vmem:[#allocation97_spill] sm:$0xff] }
 0x7f3   : > { %14992 = vst [vmem:[#allocation39_spill] sm:$0xff] %v13684_v52  ;;  %9165 = vmatpush3.bf16.msra.mxu1 %v9162_v4  ;;  %v13688_v1 = vpop.f32.mrb[207].mxu0  ;;  %8847 = vmatprep.mubr.msk.f32.mxu1 %vm980_vm1, %v14995_v21  ;;  %v14998_v4 = vld [vmem:[#allocation58_spill] sm:$0xff] }
 0x7f4   : > { %14994 = vst [vmem:[#allocation123_spill] sm:$0xff] %v13688_v1  ;;  %9167 = vmatprep.subr.bf16.mxu1 %v9166_v16  ;;  %v15016_v1 = vld [vmem:[#allocation15_spill] sm:$0xff] }
 0x7f6   : > { %8848 = vmatmul.mubr.msk.f32.gmra.mrb[2].mxu1 %vm980_vm1, %v14996_v15  ;;  %v13696_v6 = vpop.f32.mrb[208].mxu0 }
 0x7f7   : > { %8850 = vmatprep.mubr.msk.f32.mxu1 %vm980_vm1, %v14997_v61  ;;  %v13700_v12 = vpop.f32.mrb[209].mxu0  ;;  %9169 = vmatpush3.bf16.msra.mxu1 %v9166_v16 }
 0x7f8   : > { %9171 = vmatprep.subr.bf16.mxu1 %v13692_v28 }
 0x7fa   : > { %8851 = vmatmul.mubr.msk.f32.gmra.mrb[4].mxu1 %vm980_vm1, %v14998_v4  ;;  %v13705_v47 = vpop.f32.mrb[210].mxu0 }
 0x7fb   : > { %8853 = vmatprep.mubr.msk.f32.mxu1 %vm980_vm1, %v14999_v50  ;;  %v13709_v49 = vpop.f32.mrb[211].mxu0 }
 0x7fe   : > { %8854 = vmatmul.mubr.msk.f32.gmra.mrb[6].mxu1 %vm980_vm1, %v15000_v36  ;;  %v13713_v14 = vpop.f32.mrb[212].mxu0 }
 0x7ff   : > { %8856 = vmatprep.mubr.msk.f32.mxu1 %vm980_vm1, %v15001_v48  ;;  %v13717_v18 = vpop.f32.mrb[213].mxu0 }
 0x802   : > { %8857 = vmatmul.mubr.msk.f32.gmra.mrb[8].mxu1 %vm980_vm1, %v15002_v34  ;;  %v13721_v54 = vpop.f32.mrb[214].mxu0 }
 0x803   : > { %8859 = vmatprep.mubr.msk.f32.mxu1 %vm980_vm1, %v15003_v17  ;;  %v13725_v59 = vpop.f32.mrb[215].mxu0 }
 0x806   : > { %8860 = vmatmul.mubr.msk.f32.gmra.mrb[10].mxu1 %vm980_vm1, %v15004_v23  ;;  %v13729_v40 = vpop.f32.mrb[216].mxu0 }
 0x807   : > { %8862 = vmatprep.mubr.msk.f32.mxu1 %vm980_vm1, %v15005_v20  ;;  %v13733_v29 = vpop.f32.mrb[217].mxu0 }
 0x80a   : > { %8863 = vmatmul.mubr.msk.f32.gmra.mrb[12].mxu1 %vm980_vm1, %v15006_v58  ;;  %v13737_v62 = vpop.f32.mrb[218].mxu0 }
 0x80b   : > { %15007 = vst [vmem:[#allocation46_spill] sm:$0xff] %v13737_v62  ;;  %8865 = vmatprep.mubr.msk.f32.mxu1 %vm980_vm1, %v15008_v39  ;;  %v13741_v16 = vpop.f32.mrb[219].mxu0 }
 0x80c   : > { %15009 = vst [vmem:[#allocation136_spill] sm:$0xff] %v13741_v16  ;;  %v15039_v16 = vld [vmem:[#allocation132_spill] sm:$0xff] }
 0x80e   : > { %8866 = vmatmul.mubr.msk.f32.gmra.mrb[14].mxu1 %vm980_vm1, %v15010_v22  ;;  %v13745_v51 = vpop.f32.mrb[220].mxu0 }
 0x80f   : > { %15011 = vst [vmem:[#allocation130_spill] sm:$0xff] %v13745_v51  ;;  %8868 = vmatprep.mubr.msk.f32.mxu1 %vm980_vm1, %v15012_v30  ;;  %v13749_v25 = vpop.f32.mrb[221].mxu0 }
 0x810   : > { %15013 = vst [vmem:[#allocation140_spill] sm:$0xff] %v13749_v25 }
 0x812   : > { %8869 = vmatmul.mubr.msk.f32.gmra.mrb[16].mxu1 %vm980_vm1, %v15014_v11  ;;  %v13753_v5 = vpop.f32.mrb[222].mxu0 }
 0x813   : > { %15015 = vst [vmem:[#allocation135_spill] sm:$0xff] %v13753_v5  ;;  %8871 = vmatprep.mubr.msk.f32.mxu1 %vm980_vm1, %v15016_v1  ;;  %v13757_v52 = vpop.f32.mrb[223].mxu0 }
 0x814   : > { %15017 = vst [vmem:[#allocation44_spill] sm:$0xff] %v13757_v52  ;;  %v2084_v52 = vmul.f32 %v14962_v46, %v2038_v19 }
 0x816   : > { %8872 = vmatmul.mubr.msk.f32.gmra.mrb[18].mxu1 %vm980_vm1, %v15018_v32  ;;  %v13761_v33 = vpop.f32.mrb[224].mxu0 }
 0x817   : > { %15019 = vst [vmem:[#allocation5_spill] sm:$0xff] %v13761_v33  ;;  %8874 = vmatprep.mubr.msk.f32.mxu1 %vm980_vm1, %v15020_v63  ;;  %v13765_v45 = vpop.f32.mrb[225].mxu0  ;;  %v2413_v33 = vpop.permute.xlu0 %2412 }
 0x818   : > { %15021 = vst [vmem:[#allocation6_spill] sm:$0xff] %v13765_v45 }
 0x81a   : > { %8875 = vmatmul.mubr.msk.f32.gmra.mrb[20].mxu1 %vm980_vm1, %v15022_v42  ;;  %v13769_v10 = vpop.f32.mrb[226].mxu0 }
 0x81b   : > { %15023 = vst [vmem:[#allocation63_spill] sm:$0xff] %v13769_v10  ;;  %8877 = vmatprep.mubr.msk.f32.mxu1 %vm980_vm1, %v15024_v37  ;;  %v13773_v31 = vpop.f32.mrb[227].mxu0 }
 0x81c   : > { %15025 = vst [vmem:[#allocation22_spill] sm:$0xff] %v13773_v31 }
 0x81e   : > { %8878 = vmatmul.mubr.msk.f32.gmra.mrb[22].mxu1 %vm980_vm1, %v15026_v8  ;;  %v13777_v9 = vpop.f32.mrb[228].mxu0 }
 0x81f   : > { %15027 = vst [vmem:[#allocation38_spill] sm:$0xff] %v13777_v9  ;;  %8880 = vmatprep.mubr.msk.f32.mxu1 %vm980_vm1, %v15028_v43  ;;  %v13781_v55 = vpop.f32.mrb[229].mxu0  ;;  %v15034_v9 = vld [vmem:[#allocation124_spill] sm:$0xff] }
 0x820   : > { %15029 = vst [vmem:[#allocation28_spill] sm:$0xff] %v13781_v55  ;;  %v15036_v55 = vld [vmem:[#allocation126_spill] sm:$0xff] }
 0x822   : > { %8881 = vmatmul.mubr.msk.f32.gmra.mrb[24].mxu1 %vm980_vm1, %v15030_v7  ;;  %v13785_v10 = vpop.f32.mrb[230].mxu0 }
 0x823   : > { %15031 = vst [vmem:[#allocation24_spill] sm:$0xff] %v13785_v10  ;;  %8883 = vmatprep.mubr.msk.f32.mxu1 %vm980_vm1, %v15032_v44  ;;  %v13789_v31 = vpop.f32.mrb[231].mxu0  ;;  %v2085_v10 = vmul.f32 %v14933_v24, %v2043_v0  ;;  %v15041_v0 = vld [vmem:[#allocation138_spill] sm:$0xff] }
 0x824   : > { %15033 = vst [vmem:[#allocation59_spill] sm:$0xff] %v13789_v31 }
 0x825   : > { %v2411_v45 = vpop.permute.xlu1 %2410  ;;  %v2495_v51 = vadd.f32 %v2413_v33, %v2085_v10 }
 0x826   : > { %8884 = vmatmul.mubr.msk.f32.gmra.mrb[26].mxu1 %vm980_vm1, %v15034_v9  ;;  %v13793_v2 = vpop.f32.mrb[232].mxu0  ;;  %v2494_v60 = vadd.f32 %v2411_v45, %v2084_v52  ;;  %v15043_v52 = vld [vmem:[#allocation142_spill] sm:$0xff] }
 0x827   : > { %15035 = vst [vmem:[#allocation30_spill] sm:$0xff] %v13793_v2  ;;  %8886 = vmatprep.mubr.msk.f32.mxu1 %vm980_vm1, %v15036_v55  ;;  %v13797_v35 = vpop.f32.mrb[233].mxu0 }
 0x828   : > { %15037 = vst [vmem:[#allocation4_spill] sm:$0xff] %v13797_v35 }
 0x829   : > { %v2821_v5 = vpop.permute.xlu1 %2820 }
 0x82a   : > { %8887 = vmatmul.mubr.msk.f32.gmra.mrb[28].mxu1 %vm980_vm1, %v15038_v56  ;;  %v2823_v31 = vpop.permute.xlu0 %2822  ;;  %v13803_v25 = vpop.f32.mrb[234].mxu0  ;;  %v2904_v62 = vadd.f32 %v2821_v5, %v2494_v60 }
 0x82b   : > { %8889 = vmatprep.mubr.msk.f32.mxu1 %vm980_vm1, %v15039_v16  ;;  %v13807_v2 = vpop.f32.mrb[235].mxu0  ;;  %v2905_v35 = vadd.f32 %v2823_v31, %v2495_v51 }
 0x82c   : > { %15040 = vst [vmem:[#allocation51_spill] sm:$0xff] %v13807_v2  ;;  %v3346_v2 = vld [vmem:[%s14352_s5 + $0xf0] sm:$0xff] }
 0x82d   : > { %v3231_v26 = vpop.permute.xlu1 %3230 }
 0x82e   : > { %v13809_v19 = vadd.f32 %v3231_v26, %v2904_v62  ;;  %8890 = vmatmul.mubr.msk.f32.gmra.mrb[30].mxu1 %vm980_vm1, %v15041_v0  ;;  %v3233_v24 = vpop.permute.xlu0 %3232  ;;  %v13813_v45 = vpop.f32.mrb[236].mxu0 }
 0x82f   : > { %15042 = vst [vmem:[#allocation78_spill] sm:$0xff] %v13813_v45  ;;  %v13815_v46 = vadd.f32 %v3233_v24, %v2905_v35  ;;  %8892 = vmatprep.mubr.msk.f32.mxu1 %vm980_vm1, %v15043_v52  ;;  %v13819_v10 = vpop.f32.mrb[237].mxu0  ;;  %v15046_v35 = vrot.slane %v13425_v13, 5  ;;  %v5314_v24 = vrot.slane %v13425_v13, 4 }
 0x830   : > { %15044 = vst [vmem:[#allocation83_spill] sm:$0xff] %v13819_v10  ;;  %v6030_v33 = vrot.slane %v13809_v19, 5  ;;  %v15048_v10 = vrot.slane %v13809_v19, 6 }
 0x831   : > { %v6032_v26 = vrot.slane %v13815_v46, 5  ;;  %v6459_v31 = vrot.slane %v13815_v46, 6 }
 0x832   : > { %8893 = vmatmul.mubr.msk.f32.gmra.mrb[32].mxu1 %vm980_vm1, %v13317_v53  ;;  %v13827_v5 = vpop.f32.mrb[238].mxu0  ;;  %v13832_v62 = vsel %vm5960_vm8, %v15046_v35, %v6030_v33 }
 0x833   : > { %15045 = vst [vmem:[#allocation62_spill] sm:$0xff] %v13827_v5  ;;  %8895 = vmatprep.mubr.msk.f32.mxu1 %vm980_vm1, %v13567_v3  ;;  %v13836_v51 = vpop.f32.mrb[239].mxu0  ;;  %v13840_v60 = vsel %vm5960_vm8, %v6030_v33, %v6032_v26  ;;  %v13845_v45 = vsel %vm6387_vm7, %v15048_v10, %v6459_v31  ;;  %v15049_v5 = vrot.slane %v13527_v38, 4  ;;  %v15050_v38 = vld [vmem:[#allocation47_spill] sm:$0xff]  ;;  %v15083_v31 = vrot.slane %v13809_v19, 6 }
 0x834   : > { %15047 = vst [vmem:[#allocation89_spill] sm:$0xff] %v13836_v51  ;;  %v3347_v51 = vld [vmem:[%s14352_s5 + $0xf8] sm:$0xff]  ;;  %v15081_v10 = vld [vmem:[#allocation139_spill] sm:$0xff] }
 0x835   : > { %v5315_v35 = vsel %vm5242_vm6, %v15049_v5, %v5314_v24  ;;  %v9174_v33 = vpack.c.bf16 %v3347_v51, %v3346_v2  ;;  %v5671_v2 = vrot.slane %v13809_v19, 4  ;;  %v15082_v26 = vld [vmem:[#allocation143_spill] sm:$0xff]  ;;  %v15084_v5 = vrot.slane %v13425_v13, 6 }
 0x836   : > { %8896 = vmatmul.mubr.msk.f32.gmra.mrb[34].mxu1 %vm980_vm1, %v5315_v35 }
 0x837   : > { %8906 = vmatprep.mubr.msk.f32.mxu1 %vm980_vm1, %v14995_v21  ;;  %v15061_v21 = vld [vmem:[#allocation86_spill] sm:$0xff]  ;;  %v6458_v51 = vsel %vm6387_vm7, %v15084_v5, %v15083_v31 }
 0x83a   : > { %8907 = vmatmul.mubr.msk.f32.vlgmr.msra.gmra.mrb[0].mxu1 %vm980_vm1, %v14996_v15  ;;  %v15063_v15 = vld [vmem:[#allocation90_spill] sm:$0xff] }
 0x83b   : > { %9173 = vmatpush3.bf16.msra.mxu1 %v13692_v28  ;;  %8909 = vmatprep.mubr.msk.f32.mxu1 %vm980_vm1, %v14997_v61  ;;  %v15062_v28 = vld [vmem:[#allocation87_spill] sm:$0xff] }
 0x83c   : > { %9175 = vmatprep.subr.bf16.mxu1 %v9174_v33  ;;  %v15064_v61 = vld [vmem:[#allocation11_spill] sm:$0xff] }
 0x83e   : > { %8910 = vmatmul.mubr.msk.f32.gmra.mrb[2].mxu1 %vm980_vm1, %v14998_v4  ;;  %v15065_v4 = vld [vmem:[#allocation95_spill] sm:$0xff] }
 0x83f   : > { %8912 = vmatprep.mubr.msk.f32.mxu1 %vm980_vm1, %v14999_v50  ;;  %9177 = vmatpush3.bf16.msra.mxu1 %v9174_v33  ;;  %v15066_v50 = vld [vmem:[#allocation7_spill] sm:$0xff] }
 0x840   : > { %9186 = vmatprep.subr.bf16.mxu1 %v15050_v38 }
 0x842   : > { %8913 = vmatmul.mubr.msk.f32.gmra.mrb[4].mxu1 %vm980_vm1, %v15000_v36  ;;  %v15067_v36 = vld [vmem:[#allocation13_spill] sm:$0xff] }
 0x843   : > { %8915 = vmatprep.mubr.msk.f32.mxu1 %vm980_vm1, %v15001_v48  ;;  %v15068_v48 = vld [vmem:[#allocation103_spill] sm:$0xff] }
 0x846   : > { %8916 = vmatmul.mubr.msk.f32.gmra.mrb[6].mxu1 %vm980_vm1, %v15002_v34  ;;  %v15069_v34 = vld [vmem:[#allocation105_spill] sm:$0xff] }
 0x847   : > { %8918 = vmatprep.mubr.msk.f32.mxu1 %vm980_vm1, %v15003_v17  ;;  %v15070_v17 = vld [vmem:[#allocation108_spill] sm:$0xff] }
 0x84a   : > { %8919 = vmatmul.mubr.msk.f32.gmra.mrb[8].mxu1 %vm980_vm1, %v15004_v23  ;;  %v15071_v23 = vld [vmem:[#allocation110_spill] sm:$0xff] }
 0x84b   : > { %8921 = vmatprep.mubr.msk.f32.mxu1 %vm980_vm1, %v15005_v20  ;;  %v15072_v20 = vld [vmem:[#allocation112_spill] sm:$0xff] }
 0x84e   : > { %8922 = vmatmul.mubr.msk.f32.gmra.mrb[10].mxu1 %vm980_vm1, %v15006_v58  ;;  %v15073_v58 = vld [vmem:[#allocation114_spill] sm:$0xff] }
 0x84f   : > { %8924 = vmatprep.mubr.msk.f32.mxu1 %vm980_vm1, %v15008_v39  ;;  %v15074_v39 = vld [vmem:[#allocation116_spill] sm:$0xff] }
 0x852   : > { %8925 = vmatmul.mubr.msk.f32.gmra.mrb[12].mxu1 %vm980_vm1, %v15010_v22  ;;  %v15076_v22 = vld [vmem:[#allocation122_spill] sm:$0xff] }
 0x853   : > { %8927 = vmatprep.mubr.msk.f32.mxu1 %vm980_vm1, %v15012_v30  ;;  %v15077_v30 = vld [vmem:[#allocation125_spill] sm:$0xff] }
 0x856   : > { %8928 = vmatmul.mubr.msk.f32.gmra.mrb[14].mxu1 %vm980_vm1, %v15014_v11  ;;  %v15058_v11 = vld [vmem:[#allocation69_spill] sm:$0xff] }
 0x857   : > { %8930 = vmatprep.mubr.msk.f32.mxu1 %vm980_vm1, %v15016_v1  ;;  %v15060_v1 = vld [vmem:[#allocation82_spill] sm:$0xff] }
 0x85a   : > { %8931 = vmatmul.mubr.msk.f32.gmra.mrb[16].mxu1 %vm980_vm1, %v15018_v32  ;;  %v15057_v32 = vld [vmem:[#allocation45_spill] sm:$0xff] }
 0x85b   : > { %8933 = vmatprep.mubr.msk.f32.mxu1 %vm980_vm1, %v15020_v63  ;;  %v15056_v63 = vld [vmem:[#allocation34_spill] sm:$0xff] }
 0x85e   : > { %8934 = vmatmul.mubr.msk.f32.gmra.mrb[18].mxu1 %vm980_vm1, %v15022_v42  ;;  %v15055_v42 = vld [vmem:[#allocation70_spill] sm:$0xff] }
 0x85f   : > { %8936 = vmatprep.mubr.msk.f32.mxu1 %vm980_vm1, %v15024_v37  ;;  %v15054_v37 = vld [vmem:[#allocation134_spill] sm:$0xff] }
 0x862   : > { %8937 = vmatmul.mubr.msk.f32.gmra.mrb[20].mxu1 %vm980_vm1, %v15026_v8  ;;  %v15053_v8 = vld [vmem:[#allocation56_spill] sm:$0xff] }
 0x863   : > { %8939 = vmatprep.mubr.msk.f32.mxu1 %vm980_vm1, %v15028_v43 }
 0x866   : > { %8940 = vmatmul.mubr.msk.f32.gmra.mrb[22].mxu1 %vm980_vm1, %v15030_v7 }
 0x867   : > { %8942 = vmatprep.mubr.msk.f32.mxu1 %vm980_vm1, %v15032_v44  ;;  %v5673_v44 = vrot.slane %v13815_v46, 4  ;;  %v15079_v46 = vld [vmem:[#allocation129_spill] sm:$0xff] }
 0x869   : > { %v5674_v43 = vsel %vm5242_vm6, %v5671_v2, %v5673_v44 }
 0x86a   : > { %8943 = vmatmul.mubr.msk.f32.gmra.mrb[24].mxu1 %vm980_vm1, %v15034_v9  ;;  %v15052_v9 = vld [vmem:[#allocation68_spill] sm:$0xff] }
 0x86b   : > { %8945 = vmatprep.mubr.msk.f32.mxu1 %vm980_vm1, %v15036_v55  ;;  %v5672_v55 = vsel %vm5242_vm6, %v5314_v24, %v5671_v2 }
 0x86e   : > { %8946 = vmatmul.mubr.msk.f32.gmra.mrb[26].mxu1 %vm980_vm1, %v15038_v56 }
 0x86f   : > { %8948 = vmatprep.mubr.msk.f32.mxu1 %vm980_vm1, %v15039_v16  ;;  %v15075_v16 = vld [vmem:[#allocation119_spill] sm:$0xff] }
 0x872   : > { %8949 = vmatmul.mubr.msk.f32.gmra.mrb[28].mxu1 %vm980_vm1, %v15041_v0  ;;  %v15078_v0 = vld [vmem:[#allocation127_spill] sm:$0xff] }
 0x873   : > { %8951 = vmatprep.mubr.msk.f32.mxu1 %vm980_vm1, %v15043_v52  ;;  %v15080_v52 = vld [vmem:[#allocation133_spill] sm:$0xff] }
 0x876   : > { %8952 = vmatmul.mubr.msk.f32.gmra.mrb[30].mxu1 %vm980_vm1, %v13317_v53  ;;  %v15051_v53 = vld [vmem:[#allocation64_spill] sm:$0xff] }
 0x877   : > { %8954 = vmatprep.mubr.msk.f32.mxu1 %vm980_vm1, %v13567_v3  ;;  %v15059_v3 = vld [vmem:[#allocation76_spill] sm:$0xff] }
 0x879   : > { %v13927_v56 = vpop.f32.mrb[240].mxu0 }
 0x87a   : > { %8955 = vmatmul.mubr.msk.f32.gmra.mrb[32].mxu1 %vm980_vm1, %v5315_v35  ;;  %v13930_v7 = vpop.f32.mrb[241].mxu0 }
 0x87b   : > { %8957 = vmatprep.mubr.msk.f32.mxu1 %vm980_vm1, %v5672_v55 }
 0x87e   : > { %8958 = vmatmul.mubr.msk.f32.gmra.mrb[34].mxu1 %vm980_vm1, %v5674_v43  ;;  %v15088_v43 = vld [vmem:[#allocation93_spill] sm:$0xff] }
 0x87f   : > { %8968 = vmatprep.mubr.msk.f32.mxu1 %vm980_vm1, %v15051_v53 }
 0x882   : > { %8969 = vmatmul.mubr.msk.f32.vlgmr.msra.gmra.mrb[0].mxu1 %vm980_vm1, %v15052_v9 }
 0x883   : > { %9188 = vmatpush3.bf16.msra.mxu1 %v15050_v38  ;;  %8971 = vmatprep.mubr.msk.f32.mxu1 %vm980_vm1, %v15053_v8 }
 0x884   : > { %9187 = vmatprep.subr.bf16.mxu1 %v15054_v37 }
 0x886   : > { %8972 = vmatmul.mubr.msk.f32.gmra.mrb[2].mxu1 %vm980_vm1, %v15055_v42 }
 0x887   : > { %8974 = vmatprep.mubr.msk.f32.mxu1 %vm980_vm1, %v15056_v63  ;;  %9189 = vmatpush3.bf16.msra.mxu1 %v15054_v37  ;;  %v15089_v63 = vld [vmem:[#allocation41_spill] sm:$0xff] }
 0x88a   : > { %8975 = vmatmul.mubr.msk.f32.gmra.mrb[4].mxu1 %vm980_vm1, %v15057_v32 }
 0x88b   : > { %8977 = vmatprep.mubr.msk.f32.mxu1 %vm980_vm1, %v15058_v11 }
 0x88e   : > { %8978 = vmatmul.mubr.msk.f32.gmra.mrb[6].mxu1 %vm980_vm1, %v15059_v3 }
 0x88f   : > { %8980 = vmatprep.mubr.msk.f32.mxu1 %vm980_vm1, %v15060_v1  ;;  %v15090_v1 = vld [vmem:[#allocation48_spill] sm:$0xff] }
 0x892   : > { %8981 = vmatmul.mubr.msk.f32.gmra.mrb[8].mxu1 %vm980_vm1, %v15061_v21 }
 0x893   : > { %8983 = vmatprep.mubr.msk.f32.mxu1 %vm980_vm1, %v15062_v28 }
 0x896   : > { %8984 = vmatmul.mubr.msk.f32.gmra.mrb[10].mxu1 %vm980_vm1, %v15063_v15 }
 0x897   : > { %8986 = vmatprep.mubr.msk.f32.mxu1 %vm980_vm1, %v15064_v61 }
 0x89a   : > { %8987 = vmatmul.mubr.msk.f32.gmra.mrb[12].mxu1 %vm980_vm1, %v15065_v4 }
 0x89b   : > { %8989 = vmatprep.mubr.msk.f32.mxu1 %vm980_vm1, %v15066_v50  ;;  %v15091_v50 = vld [vmem:[#allocation40_spill] sm:$0xff] }
 0x89e   : > { %8990 = vmatmul.mubr.msk.f32.gmra.mrb[14].mxu1 %vm980_vm1, %v15067_v36 }
 0x89f   : > { %8992 = vmatprep.mubr.msk.f32.mxu1 %vm980_vm1, %v15068_v48 }
 0x8a2   : > { %8993 = vmatmul.mubr.msk.f32.gmra.mrb[16].mxu1 %vm980_vm1, %v15069_v34 }
 0x8a3   : > { %8995 = vmatprep.mubr.msk.f32.mxu1 %vm980_vm1, %v15070_v17  ;;  %v15092_v17 = vld [vmem:[#allocation27_spill] sm:$0xff] }
 0x8a6   : > { %8996 = vmatmul.mubr.msk.f32.gmra.mrb[18].mxu1 %vm980_vm1, %v15071_v23 }
 0x8a7   : > { %8998 = vmatprep.mubr.msk.f32.mxu1 %vm980_vm1, %v15072_v20 }
 0x8aa   : > { %8999 = vmatmul.mubr.msk.f32.gmra.mrb[20].mxu1 %vm980_vm1, %v15073_v58 }
 0x8ab   : > { %9001 = vmatprep.mubr.msk.f32.mxu1 %vm980_vm1, %v15074_v39 }
 0x8ae   : > { %9002 = vmatmul.mubr.msk.f32.gmra.mrb[22].mxu1 %vm980_vm1, %v15075_v16 }
 0x8af   : > { %9004 = vmatprep.mubr.msk.f32.mxu1 %vm980_vm1, %v15076_v22  ;;  %v15093_v22 = vld [vmem:[#allocation65_spill] sm:$0xff] }
 0x8b2   : > { %9005 = vmatmul.mubr.msk.f32.gmra.mrb[24].mxu1 %vm980_vm1, %v15077_v30 }
 0x8b3   : > { %9007 = vmatprep.mubr.msk.f32.mxu1 %vm980_vm1, %v15078_v0 }
 0x8b6   : > { %9008 = vmatmul.mubr.msk.f32.gmra.mrb[26].mxu1 %vm980_vm1, %v15079_v46 }
 0x8b7   : > { %9010 = vmatprep.mubr.msk.f32.mxu1 %vm980_vm1, %v15080_v52  ;;  %v15094_v52 = vld [vmem:[#allocation37_spill] sm:$0xff] }
 0x8ba   : > { %9011 = vmatmul.mubr.msk.f32.gmra.mrb[28].mxu1 %vm980_vm1, %v15081_v10 }
 0x8bb   : > { %9013 = vmatprep.mubr.msk.f32.mxu1 %vm980_vm1, %v15082_v26 }
 0x8be   : > { %9014 = vmatmul.mubr.msk.f32.gmra.mrb[30].mxu1 %vm980_vm1, %v13324_v41 }
 0x8bf   : > { %9016 = vmatprep.mubr.msk.f32.mxu1 %vm980_vm1, %v13574_v57  ;;  %v15085_v57 = vld [vmem:[#allocation20_spill] sm:$0xff] }
 0x8c2   : > { %9017 = vmatmul.mubr.msk.f32.gmra.mrb[32].mxu1 %vm980_vm1, %v13579_v27 }
 0x8c3   : > { %9019 = vmatprep.mubr.msk.f32.mxu1 %vm980_vm1, %v13832_v62  ;;  %v14023_v62 = vld [vmem:[%s14353_s6] ss:$0 sm:$0xff] }
 0x8c6   : > { %9020 = vmatmul.mubr.msk.f32.gmra.mrb[34].mxu1 %vm980_vm1, %v13840_v60  ;;  %v15086_v60 = vld [vmem:[#allocation77_spill] sm:$0xff] }
 0x8c7   : > { %9081 = vmatprep.mubr.msk.f32.mxu1 %vm980_vm1, %v6458_v51 }
 0x8ce   : > { %9082 = vmatmul.mubr.msk.f32.vlgmr.msra.gmra.mrb[34].mxu1 %vm980_vm1, %v13845_v45  ;;  %v15087_v45 = vld [vmem:[#allocation21_spill] sm:$0xff] }
 0x955   : > { %v8970_v41 = vpop.f32.mrb[0].mxu1 }
 0x956   : > { %v9190_v27 = vadd.f32 %v8970_v41, %v15085_v57  ;;  %v6172_v24 = vpop.f32.mrb[1].mxu1 }
 0x957   : > { %v9192_v19 = vadd.f32 %v6172_v24, %v15086_v60  ;;  %v15095_v60 = vld [vmem:[#allocation75_spill] sm:$0xff] }
 0x958   : > { %v9191_v13 = vadd.f32 %v9190_v27, %v13696_v6 }
 0x959   : > { %v9193_v35 = vadd.f32 %v9192_v19, %v13700_v12  ;;  %v8973_v33 = vpop.f32.mrb[2].mxu1 }
 0x95a   : > { %v14029_v38 = vadd.f32 %v9191_v13, %v14023_v62  ;;  %v9194_v2 = vadd.f32 %v8973_v33, %v15087_v45  ;;  %v6182_v44 = vpop.f32.mrb[3].mxu1 }
 0x95b   : > { %v14033_v55 = vadd.f32 %v9193_v35, %v14023_v62  ;;  %v9196_v53 = vadd.f32 %v6182_v44, %v15088_v43 }
 0x95c   : > { %v7621_v9 = vmul.f32 -1.442695, %v14029_v38  ;;  %v9195_v8 = vadd.f32 %v9194_v2, %v13705_v47 }
 0x95d   : > { %v7620_v6 = vmul.f32 -1.442695, %v14033_v55  ;;  %v9197_v12 = vadd.f32 %v9196_v53, %v13709_v49  ;;  %v8976_v37 = vpop.f32.mrb[4].mxu1 }
 0x95e   : > { %9997 = vpow2.f32 %v7621_v9  ;;  %v14041_v42 = vadd.f32 %v9195_v8, %v14023_v62  ;;  %v9198_v32 = vadd.f32 %v8976_v37, %v15089_v63  ;;  %v6192_v11 = vpop.f32.mrb[5].mxu1  ;;  %v15098_v8 = vld [vmem:[#allocation136_spill] sm:$0xff] }
 0x95f   : > { %9999 = vpow2.f32 %v7620_v6  ;;  %v14045_v3 = vadd.f32 %v9197_v12, %v14023_v62  ;;  %v9200_v21 = vadd.f32 %v6192_v11, %v15090_v1 }
 0x960   : > { %v7623_v47 = vmul.f32 -1.442695, %v14041_v42  ;;  %v9199_v28 = vadd.f32 %v9198_v32, %v13713_v14  ;;  %v15099_v32 = vld [vmem:[#allocation33_spill] sm:$0xff] }
 0x961   : > { %v7622_v49 = vmul.f32 -1.442695, %v14045_v3  ;;  %v9201_v15 = vadd.f32 %v9200_v21, %v13717_v18  ;;  %v8979_v61 = vpop.f32.mrb[6].mxu1 }
 0x962   : > { %10001 = vpow2.f32 %v7623_v47  ;;  %v14053_v4 = vadd.f32 %v9199_v28, %v14023_v62  ;;  %v9202_v36 = vadd.f32 %v8979_v61, %v15091_v50  ;;  %v6202_v48 = vpop.f32.mrb[7].mxu1  ;;  %v15100_v47 = vld [vmem:[#allocation72_spill] sm:$0xff]  ;;  %v15101_v61 = vld [vmem:[#allocation130_spill] sm:$0xff] }
 0x963   : > { %10003 = vpow2.f32 %v7622_v49  ;;  %v14057_v34 = vadd.f32 %v9201_v15, %v14023_v62  ;;  %v9204_v23 = vadd.f32 %v6202_v48, %v15092_v17 }
 0x964   : > { %v7625_v14 = vmul.f32 -1.442695, %v14053_v4  ;;  %v9203_v20 = vadd.f32 %v9202_v36, %v13721_v54 }
 0x965   : > { %v7624_v18 = vmul.f32 -1.442695, %v14057_v34  ;;  %v9205_v58 = vadd.f32 %v9204_v23, %v13725_v59  ;;  %v8982_v39 = vpop.f32.mrb[8].mxu1  ;;  %v15102_v23 = vld [vmem:[#allocation140_spill] sm:$0xff] }
 0x966   : > { %10005 = vpow2.f32 %v7625_v14  ;;  %v14065_v16 = vadd.f32 %v9203_v20, %v14023_v62  ;;  %v9206_v30 = vadd.f32 %v8982_v39, %v15093_v22  ;;  %v6212_v0 = vpop.f32.mrb[9].mxu1  ;;  %v15103_v39 = vld [vmem:[#allocation32_spill] sm:$0xff] }
 0x967   : > { %10007 = vpow2.f32 %v7624_v18  ;;  %v14069_v46 = vadd.f32 %v9205_v58, %v14023_v62  ;;  %v9208_v10 = vadd.f32 %v6212_v0, %v15094_v52  ;;  %v15104_v52 = vld [vmem:[#allocation12_spill] sm:$0xff] }
 0x968   : > { %v9998_v26 = vpop.eup %9997  ;;  %v7627_v54 = vmul.f32 -1.442695, %v14065_v16  ;;  %v9207_v31 = vadd.f32 %v9206_v30, %v13729_v40  ;;  %v15096_v40 = vld [vmem:[#allocation57_spill] sm:$0xff] }
 0x969   : > { %v10000_v59 = vpop.eup %9999  ;;  %v6966_v5 = vadd.f32 1.0, %v9998_v26  ;;  %v7626_v51 = vmul.f32 -1.442695, %v14069_v46  ;;  %v9209_v41 = vadd.f32 %v9208_v10, %v13733_v29  ;;  %v8985_v57 = vpop.f32.mrb[10].mxu1  ;;  %v15097_v29 = vld [vmem:[#allocation46_spill] sm:$0xff] }
 0x96a   : > { %v6965_v27 = vadd.f32 1.0, %v10000_v59  ;;  %10009 = vpow2.f32 %v7627_v54  ;;  %v14077_v24 = vadd.f32 %v9207_v31, %v14023_v62  ;;  %v9210_v19 = vadd.f32 %v8985_v57, %v15095_v60  ;;  %v6222_v13 = vpop.f32.mrb[11].mxu1  ;;  %v15105_v31 = vld [vmem:[#allocation135_spill] sm:$0xff]  ;;  %v15106_v57 = vld [vmem:[#allocation44_spill] sm:$0xff] }
 0x96b   : > { %10011 = vrcp.f32 %v6966_v5  ;;  %v14081_v35 = vadd.f32 %v9209_v41, %v14023_v62  ;;  %v9212_v33 = vadd.f32 %v6222_v13, %v15096_v40 }
 0x96c   : > { %v10002_v45 = vpop.eup %10001  ;;  %10013 = vrcp.f32 %v6965_v27  ;;  %v7629_v2 = vmul.f32 -1.442695, %v14077_v24  ;;  %v9211_v44 = vadd.f32 %v9210_v19, %v15097_v29 }
 0x96d   : > { %v10004_v43 = vpop.eup %10003  ;;  %v6968_v53 = vadd.f32 1.0, %v10002_v45  ;;  %10015 = vpow2.f32 %v7626_v51  ;;  %v7628_v9 = vmul.f32 -1.442695, %v14081_v35  ;;  %v9213_v6 = vadd.f32 %v9212_v33, %v15098_v8  ;;  %v8988_v12 = vpop.f32.mrb[12].mxu1  ;;  %v15107_v33 = vld [vmem:[#allocation98_spill] sm:$0xff] }
 0x96e   : > { %v6967_v37 = vadd.f32 1.0, %v10004_v43  ;;  %10017 = vpow2.f32 %v7629_v2  ;;  %v14089_v63 = vadd.f32 %v9211_v44, %v14023_v62  ;;  %v9214_v11 = vadd.f32 %v8988_v12, %v15099_v32  ;;  %v6232_v1 = vpop.f32.mrb[13].mxu1  ;;  %v15109_v12 = vld [vmem:[#allocation5_spill] sm:$0xff] }
 0x96f   : > { %10019 = vrcp.f32 %v6968_v53  ;;  %v14093_v21 = vadd.f32 %v9213_v6, %v14023_v62  ;;  %v9216_v28 = vadd.f32 %v6232_v1, %v15100_v47  ;;  %v15108_v53 = vld [vmem:[#allocation36_spill] sm:$0xff]  ;;  %v15110_v1 = vld [vmem:[#allocation6_spill] sm:$0xff] }
 0x970   : > { %v10006_v49 = vpop.eup %10005  ;;  %10021 = vrcp.f32 %v6967_v37  ;;  %v7631_v15 = vmul.f32 -1.442695, %v14089_v63  ;;  %v9215_v50 = vadd.f32 %v9214_v11, %v15101_v61 }
 0x971   : > { %v10008_v36 = vpop.eup %10007  ;;  %v6970_v48 = vadd.f32 1.0, %v10006_v49  ;;  %10023 = vpow2.f32 %v7628_v9  ;;  %v7630_v17 = vmul.f32 -1.442695, %v14093_v21  ;;  %v9217_v14 = vadd.f32 %v9216_v28, %v15102_v23  ;;  %v8991_v20 = vpop.f32.mrb[14].mxu1 }
 0x972   : > { %v6969_v18 = vadd.f32 1.0, %v10008_v36  ;;  %10025 = vpow2.f32 %v7631_v15  ;;  %v14102_v58 = vadd.f32 %v9215_v50, %v14023_v62  ;;  %v9218_v22 = vadd.f32 %v8991_v20, %v15103_v39  ;;  %v6242_v30 = vpop.f32.mrb[15].mxu1  ;;  %v15111_v50 = vld [vmem:[#allocation88_spill] sm:$0xff]  ;;  %v15112_v20 = vld [vmem:[#allocation55_spill] sm:$0xff] }
 0x973   : > { %10027 = vrcp.f32 %v6970_v48  ;;  %v14106_v0 = vadd.f32 %v9217_v14, %v14023_v62  ;;  %v9220_v10 = vadd.f32 %v6242_v30, %v15104_v52  ;;  %v15113_v30 = vld [vmem:[#allocation63_spill] sm:$0xff] }
 0x974   : > { %v10010_v26 = vpop.eup %10009  ;;  %10029 = vrcp.f32 %v6969_v18  ;;  %v7633_v54 = vmul.f32 -1.442695, %v14102_v58  ;;  %v9219_v59 = vadd.f32 %v9218_v22, %v15105_v31 }
 0x975   : > { %v10012_v5 = vpop.eup %10011  ;;  %v6972_v51 = vadd.f32 1.0, %v10010_v26  ;;  %10031 = vpow2.f32 %v7630_v17  ;;  %v7632_v41 = vmul.f32 -1.442695, %v14106_v0  ;;  %v9221_v27 = vadd.f32 %v9220_v10, %v15106_v57  ;;  %v8994_v60 = vpop.f32.mrb[16].mxu1  ;;  %v15115_v57 = vld [vmem:[#allocation73_spill] sm:$0xff] }
 0x976   : > { %v10014_v19 = vpop.eup %10013  ;;  %v7074_v13 = vmul.f32 %v10012_v5, %v14029_v38  ;;  %10033 = vpow2.f32 %v7633_v54  ;;  %v14120_v40 = vadd.f32 %v9219_v59, %v14023_v62  ;;  %v9222_v45 = vadd.f32 %v8994_v60, %v15107_v33  ;;  %v6252_v2 = vpop.f32.mrb[17].mxu1  ;;  %v15114_v54 = vld [vmem:[#allocation22_spill] sm:$0xff] }
 0x977   : > { %v10016_v29 = vpop.eup %10015  ;;  %v7073_v44 = vmul.f32 %v10014_v19, %v14033_v55  ;;  %10035 = vrcp.f32 %v6972_v51  ;;  %v14125_v43 = vadd.f32 %v9221_v27, %v14023_v62  ;;  %v9224_v9 = vadd.f32 %v6252_v2, %v15108_v53  ;;  %v15117_v53 = vld [vmem:[#allocation38_spill] sm:$0xff] }
 0x978   : > { %v10018_v8 = vpop.eup %10017  ;;  %7110 = vst.msk [vmem:[%s14114_s13 + $0x8] sm:$0xff] %vm980_vm1, %v7074_v13  ;;  %v6971_v38 = vadd.f32 1.0, %v10016_v29  ;;  %10037 = vpow2.f32 %v7632_v41  ;;  %v7635_v6 = vmul.f32 -1.442695, %v14120_v40  ;;  %v9223_v37 = vadd.f32 %v9222_v45, %v15109_v12  ;;  %v15116_v45 = vld [vmem:[#allocation71_spill] sm:$0xff] }
 0x979   : > { %v10020_v32 = vpop.eup %10019  ;;  %7109 = vst.msk [vmem:[%s14114_s13] sm:$0xff] %vm980_vm1, %v7073_v44  ;;  %v6974_v11 = vadd.f32 1.0, %v10018_v8  ;;  %v7634_v55 = vmul.f32 -1.442695, %v14125_v43  ;;  %v9225_v47 = vadd.f32 %v9224_v9, %v15110_v1  ;;  %v8997_v28 = vpop.f32.mrb[18].mxu1  ;;  %v15119_v1 = vld [vmem:[#allocation61_spill] sm:$0xff] }
 0x97a   : > { %v10022_v49 = vpop.eup %10021  ;;  %v7076_v15 = vmul.f32 %v10020_v32, %v14041_v42  ;;  %10039 = vrcp.f32 %v6971_v38  ;;  %v14138_v61 = vadd.f32 %v9223_v37, %v14023_v62  ;;  %v9226_v36 = vadd.f32 %v8997_v28, %v15111_v50  ;;  %v6262_v48 = vpop.f32.mrb[19].mxu1  ;;  %v15120_v50 = vld [vmem:[#allocation31_spill] sm:$0xff] }
 0x97b   : > { %v10024_v17 = vpop.eup %10023  ;;  %v7075_v23 = vmul.f32 %v10022_v49, %v14045_v3  ;;  %10041 = vrcp.f32 %v6974_v11  ;;  %v14143_v14 = vadd.f32 %v9225_v47, %v14023_v62  ;;  %v9228_v18 = vadd.f32 %v6262_v48, %v15112_v20 }
 0x97c   : > { %v10026_v39 = vpop.eup %10025  ;;  %7112 = vst.msk [vmem:[%s14114_s13 + $0x18] sm:$0xff] %vm980_vm1, %v7076_v15  ;;  %v6973_v42 = vadd.f32 1.0, %v10024_v17  ;;  %10043 = vpow2.f32 %v7635_v6  ;;  %v7637_v22 = vmul.f32 -1.442695, %v14138_v61  ;;  %v9227_v52 = vadd.f32 %v9226_v36, %v15113_v30  ;;  %v15118_v6 = vld [vmem:[#allocation28_spill] sm:$0xff] }
 0x97d   : > { %v10028_v10 = vpop.eup %10027  ;;  %7111 = vst.msk [vmem:[%s14114_s13 + $0x10] sm:$0xff] %vm980_vm1, %v7075_v23  ;;  %v6976_v26 = vadd.f32 1.0, %v10026_v39  ;;  %10045 = vpow2.f32 %v7634_v55  ;;  %v7636_v3 = vmul.f32 -1.442695, %v14143_v14  ;;  %v9229_v31 = vadd.f32 %v9228_v18, %v15114_v54  ;;  %v9000_v59 = vpop.f32.mrb[20].mxu1  ;;  %v15121_v17 = vld [vmem:[#allocation24_spill] sm:$0xff] }
 0x97e   : > { %v10030_v5 = vpop.eup %10029  ;;  %v7078_v51 = vmul.f32 %v10028_v10, %v14053_v4  ;;  %10047 = vrcp.f32 %v6973_v42  ;;  %v14156_v41 = vadd.f32 %v9227_v52, %v14023_v62  ;;  %v9230_v27 = vadd.f32 %v9000_v59, %v15115_v57  ;;  %v6272_v60 = vpop.f32.mrb[21].mxu1  ;;  %v15122_v42 = vld [vmem:[#allocation59_spill] sm:$0xff] }
 0x97f   : > { %v10032_v19 = vpop.eup %10031  ;;  %v7077_v13 = vmul.f32 %v10030_v5, %v14057_v34  ;;  %10049 = vrcp.f32 %v6976_v26  ;;  %v14161_v33 = vadd.f32 %v9229_v31, %v14023_v62  ;;  %v9232_v2 = vadd.f32 %v6272_v60, %v15116_v45 }
 0x980   : > { %v10034_v29 = vpop.eup %10033  ;;  %7114 = vst.msk [vmem:[%s14114_s13 + $0x28] sm:$0xff] %vm980_vm1, %v7078_v51  ;;  %v6975_v4 = vadd.f32 1.0, %v10032_v19  ;;  %10051 = vpow2.f32 %v7637_v22  ;;  %v7639_v44 = vmul.f32 -1.442695, %v14156_v41  ;;  %v9231_v9 = vadd.f32 %v9230_v27, %v15117_v53  ;;  %v15124_v51 = vld [vmem:[#allocation60_spill] sm:$0xff]  ;;  %v15125_v19 = vld [vmem:[#allocation30_spill] sm:$0xff] }
 0x981   : > { %v10036_v8 = vpop.eup %10035  ;;  %7113 = vst.msk [vmem:[%s14114_s13 + $0x20] sm:$0xff] %vm980_vm1, %v7077_v13  ;;  %v6978_v38 = vadd.f32 1.0, %v10034_v29  ;;  %10053 = vpow2.f32 %v7636_v3  ;;  %v7638_v34 = vmul.f32 -1.442695, %v14161_v33  ;;  %v9233_v12 = vadd.f32 %v9232_v2, %v15118_v6  ;;  %v9003_v37 = vpop.f32.mrb[22].mxu1  ;;  %v15123_v3 = vld [vmem:[#allocation43_spill] sm:$0xff] }
 0x982   : > { %v10038_v32 = vpop.eup %10037  ;;  %v7080_v11 = vmul.f32 %v10036_v8, %v14065_v16  ;;  %10055 = vrcp.f32 %v6975_v4  ;;  %v14174_v55 = vadd.f32 %v9231_v9, %v14023_v62  ;;  %v9234_v47 = vadd.f32 %v9003_v37, %v15119_v1  ;;  %v6282_v28 = vpop.f32.mrb[23].mxu1  ;;  %v15126_v4 = vld [vmem:[#allocation4_spill] sm:$0xff] }
 0x983   : > { %10057 = vrcp.f32 %v6978_v38  ;;  %v6977_v49 = vadd.f32 1.0, %v10038_v32  ;;  %v14178_v15 = vadd.f32 %v9233_v12, %v14023_v62  ;;  %v9236_v36 = vadd.f32 %v6282_v28, %v15120_v50 }
 0x984   : > { %v10040_v48 = vpop.eup %10039  ;;  %7116 = vst.msk [vmem:[%s14114_s13 + $0x38] sm:$0xff] %vm980_vm1, %v7080_v11  ;;  %10059 = vpow2.f32 %v7639_v44  ;;  %v7641_v16 = vmul.f32 -1.442695, %v14174_v55  ;;  %v9235_v23 = vadd.f32 %v9234_v47, %v15121_v17  ;;  %v15128_v11 = vld [vmem:[#allocation8_spill] sm:$0xff] }
 0x985   : > { %v10042_v20 = vpop.eup %10041  ;;  %v7079_v18 = vmul.f32 %v10040_v48, %v14069_v46  ;;  %10061 = vrcp.f32 %v6977_v49  ;;  %v7640_v39 = vmul.f32 -1.442695, %v14178_v15  ;;  %v9237_v22 = vadd.f32 %v9236_v36, %v15122_v42  ;;  %v9006_v30 = vpop.f32.mrb[24].mxu1  ;;  %v15130_v42 = vld [vmem:[#allocation25_spill] sm:$0xff] }
 0x986   : > { %v10044_v52 = vpop.eup %10043  ;;  %v7082_v10 = vmul.f32 %v10042_v20, %v14077_v24  ;;  %10063 = vpow2.f32 %v7638_v34  ;;  %v14190_v26 = vadd.f32 %v9235_v23, %v14023_v62  ;;  %v9238_v54 = vadd.f32 %v9006_v30, %v15123_v3  ;;  %v6292_v31 = vpop.f32.mrb[25].mxu1  ;;  %v15127_v34 = vld [vmem:[#allocation81_spill] sm:$0xff] }
 0x987   : > { %v10046_v59 = vpop.eup %10045  ;;  %7115 = vst.msk [vmem:[%s14114_s13 + $0x30] sm:$0xff] %vm980_vm1, %v7079_v18  ;;  %v6980_v46 = vadd.f32 1.0, %v10044_v52  ;;  %10065 = vpow2.f32 %v7641_v16  ;;  %v14196_v5 = vadd.f32 %v9237_v22, %v14023_v62  ;;  %v9240_v57 = vadd.f32 %v6292_v31, %v15124_v51  ;;  %v15129_v16 = vld [vmem:[#allocation51_spill] sm:$0xff] }
 0x988   : > { %v10048_v27 = vpop.eup %10047  ;;  %7118 = vst.msk [vmem:[%s14114_s13 + $0x48] sm:$0xff] %vm980_vm1, %v7082_v10  ;;  %v6979_v24 = vadd.f32 1.0, %v10046_v59  ;;  %10067 = vpow2.f32 %v7640_v39  ;;  %v7643_v60 = vmul.f32 -1.442695, %v14190_v26  ;;  %v9239_v13 = vadd.f32 %v9238_v54, %v15125_v19  ;;  %v15131_v10 = vld [vmem:[#allocation10_spill] sm:$0xff] }
 0x989   : > { %v10050_v45 = vpop.eup %10049  ;;  %v7081_v2 = vmul.f32 %v10048_v27, %v14081_v35  ;;  %10069 = vrcp.f32 %v6980_v46  ;;  %v7642_v29 = vmul.f32 -1.442695, %v14196_v5  ;;  %v9241_v44 = vadd.f32 %v9240_v57, %v15126_v4  ;;  %v9009_v53 = vpop.f32.mrb[26].mxu1  ;;  %v15132_v59 = vld [vmem:[#allocation78_spill] sm:$0xff] }
 0x98a   : > { %v10052_v9 = vpop.eup %10051  ;;  %v7084_v8 = vmul.f32 %v10050_v45, %v14089_v63  ;;  %10071 = vrcp.f32 %v6979_v24  ;;  %v14208_v38 = vadd.f32 %v9239_v13, %v14023_v62  ;;  %v9242_v6 = vadd.f32 %v9009_v53, %v15127_v34  ;;  %v6302_v12 = vpop.f32.mrb[27].mxu1  ;;  %v15133_v24 = vld [vmem:[#allocation83_spill] sm:$0xff] }
 0x98b   : > { %v10054_v37 = vpop.eup %10053  ;;  %7117 = vst.msk [vmem:[%s14114_s13 + $0x40] sm:$0xff] %vm980_vm1, %v7081_v2  ;;  %v6982_v35 = vadd.f32 1.0, %v10052_v9  ;;  %10073 = vpow2.f32 %v7643_v60  ;;  %v14214_v32 = vadd.f32 %v9241_v44, %v14023_v62  ;;  %v9244_v1 = vadd.f32 %v6302_v12, %v15128_v11  ;;  %v15134_v2 = vld [vmem:[#allocation92_spill] sm:$0xff] }
 0x98c   : > { %v10056_v47 = vpop.eup %10055  ;;  %7120 = vst.msk [vmem:[%s14114_s13 + $0x58] sm:$0xff] %vm980_vm1, %v7084_v8  ;;  %v6981_v63 = vadd.f32 1.0, %v10054_v37  ;;  %10075 = vpow2.f32 %v7642_v29  ;;  %v7645_v28 = vmul.f32 -1.442695, %v14208_v38  ;;  %v9243_v49 = vadd.f32 %v9242_v6, %v13803_v25  ;;  %v15135_v8 = vld [vmem:[#allocation79_spill] sm:$0xff] }
 0x98d   : > { %v10058_v50 = vpop.eup %10057  ;;  %v7083_v36 = vmul.f32 %v10056_v47, %v14093_v21  ;;  %10077 = vrcp.f32 %v6982_v35  ;;  %v7644_v48 = vmul.f32 -1.442695, %v14214_v32  ;;  %v9245_v17 = vadd.f32 %v9244_v1, %v15129_v16  ;;  %v9012_v23 = vpop.f32.mrb[28].mxu1  ;;  %v15136_v35 = vld [vmem:[#allocation62_spill] sm:$0xff]  ;;  %v15138_v16 = vld [vmem:[#allocation99_spill] sm:$0xff] }
 0x98e   : > { %v10060_v20 = vpop.eup %10059  ;;  %v7086_v18 = vmul.f32 %v10058_v50, %v14102_v58  ;;  %10079 = vrcp.f32 %v6981_v63  ;;  %v14226_v39 = vadd.f32 %v9243_v49, %v14023_v62  ;;  %v9246_v22 = vadd.f32 %v9012_v23, %v15130_v42  ;;  %v6312_v25 = vpop.f32.mrb[29].mxu1  ;;  %v15139_v42 = vld [vmem:[#allocation29_spill] sm:$0xff] }
 0x98f   : > { %v10062_v30 = vpop.eup %10061  ;;  %7119 = vst.msk [vmem:[%s14114_s13 + $0x50] sm:$0xff] %vm980_vm1, %v7083_v36  ;;  %v6984_v21 = vadd.f32 1.0, %v10060_v20  ;;  %10081 = vpow2.f32 %v7645_v28  ;;  %v14232_v52 = vadd.f32 %v9245_v17, %v14023_v62  ;;  %v9248_v3 = vadd.f32 %v6312_v25, %v15131_v10  ;;  %v15137_v28 = vld [vmem:[#allocation89_spill] sm:$0xff] }
 0x990   : > { %v10064_v54 = vpop.eup %10063  ;;  %7122 = vst.msk [vmem:[%s14114_s13 + $0x68] sm:$0xff] %vm980_vm1, %v7086_v18  ;;  %v7085_v58 = vmul.f32 %v10062_v30, %v14106_v0  ;;  %10083 = vpow2.f32 %v7644_v48  ;;  %v7647_v31 = vmul.f32 -1.442695, %v14226_v39  ;;  %v9247_v46 = vadd.f32 %v9246_v22, %v15132_v59 }
 0x991   : > { %v10066_v51 = vpop.eup %10065  ;;  %10085 = vrcp.f32 %v6984_v21  ;;  %v6983_v57 = vadd.f32 1.0, %v10064_v54  ;;  %v7646_v27 = vmul.f32 -1.442695, %v14232_v52  ;;  %v9249_v60 = vadd.f32 %v9248_v3, %v15133_v24  ;;  %v9015_v19 = vpop.f32.mrb[30].mxu1 }
 0x992   : > { %v10068_v13 = vpop.eup %10067  ;;  %7121 = vst.msk [vmem:[%s14114_s13 + $0x60] sm:$0xff] %vm980_vm1, %v7085_v58  ;;  %v6986_v45 = vadd.f32 1.0, %v10066_v51  ;;  %10087 = vpow2.f32 %v7647_v31  ;;  %v14245_v0 = vadd.f32 %v9247_v46, %v14023_v62  ;;  %v9250_v29 = vadd.f32 %v9015_v19, %v15134_v2  ;;  %v6322_v4 = vpop.f32.mrb[31].mxu1 }
 0x993   : > { %v10070_v44 = vpop.eup %10069  ;;  %10089 = vrcp.f32 %v6983_v57  ;;  %v6985_v53 = vadd.f32 1.0, %v10068_v13  ;;  %v14249_v9 = vadd.f32 %v9249_v60, %v14023_v62  ;;  %v9252_v34 = vadd.f32 %v6322_v4, %v15135_v8 }
 0x994   : > { %v10072_v6 = vpop.eup %10071  ;;  %v7088_v12 = vmul.f32 %v10070_v44, %v14120_v40  ;;  %10091 = vrcp.f32 %v6986_v45  ;;  %v7649_v37 = vmul.f32 -1.442695, %v14245_v0  ;;  %v9251_v11 = vadd.f32 %v9250_v29, %v15136_v35 }
 0x995   : > { %v10074_v1 = vpop.eup %10073  ;;  %v7087_v47 = vmul.f32 %v10072_v6, %v14125_v43  ;;  %10093 = vrcp.f32 %v6985_v53  ;;  %v7648_v63 = vmul.f32 -1.442695, %v14249_v9  ;;  %v9253_v49 = vadd.f32 %v9252_v34, %v15137_v28  ;;  %v9018_v50 = vpop.f32.mrb[32].mxu1  ;;  %v15140_v6 = vld [vmem:[#allocation39_spill] sm:$0xff] }
 0x996   : > { %v10076_v36 = vpop.eup %10075  ;;  %7124 = vst.msk [vmem:[%s14114_s13 + $0x78] sm:$0xff] %vm980_vm1, %v7088_v12  ;;  %v6988_v48 = vadd.f32 1.0, %v10074_v1  ;;  %10095 = vpow2.f32 %v7646_v27  ;;  %v14261_v40 = vadd.f32 %v9251_v11, %v14023_v62  ;;  %v9254_v17 = vadd.f32 %v9018_v50, %v15138_v16  ;;  %v6332_v23 = vpop.f32.mrb[33].mxu1 }
 0x997   : > { %v10078_v20 = vpop.eup %10077  ;;  %7123 = vst.msk [vmem:[%s14114_s13 + $0x70] sm:$0xff] %vm980_vm1, %v7087_v47  ;;  %v6987_v43 = vadd.f32 1.0, %v10076_v36  ;;  %10097 = vpow2.f32 %v7649_v37  ;;  %v14267_v18 = vadd.f32 %v9253_v49, %v14023_v62  ;;  %v9256_v22 = vadd.f32 %v6332_v23, %v15139_v42 }
 0x998   : > { %v10080_v25 = vpop.eup %10079  ;;  %v7090_v30 = vmul.f32 %v10078_v20, %v14138_v61  ;;  %10099 = vrcp.f32 %v6988_v48  ;;  %v7651_v21 = vmul.f32 -1.442695, %v14261_v40  ;;  %v9255_v10 = vadd.f32 %v9254_v17, %v13927_v56 }
 0x999   : > { %v10082_v3 = vpop.eup %10081  ;;  %v7089_v54 = vmul.f32 %v10080_v25, %v14143_v14  ;;  %10101 = vrcp.f32 %v6987_v43  ;;  %v9257_v58 = vadd.f32 %v9256_v22, %v13930_v7  ;;  %v7650_v46 = vmul.f32 -1.442695, %v14267_v18 }
 0x99a   : > { %v10084_v31 = vpop.eup %10083  ;;  %7126 = vst.msk [vmem:[%s14114_s13 + $0x88] sm:$0xff] %vm980_vm1, %v7090_v30  ;;  %v6990_v59 = vadd.f32 1.0, %v10082_v3  ;;  %10103 = vpow2.f32 %v7648_v63  ;;  %v14279_v61 = vadd.f32 %v9255_v10, %v14023_v62 }
 0x99b   : > { %v10086_v51 = vpop.eup %10085  ;;  %7125 = vst.msk [vmem:[%s14114_s13 + $0x80] sm:$0xff] %vm980_vm1, %v7089_v54  ;;  %v6989_v56 = vadd.f32 1.0, %v10084_v31  ;;  %10105 = vpow2.f32 %v7651_v21  ;;  %v14284_v14 = vadd.f32 %v9257_v58, %v14023_v62 }
 0x99c   : > { %v10088_v7 = vpop.eup %10087  ;;  %v7092_v57 = vmul.f32 %v10086_v51, %v14156_v41  ;;  %10107 = vrcp.f32 %v6990_v59  ;;  %v7653_v27 = vmul.f32 -1.442695, %v14279_v61 }
 0x99d   : > { %v10090_v24 = vpop.eup %10089  ;;  %10109 = vrcp.f32 %v6989_v56  ;;  %v6992_v60 = vadd.f32 1.0, %v10088_v7  ;;  %v7652_v19 = vmul.f32 -1.442695, %v14284_v14 }
 0x99e   : > { %v10092_v13 = vpop.eup %10091  ;;  %7128 = vst.msk [vmem:[%s14114_s13 + $0x98] sm:$0xff] %vm980_vm1, %v7092_v57  ;;  %v7091_v45 = vmul.f32 %v10090_v24, %v14161_v33  ;;  %10111 = vpow2.f32 %v7650_v46 }
 0x99f   : > { %v10094_v2 = vpop.eup %10093  ;;  %v7094_v29 = vmul.f32 %v10092_v13, %v14174_v55  ;;  %10113 = vrcp.f32 %v6992_v60 }
 0x9a0   : > { %v10096_v41 = vpop.eup %10095  ;;  %7127 = vst.msk [vmem:[%s14114_s13 + $0x90] sm:$0xff] %vm980_vm1, %v7091_v45  ;;  %v7093_v4 = vmul.f32 %v10094_v2, %v14178_v15  ;;  %10115 = vpow2.f32 %v7653_v27  ;;  %v15141_v15 = vld [vmem:[#allocation123_spill] sm:$0xff] }
 0x9a1   : > { %v10098_v44 = vpop.eup %10097  ;;  %7130 = vst.msk [vmem:[%s14114_s13 + $0xa8] sm:$0xff] %vm980_vm1, %v7094_v29  ;;  %v6991_v53 = vadd.f32 1.0, %v10096_v41  ;;  %10117 = vpow2.f32 %v7652_v19  ;;  %v9083_v8 = vpop.f32.mrb[34].mxu1 }
 0x9a2   : > { %v10100_v34 = vpop.eup %10099  ;;  %7129 = vst.msk [vmem:[%s14114_s13 + $0xa0] sm:$0xff] %vm980_vm1, %v7093_v4  ;;  %v6994_v33 = vadd.f32 1.0, %v10098_v44  ;;  %v9258_v55 = vadd.f32 %v9083_v8, %v15140_v6  ;;  %v6769_v12 = vpop.f32.mrb[35].mxu1 }
 0x9a3   : > { %v10102_v37 = vpop.eup %10101  ;;  %v7096_v35 = vmul.f32 %v10100_v34, %v14190_v26  ;;  %10119 = vrcp.f32 %v6991_v53  ;;  %v9259_v11 = vadd.f32 %v6769_v12, %v15141_v15 }
 0x9a4   : > { %v10104_v1 = vpop.eup %10103  ;;  %v7095_v47 = vmul.f32 %v10102_v37, %v14196_v5  ;;  %10121 = vrcp.f32 %v6994_v33  ;;  %v6856_v63 = vadd.f32 %v9258_v55, %v14023_v62 }
 0x9a5   : > { %v10106_v28 = vpop.eup %10105  ;;  %7132 = vst.msk [vmem:[%s14114_s13 + $0xb8] sm:$0xff] %vm980_vm1, %v7096_v35  ;;  %v6993_v49 = vadd.f32 1.0, %v10104_v1  ;;  %v6855_v50 = vadd.f32 %v9259_v11, %v14023_v62 }
 0x9a6   : > { %v10108_v36 = vpop.eup %10107  ;;  %7131 = vst.msk [vmem:[%s14114_s13 + $0xb0] sm:$0xff] %vm980_vm1, %v7095_v47  ;;  %v6996_v26 = vadd.f32 1.0, %v10106_v28  ;;  %v7655_v48 = vmul.f32 -1.442695, %v6856_v63 }
 0x9a7   : > { %v10110_v16 = vpop.eup %10109  ;;  %v7098_v17 = vmul.f32 %v10108_v36, %v14208_v38  ;;  %10123 = vrcp.f32 %v6993_v49  ;;  %v7654_v5 = vmul.f32 -1.442695, %v6855_v50 }
 0x9a8   : > { %v10112_v23 = vpop.eup %10111  ;;  %v7097_v20 = vmul.f32 %v10110_v16, %v14214_v32  ;;  %10125 = vrcp.f32 %v6996_v26 }
 0x9a9   : > { %v10114_v43 = vpop.eup %10113  ;;  %7134 = vst.msk [vmem:[%s14114_s13 + $0xc8] sm:$0xff] %vm980_vm1, %v7098_v17  ;;  %v6995_v62 = vadd.f32 1.0, %v10112_v23  ;;  %10127 = vpow2.f32 %v7655_v48 }
 0x9aa   : > { %v10116_v42 = vpop.eup %10115  ;;  %7133 = vst.msk [vmem:[%s14114_s13 + $0xc0] sm:$0xff] %vm980_vm1, %v7097_v20  ;;  %v7100_v22 = vmul.f32 %v10114_v43, %v14226_v39  ;;  %10129 = vpow2.f32 %v7654_v5 }
 0x9ab   : > { %v10118_v38 = vpop.eup %10117  ;;  %10131 = vrcp.f32 %v6995_v62  ;;  %v6998_v25 = vadd.f32 1.0, %v10116_v42 }
 0x9ac   : > { %7136 = vst.msk [vmem:[%s14114_s13 + $0xd8] sm:$0xff] %vm980_vm1, %v7100_v22  ;;  %v6997_v32 = vadd.f32 1.0, %v10118_v38 }
 0x9ad   : > { %v10120_v30 = vpop.eup %10119  ;;  %10133 = vrcp.f32 %v6998_v25 }
 0x9ae   : > { %v10122_v21 = vpop.eup %10121  ;;  %v7099_v10 = vmul.f32 %v10120_v30, %v14232_v52  ;;  %10135 = vrcp.f32 %v6997_v32 }
 0x9af   : > { %v7102_v3 = vmul.f32 %v10122_v21, %v14245_v0 }
 0x9b0   : > { %7135 = vst.msk [vmem:[%s14114_s13 + $0xd0] sm:$0xff] %vm980_vm1, %v7099_v10 }
 0x9b1   : > { %v10124_v39 = vpop.eup %10123  ;;  %7138 = vst.msk [vmem:[%s14114_s13 + $0xe8] sm:$0xff] %vm980_vm1, %v7102_v3 }
 0x9b2   : > { %v10126_v54 = vpop.eup %10125  ;;  %v7101_v58 = vmul.f32 %v10124_v39, %v14249_v9 }
 0x9b3   : > { %v10128_v31 = vpop.eup %10127  ;;  %v7104_v59 = vmul.f32 %v10126_v54, %v14261_v40 }
 0x9b4   : > { %v10130_v46 = vpop.eup %10129  ;;  %7137 = vst.msk [vmem:[%s14114_s13 + $0xe0] sm:$0xff] %vm980_vm1, %v7101_v58  ;;  %v7000_v52 = vadd.f32 1.0, %v10128_v31 }
 0x9b5   : > { %v10132_v51 = vpop.eup %10131  ;;  %7140 = vst.msk [vmem:[%s14114_s13 + $0xf8] sm:$0xff] %vm980_vm1, %v7104_v59  ;;  %v6999_v0 = vadd.f32 1.0, %v10130_v46 }
 0x9b6   : > { %v7103_v56 = vmul.f32 %v10132_v51, %v14267_v18  ;;  %10137 = vrcp.f32 %v7000_v52 }
 0x9b7   : > { %v10134_v7 = vpop.eup %10133  ;;  %10139 = vrcp.f32 %v6999_v0 }
 0x9b8   : > { %v10136_v9 = vpop.eup %10135  ;;  %7139 = vst.msk [vmem:[%s14114_s13 + $0xf0] sm:$0xff] %vm980_vm1, %v7103_v56  ;;  %v7106_v40 = vmul.f32 %v10134_v7, %v14279_v61 }
 0x9b9   : > { %v7105_v57 = vmul.f32 %v10136_v9, %v14284_v14 }
 0x9ba   : > { %7142 = vst.msk [vmem:[%s14114_s13 + $0x108] sm:$0xff] %vm980_vm1, %v7106_v40 }
 0x9bb   : > { %7141 = vst.msk [vmem:[%s14114_s13 + $0x100] sm:$0xff] %vm980_vm1, %v7105_v57 }
 0x9c0   : > { %v10138_v27 = vpop.eup %10137 }
 0x9c1   : > { %v10140_v24 = vpop.eup %10139  ;;  %v7108_v60 = vmul.f32 %v10138_v27, %v6856_v63 }
 0x9c2   : > { %v7107_v19 = vmul.f32 %v10140_v24, %v6855_v50 }
 0x9c3   : > { %7144 = vst.msk [vmem:[%s14114_s13 + $0x118] sm:$0xff] %vm980_vm1, %v7108_v60 }
 0x9c4   : > { %7143 = vst.msk [vmem:[%s14114_s13 + $0x110] sm:$0xff] %vm980_vm1, %v7107_v19 }
 0x9c5 PF: > { %s17_s24 = sadd.s32 1, %s10147_s24  }
 0x9c6   : > { %p14_p4 = scmp.ge.s32.totalorder %s17_s24, 4  }
 0x9c8   :  { %16 = sbr.rel (!%p14_p4) target bundleno = 1 (0x1), region = 78 }

</bundles_post_ra>
